<compile_context>
chip_gen: v5e
topology: v5e:2x2
jax: 0.10.0
libtpu: 0.0.40
codegen_flags: <defaults>
</compile_context>

<pallas_src>
import functools
from types import SimpleNamespace

import jax
import jax.numpy as jnp
from jax.experimental import pallas as pl
from jax.experimental.pallas import tpu as pltpu

VMEM_LIMIT = 32 * 1024 * 1024
HEAD_PAD = 128  # lane-dense padded width per output head (outPose / outCenter)


# ---------------------------------------------------------------------------
# Pallas kernels
# ---------------------------------------------------------------------------
def token_linear_kernel(x_ref, w_ref, b_ref, o_ref):
    # Folded sa+ca per-token stub linear for one image.
    # x: (1, 196, 768) bf16, w: (768, 768) bf16, b: (1, 768) f32 -> o: (1, 196, 768) bf16
    acc = jnp.dot(x_ref[0], w_ref[...], preferred_element_type=jnp.float32)
    o_ref[0] = (acc + b_ref[...]).astype(o_ref.dtype)


def tail_kernel(x_ref, w_ref, b_ref, o_ref):
    # Folded conv2d(k=2,s=2)+bias -> avgpool -> outPose/outCenter tail.
    # x: (B, 3072) bf16 (parity-class means), w: (3072, 256) bf16, b: (1, 256) f32
    # -> o: (B, 256) f32  (cols 0:128 = outPose padded, 128:256 = outCenter padded)
    acc = jnp.dot(x_ref[...], w_ref[...], preferred_element_type=jnp.float32)
    o_ref[...] = (acc + b_ref[...]).astype(o_ref.dtype)


# ---------------------------------------------------------------------------
# pallas_call wrappers
# ---------------------------------------------------------------------------
def token_linear(x, w, b):
    """Per-image (196, 768) @ (768, 768) + b, bf16 MXU, f32 accumulation."""
    B, T, D = x.shape
    return pl.pallas_call(
        token_linear_kernel,
        out_shape=jax.ShapeDtypeStruct((B, T, D), jnp.bfloat16),
        grid=(B,),
        in_specs=[
            pl.BlockSpec((1, T, D), lambda i: (i, 0, 0)),
            pl.BlockSpec((D, D), lambda i: (0, 0)),
            pl.BlockSpec((1, D), lambda i: (0, 0)),
        ],
        out_specs=pl.BlockSpec((1, T, D), lambda i: (i, 0, 0)),
        compiler_params=pltpu.CompilerParams(
            dimension_semantics=("parallel",),
            vmem_limit_bytes=VMEM_LIMIT,
        ),
    )(x.astype(jnp.bfloat16), w, b)


def tail_apply(x, w, b):
    """Single fused tail matmul: (B, 3072) @ (3072, 256) + b -> (B, 256) f32."""
    B, K = x.shape
    N = w.shape[1]
    return pl.pallas_call(
        tail_kernel,
        out_shape=jax.ShapeDtypeStruct((B, N), jnp.float32),
        grid=(1,),
        in_specs=[
            pl.BlockSpec((B, K), lambda i: (0, 0)),
            pl.BlockSpec((K, N), lambda i: (0, 0)),
            pl.BlockSpec((1, N), lambda i: (0, 0)),
        ],
        out_specs=pl.BlockSpec((B, N), lambda i: (0, 0)),
        compiler_params=pltpu.CompilerParams(
            dimension_semantics=("arbitrary",),
            vmem_limit_bytes=VMEM_LIMIT,
        ),
    )(x.astype(jnp.bfloat16), w, b)


# ---------------------------------------------------------------------------
# Glue (small, layout-only)
# ---------------------------------------------------------------------------
def patchify(x_nchw, patch=16):
    # (B, 3, 224, 224) -> (B, 196, 768) ViT-style 16x16 patches
    B, C, H, W = x_nchw.shape
    hp, wp = H // patch, W // patch
    x = x_nchw.reshape(B, C, hp, patch, wp, patch)
    x = jnp.transpose(x, (0, 2, 4, 1, 3, 5))            # (B, hp, wp, C, p, p)
    return x.reshape(B, hp * wp, C * patch * patch)


def parity_means(ca_token):
    # ca_token: (B, 196, 768) bf16.  Reproduce the reference's raw
    # `view(batch, 768, 14, 14)` reinterpretation and compute the four
    # parity-class spatial means needed by the folded conv(k=2,s=2)+avgpool
    # tail.  Flat ordering of the 3072 axis is (kh, kw, cin), matching the
    # flattened conv weight.
    B = ca_token.shape[0]
    t = ca_token.reshape(B, 768, 14, 14).astype(jnp.float32)
    means = [t[:, :, dy::2, dx::2].mean(axis=(2, 3))     # each (B, 768)
             for dy in (0, 1) for dx in (0, 1)]
    return jnp.stack(means, axis=1).reshape(B, 4 * 768)  # (B, 3072)


# ---------------------------------------------------------------------------
# Parameter init (deterministic, synthetic) + offline affine folds
# ---------------------------------------------------------------------------
def init_params(key, args):
    ks = jax.random.split(key, 10)
    d = args.d_model                      # 768
    n_pose = args.num_points * 2
    f32 = jnp.float32

    # Self_Attention / Cross_Attention stubs (definitions not in reference).
    # TODO(synk): stub-only — real attention cannot be folded like this.
    sa_w = jax.random.normal(ks[0], (d, d), f32) * 0.02
    sa_b = jnp.zeros((d,), f32)
    ca_w = jax.random.normal(ks[2], (d, d), f32) * 0.02
    ca_b = jnp.zeros((d,), f32)
    comb_w = sa_w @ ca_w                                   # (768, 768)
    comb_b = sa_b @ ca_w + ca_b                            # (768,)

    # conv2d = nn.Conv2d(768, 512, 2, 2); torch weight layout (O, I, kh, kw).
    conv_w_t = jax.random.normal(ks[3], (512, d, 2, 2), f32) * 0.02
    conv_w = jnp.transpose(conv_w_t, (2, 3, 1, 0)).reshape(4 * d, 512)  # (kh,kw,cin) x O
    conv_b = jax.random.normal(ks[4], (512,), f32) * 0.02

    # outPose: Linear(512, n_pose); outCenter: Linear(512, 2)
    pose_w = jax.random.normal(ks[5], (512, n_pose), f32) * 0.02
    pose_b = jax.random.normal(ks[6], (n_pose,), f32) * 0.02
    center_w = jax.random.normal(ks[7], (512, 2), f32) * 0.02
    center_b = jax.random.normal(ks[8], (2,), f32) * 0.02

    # conv(+bias) -> avgpool -> linear head is an affine chain: fold it offline
    # (exact in f32) into one (3072, 128)-per-head matmul, packed lane-dense.
    tail_w = jnp.zeros((4 * d, 2 * HEAD_PAD), f32)
    tail_w = tail_w.at[:, :n_pose].set(conv_w @ pose_w)
    tail_w = tail_w.at[:, HEAD_PAD:HEAD_PAD + 2].set(conv_w @ center_w)
    tail_b = jnp.zeros((1, 2 * HEAD_PAD), f32)
    tail_b = tail_b.at[0, :n_pose].set(conv_b @ pose_w + pose_b)
    tail_b = tail_b.at[0, HEAD_PAD:HEAD_PAD + 2].set(conv_b @ center_w + center_b)

    return {
        "comb_w": comb_w.astype(jnp.bfloat16),
        "comb_b": comb_b.reshape(1, d).astype(f32),
        "tail_w": tail_w.astype(jnp.bfloat16),
        "tail_b": tail_b,
    }


# ---------------------------------------------------------------------------
# Forward pass
# ---------------------------------------------------------------------------
def forward(params, sk, im, *, n_pose):
    sk_im = jnp.concatenate([sk, im], axis=0)             # (B, 3, 224, 224)
    B = sk_im.shape[0]
    half = B // 2

    # ---- Self/Cross attention stubs, folded into ONE per-token linear ----
    # TODO(synk): real Self_Attention / Cross_Attention unavailable in the
    # reference source; the cls row (discarded by ca_fea[:, 1:]) is never formed.
    patches = patchify(sk_im)                             # (B, 196, 768)
    ca_token = token_linear(patches, params["comb_w"], params["comb_b"])
    # ca_token (B, 196, 768) bf16 == ca_fea[:, 1:] under the stub

    # ---- reference's raw view(B,768,14,14); pool-before-matmul algebra ----
    mean_vec = parity_means(ca_token)                     # (B, 3072) f32

    # ---- folded conv2d(k=2,s=2)+bias + avgpool + outPose/outCenter tail ----
    out = tail_apply(mean_vec, params["tail_w"], params["tail_b"])  # (B, 256) f32

    sk_out = out[:half, :n_pose]                          # (B/2, num_points*2)
    im_out = out[half:, HEAD_PAD:HEAD_PAD + 2]            # (B/2, 2)
    return sk_out, im_out


# ---------------------------------------------------------------------------
if __name__ == "__main__":
    args = SimpleNamespace(num_points=17, d_model=768, cls_number=6,
                           head=8, number=2, d_ff=2048, pretrained=False)

    key = jax.random.PRNGKey(0)
    kp, k1, k2 = jax.random.split(key, 3)
    params = init_params(kp, args)

    # The hard-coded .view(B, 768, 14, 14) implies ViT-style 224x224 inputs
    # (14x14 patches of 16x16x3 = 768); keep per-image batch = 1 (small).
    sk = jax.random.normal(k1, (1, 3, 224, 224), jnp.float32)
    im = jax.random.normal(k2, (1, 3, 224, 224), jnp.float32)

    fwd = jax.jit(functools.partial(forward, n_pose=args.num_points * 2))
    sk_out, im_out = fwd(params, sk, im)
    jax.block_until_ready((sk_out, im_out))

    assert sk_out.shape == (1, args.num_points * 2), sk_out.shape
    assert im_out.shape == (1, 2), im_out.shape
    print("KERNEL_OK")
</pallas_src>

<mosaic_0001>
module attributes {stable_mosaic.version = 11 : i64} {
  func.func @token_linear_kernel(%arg0: i32, %arg1: memref<1x196x768xbf16, #tpu.memory_space<vmem>>, %arg2: memref<768x768xbf16, #tpu.memory_space<vmem>>, %arg3: memref<1x768xf32, #tpu.memory_space<vmem>>, %arg4: memref<1x196x768xbf16, #tpu.memory_space<vmem>>) attributes {dimension_semantics = [#tpu.dimension_semantics<parallel>], iteration_bounds = array<i64: 2>, scalar_prefetch = 0 : i64, scratch_operands = 0 : i64, tpu.core_type = #tpu.core_type<tc>, window_params = [{transform_indices = @transform_0, window_bounds = array<i64: 1, 196, 768>}, {pipeline_mode = #tpu.pipeline_mode<synchronous>, transform_indices = @transform_1, window_bounds = array<i64: 768, 768>}, {pipeline_mode = #tpu.pipeline_mode<synchronous>, transform_indices = @transform_2, window_bounds = array<i64: 1, 768>}, {transform_indices = @transform_3, window_bounds = array<i64: 1, 196, 768>}]} {
    %c0 = arith.constant 0 : index
    %c0_0 = arith.constant 0 : index
    %c0_1 = arith.constant 0 : index
    %0 = vector.load %arg1[%c0, %c0_0, %c0_1] : memref<1x196x768xbf16, #tpu.memory_space<vmem>>, vector<1x196x768xbf16>
    %1 = vector.shape_cast %0 : vector<1x196x768xbf16> to vector<196x768xbf16>
    %c0_2 = arith.constant 0 : index
    %c0_3 = arith.constant 0 : index
    %2 = vector.load %arg2[%c0_2, %c0_3] : memref<768x768xbf16, #tpu.memory_space<vmem>>, vector<768x768xbf16>
    %cst = arith.constant dense<0.000000e+00> : vector<196x768xf32>
    %3 = tpu.matmul %1, %2, %cst {dimension_numbers = #tpu.dot_dimension_numbers<[1], [0], [0], [1], [0, 0, 1, 1], [], []>} : vector<196x768xbf16>, vector<768x768xbf16>, vector<196x768xf32> -> vector<196x768xf32>
    %c0_4 = arith.constant 0 : index
    %c0_5 = arith.constant 0 : index
    %4 = vector.load %arg3[%c0_4, %c0_5] : memref<1x768xf32, #tpu.memory_space<vmem>>, vector<1x768xf32>
    %5 = vector.broadcast %4 : vector<1x768xf32> to vector<196x768xf32>
    %6 = arith.addf %3, %5 : vector<196x768xf32>
    %7 = arith.truncf %6 : vector<196x768xf32> to vector<196x768xbf16>
    %c0_6 = arith.constant 0 : index
    %c0_7 = arith.constant 0 : index
    %c0_8 = arith.constant 0 : index
    %8 = vector.load %arg4[%c0_6, %c0_7, %c0_8] : memref<1x196x768xbf16, #tpu.memory_space<vmem>>, vector<1x196x768xbf16>
    %9 = vector.shape_cast %8 : vector<1x196x768xbf16> to vector<196x768xbf16>
    %10 = vector.shape_cast %7 : vector<196x768xbf16> to vector<1x196x768xbf16>
    tpu.vector_store %arg4[%c0_6, %c0_7, %c0_8], %10 {strides = array<i32>} : memref<1x196x768xbf16, #tpu.memory_space<vmem>>, vector<1x196x768xbf16>,
    return
  }
  func.func @transform_0(%arg0: i32) -> (i32, i32, i32) {
    %c0_i32 = arith.constant 0 : i32
    %c0_i32_0 = arith.constant 0 : i32
    %c0_i32_1 = arith.constant 0 : i32
    return %arg0, %c0_i32, %c0_i32_0 : i32, i32, i32
  }
  func.func @transform_1(%arg0: i32) -> (i32, i32) {
    %c0_i32 = arith.constant 0 : i32
    %c0_i32_0 = arith.constant 0 : i32
    %c0_i32_1 = arith.constant 0 : i32
    return %c0_i32, %c0_i32_0 : i32, i32
  }
  func.func @transform_2(%arg0: i32) -> (i32, i32) {
    %c0_i32 = arith.constant 0 : i32
    %c0_i32_0 = arith.constant 0 : i32
    %c0_i32_1 = arith.constant 0 : i32
    return %c0_i32, %c0_i32_0 : i32, i32
  }
  func.func @transform_3(%arg0: i32) -> (i32, i32, i32) {
    %c0_i32 = arith.constant 0 : i32
    %c0_i32_0 = arith.constant 0 : i32
    %c0_i32_1 = arith.constant 0 : i32
    return %arg0, %c0_i32, %c0_i32_0 : i32, i32, i32
  }
}

module attributes {stable_mosaic.version = 11 : i64} {
  func.func @tail_kernel(%arg0: i32, %arg1: memref<2x3072xbf16, #tpu.memory_space<vmem>>, %arg2: memref<3072x256xbf16, #tpu.memory_space<vmem>>, %arg3: memref<1x256xf32, #tpu.memory_space<vmem>>, %arg4: memref<2x256xf32, #tpu.memory_space<vmem>>) attributes {dimension_semantics = [#tpu.dimension_semantics<arbitrary>], iteration_bounds = array<i64: 1>, scalar_prefetch = 0 : i64, scratch_operands = 0 : i64, tpu.core_type = #tpu.core_type<tc>, window_params = [{pipeline_mode = #tpu.pipeline_mode<synchronous>, transform_indices = @transform_0, window_bounds = array<i64: 2, 3072>}, {pipeline_mode = #tpu.pipeline_mode<synchronous>, transform_indices = @transform_1, window_bounds = array<i64: 3072, 256>}, {pipeline_mode = #tpu.pipeline_mode<synchronous>, transform_indices = @transform_2, window_bounds = array<i64: 1, 256>}, {pipeline_mode = #tpu.pipeline_mode<synchronous>, transform_indices = @transform_3, window_bounds = array<i64: 2, 256>}]} {
    %c0 = arith.constant 0 : index
    %c0_0 = arith.constant 0 : index
    %0 = vector.load %arg1[%c0, %c0_0] : memref<2x3072xbf16, #tpu.memory_space<vmem>>, vector<2x3072xbf16>
    %c0_1 = arith.constant 0 : index
    %c0_2 = arith.constant 0 : index
    %1 = vector.load %arg2[%c0_1, %c0_2] : memref<3072x256xbf16, #tpu.memory_space<vmem>>, vector<3072x256xbf16>
    %cst = arith.constant dense<0.000000e+00> : vector<2x256xf32>
    %2 = tpu.matmul %0, %1, %cst {dimension_numbers = #tpu.dot_dimension_numbers<[1], [0], [0], [1], [0, 0, 1, 1], [], []>} : vector<2x3072xbf16>, vector<3072x256xbf16>, vector<2x256xf32> -> vector<2x256xf32>
    %c0_3 = arith.constant 0 : index
    %c0_4 = arith.constant 0 : index
    %3 = vector.load %arg3[%c0_3, %c0_4] : memref<1x256xf32, #tpu.memory_space<vmem>>, vector<1x256xf32>
    %4 = vector.broadcast %3 : vector<1x256xf32> to vector<2x256xf32>
    %5 = arith.addf %2, %4 : vector<2x256xf32>
    %c0_5 = arith.constant 0 : index
    %c0_6 = arith.constant 0 : index
    %6 = vector.load %arg4[%c0_5, %c0_6] : memref<2x256xf32, #tpu.memory_space<vmem>>, vector<2x256xf32>
    tpu.vector_store %arg4[%c0_5, %c0_6], %5 {strides = array<i32>} : memref<2x256xf32, #tpu.memory_space<vmem>>, vector<2x256xf32>,
    return
  }
  func.func @transform_0(%arg0: i32) -> (i32, i32) {
    %c0_i32 = arith.constant 0 : i32
    %c0_i32_0 = arith.constant 0 : i32
    %c0_i32_1 = arith.constant 0 : i32
    return %c0_i32, %c0_i32_0 : i32, i32
  }
  func.func @transform_1(%arg0: i32) -> (i32, i32) {
    %c0_i32 = arith.constant 0 : i32
    %c0_i32_0 = arith.constant 0 : i32
    %c0_i32_1 = arith.constant 0 : i32
    return %c0_i32, %c0_i32_0 : i32, i32
  }
  func.func @transform_2(%arg0: i32) -> (i32, i32) {
    %c0_i32 = arith.constant 0 : i32
    %c0_i32_0 = arith.constant 0 : i32
    %c0_i32_1 = arith.constant 0 : i32
    return %c0_i32, %c0_i32_0 : i32, i32
  }
  func.func @transform_3(%arg0: i32) -> (i32, i32) {
    %c0_i32 = arith.constant 0 : i32
    %c0_i32_0 = arith.constant 0 : i32
    %c0_i32_1 = arith.constant 0 : i32
    return %c0_i32, %c0_i32_0 : i32, i32
  }
}

</mosaic_0001>

<bundles_post_ra>
// kernel: forward.2
= control target key start
LH: loop header
LB: loop body
LE: loop exit
PB: predicated region body
PF: predicated region fallthrough
CT: control target
= control target key end

     0   :  { %s7051_s12 = smov 0   ;;  %s10514_s0 = inlined_call_operand.vmem [shape: bf16[2,196,768], index: 0, kind: input, shape index: {}]   ;;  %s10515_s1 = inlined_call_operand.vmem [shape: bf16[768,768], index: 1, kind: input, shape index: {}]   ;;  %s10516_s2 = inlined_call_operand.vmem [shape: f32[1,768], index: 2, kind: input, shape index: {}]   ;;  %s10517_s3 = inlined_call_operand.vmem [shape: bf16[2,196,768], index: 3, kind: output, shape index: {}]  }
   0x1 LB: > { %s5202_s13 = sadd.s32 4294967295, %s7029_s12   ;;  %p5206_p0 = scmp.ge.s32.totalorder %s7029_s12, 1  ;;  %s7029_s12 = sphi %s7051_s12, %s13_s12  }
   0x2   : > { %p137_p1 = scmp.lt.s32.totalorder %s7029_s12, 3 }
   0x4   : > { %p138_p2 = pnand %p5206_p0, %p137_p1 }
   0x6   : > { %141 = sbr.rel (%p138_p2) target bundleno = 2044 (0x7fc), region = 32 }
   0xb   : > { %v5667_v0 = vld [vmem:[%s10515_s1 + $0x150] sm:$0xf]  ;;  %v6768_v1 = vld [vmem:[%s10515_s1 + $0x164] sm:$0xf0]  ;;  %v5643_v11 = vld [vmem:[%s10515_s1 + $0x120] sm:$0xf] }
   0xc   : > { %v5859_v2 = vld [vmem:[%s10515_s1 + $0x2d0] sm:$0xf]  ;;  %v5668_v3 = vor.u32 %v6768_v1, %v5667_v0  ;;  %v6816_v4 = vld [vmem:[%s10515_s1 + $0x2e4] sm:$0xf0]  ;;  %v6762_v13 = vld [vmem:[%s10515_s1 + $0x134] sm:$0xf0] }
   0xd   : > { %v6051_v5 = vld [vmem:[%s10515_s1 + $0x450] sm:$0xf]  ;;  %v6864_v6 = vld [vmem:[%s10515_s1 + $0x464] sm:$0xf0]  ;;  %v5860_v7 = vor.u32 %v6816_v4, %v5859_v2  ;;  %v5835_v14 = vld [vmem:[%s10515_s1 + $0x2a0] sm:$0xf]  ;;  %v5644_v16 = vor.u32 %v6762_v13, %v5643_v11 }
   0xe   : > { %v6052_v8 = vor.u32 %v6864_v6, %v6051_v5  ;;  %v6243_v9 = vld [vmem:[%s10515_s1 + $0x5d0] sm:$0xf]  ;;  %v6912_v10 = vld [vmem:[%s10515_s1 + $0x5e4] sm:$0xf0]  ;;  %2369 = vmatpush.bf16.msra.mxu0 %v5668_v3  ;;  %v6810_v15 = vld [vmem:[%s10515_s1 + $0x2b4] sm:$0xf0] }
   0xf   : > { %v6244_v12 = vor.u32 %v6912_v10, %v6243_v9  ;;  %2442 = vmatpush.bf16.msra.mxu1 %v5860_v7  ;;  %v5836_v17 = vor.u32 %v6810_v15, %v5835_v14  ;;  %v6027_v18 = vld [vmem:[%s10515_s1 + $0x420] sm:$0xf]  ;;  %v6858_v19 = vld [vmem:[%s10515_s1 + $0x434] sm:$0xf0]  ;;  %v5619_v23 = vld [vmem:[%s10515_s1 + $0xf0] sm:$0xf] }
  0x10   : > { %2515 = vmatpush.bf16.msra.mxu2 %v6052_v8  ;;  %v6219_v20 = vld [vmem:[%s10515_s1 + $0x5a0] sm:$0xf]  ;;  %v6028_v21 = vor.u32 %v6858_v19, %v6027_v18  ;;  %v6906_v22 = vld [vmem:[%s10515_s1 + $0x5b4] sm:$0xf0]  ;;  %v6756_v24 = vld [vmem:[%s10515_s1 + $0x104] sm:$0xf0] }
  0x11   : > { %2588 = vmatpush.bf16.msra.mxu3 %v6244_v12  ;;  %v6220_v25 = vor.u32 %v6906_v22, %v6219_v20  ;;  %v5811_v26 = vld [vmem:[%s10515_s1 + $0x270] sm:$0xf]  ;;  %v6804_v27 = vld [vmem:[%s10515_s1 + $0x284] sm:$0xf0]  ;;  %v5620_v29 = vor.u32 %v6756_v24, %v5619_v23  ;;  %v5595_v35 = vld [vmem:[%s10515_s1 + $0xc0] sm:$0xf] }
  0x12   : > { %v6003_v28 = vld [vmem:[%s10515_s1 + $0x3f0] sm:$0xf]  ;;  %2370 = vmatpush.bf16.msra.mxu0 %v5644_v16  ;;  %v6852_v30 = vld [vmem:[%s10515_s1 + $0x404] sm:$0xf0]  ;;  %v5812_v33 = vor.u32 %v6804_v27, %v5811_v26  ;;  %v6750_v36 = vld [vmem:[%s10515_s1 + $0xd4] sm:$0xf0] }
  0x13   : > { %v6195_v31 = vld [vmem:[%s10515_s1 + $0x570] sm:$0xf]  ;;  %v6900_v32 = vld [vmem:[%s10515_s1 + $0x584] sm:$0xf0]  ;;  %2443 = vmatpush.bf16.msra.mxu1 %v5836_v17  ;;  %v6004_v34 = vor.u32 %v6852_v30, %v6003_v28  ;;  %v5787_v37 = vld [vmem:[%s10515_s1 + $0x240] sm:$0xf]  ;;  %v5596_v44 = vor.u32 %v6750_v36, %v5595_v35 }
  0x14   : > { %2516 = vmatpush.bf16.msra.mxu2 %v6028_v21  ;;  %v6196_v38 = vor.u32 %v6900_v32, %v6195_v31  ;;  %v6798_v39 = vld [vmem:[%s10515_s1 + $0x254] sm:$0xf0]  ;;  %v5979_v40 = vld [vmem:[%s10515_s1 + $0x3c0] sm:$0xf]  ;;  %v5571_v47 = vld [vmem:[%s10515_s1 + $0x90] sm:$0xf] }
  0x15   : > { %2589 = vmatpush.bf16.msra.mxu3 %v6220_v25  ;;  %v6846_v41 = vld [vmem:[%s10515_s1 + $0x3d4] sm:$0xf0]  ;;  %v6171_v42 = vld [vmem:[%s10515_s1 + $0x540] sm:$0xf]  ;;  %v5788_v45 = vor.u32 %v6798_v39, %v5787_v37  ;;  %v6744_v48 = vld [vmem:[%s10515_s1 + $0xa4] sm:$0xf0] }
  0x16   : > { %v6894_v43 = vld [vmem:[%s10515_s1 + $0x554] sm:$0xf0]  ;;  %2371 = vmatpush.bf16.msra.mxu0 %v5620_v29  ;;  %v5980_v46 = vor.u32 %v6846_v41, %v5979_v40  ;;  %v5763_v49 = vld [vmem:[%s10515_s1 + $0x210] sm:$0xf]  ;;  %v6792_v51 = vld [vmem:[%s10515_s1 + $0x224] sm:$0xf0]  ;;  %v5572_v56 = vor.u32 %v6744_v48, %v5571_v47 }
  0x17   : > { %2444 = vmatpush.bf16.msra.mxu1 %v5812_v33  ;;  %v6172_v50 = vor.u32 %v6894_v43, %v6171_v42  ;;  %v5955_v52 = vld [vmem:[%s10515_s1 + $0x390] sm:$0xf]  ;;  %v6840_v53 = vld [vmem:[%s10515_s1 + $0x3a4] sm:$0xf0]  ;;  %v5764_v57 = vor.u32 %v6792_v51, %v5763_v49  ;;  %v5547_v59 = vld [vmem:[%s10515_s1 + $0x60] sm:$0xf] }
  0x18   : > { %2517 = vmatpush.bf16.msra.mxu2 %v6004_v34  ;;  %v6147_v54 = vld [vmem:[%s10515_s1 + $0x510] sm:$0xf]  ;;  %v6888_v55 = vld [vmem:[%s10515_s1 + $0x524] sm:$0xf0]  ;;  %v5956_v58 = vor.u32 %v6840_v53, %v5955_v52  ;;  %v6738_v60 = vld [vmem:[%s10515_s1 + $0x74] sm:$0xf0] }
  0x19   : > { %2590 = vmatpush.bf16.msra.mxu3 %v6196_v38  ;;  %v5739_v61 = vld [vmem:[%s10515_s1 + $0x1e0] sm:$0xf]  ;;  %v6148_v62 = vor.u32 %v6888_v55, %v6147_v54  ;;  %v6786_v63 = vld [vmem:[%s10515_s1 + $0x1f4] sm:$0xf0]  ;;  %v5548_v4 = vor.u32 %v6738_v60, %v5547_v59  ;;  %v5523_v5 = vld [vmem:[%s10515_s1 + $0x30] sm:$0xf] }
  0x1a   : > { %2372 = vmatpush.bf16.msra.mxu0 %v5596_v44  ;;  %v5931_v0 = vld [vmem:[%s10515_s1 + $0x360] sm:$0xf]  ;;  %v6834_v1 = vld [vmem:[%s10515_s1 + $0x374] sm:$0xf0]  ;;  %v5740_v6 = vor.u32 %v6786_v63, %v5739_v61  ;;  %v6732_v8 = vld [vmem:[%s10515_s1 + $0x44] sm:$0xf0] }
  0x1b   : > { %2445 = vmatpush.bf16.msra.mxu1 %v5788_v45  ;;  %v6123_v2 = vld [vmem:[%s10515_s1 + $0x4e0] sm:$0xf]  ;;  %v6882_v3 = vld [vmem:[%s10515_s1 + $0x4f4] sm:$0xf0]  ;;  %v5932_v7 = vor.u32 %v6834_v1, %v5931_v0  ;;  %v5715_v9 = vld [vmem:[%s10515_s1 + $0x1b0] sm:$0xf]  ;;  %v5524_v17 = vor.u32 %v6732_v8, %v5523_v5 }
  0x1c   : > { %2518 = vmatpush.bf16.msra.mxu2 %v5980_v46  ;;  %v6780_v10 = vld [vmem:[%s10515_s1 + $0x1c4] sm:$0xf0]  ;;  %v6124_v11 = vor.u32 %v6882_v3, %v6123_v2  ;;  %v5907_v12 = vld [vmem:[%s10515_s1 + $0x330] sm:$0xf]  ;;  %p161_p3 = scmp.lt.s32.totalorder %s5202_s13, 1 }
  0x1d   : > { %2591 = vmatpush.bf16.msra.mxu3 %v6172_v50  ;;  %v6828_v13 = vld [vmem:[%s10515_s1 + $0x344] sm:$0xf0]  ;;  %v6099_v14 = vld [vmem:[%s10515_s1 + $0x4b0] sm:$0xf]  ;;  %v5499_v16 = vld [vmem:[%s10515_s1] sm:$0xf]  ;;  %v5716_v20 = vor.u32 %v6780_v10, %v5715_v9 }
  0x1e   : > { %2373 = vmatpush.bf16.msra.mxu0 %v5572_v56  ;;  %v6876_v15 = vld [vmem:[%s10515_s1 + $0x4c4] sm:$0xf0]  ;;  %v6726_v18 = vld [vmem:[%s10515_s1 + $0x14] sm:$0xf0]  ;;  %v5691_v19 = vld [vmem:[%s10515_s1 + $0x180] sm:$0xf]  ;;  %v5908_v21 = vor.u32 %v6828_v13, %v5907_v12 }
  0x1f   : > { %2446 = vmatpush.bf16.msra.mxu1 %v5764_v57  ;;  %s11111_s13 = smov (!%p161_p3, %s5202_s13), 1  ;;  %v6774_v22 = vld [vmem:[%s10515_s1 + $0x194] sm:$0xf0]  ;;  %v5883_v23 = vld [vmem:[%s10515_s1 + $0x300] sm:$0xf]  ;;  %v6100_v25 = vor.u32 %v6876_v15, %v6099_v14  ;;  %v5500_v31 = vor.u32 %v6726_v18, %v5499_v16 }
  0x20   : > { %2519 = vmatpush.bf16.msra.mxu2 %v5956_v58  ;;  %v6822_v24 = vld [vmem:[%s10515_s1 + $0x314] sm:$0xf0]  ;;  %v6075_v26 = vld [vmem:[%s10515_s1 + $0x480] sm:$0xf]  ;;  %s7011_s17 = smul.u32 600, %s11111_s13  ;;  %v5692_v35 = vor.u32 %v6774_v22, %v5691_v19 }
  0x21   : > { %2592 = vmatpush.bf16.msra.mxu3 %v6148_v62  ;;  %v6870_v27 = vld [vmem:[%s10515_s1 + $0x494] sm:$0xf0]  ;;  %v6765_v28 = vld [vmem:[%s10515_s1 + $0x154] sm:$0xf]  ;;  %v5669_v29 = vld [vmem:[%s10515_s1 + $0x168] sm:$0xf0]  ;;  %v5884_v36 = vor.u32 %v6822_v24, %v5883_v23 }
  0x22   : > { %2374 = vmatpush.bf16.msra.mxu0 %v5548_v4  ;;  %v6813_v30 = vld [vmem:[%s10515_s1 + $0x2d4] sm:$0xf]  ;;  %s7272_s26 = scalar_lea.vmem %s10514_s0, %s7011_s17  ;;  %v5861_v32 = vld [vmem:[%s10515_s1 + $0x2e8] sm:$0xf0]  ;;  %v6435_v33 = vld [vmem:[%s10515_s1 + $0x750] sm:$0xf]  ;;  %v6076_v43 = vor.u32 %v6870_v27, %v6075_v26  ;;  %v5672_v47 = vor.u32 %v6765_v28, %v5669_v29  ;;  %s8502_s21 = scalar_lea.vmem %s10517_s3, %s7011_s17 }
  0x23   : > { %2447 = vmatpush.bf16.msra.mxu1 %v5740_v6  ;;  %v6960_v34 = vld [vmem:[%s10515_s1 + $0x764] sm:$0xf0]  ;;  %v5211_v37 = vld [vmem:[%s7272_s26] sm:$0xf]  ;;  %v6654_v38 = vld [vmem:[%s7272_s26 + $0x14] sm:$0xf0]  ;;  %v5864_v51 = vor.u32 %v6813_v30, %v5861_v32 }
  0x24   : > { %2520 = vmatpush.bf16.msra.mxu2 %v5932_v7  ;;  %v6651_v39 = vld [vmem:[%s7272_s26 + $0x4] sm:$0xf]  ;;  %v6627_v40 = vld [vmem:[%s10515_s1 + $0x8d0] sm:$0xf]  ;;  %v7008_v41 = vld [vmem:[%s10515_s1 + $0x8e4] sm:$0xf0]  ;;  %v7298_v48 = vor.u32 %v6654_v38, %v5211_v37  ;;  %v6436_v58 = vor.u32 %v6960_v34, %v6435_v33 }
  0x25   : > { %2593 = vmatpush.bf16.msra.mxu3 %v6124_v11  ;;  %v6759_v42 = vld [vmem:[%s10515_s1 + $0x124] sm:$0xf]  ;;  %v5213_v44 = vld [vmem:[%s7272_s26 + $0x18] sm:$0xf0]  ;;  %v5219_v45 = vld [vmem:[%s7272_s26 + $0x8] sm:$0xf]  ;;  %v6628_v59 = vor.u32 %v7008_v41, %v6627_v40 }
  0x26   : > { %2375 = vmatpush.bf16.msra.mxu0 %v5524_v17  ;;  %v6655_v46 = vld [vmem:[%s7272_s26 + $0x1c] sm:$0xf0]  ;;  %10720 = vst [vmem:[#allocation2_spill] sm:$0xff] %v7298_v48  ;;  %v6652_v49 = vld [vmem:[%s7272_s26 + $0xc] sm:$0xf]  ;;  %v7305_v53 = vor.u32 %v6651_v39, %v5213_v44 }
  0x27   : > { %2448 = vmatpush.bf16.msra.mxu1 %v5716_v20  ;;  %v5221_v50 = vld [vmem:[%s7272_s26 + $0x20] sm:$0xf0]  ;;  %v5645_v52 = vld [vmem:[%s10515_s1 + $0x138] sm:$0xf0]  ;;  %v7307_v54 = vor.u32 %v6655_v46, %v5219_v45  ;;  %v6411_v61 = vld [vmem:[%s10515_s1 + $0x720] sm:$0xf] }
  0x28   : > { %2521 = vmatpush.bf16.msra.mxu2 %v5908_v21  ;;  %10721 = vst [vmem:[#allocation3_spill] sm:$0xff] %v7305_v53  ;;  %v6807_v55 = vld [vmem:[%s10515_s1 + $0x2a4] sm:$0xf]  ;;  %v5837_v56 = vld [vmem:[%s10515_s1 + $0x2b8] sm:$0xf0]  ;;  %v7315_v57 = vor.u32 %v6652_v49, %v5221_v50  ;;  %v5648_v60 = vor.u32 %v6759_v42, %v5645_v52 }
  0x29   : > { %2594 = vmatpush.bf16.msra.mxu3 %v6100_v25  ;;  %v6954_v62 = vld [vmem:[%s10515_s1 + $0x734] sm:$0xf0]  ;;  %v5840_v63 = vor.u32 %v6807_v55, %v5837_v56  ;;  %v6603_v0 = vld [vmem:[%s10515_s1 + $0x8a0] sm:$0xf]  ;;  %v5235_v4 = vld [vmem:[%s7272_s26 + $0x30] sm:$0xf] }
  0x2a   : > { %2376 = vmatpush.bf16.msra.mxu0 %v5500_v31  ;;  %10722 = vst [vmem:[#allocation4_spill] sm:$0xff] %v7315_v57  ;;  %v7002_v1 = vld [vmem:[%s10515_s1 + $0x8b4] sm:$0xf0]  ;;  %v6412_v2 = vor.u32 %v6954_v62, %v6411_v61  ;;  %v6660_v5 = vld [vmem:[%s7272_s26 + $0x44] sm:$0xf0] }
  0x2b   : > { %2449 = vmatpush.bf16.msra.mxu1 %v5692_v35  ;;  %v6604_v3 = vor.u32 %v7002_v1, %v6603_v0  ;;  %v6657_v6 = vld [vmem:[%s7272_s26 + $0x34] sm:$0xf]  ;;  %v5237_v7 = vld [vmem:[%s7272_s26 + $0x48] sm:$0xf0]  ;;  %v5243_v8 = vld [vmem:[%s7272_s26 + $0x38] sm:$0xf]  ;;  %v7341_v12 = vor.u32 %v6660_v5, %v5235_v4 }
  0x2c   : > { %2522 = vmatpush.bf16.msra.mxu2 %v5884_v36  ;;  %v6661_v9 = vld [vmem:[%s7272_s26 + $0x4c] sm:$0xf0]  ;;  %v6658_v10 = vld [vmem:[%s7272_s26 + $0x3c] sm:$0xf]  ;;  %v5245_v11 = vld [vmem:[%s7272_s26 + $0x50] sm:$0xf0]  ;;  %v7343_v13 = vor.u32 %v6657_v6, %v5237_v7 }
  0x2d   : > { %2595 = vmatpush.bf16.msra.mxu3 %v6076_v43  ;;  %2377 = vmatmul.bf16.vlgmr.msra.gmra.mxu0 %v7298_v48  ;;  %10723 = vst [vmem:[#allocation5_spill] sm:$0xff] %v7341_v12  ;;  %v7345_v14 = vor.u32 %v6661_v9, %v5243_v8  ;;  %v7347_v15 = vor.u32 %v6658_v10, %v5245_v11  ;;  %v6753_v16 = vld [vmem:[%s10515_s1 + $0xf4] sm:$0xf]  ;;  %v5621_v17 = vld [vmem:[%s10515_s1 + $0x108] sm:$0xf0] }
  0x2e   : > { %2450 = vmatmul.bf16.vlgmr.msra.gmra.mxu1 %v7305_v53  ;;  %2661 = vmatpush.bf16.msrb.mxu0 %v6436_v58  ;;  %10724 = vst [vmem:[#allocation6_spill] sm:$0xff] %v7343_v13  ;;  %v6801_v18 = vld [vmem:[%s10515_s1 + $0x274] sm:$0xf]  ;;  %v5624_v19 = vor.u32 %v6753_v16, %v5621_v17  ;;  %v5813_v20 = vld [vmem:[%s10515_s1 + $0x288] sm:$0xf0] }
  0x2f   : > { %2523 = vmatmul.bf16.vlgmr.msra.gmra.mxu2 %v7307_v54  ;;  %2734 = vmatpush.bf16.msrb.mxu1 %v6628_v59  ;;  %10725 = vst [vmem:[#allocation7_spill] sm:$0xff] %v7345_v14  ;;  %v6387_v21 = vld [vmem:[%s10515_s1 + $0x6f0] sm:$0xf]  ;;  %v6948_v22 = vld [vmem:[%s10515_s1 + $0x704] sm:$0xf0]  ;;  %v5816_v23 = vor.u32 %v6801_v18, %v5813_v20 }
  0x30   : > { %2807 = vmatpush.bf16.msrb.mxu2 %v5672_v47  ;;  %2596 = vmatmul.bf16.vlgmr.msra.gmra.mxu3 %v7315_v57  ;;  %10726 = vst [vmem:[#allocation8_spill] sm:$0xff] %v7347_v15  ;;  %v6388_v24 = vor.u32 %v6948_v22, %v6387_v21  ;;  %v6579_v25 = vld [vmem:[%s10515_s1 + $0x870] sm:$0xf]  ;;  %v6996_v26 = vld [vmem:[%s10515_s1 + $0x884] sm:$0xf0] }
  0x31   : > { %2880 = vmatpush.bf16.msrb.mxu3 %v5864_v51  ;;  %v6580_v27 = vor.u32 %v6996_v26, %v6579_v25  ;;  %v5259_v28 = vld [vmem:[%s7272_s26 + $0x60] sm:$0xf]  ;;  %v6666_v29 = vld [vmem:[%s7272_s26 + $0x74] sm:$0xf0]  ;;  %v6663_v30 = vld [vmem:[%s7272_s26 + $0x64] sm:$0xf] }
  0x32   : > { %2662 = vmatpush.bf16.msrb.mxu0 %v6412_v2  ;;  %v5261_v31 = vld [vmem:[%s7272_s26 + $0x78] sm:$0xf0]  ;;  %v5267_v32 = vld [vmem:[%s7272_s26 + $0x68] sm:$0xf]  ;;  %v6667_v33 = vld [vmem:[%s7272_s26 + $0x7c] sm:$0xf0]  ;;  %v7385_v36 = vor.u32 %v6666_v29, %v5259_v28 }
  0x33   : > { %2735 = vmatpush.bf16.msrb.mxu1 %v6604_v3  ;;  %v6664_v34 = vld [vmem:[%s7272_s26 + $0x6c] sm:$0xf]  ;;  %v5269_v35 = vld [vmem:[%s7272_s26 + $0x80] sm:$0xf0]  ;;  %v7387_v37 = vor.u32 %v6663_v30, %v5261_v31  ;;  %v7389_v38 = vor.u32 %v6667_v33, %v5267_v32  ;;  %v5597_v41 = vld [vmem:[%s10515_s1 + $0xd8] sm:$0xf0] }
  0x34   : > { %2808 = vmatpush.bf16.msrb.mxu2 %v5648_v60  ;;  %10727 = vst [vmem:[#allocation9_spill] sm:$0xff] %v7385_v36  ;;  %v7391_v39 = vor.u32 %v6664_v34, %v5269_v35  ;;  %v6747_v40 = vld [vmem:[%s10515_s1 + $0xc4] sm:$0xf]  ;;  %v5789_v44 = vld [vmem:[%s10515_s1 + $0x258] sm:$0xf0] }
  0x35   : > { %2881 = vmatpush.bf16.msrb.mxu3 %v5840_v63  ;;  %10728 = vst [vmem:[#allocation10_spill] sm:$0xff] %v7387_v37  ;;  %v6795_v42 = vld [vmem:[%s10515_s1 + $0x244] sm:$0xf]  ;;  %v5600_v43 = vor.u32 %v6747_v40, %v5597_v41  ;;  %v5283_v46 = vld [vmem:[%s7272_s26 + $0x90] sm:$0xf] }
  0x36   : > { %2663 = vmatpush.bf16.msrb.mxu0 %v6388_v24  ;;  %10729 = vst [vmem:[#allocation11_spill] sm:$0xff] %v7389_v38  ;;  %v5792_v45 = vor.u32 %v6795_v42, %v5789_v44  ;;  %v6672_v47 = vld [vmem:[%s7272_s26 + $0xa4] sm:$0xf0]  ;;  %v6669_v49 = vld [vmem:[%s7272_s26 + $0x94] sm:$0xf] }
  0x37   : > { %2736 = vmatpush.bf16.msrb.mxu1 %v6580_v27  ;;  %10730 = vst [vmem:[#allocation12_spill] sm:$0xff] %v7391_v39  ;;  %v5285_v50 = vld [vmem:[%s7272_s26 + $0xa8] sm:$0xf0]  ;;  %v5291_v51 = vld [vmem:[%s7272_s26 + $0x98] sm:$0xf]  ;;  %v7417_v58 = vor.u32 %v6672_v47, %v5283_v46 }
  0x38   : > { %2809 = vmatpush.bf16.msrb.mxu2 %v5624_v19  ;;  %v6673_v52 = vld [vmem:[%s7272_s26 + $0xac] sm:$0xf0]  ;;  %v6670_v55 = vld [vmem:[%s7272_s26 + $0x9c] sm:$0xf]  ;;  %v5293_v56 = vld [vmem:[%s7272_s26 + $0xb0] sm:$0xf0]  ;;  %v7419_v59 = vor.u32 %v6669_v49, %v5285_v50 }
  0x39   : > { %2882 = vmatpush.bf16.msrb.mxu3 %v5816_v23  ;;  %10731 = vst [vmem:[#allocation13_spill] sm:$0xff] %v7417_v58  ;;  %v7421_v60 = vor.u32 %v6673_v52, %v5291_v51  ;;  %v7423_v61 = vor.u32 %v6670_v55, %v5293_v56  ;;  %v6363_v62 = vld [vmem:[%s10515_s1 + $0x6c0] sm:$0xf]  ;;  %v6942_v63 = vld [vmem:[%s10515_s1 + $0x6d4] sm:$0xf0] }
  0x3a   : > { %10732 = vst [vmem:[#allocation14_spill] sm:$0xff] %v7419_v59  ;;  %v6555_v0 = vld [vmem:[%s10515_s1 + $0x840] sm:$0xf]  ;;  %v6364_v1 = vor.u32 %v6942_v63, %v6363_v62  ;;  %v6990_v2 = vld [vmem:[%s10515_s1 + $0x854] sm:$0xf0] }
  0x3b   : > { %10733 = vst [vmem:[#allocation15_spill] sm:$0xff] %v7421_v60  ;;  %v6556_v3 = vor.u32 %v6990_v2, %v6555_v0  ;;  %v5307_v4 = vld [vmem:[%s7272_s26 + $0xc0] sm:$0xf]  ;;  %v6678_v5 = vld [vmem:[%s7272_s26 + $0xd4] sm:$0xf0] }
  0x3c   : > { %2810 = vmatpush.bf16.msrb.mxu2 %v5600_v43  ;;  %10734 = vst [vmem:[#allocation16_spill] sm:$0xff] %v7423_v61  ;;  %2664 = vmatpush.bf16.msrb.mxu0 %v6364_v1  ;;  %v6675_v6 = vld [vmem:[%s7272_s26 + $0xc4] sm:$0xf]  ;;  %v5309_v7 = vld [vmem:[%s7272_s26 + $0xd8] sm:$0xf0]  ;;  %v7449_v16 = vor.u32 %v6678_v5, %v5307_v4 }
  0x3d   : > { %2382 = vmatmul.bf16.gmra.mxu0 %v7341_v12  ;;  %2883 = vmatpush.bf16.msrb.mxu3 %v5792_v45  ;;  %v5315_v8 = vld [vmem:[%s7272_s26 + $0xc8] sm:$0xf]  ;;  %v6679_v9 = vld [vmem:[%s7272_s26 + $0xdc] sm:$0xf0]  ;;  %v6676_v10 = vld [vmem:[%s7272_s26 + $0xcc] sm:$0xf]  ;;  %v7451_v17 = vor.u32 %v6675_v6, %v5309_v7 }
  0x3e   : > { %2455 = vmatmul.bf16.gmra.mxu1 %v7343_v13  ;;  %v5317_v11 = vld [vmem:[%s7272_s26 + $0xe0] sm:$0xf0]  ;;  %10735 = vst [vmem:[#allocation17_spill] sm:$0xff] %v7449_v16  ;;  %v7453_v18 = vor.u32 %v6679_v9, %v5315_v8  ;;  %v6741_v20 = vld [vmem:[%s10515_s1 + $0x94] sm:$0xf] }
  0x3f   : > { %2528 = vmatmul.bf16.gmra.mxu2 %v7345_v14  ;;  %2737 = vmatpush.bf16.msrb.mxu1 %v6556_v3  ;;  %10736 = vst [vmem:[#allocation18_spill] sm:$0xff] %v7451_v17  ;;  %v7455_v19 = vor.u32 %v6676_v10, %v5317_v11  ;;  %v5573_v21 = vld [vmem:[%s10515_s1 + $0xa8] sm:$0xf0]  ;;  %v6789_v22 = vld [vmem:[%s10515_s1 + $0x214] sm:$0xf] }
  0x40   : > { %2601 = vmatmul.bf16.gmra.mxu3 %v7347_v15  ;;  %10737 = vst [vmem:[#allocation19_spill] sm:$0xff] %v7453_v18  ;;  %v5576_v23 = vor.u32 %v6741_v20, %v5573_v21  ;;  %v5765_v24 = vld [vmem:[%s10515_s1 + $0x228] sm:$0xf0]  ;;  %v6339_v25 = vld [vmem:[%s10515_s1 + $0x690] sm:$0xf] }
  0x41   : > { %10738 = vst [vmem:[#allocation20_spill] sm:$0xff] %v7455_v19  ;;  %v6936_v26 = vld [vmem:[%s10515_s1 + $0x6a4] sm:$0xf0]  ;;  %v5768_v27 = vor.u32 %v6789_v22, %v5765_v24  ;;  %v6531_v29 = vld [vmem:[%s10515_s1 + $0x810] sm:$0xf] }
  0x42   : > { %v6340_v28 = vor.u32 %v6936_v26, %v6339_v25  ;;  %v6984_v30 = vld [vmem:[%s10515_s1 + $0x824] sm:$0xf0]  ;;  %2811 = vmatpush.bf16.msrb.mxu2 %v5576_v23  ;;  %v5331_v32 = vld [vmem:[%s7272_s26 + $0xf0] sm:$0xf]  ;;  %v6681_v34 = vld [vmem:[%s7272_s26 + $0xf4] sm:$0xf] }
  0x43   : > { %v6532_v31 = vor.u32 %v6984_v30, %v6531_v29  ;;  %2884 = vmatpush.bf16.msrb.mxu3 %v5768_v27  ;;  %v6684_v33 = vld [vmem:[%s7272_s26 + $0x104] sm:$0xf0]  ;;  %v5333_v35 = vld [vmem:[%s7272_s26 + $0x108] sm:$0xf0]  ;;  %v5339_v40 = vld [vmem:[%s7272_s26 + $0xf8] sm:$0xf] }
  0x44   : > { %2665 = vmatpush.bf16.msrb.mxu0 %v6340_v28  ;;  %v6685_v41 = vld [vmem:[%s7272_s26 + $0x10c] sm:$0xf0]  ;;  %v6682_v42 = vld [vmem:[%s7272_s26 + $0xfc] sm:$0xf]  ;;  %v5341_v43 = vld [vmem:[%s7272_s26 + $0x110] sm:$0xf0]  ;;  %v7493_v44 = vor.u32 %v6684_v33, %v5331_v32  ;;  %v7495_v45 = vor.u32 %v6681_v34, %v5333_v35 }
  0x45   : > { %2738 = vmatpush.bf16.msrb.mxu1 %v6532_v31  ;;  %v7497_v46 = vor.u32 %v6685_v41, %v5339_v40  ;;  %v7499_v47 = vor.u32 %v6682_v42, %v5341_v43  ;;  %v5355_v49 = vld [vmem:[%s7272_s26 + $0x120] sm:$0xf]  ;;  %v6690_v50 = vld [vmem:[%s7272_s26 + $0x134] sm:$0xf0]  ;;  %v6687_v51 = vld [vmem:[%s7272_s26 + $0x124] sm:$0xf] }
  0x46   : > { %10739 = vst [vmem:[#allocation21_spill] sm:$0xff] %v7493_v44  ;;  %v5357_v52 = vld [vmem:[%s7272_s26 + $0x138] sm:$0xf0]  ;;  %v5363_v55 = vld [vmem:[%s7272_s26 + $0x128] sm:$0xf]  ;;  %v7513_v0 = vor.u32 %v6690_v50, %v5355_v49 }
  0x47   : > { %10740 = vst [vmem:[#allocation22_spill] sm:$0xff] %v7495_v45  ;;  %v6691_v56 = vld [vmem:[%s7272_s26 + $0x13c] sm:$0xf0]  ;;  %v6688_v62 = vld [vmem:[%s7272_s26 + $0x12c] sm:$0xf]  ;;  %v7515_v1 = vor.u32 %v6687_v51, %v5357_v52 }
  0x48   : > { %10741 = vst [vmem:[#allocation23_spill] sm:$0xff] %v7497_v46  ;;  %v5365_v63 = vld [vmem:[%s7272_s26 + $0x140] sm:$0xf0]  ;;  %v7517_v2 = vor.u32 %v6691_v56, %v5363_v55  ;;  %v5549_v5 = vld [vmem:[%s10515_s1 + $0x78] sm:$0xf0] }
  0x49   : > { %10742 = vst [vmem:[#allocation24_spill] sm:$0xff] %v7499_v47  ;;  %v7519_v3 = vor.u32 %v6688_v62, %v5365_v63  ;;  %v6735_v4 = vld [vmem:[%s10515_s1 + $0x64] sm:$0xf]  ;;  %v5741_v8 = vld [vmem:[%s10515_s1 + $0x1f8] sm:$0xf0] }
  0x4a   : > { %10743 = vst [vmem:[#allocation25_spill] sm:$0xff] %v7513_v0  ;;  %v6783_v6 = vld [vmem:[%s10515_s1 + $0x1e4] sm:$0xf]  ;;  %v5552_v7 = vor.u32 %v6735_v4, %v5549_v5  ;;  %v5379_v10 = vld [vmem:[%s7272_s26 + $0x150] sm:$0xf] }
  0x4b   : > { %10744 = vst [vmem:[#allocation26_spill] sm:$0xff] %v7515_v1  ;;  %v5744_v9 = vor.u32 %v6783_v6, %v5741_v8  ;;  %v6315_v11 = vld [vmem:[%s10515_s1 + $0x660] sm:$0xf]  ;;  %v6930_v20 = vld [vmem:[%s10515_s1 + $0x674] sm:$0xf0] }
  0x4c   : > { %10745 = vst [vmem:[#allocation27_spill] sm:$0xff] %v7517_v2  ;;  %2812 = vmatpush.bf16.msrb.mxu2 %v5552_v7  ;;  %v6507_v21 = vld [vmem:[%s10515_s1 + $0x7e0] sm:$0xf]  ;;  %v6696_v22 = vld [vmem:[%s7272_s26 + $0x164] sm:$0xf0]  ;;  %v6316_v24 = vor.u32 %v6930_v20, %v6315_v11 }
  0x4d   : > { %2387 = vmatmul.bf16.gmra.mxu0 %v7385_v36  ;;  %10746 = vst [vmem:[#allocation28_spill] sm:$0xff] %v7519_v3  ;;  %2885 = vmatpush.bf16.msrb.mxu3 %v5744_v9  ;;  %v6693_v23 = vld [vmem:[%s7272_s26 + $0x154] sm:$0xf]  ;;  %v6978_v25 = vld [vmem:[%s10515_s1 + $0x7f4] sm:$0xf0]  ;;  %v7557_v32 = vor.u32 %v6696_v22, %v5379_v10 }
  0x4e   : > { %2460 = vmatmul.bf16.gmra.mxu1 %v7387_v37  ;;  %v5381_v26 = vld [vmem:[%s7272_s26 + $0x168] sm:$0xf0]  ;;  %v5387_v27 = vld [vmem:[%s7272_s26 + $0x158] sm:$0xf]  ;;  %v6697_v28 = vld [vmem:[%s7272_s26 + $0x16c] sm:$0xf0]  ;;  %v6508_v29 = vor.u32 %v6978_v25, %v6507_v21  ;;  %2666 = vmatpush.bf16.msrb.mxu0 %v6316_v24 }
  0x4f   : > { %2533 = vmatmul.bf16.gmra.mxu2 %v7389_v38  ;;  %v6694_v30 = vld [vmem:[%s7272_s26 + $0x15c] sm:$0xf]  ;;  %v5389_v31 = vld [vmem:[%s7272_s26 + $0x170] sm:$0xf0]  ;;  %10747 = vst [vmem:[#allocation29_spill] sm:$0xff] %v7557_v32  ;;  %v7559_v33 = vor.u32 %v6693_v23, %v5381_v26  ;;  %v7561_v34 = vor.u32 %v6697_v28, %v5387_v27 }
  0x50   : > { %2606 = vmatmul.bf16.gmra.mxu3 %v7391_v39  ;;  %2739 = vmatpush.bf16.msrb.mxu1 %v6508_v29  ;;  %v7563_v35 = vor.u32 %v6694_v30, %v5389_v31  ;;  %v534_v40 = vld [vmem:[%s10516_s2] sm:$0x3f]  ;;  %v6702_v43 = vld [vmem:[%s7272_s26 + $0x194] sm:$0xf0]  ;;  %v5405_v50 = vld [vmem:[%s7272_s26 + $0x198] sm:$0xf0] }
  0x51   : > { %10748 = vst [vmem:[#allocation30_spill] sm:$0xff] %v7559_v33  ;;  %v7572_v41 = vperm.slane %v534_v40, 0  ;;  %v5403_v42 = vld [vmem:[%s7272_s26 + $0x180] sm:$0xf]  ;;  %v6699_v49 = vld [vmem:[%s7272_s26 + $0x184] sm:$0xf] }
  0x52   : > { %10749 = vst [vmem:[#allocation31_spill] sm:$0xff] %v7561_v34  ;;  %v5411_v51 = vld [vmem:[%s7272_s26 + $0x188] sm:$0xf]  ;;  %v6703_v52 = vld [vmem:[%s7272_s26 + $0x19c] sm:$0xf0]  ;;  %v7582_v62 = vor.u32 %v6702_v43, %v5403_v42  ;;  %v7584_v4 = vor.u32 %v6699_v49, %v5405_v50 }
  0x53   : > { %10750 = vst [vmem:[#allocation32_spill] sm:$0xff] %v7563_v35  ;;  %v6700_v55 = vld [vmem:[%s7272_s26 + $0x18c] sm:$0xf]  ;;  %v5413_v56 = vld [vmem:[%s7272_s26 + $0x1a0] sm:$0xf0]  ;;  %v7586_v5 = vor.u32 %v6703_v52, %v5411_v51 }
  0x54   : > { %10751 = vst [vmem:[#allocation33_spill] sm:$0xff] %v7582_v62  ;;  %v7589_v8 = vor.u32 %v6700_v55, %v5413_v56  ;;  %v6729_v9 = vld [vmem:[%s10515_s1 + $0x34] sm:$0xf]  ;;  %v5525_v10 = vld [vmem:[%s10515_s1 + $0x48] sm:$0xf0] }
  0x55   : > { %10752 = vst [vmem:[#allocation34_spill] sm:$0xff] %v7584_v4  ;;  %v6777_v11 = vld [vmem:[%s10515_s1 + $0x1b4] sm:$0xf]  ;;  %v5528_v21 = vor.u32 %v6729_v9, %v5525_v10  ;;  %v5717_v22 = vld [vmem:[%s10515_s1 + $0x1c8] sm:$0xf0] }
  0x56   : > { %10753 = vst [vmem:[#allocation35_spill] sm:$0xff] %v7586_v5  ;;  %v6291_v23 = vld [vmem:[%s10515_s1 + $0x630] sm:$0xf]  ;;  %v6924_v24 = vld [vmem:[%s10515_s1 + $0x644] sm:$0xf0]  ;;  %v5720_v25 = vor.u32 %v6777_v11, %v5717_v22 }
  0x57   : > { %10754 = vst [vmem:[#allocation36_spill] sm:$0xff] %v7589_v8  ;;  %v6292_v26 = vor.u32 %v6924_v24, %v6291_v23  ;;  %2813 = vmatpush.bf16.msrb.mxu2 %v5528_v21  ;;  %v6483_v27 = vld [vmem:[%s10515_s1 + $0x7b0] sm:$0xf]  ;;  %v6972_v29 = vld [vmem:[%s10515_s1 + $0x7c4] sm:$0xf0] }
  0x58   : > { %2886 = vmatpush.bf16.msrb.mxu3 %v5720_v25  ;;  %v6484_v42 = vor.u32 %v6972_v29, %v6483_v27  ;;  %v5427_v52 = vld [vmem:[%s7272_s26 + $0x1b0] sm:$0xf]  ;;  %v6708_v55 = vld [vmem:[%s7272_s26 + $0x1c4] sm:$0xf0]  ;;  %v6705_v56 = vld [vmem:[%s7272_s26 + $0x1b4] sm:$0xf] }
  0x59   : > { %2667 = vmatpush.bf16.msrb.mxu0 %v6292_v26  ;;  %v6706_v9 = vld [vmem:[%s7272_s26 + $0x1bc] sm:$0xf]  ;;  %v5437_v10 = vld [vmem:[%s7272_s26 + $0x1d0] sm:$0xf0] }
  0x5a   : > { %2740 = vmatpush.bf16.msrb.mxu1 %v6484_v42 }
  0x5d   : > { %2392 = vmatmul.bf16.gmra.mxu0 %v7417_v58 }
  0x5e   : > { %2465 = vmatmul.bf16.gmra.mxu1 %v7419_v59 }
  0x5f   : > { %2538 = vmatmul.bf16.gmra.mxu2 %v7421_v60 }
  0x60   : > { %2611 = vmatmul.bf16.gmra.mxu3 %v7423_v61 }
  0x6d   : > { %2397 = vmatmul.bf16.gmra.mxu0 %v7449_v16 }
  0x6e   : > { %2470 = vmatmul.bf16.gmra.mxu1 %v7451_v17 }
  0x6f   : > { %2543 = vmatmul.bf16.gmra.mxu2 %v7453_v18 }
  0x70   : > { %2616 = vmatmul.bf16.gmra.mxu3 %v7455_v19 }
  0x7d   : > { %2402 = vmatmul.bf16.gmra.mxu0 %v7493_v44 }
  0x7e   : > { %2475 = vmatmul.bf16.gmra.mxu1 %v7495_v45 }
  0x7f   : > { %2548 = vmatmul.bf16.gmra.mxu2 %v7497_v46 }
  0x80   : > { %2621 = vmatmul.bf16.gmra.mxu3 %v7499_v47 }
  0x8d   : > { %2407 = vmatmul.bf16.gmra.mxu0 %v7513_v0 }
  0x8e   : > { %2480 = vmatmul.bf16.gmra.mxu1 %v7515_v1 }
  0x8f   : > { %2553 = vmatmul.bf16.gmra.mxu2 %v7517_v2 }
  0x90   : > { %2626 = vmatmul.bf16.gmra.mxu3 %v7519_v3 }
  0x9d   : > { %2412 = vmatmul.bf16.gmra.mxu0 %v7557_v32 }
  0x9e   : > { %2485 = vmatmul.bf16.gmra.mxu1 %v7559_v33 }
  0x9f   : > { %2558 = vmatmul.bf16.gmra.mxu2 %v7561_v34 }
  0xa0   : > { %2631 = vmatmul.bf16.gmra.mxu3 %v7563_v35 }
  0xaa   : > { %v2378_v63 = vpop.f32.mrf.mxu0 }
  0xab   : > { %v2379_v6 = vadd.f32 %v2378_v63, %v7572_v41  ;;  %v2451_v7 = vpop.f32.mrf.mxu1  ;;  %v5429_v63 = vld [vmem:[%s7272_s26 + $0x1c8] sm:$0xf0] }
  0xac   : > { %v7632_v24 = vor.u32 %v6705_v56, %v5429_v63  ;;  %v6714_v56 = vld [vmem:[%s7272_s26 + $0x1f4] sm:$0xf0] }
  0xad   : > { %v2452_v20 = vadd.f32 %v2451_v7, %v2379_v6  ;;  %2417 = vmatmul.bf16.gmra.mxu0 %v7582_v62  ;;  %v5435_v6 = vld [vmem:[%s7272_s26 + $0x1b8] sm:$0xf]  ;;  %v6709_v7 = vld [vmem:[%s7272_s26 + $0x1cc] sm:$0xf0] }
  0xae   : > { %2490 = vmatmul.bf16.gmra.mxu1 %v7584_v4  ;;  %10756 = vst [vmem:[#allocation38_spill] sm:$0xff] %v7632_v24  ;;  %v7634_v25 = vor.u32 %v6709_v7, %v5435_v6  ;;  %v6711_v6 = vld [vmem:[%s7272_s26 + $0x1e4] sm:$0xf] }
  0xaf   : > { %2563 = vmatmul.bf16.gmra.mxu2 %v7586_v5  ;;  %v6723_v7 = vld [vmem:[%s10515_s1 + $0x4] sm:$0xf] }
  0xb0   : > { %2636 = vmatmul.bf16.gmra.mxu3 %v7589_v8  ;;  %10757 = vst [vmem:[#allocation39_spill] sm:$0xff] %v7634_v25 }
  0xb2   : > { %v2524_v28 = vpop.f32.mrf.mxu2  ;;  %v2380_v40 = vpop.f32.mrf.mxu0 }
  0xb3   : > { %v2525_v30 = vadd.f32 %v2524_v28, %v2452_v20  ;;  %v2597_v31 = vpop.f32.mrf.mxu3  ;;  %v2381_v43 = vadd.f32 %v2380_v40, %v7572_v41  ;;  %v2453_v49 = vpop.f32.mrf.mxu1  ;;  %v7630_v20 = vor.u32 %v6708_v55, %v5427_v52  ;;  %v7637_v28 = vor.u32 %v6706_v9, %v5437_v10  ;;  %v5451_v55 = vld [vmem:[%s7272_s26 + $0x1e0] sm:$0xf]  ;;  %v5501_v9 = vld [vmem:[%s10515_s1 + $0x18] sm:$0xf0]  ;;  %v6771_v10 = vld [vmem:[%s10515_s1 + $0x184] sm:$0xf] }
  0xb5   : > { %v7620_v50 = vadd.f32 %v2597_v31, %v2525_v30  ;;  %v2454_v51 = vadd.f32 %v2453_v49, %v2381_v43  ;;  %10755 = vst [vmem:[#allocation37_spill] sm:$0xff] %v7630_v20 }
  0xb6   : > { %10758 = vst [vmem:[#allocation40_spill] sm:$0xff] %v7637_v28 }
  0xba   : > { %v2526_v11 = vpop.f32.mrf.mxu2  ;;  %v2383_v23 = vpop.f32.mrf.mxu0 }
  0xbb   : > { %v2527_v21 = vadd.f32 %v2526_v11, %v2454_v51  ;;  %v2599_v22 = vpop.f32.mrf.mxu3  ;;  %v2384_v26 = vadd.f32 %v2383_v23, %v7572_v41  ;;  %v2456_v27 = vpop.f32.mrf.mxu1  ;;  %v5504_v11 = vor.u32 %v6723_v7, %v5501_v9  ;;  %v6918_v23 = vld [vmem:[%s10515_s1 + $0x614] sm:$0xf0] }
  0xbd   : > { %v7639_v29 = vadd.f32 %v2599_v22, %v2527_v21  ;;  %v2457_v30 = vadd.f32 %v2456_v27, %v2384_v26  ;;  %2422 = vmatmul.bf16.gmra.mxu0 %v7630_v20  ;;  %v5693_v21 = vld [vmem:[%s10515_s1 + $0x198] sm:$0xf0]  ;;  %v6267_v22 = vld [vmem:[%s10515_s1 + $0x600] sm:$0xf]  ;;  %v5459_v27 = vld [vmem:[%s7272_s26 + $0x1e8] sm:$0xf]  ;;  %2814 = vmatpush.bf16.msrb.mxu2 %v5504_v11 }
  0xbe   : > { %2495 = vmatmul.bf16.gmra.mxu1 %v7632_v24  ;;  %v5453_v26 = vld [vmem:[%s7272_s26 + $0x1f8] sm:$0xf0] }
  0xbf   : > { %2568 = vmatmul.bf16.gmra.mxu2 %v7634_v25  ;;  %v7676_v25 = vor.u32 %v6711_v6, %v5453_v26 }
  0xc0   : > { %2641 = vmatmul.bf16.gmra.mxu3 %v7637_v28 }
  0xc1   : > { %10760 = vst [vmem:[#allocation42_spill] sm:$0xff] %v7676_v25 }
  0xc2   : > { %v2529_v31 = vpop.f32.mrf.mxu2  ;;  %v2385_v43 = vpop.f32.mrf.mxu0 }
  0xc3   : > { %v2530_v40 = vadd.f32 %v2529_v31, %v2457_v30  ;;  %v2602_v42 = vpop.f32.mrf.mxu3  ;;  %v2386_v49 = vadd.f32 %v2385_v43, %v7572_v41  ;;  %v2458_v51 = vpop.f32.mrf.mxu1  ;;  %v6715_v30 = vld [vmem:[%s7272_s26 + $0x1fc] sm:$0xf0]  ;;  %v5696_v31 = vor.u32 %v6771_v10, %v5693_v21  ;;  %v5461_v43 = vld [vmem:[%s7272_s26 + $0x200] sm:$0xf0] }
  0xc4   : > { %v7678_v8 = vor.u32 %v6715_v30, %v5459_v27  ;;  %v5475_v30 = vld [vmem:[%s7272_s26 + $0x210] sm:$0xf] }
  0xc5   : > { %v7646_v52 = vadd.f32 %v2602_v42, %v2530_v40  ;;  %v2459_v63 = vadd.f32 %v2458_v51, %v2386_v49  ;;  %v6268_v40 = vor.u32 %v6918_v23, %v6267_v22  ;;  %v6712_v42 = vld [vmem:[%s7272_s26 + $0x1ec] sm:$0xf]  ;;  %v7674_v51 = vor.u32 %v6714_v56, %v5451_v55  ;;  %2887 = vmatpush.bf16.msrb.mxu3 %v5696_v31  ;;  %v6459_v55 = vld [vmem:[%s10515_s1 + $0x780] sm:$0xf]  ;;  %v6966_v56 = vld [vmem:[%s10515_s1 + $0x794] sm:$0xf0] }
  0xc6   : > { %10761 = vst [vmem:[#allocation43_spill] sm:$0xff] %v7678_v8  ;;  %v7681_v10 = vor.u32 %v6712_v42, %v5461_v43  ;;  %v6720_v31 = vld [vmem:[%s7272_s26 + $0x224] sm:$0xf0]  ;;  %v5477_v42 = vld [vmem:[%s7272_s26 + $0x228] sm:$0xf0] }
  0xc7   : > { %10759 = vst [vmem:[#allocation41_spill] sm:$0xff] %v7674_v51  ;;  %2668 = vmatpush.bf16.msrb.mxu0 %v6268_v40  ;;  %v6717_v40 = vld [vmem:[%s7272_s26 + $0x214] sm:$0xf]  ;;  %v5483_v43 = vld [vmem:[%s7272_s26 + $0x218] sm:$0xf] }
  0xc8   : > { %10762 = vst [vmem:[#allocation44_spill] sm:$0xff] %v7681_v10 }
  0xca   : > { %v2531_v49 = vpop.f32.mrf.mxu2  ;;  %v2388_v28 = vpop.f32.mrf.mxu0 }
  0xcb   : > { %v2532_v7 = vadd.f32 %v2531_v49, %v2459_v63  ;;  %v2604_v9 = vpop.f32.mrf.mxu3  ;;  %v2389_v5 = vadd.f32 %v2388_v28, %v7572_v41  ;;  %v2461_v35 = vpop.f32.mrf.mxu1  ;;  %v6460_v28 = vor.u32 %v6966_v56, %v6459_v55  ;;  %v6721_v49 = vld [vmem:[%s7272_s26 + $0x22c] sm:$0xf0]  ;;  %v7706_v56 = vor.u32 %v6720_v31, %v5475_v30  ;;  %v6437_v30 = vld [vmem:[%s10515_s1 + $0x768] sm:$0xf0]  ;;  %v7005_v31 = vld [vmem:[%s10515_s1 + $0x8d4] sm:$0xf] }
  0xcd   : > { %v7683_v21 = vadd.f32 %v2604_v9, %v2532_v7  ;;  %v2462_v63 = vadd.f32 %v2461_v35, %v2389_v5  ;;  %2427 = vmatmul.bf16.gmra.mxu0 %v7674_v51  ;;  %2741 = vmatpush.bf16.msrb.mxu1 %v6460_v28  ;;  %v6718_v7 = vld [vmem:[%s7272_s26 + $0x21c] sm:$0xf]  ;;  %v5485_v9 = vld [vmem:[%s7272_s26 + $0x230] sm:$0xf0]  ;;  %10763 = vst [vmem:[#allocation45_spill] sm:$0xff] %v7706_v56 }
  0xce   : > { %2500 = vmatmul.bf16.gmra.mxu1 %v7676_v25 }
  0xcf   : > { %2573 = vmatmul.bf16.gmra.mxu2 %v7678_v8 }
  0xd0   : > { %2646 = vmatmul.bf16.gmra.mxu3 %v7681_v10  ;;  %v7708_v10 = vor.u32 %v6717_v40, %v5477_v42  ;;  %v6629_v42 = vld [vmem:[%s10515_s1 + $0x8e8] sm:$0xf0] }
  0xd2   : > { %v2534_v6 = vpop.f32.mrf.mxu2  ;;  %v2390_v5 = vpop.f32.mrf.mxu0  ;;  %10764 = vst [vmem:[#allocation46_spill] sm:$0xff] %v7708_v10 }
  0xd3   : > { %v2535_v11 = vadd.f32 %v2534_v6, %v2462_v63  ;;  %v2607_v35 = vpop.f32.mrf.mxu3  ;;  %v2391_v22 = vadd.f32 %v2390_v5, %v7572_v41  ;;  %v2463_v23 = vpop.f32.mrf.mxu1  ;;  %v7710_v5 = vor.u32 %v6721_v49, %v5483_v43  ;;  %v6632_v49 = vor.u32 %v7005_v31, %v6629_v42 }
  0xd5   : > { %v7696_v26 = vadd.f32 %v2607_v35, %v2535_v11  ;;  %v2464_v27 = vadd.f32 %v2463_v23, %v2391_v22  ;;  %10765 = vst [vmem:[#allocation47_spill] sm:$0xff] %v7710_v5  ;;  %v7713_v22 = vor.u32 %v6718_v7, %v5485_v9  ;;  %3172 = vmatpush.bf16.msra.mxu3 %v6632_v49 }
  0xd7   : > { %10766 = vst [vmem:[#allocation48_spill] sm:$0xff] %v7713_v22 }
  0xda   : > { %v2536_v55 = vpop.f32.mrf.mxu2  ;;  %v2393_v6 = vpop.f32.mrf.mxu0 }
  0xdb   : > { %v2537_v63 = vadd.f32 %v2536_v55, %v2464_v27  ;;  %v2609_v28 = vpop.f32.mrf.mxu3  ;;  %v2394_v11 = vadd.f32 %v2393_v6, %v7572_v41  ;;  %v2466_v35 = vpop.f32.mrf.mxu1  ;;  %v6957_v27 = vld [vmem:[%s10515_s1 + $0x754] sm:$0xf] }
  0xdc   : > { %v6440_v40 = vor.u32 %v6957_v27, %v6437_v30  ;;  %v6861_v27 = vld [vmem:[%s10515_s1 + $0x454] sm:$0xf]  ;;  %v6053_v30 = vld [vmem:[%s10515_s1 + $0x468] sm:$0xf0] }
  0xdd   : > { %v7715_v23 = vadd.f32 %v2609_v28, %v2537_v63  ;;  %v2467_v8 = vadd.f32 %v2466_v35, %v2394_v11  ;;  %2432 = vmatmul.bf16.gmra.mxu0 %v7706_v56  ;;  %v243_v63 = vld [vmem:[%s7272_s26 + $0x240] sm:$0x33]  ;;  %v244_v11 = vld [vmem:[%s7272_s26 + $0x248] sm:$0x33]  ;;  %v6056_v42 = vor.u32 %v6861_v27, %v6053_v30 }
  0xde   : > { %2505 = vmatmul.bf16.gmra.mxu1 %v7708_v10  ;;  %3099 = vmatpush.bf16.msra.mxu2 %v6440_v40  ;;  %v767_v31 = vunpack.c.l.b16 %v243_v63  ;;  %v6909_v40 = vld [vmem:[%s10515_s1 + $0x5d4] sm:$0xf]  ;;  %v768_v49 = vunpack.c.h.b16 %v243_v63 }
  0xdf   : > { %2578 = vmatmul.bf16.gmra.mxu2 %v7710_v5  ;;  %2953 = vmatpush.bf16.msra.mxu0 %v6056_v42 }
  0xe0   : > { %2651 = vmatmul.bf16.gmra.mxu3 %v7713_v22  ;;  %v7750_v5 = vpack.c.b16 %v767_v31, %v767_v31  ;;  %v7752_v30 = vpack.c.b16 %v768_v49, %v768_v49  ;;  %v6951_v49 = vld [vmem:[%s10515_s1 + $0x724] sm:$0xf] }
  0xe2   : > { %v2539_v43 = vpop.f32.mrf.mxu2  ;;  %v2395_v55 = vpop.f32.mrf.mxu0  ;;  %10767 = vst [vmem:[#allocation49_spill] sm:$0xff] %v7750_v5 }
  0xe3   : > { %v2540_v7 = vadd.f32 %v2539_v43, %v2467_v8  ;;  %v2612_v9 = vpop.f32.mrf.mxu3  ;;  %v2396_v28 = vadd.f32 %v2395_v55, %v7572_v41  ;;  %v2468_v6 = vpop.f32.mrf.mxu1  ;;  %v6245_v43 = vld [vmem:[%s10515_s1 + $0x5e8] sm:$0xf0]  ;;  %v770_v55 = vunpack.c.h.b16 %v244_v11  ;;  %10768 = vst [vmem:[#allocation50_spill] sm:$0xff] %v7752_v30 }
  0xe5   : > { %v7736_v35 = vadd.f32 %v2612_v9, %v2540_v7  ;;  %v2469_v8 = vadd.f32 %v2468_v6, %v2396_v28  ;;  %v769_v7 = vunpack.c.l.b16 %v244_v11  ;;  %v6248_v9 = vor.u32 %v6909_v40, %v6245_v43 }
  0xe6   : > { %v7757_v47 = vpack.c.b16 %v770_v55, %v770_v55  ;;  %v5227_v55 = vld [vmem:[%s7272_s26 + $0x10] sm:$0xf] }
  0xe7   : > { %3026 = vmatpush.bf16.msra.mxu1 %v6248_v9  ;;  %v7754_v34 = vpack.c.b16 %v769_v7, %v769_v7  ;;  %v6413_v7 = vld [vmem:[%s10515_s1 + $0x738] sm:$0xf0]  ;;  %v6999_v9 = vld [vmem:[%s10515_s1 + $0x8a4] sm:$0xf] }
  0xe8   : > { %10770 = vst [vmem:[#allocation52_spill] sm:$0xff] %v7757_v47 }
  0xe9   : > { %10769 = vst [vmem:[#allocation51_spill] sm:$0xff] %v7754_v34 }
  0xea   : > { %v2541_v22 = vpop.f32.mrf.mxu2  ;;  %v2398_v27 = vpop.f32.mrf.mxu0 }
  0xeb   : > { %v2542_v28 = vadd.f32 %v2541_v22, %v2469_v8  ;;  %v2614_v6 = vpop.f32.mrf.mxu3  ;;  %v2399_v3 = vadd.f32 %v2398_v27, %v7572_v41  ;;  %v2471_v2 = vpop.f32.mrf.mxu1  ;;  %v6605_v27 = vld [vmem:[%s10515_s1 + $0x8b8] sm:$0xf0] }
  0xed   : > { %v7759_v63 = vadd.f32 %v2614_v6, %v2542_v28  ;;  %v2472_v11 = vadd.f32 %v2471_v2, %v2399_v3  ;;  %2437 = vmatmul.bf16.gmra.mxu0 %v7750_v5  ;;  %v6656_v28 = vld [vmem:[%s7272_s26 + $0x24] sm:$0xf0]  ;;  %v6416_v6 = vor.u32 %v6951_v49, %v6413_v7 }
  0xee   : > { %2510 = vmatmul.bf16.gmra.mxu1 %v7752_v30 }
  0xef   : > { %2583 = vmatmul.bf16.gmra.mxu2 %v7754_v34 }
  0xf0   : > { %2656 = vmatmul.bf16.gmra.mxu3 %v7757_v47  ;;  %3100 = vmatpush.bf16.msra.mxu2 %v6416_v6 }
  0xf2   : > { %v2544_v22 = vpop.f32.mrf.mxu2  ;;  %v2400_v42 = vpop.f32.mrf.mxu0 }
  0xf3   : > { %v2545_v8 = vadd.f32 %v2544_v22, %v2472_v11  ;;  %v2617_v31 = vpop.f32.mrf.mxu3  ;;  %v2401_v40 = vadd.f32 %v2400_v42, %v7572_v41  ;;  %v2473_v43 = vpop.f32.mrf.mxu1  ;;  %v6653_v11 = vld [vmem:[%s7272_s26 + $0x14] sm:$0xf]  ;;  %v5229_v22 = vld [vmem:[%s7272_s26 + $0x28] sm:$0xf0]  ;;  %v7784_v42 = vor.u32 %v6656_v28, %v5227_v55  ;;  %v6903_v55 = vld [vmem:[%s10515_s1 + $0x5a4] sm:$0xf] }
  0xf4   : > { %v7786_v34 = vor.u32 %v6653_v11, %v5229_v22 }
  0xf5   : > { %v7766_v2 = vadd.f32 %v2617_v31, %v2545_v8  ;;  %v2474_v3 = vadd.f32 %v2473_v43, %v2401_v40  ;;  %v6608_v8 = vor.u32 %v6999_v9, %v6605_v27  ;;  %10771 = vst [vmem:[#allocation53_spill] sm:$0xff] %v7784_v42  ;;  %v6855_v9 = vld [vmem:[%s10515_s1 + $0x424] sm:$0xf] }
  0xf6   : > { %10772 = vst [vmem:[#allocation54_spill] sm:$0xff] %v7786_v34 }
  0xf7   : > { %3173 = vmatpush.bf16.msra.mxu3 %v6608_v8 }
  0xfa   : > { %v2546_v31 = vpop.f32.mrf.mxu2  ;;  %v2403_v47 = vpop.f32.mrf.mxu0 }
  0xfb   : > { %v2547_v40 = vadd.f32 %v2546_v31, %v2474_v3  ;;  %v2619_v43 = vpop.f32.mrf.mxu3  ;;  %v2404_v46 = vadd.f32 %v2403_v47, %v7572_v41  ;;  %v2476_v49 = vpop.f32.mrf.mxu1  ;;  %v6029_v3 = vld [vmem:[%s10515_s1 + $0x438] sm:$0xf0] }
  0xfc   : > { %v6221_v47 = vld [vmem:[%s10515_s1 + $0x5b8] sm:$0xf0] }
  0xfd   : > { %v7789_v7 = vadd.f32 %v2619_v43, %v2547_v40  ;;  %v2477_v19 = vadd.f32 %v2476_v49, %v2404_v46  ;;  %2669 = vmatmul.bf16.vlgmr.msrb.gmra.mxu0 %v7784_v42  ;;  %v6032_v46 = vor.u32 %v6855_v9, %v6029_v3  ;;  %v6224_v28 = vor.u32 %v6903_v55, %v6221_v47  ;;  %v5251_v49 = vld [vmem:[%s7272_s26 + $0x40] sm:$0xf]  ;;  %v6662_v9 = vld [vmem:[%s7272_s26 + $0x54] sm:$0xf0]  ;;  %v6659_v3 = vld [vmem:[%s7272_s26 + $0x44] sm:$0xf] }
  0xfe   : > { %2742 = vmatmul.bf16.vlgmr.msrb.gmra.mxu1 %v7786_v34  ;;  %v7814_v61 = vor.u32 %v6662_v9, %v5251_v49  ;;  %v5275_v9 = vld [vmem:[%s7272_s26 + $0x70] sm:$0xf] }
  0xff   : > { %2815 = vmatmul.bf16.vlgmr.msrb.gmra.mxu2 %v7298_v48  ;;  %2954 = vmatpush.bf16.msra.mxu0 %v6032_v46  ;;  %v5253_v48 = vld [vmem:[%s7272_s26 + $0x58] sm:$0xf0] }
 0x100   : > { %2888 = vmatmul.bf16.vlgmr.msrb.gmra.mxu3 %v7305_v53  ;;  %3027 = vmatpush.bf16.msra.mxu1 %v6224_v28  ;;  %10773 = vst [vmem:[#allocation55_spill] sm:$0xff] %v7814_v61  ;;  %v7816_v28 = vor.u32 %v6659_v3, %v5253_v48  ;;  %v6945_v3 = vld [vmem:[%s10515_s1 + $0x6f4] sm:$0xf] }
 0x102   : > { %v2549_v6 = vpop.f32.mrf.mxu2  ;;  %v2405_v22 = vpop.f32.mrf.mxu0  ;;  %10774 = vst [vmem:[#allocation56_spill] sm:$0xff] %v7816_v28 }
 0x103   : > { %v2550_v27 = vadd.f32 %v2549_v6, %v2477_v19  ;;  %v2622_v11 = vpop.f32.mrf.mxu3  ;;  %v2406_v8 = vadd.f32 %v2405_v22, %v7572_v41  ;;  %v2478_v31 = vpop.f32.mrf.mxu1 }
 0x105   : > { %v7808_v40 = vadd.f32 %v2622_v11, %v2550_v27  ;;  %v2479_v43 = vadd.f32 %v2478_v31, %v2406_v8 }
 0x10a   : > { %v2551_v18 = vpop.f32.mrf.mxu2  ;;  %v2408_v47 = vpop.f32.mrf.mxu0 }
 0x10b   : > { %v2552_v55 = vadd.f32 %v2551_v18, %v2479_v43  ;;  %v2624_v46 = vpop.f32.mrf.mxu3  ;;  %v2409_v19 = vadd.f32 %v2408_v47, %v7572_v41  ;;  %v2481_v6 = vpop.f32.mrf.mxu1 }
 0x10d   : > { %v7819_v22 = vadd.f32 %v2624_v46, %v2552_v55  ;;  %v2482_v27 = vadd.f32 %v2481_v6, %v2409_v19  ;;  %2674 = vmatmul.bf16.gmra.mxu0 %v7814_v61  ;;  %v6389_v55 = vld [vmem:[%s10515_s1 + $0x708] sm:$0xf0]  ;;  %v6993_v46 = vld [vmem:[%s10515_s1 + $0x874] sm:$0xf] }
 0x10e   : > { %2747 = vmatmul.bf16.gmra.mxu1 %v7816_v28  ;;  %v6392_v19 = vor.u32 %v6945_v3, %v6389_v55  ;;  %v6581_v6 = vld [vmem:[%s10515_s1 + $0x888] sm:$0xf0]  ;;  %v6665_v3 = vld [vmem:[%s7272_s26 + $0x74] sm:$0xf] }
 0x10f   : > { %2820 = vmatmul.bf16.gmra.mxu2 %v7341_v12  ;;  %v5277_v55 = vld [vmem:[%s7272_s26 + $0x88] sm:$0xf0] }
 0x110   : > { %2893 = vmatmul.bf16.gmra.mxu3 %v7343_v13  ;;  %3101 = vmatpush.bf16.msra.mxu2 %v6392_v19 }
 0x112   : > { %v2554_v18 = vpop.f32.mrf.mxu2  ;;  %v2410_v8 = vpop.f32.mrf.mxu0 }
 0x113   : > { %v2555_v11 = vadd.f32 %v2554_v18, %v2482_v27  ;;  %v2627_v48 = vpop.f32.mrf.mxu3  ;;  %v2411_v31 = vadd.f32 %v2410_v8, %v7572_v41  ;;  %v2483_v43 = vpop.f32.mrf.mxu1  ;;  %v6849_v27 = vld [vmem:[%s10515_s1 + $0x3f4] sm:$0xf]  ;;  %v6005_v18 = vld [vmem:[%s10515_s1 + $0x408] sm:$0xf0] }
 0x114   : > { %v6008_v8 = vor.u32 %v6849_v27, %v6005_v18  ;;  %v7858_v18 = vor.u32 %v6665_v3, %v5277_v55  ;;  %v5301_v3 = vld [vmem:[%s7272_s26 + $0xb8] sm:$0xf0] }
 0x115   : > { %v7826_v49 = vadd.f32 %v2627_v48, %v2555_v11  ;;  %v2484_v47 = vadd.f32 %v2483_v43, %v2411_v31  ;;  %v6668_v11 = vld [vmem:[%s7272_s26 + $0x84] sm:$0xf0]  ;;  %v6584_v48 = vor.u32 %v6993_v46, %v6581_v6  ;;  %v6897_v31 = vld [vmem:[%s10515_s1 + $0x574] sm:$0xf]  ;;  %v6197_v43 = vld [vmem:[%s10515_s1 + $0x588] sm:$0xf0] }
 0x116   : > { %v6200_v13 = vor.u32 %v6897_v31, %v6197_v43  ;;  %2955 = vmatpush.bf16.msra.mxu0 %v6008_v8  ;;  %v7856_v53 = vor.u32 %v6668_v11, %v5275_v9  ;;  %10776 = vst [vmem:[#allocation58_spill] sm:$0xff] %v7858_v18  ;;  %v6671_v43 = vld [vmem:[%s7272_s26 + $0xa4] sm:$0xf] }
 0x117   : > { %3174 = vmatpush.bf16.msra.mxu3 %v6584_v48 }
 0x118   : > { %10775 = vst [vmem:[#allocation57_spill] sm:$0xff] %v7856_v53  ;;  %3028 = vmatpush.bf16.msra.mxu1 %v6200_v13 }
 0x11a   : > { %v2556_v12 = vpop.f32.mrf.mxu2  ;;  %v2413_v27 = vpop.f32.mrf.mxu0 }
 0x11b   : > { %v2557_v46 = vadd.f32 %v2556_v12, %v2484_v47  ;;  %v2629_v6 = vpop.f32.mrf.mxu3  ;;  %v2414_v60 = vadd.f32 %v2413_v27, %v7572_v41  ;;  %v2486_v39 = vpop.f32.mrf.mxu1 }
 0x11d   : > { %v7861_v38 = vadd.f32 %v2629_v6, %v2557_v46  ;;  %v2487_v19 = vadd.f32 %v2486_v39, %v2414_v60  ;;  %2679 = vmatmul.bf16.gmra.mxu0 %v7856_v53  ;;  %v5299_v39 = vld [vmem:[%s7272_s26 + $0xa0] sm:$0xf]  ;;  %v6674_v60 = vld [vmem:[%s7272_s26 + $0xb4] sm:$0xf0] }
 0x11e   : > { %2752 = vmatmul.bf16.gmra.mxu1 %v7858_v18  ;;  %v7874_v46 = vor.u32 %v6674_v60, %v5299_v39  ;;  %v6843_v60 = vld [vmem:[%s10515_s1 + $0x3c4] sm:$0xf] }
 0x11f   : > { %2825 = vmatmul.bf16.gmra.mxu2 %v7385_v36  ;;  %v7876_v36 = vor.u32 %v6671_v43, %v5301_v3  ;;  %v5981_v43 = vld [vmem:[%s10515_s1 + $0x3d8] sm:$0xf0] }
 0x120   : > { %2898 = vmatmul.bf16.gmra.mxu3 %v7387_v37  ;;  %10777 = vst [vmem:[#allocation59_spill] sm:$0xff] %v7874_v46  ;;  %v5984_v3 = vor.u32 %v6843_v60, %v5981_v43  ;;  %v6677_v43 = vld [vmem:[%s7272_s26 + $0xd4] sm:$0xf] }
 0x121   : > { %10778 = vst [vmem:[#allocation60_spill] sm:$0xff] %v7876_v36 }
 0x122   : > { %v2559_v12 = vpop.f32.mrf.mxu2  ;;  %v2415_v47 = vpop.f32.mrf.mxu0  ;;  %2956 = vmatpush.bf16.msra.mxu0 %v5984_v3 }
 0x123   : > { %v2560_v13 = vadd.f32 %v2559_v12, %v2487_v19  ;;  %v2632_v9 = vpop.f32.mrf.mxu3  ;;  %v2416_v11 = vadd.f32 %v2415_v47, %v7572_v41  ;;  %v2488_v48 = vpop.f32.mrf.mxu1 }
 0x125   : > { %v7868_v8 = vadd.f32 %v2632_v9, %v2560_v13  ;;  %v2489_v31 = vadd.f32 %v2488_v48, %v2416_v11  ;;  %v6939_v9 = vld [vmem:[%s10515_s1 + $0x6c4] sm:$0xf]  ;;  %v6365_v11 = vld [vmem:[%s10515_s1 + $0x6d8] sm:$0xf0] }
 0x126   : > { %v6987_v48 = vld [vmem:[%s10515_s1 + $0x844] sm:$0xf] }
 0x12a   : > { %v2561_v55 = vpop.f32.mrf.mxu2  ;;  %v2418_v37 = vpop.f32.mrf.mxu0 }
 0x12b   : > { %v2562_v6 = vadd.f32 %v2561_v55, %v2489_v31  ;;  %v2634_v27 = vpop.f32.mrf.mxu3  ;;  %v2419_v19 = vadd.f32 %v2418_v37, %v7572_v41  ;;  %v2491_v12 = vpop.f32.mrf.mxu1  ;;  %v6368_v37 = vor.u32 %v6939_v9, %v6365_v11  ;;  %v6557_v31 = vld [vmem:[%s10515_s1 + $0x858] sm:$0xf0] }
 0x12c   : > { %v6560_v39 = vor.u32 %v6987_v48, %v6557_v31  ;;  %v6891_v48 = vld [vmem:[%s10515_s1 + $0x544] sm:$0xf] }
 0x12d   : > { %v7879_v47 = vadd.f32 %v2634_v27, %v2562_v6  ;;  %v2492_v13 = vadd.f32 %v2491_v12, %v2419_v19  ;;  %2684 = vmatmul.bf16.gmra.mxu0 %v7874_v46  ;;  %3102 = vmatpush.bf16.msra.mxu2 %v6368_v37  ;;  %v6173_v37 = vld [vmem:[%s10515_s1 + $0x558] sm:$0xf0] }
 0x12e   : > { %2757 = vmatmul.bf16.gmra.mxu1 %v7876_v36  ;;  %3175 = vmatpush.bf16.msra.mxu3 %v6560_v39  ;;  %v6176_v60 = vor.u32 %v6891_v48, %v6173_v37  ;;  %v5323_v39 = vld [vmem:[%s7272_s26 + $0xd0] sm:$0xf] }
 0x12f   : > { %2830 = vmatmul.bf16.gmra.mxu2 %v7417_v58 }
 0x130   : > { %2903 = vmatmul.bf16.gmra.mxu3 %v7419_v59  ;;  %3029 = vmatpush.bf16.msra.mxu1 %v6176_v60 }
 0x132   : > { %v2564_v55 = vpop.f32.mrf.mxu2  ;;  %v2420_v19 = vpop.f32.mrf.mxu0 }
 0x133   : > { %v2565_v6 = vadd.f32 %v2564_v55, %v2492_v13  ;;  %v2637_v27 = vpop.f32.mrf.mxu3  ;;  %v2421_v12 = vadd.f32 %v2420_v19, %v7572_v41  ;;  %v2493_v9 = vpop.f32.mrf.mxu1  ;;  %v6680_v13 = vld [vmem:[%s7272_s26 + $0xe4] sm:$0xf0]  ;;  %v5325_v55 = vld [vmem:[%s7272_s26 + $0xe8] sm:$0xf0] }
 0x134   : > { %v7916_v19 = vor.u32 %v6680_v13, %v5323_v39  ;;  %v7918_v58 = vor.u32 %v6677_v43, %v5325_v55  ;;  %v6933_v39 = vld [vmem:[%s10515_s1 + $0x694] sm:$0xf]  ;;  %v6341_v13 = vld [vmem:[%s10515_s1 + $0x6a8] sm:$0xf0]  ;;  %v5347_v55 = vld [vmem:[%s7272_s26 + $0x100] sm:$0xf] }
 0x135   : > { %v7904_v11 = vadd.f32 %v2637_v27, %v2565_v6  ;;  %v2494_v31 = vadd.f32 %v2493_v9, %v2421_v12  ;;  %v6981_v43 = vld [vmem:[%s10515_s1 + $0x814] sm:$0xf] }
 0x136   : > { %10780 = vst [vmem:[#allocation62_spill] sm:$0xff] %v7916_v19 }
 0x137   : > { %10779 = vst [vmem:[#allocation61_spill] sm:$0xff] %v7904_v11 }
 0x138   : > { %10781 = vst [vmem:[#allocation63_spill] sm:$0xff] %v7918_v58 }
 0x13a   : > { %v2566_v3 = vpop.f32.mrf.mxu2  ;;  %v2423_v59 = vpop.f32.mrf.mxu0 }
 0x13b   : > { %v2567_v6 = vadd.f32 %v2566_v3, %v2494_v31  ;;  %v2639_v27 = vpop.f32.mrf.mxu3  ;;  %v2424_v36 = vadd.f32 %v2423_v59, %v7572_v41  ;;  %v2496_v46 = vpop.f32.mrf.mxu1  ;;  %v6686_v3 = vld [vmem:[%s7272_s26 + $0x114] sm:$0xf0] }
 0x13d   : > { %v7921_v11 = vadd.f32 %v2639_v27, %v2567_v6  ;;  %v2497_v12 = vadd.f32 %v2496_v46, %v2424_v36  ;;  %2689 = vmatmul.bf16.gmra.mxu0 %v7916_v19  ;;  %v6344_v6 = vor.u32 %v6933_v39, %v6341_v13  ;;  %v6533_v27 = vld [vmem:[%s10515_s1 + $0x828] sm:$0xf0]  ;;  %v6837_v19 = vld [vmem:[%s10515_s1 + $0x394] sm:$0xf] }
 0x13e   : > { %2762 = vmatmul.bf16.gmra.mxu1 %v7918_v58 }
 0x13f   : > { %2835 = vmatmul.bf16.gmra.mxu2 %v7449_v16 }
 0x140   : > { %2908 = vmatmul.bf16.gmra.mxu3 %v7451_v17  ;;  %3103 = vmatpush.bf16.msra.mxu2 %v6344_v6 }
 0x142   : > { %v2569_v9 = vpop.f32.mrf.mxu2  ;;  %v2425_v59 = vpop.f32.mrf.mxu0 }
 0x143   : > { %v2570_v48 = vadd.f32 %v2569_v9, %v2497_v12  ;;  %v2642_v37 = vpop.f32.mrf.mxu3  ;;  %v2426_v31 = vadd.f32 %v2425_v59, %v7572_v41  ;;  %v2498_v60 = vpop.f32.mrf.mxu1  ;;  %v6683_v12 = vld [vmem:[%s7272_s26 + $0x104] sm:$0xf]  ;;  %v5349_v9 = vld [vmem:[%s7272_s26 + $0x118] sm:$0xf0]  ;;  %v7946_v59 = vor.u32 %v6686_v3, %v5347_v55  ;;  %v6885_v3 = vld [vmem:[%s10515_s1 + $0x514] sm:$0xf] }
 0x144   : > { %v7948_v16 = vor.u32 %v6683_v12, %v5349_v9 }
 0x145   : > { %v7928_v36 = vadd.f32 %v2642_v37, %v2570_v48  ;;  %v2499_v46 = vadd.f32 %v2498_v60, %v2426_v31  ;;  %v6536_v48 = vor.u32 %v6981_v43, %v6533_v27  ;;  %10782 = vst [vmem:[#allocation64_spill] sm:$0xff] %v7946_v59  ;;  %v5957_v43 = vld [vmem:[%s10515_s1 + $0x3a8] sm:$0xf0] }
 0x146   : > { %10783 = vst [vmem:[#allocation65_spill] sm:$0xff] %v7948_v16 }
 0x147   : > { %3176 = vmatpush.bf16.msra.mxu3 %v6536_v48 }
 0x14a   : > { %v2571_v37 = vpop.f32.mrf.mxu2  ;;  %v2428_v17 = vpop.f32.mrf.mxu0 }
 0x14b   : > { %v2572_v31 = vadd.f32 %v2571_v37, %v2499_v46  ;;  %v2644_v60 = vpop.f32.mrf.mxu3  ;;  %v2429_v58 = vadd.f32 %v2428_v17, %v7572_v41  ;;  %v2501_v39 = vpop.f32.mrf.mxu1  ;;  %v5960_v46 = vor.u32 %v6837_v19, %v5957_v43  ;;  %v6149_v17 = vld [vmem:[%s10515_s1 + $0x528] sm:$0xf0]  ;;  %v6689_v43 = vld [vmem:[%s7272_s26 + $0x134] sm:$0xf] }
 0x14d   : > { %v7951_v13 = vadd.f32 %v2644_v60, %v2572_v31  ;;  %v2502_v55 = vadd.f32 %v2501_v39, %v2429_v58  ;;  %2694 = vmatmul.bf16.gmra.mxu0 %v7946_v59  ;;  %v6152_v58 = vor.u32 %v6885_v3, %v6149_v17  ;;  %v5371_v60 = vld [vmem:[%s7272_s26 + $0x130] sm:$0xf]  ;;  %v6692_v39 = vld [vmem:[%s7272_s26 + $0x144] sm:$0xf0] }
 0x14e   : > { %2767 = vmatmul.bf16.gmra.mxu1 %v7948_v16  ;;  %2957 = vmatpush.bf16.msra.mxu0 %v5960_v46  ;;  %v7976_v3 = vor.u32 %v6692_v39, %v5371_v60 }
 0x14f   : > { %2840 = vmatmul.bf16.gmra.mxu2 %v7493_v44  ;;  %3030 = vmatpush.bf16.msra.mxu1 %v6152_v58  ;;  %v5373_v44 = vld [vmem:[%s7272_s26 + $0x148] sm:$0xf0] }
 0x150   : > { %2913 = vmatmul.bf16.gmra.mxu3 %v7495_v45  ;;  %10784 = vst [vmem:[#allocation66_spill] sm:$0xff] %v7976_v3  ;;  %v7978_v45 = vor.u32 %v6689_v43, %v5373_v44  ;;  %v6317_v44 = vld [vmem:[%s10515_s1 + $0x678] sm:$0xf0] }
 0x152   : > { %v2574_v19 = vpop.f32.mrf.mxu2  ;;  %v2430_v12 = vpop.f32.mrf.mxu0  ;;  %10785 = vst [vmem:[#allocation67_spill] sm:$0xff] %v7978_v45 }
 0x153   : > { %v2575_v6 = vadd.f32 %v2574_v19, %v2502_v55  ;;  %v2647_v27 = vpop.f32.mrf.mxu3  ;;  %v2431_v9 = vadd.f32 %v2430_v12, %v7572_v41  ;;  %v2503_v48 = vpop.f32.mrf.mxu1 }
 0x155   : > { %v7970_v37 = vadd.f32 %v2647_v27, %v2575_v6  ;;  %v2504_v31 = vadd.f32 %v2503_v48, %v2431_v9  ;;  %v6975_v27 = vld [vmem:[%s10515_s1 + $0x7e4] sm:$0xf]  ;;  %v6509_v48 = vld [vmem:[%s10515_s1 + $0x7f8] sm:$0xf0] }
 0x156   : > { %v6512_v60 = vor.u32 %v6975_v27, %v6509_v48  ;;  %v5395_v27 = vld [vmem:[%s7272_s26 + $0x160] sm:$0xf] }
 0x158   : > { %3177 = vmatpush.bf16.msra.mxu3 %v6512_v60  ;;  %v6695_v60 = vld [vmem:[%s7272_s26 + $0x164] sm:$0xf] }
 0x15a   : > { %v2576_v16 = vpop.f32.mrf.mxu2  ;;  %v2433_v58 = vpop.f32.mrf.mxu0 }
 0x15b   : > { %v2577_v17 = vadd.f32 %v2576_v16, %v2504_v31  ;;  %v2649_v46 = vpop.f32.mrf.mxu3  ;;  %v2434_v55 = vadd.f32 %v2433_v58, %v7572_v41  ;;  %v2506_v19 = vpop.f32.mrf.mxu1  ;;  %v6927_v16 = vld [vmem:[%s10515_s1 + $0x664] sm:$0xf] }
 0x15c   : > { %v6320_v9 = vor.u32 %v6927_v16, %v6317_v44  ;;  %v6831_v16 = vld [vmem:[%s10515_s1 + $0x364] sm:$0xf] }
 0x15d   : > { %v7981_v12 = vadd.f32 %v2649_v46, %v2577_v17  ;;  %v2507_v6 = vadd.f32 %v2506_v19, %v2434_v55  ;;  %2699 = vmatmul.bf16.gmra.mxu0 %v7976_v3  ;;  %v6879_v44 = vld [vmem:[%s10515_s1 + $0x4e4] sm:$0xf] }
 0x15e   : > { %2772 = vmatmul.bf16.gmra.mxu1 %v7978_v45  ;;  %3104 = vmatpush.bf16.msra.mxu2 %v6320_v9  ;;  %v6698_v9 = vld [vmem:[%s7272_s26 + $0x174] sm:$0xf0] }
 0x15f   : > { %2845 = vmatmul.bf16.gmra.mxu2 %v7513_v0 }
 0x160   : > { %2918 = vmatmul.bf16.gmra.mxu3 %v7515_v1 }
 0x162   : > { %v2579_v31 = vpop.f32.mrf.mxu2  ;;  %v2435_v17 = vpop.f32.mrf.mxu0 }
 0x163   : > { %v2580_v39 = vadd.f32 %v2579_v31, %v2507_v6  ;;  %v2652_v43 = vpop.f32.mrf.mxu3  ;;  %v2436_v46 = vadd.f32 %v2435_v17, %v7572_v41  ;;  %v2508_v58 = vpop.f32.mrf.mxu1  ;;  %v5933_v6 = vld [vmem:[%s10515_s1 + $0x378] sm:$0xf0] }
 0x164   : > { %v5936_v48 = vor.u32 %v6831_v16, %v5933_v6  ;;  %v6125_v31 = vld [vmem:[%s10515_s1 + $0x4f8] sm:$0xf0] }
 0x165   : > { %v8000_v55 = vadd.f32 %v2652_v43, %v2580_v39  ;;  %v2509_v19 = vadd.f32 %v2508_v58, %v2436_v46  ;;  %v5397_v39 = vld [vmem:[%s7272_s26 + $0x178] sm:$0xf0]  ;;  %v6128_v43 = vor.u32 %v6879_v44, %v6125_v31  ;;  %v8018_v46 = vor.u32 %v6698_v9, %v5395_v27 }
 0x166   : > { %2958 = vmatpush.bf16.msra.mxu0 %v5936_v48  ;;  %v8020_v45 = vor.u32 %v6695_v60, %v5397_v39  ;;  %v6704_v60 = vld [vmem:[%s7272_s26 + $0x1a4] sm:$0xf0]  ;;  %v5421_v39 = vld [vmem:[%s7272_s26 + $0x1a8] sm:$0xf0] }
 0x167   : > { %10786 = vst [vmem:[#allocation68_spill] sm:$0xff] %v8018_v46  ;;  %3031 = vmatpush.bf16.msra.mxu1 %v6128_v43 }
 0x168   : > { %10787 = vst [vmem:[#allocation69_spill] sm:$0xff] %v8020_v45 }
 0x16a   : > { %v2581_v17 = vpop.f32.mrf.mxu2  ;;  %v2438_v0 = vpop.f32.mrf.mxu0 }
 0x16b   : > { %v2582_v58 = vadd.f32 %v2581_v17, %v2509_v19  ;;  %v2654_v1 = vpop.f32.mrf.mxu3  ;;  %v2439_v16 = vadd.f32 %v2438_v0, %v7572_v41  ;;  %v2511_v6 = vpop.f32.mrf.mxu1  ;;  %v5419_v41 = vld [vmem:[%s7272_s26 + $0x190] sm:$0xf] }
 0x16c   : > { %v8035_v17 = vor.u32 %v6704_v60, %v5419_v41  ;;  %v5909_v41 = vld [vmem:[%s10515_s1 + $0x348] sm:$0xf0] }
 0x16d   : > { %v8023_v3 = vadd.f32 %v2654_v1, %v2582_v58  ;;  %v2512_v44 = vadd.f32 %v2511_v6, %v2439_v16  ;;  %2704 = vmatmul.bf16.gmra.mxu0 %v8018_v46  ;;  %v6701_v1 = vld [vmem:[%s7272_s26 + $0x194] sm:$0xf] }
 0x16e   : > { %2777 = vmatmul.bf16.gmra.mxu1 %v8020_v45  ;;  %10788 = vst [vmem:[#allocation70_spill] sm:$0xff] %v8035_v17  ;;  %v8037_v6 = vor.u32 %v6701_v1, %v5421_v39  ;;  %v6873_v39 = vld [vmem:[%s10515_s1 + $0x4b4] sm:$0xf] }
 0x16f   : > { %2850 = vmatmul.bf16.gmra.mxu2 %v7557_v32 }
 0x170   : > { %2923 = vmatmul.bf16.gmra.mxu3 %v7559_v33  ;;  %10789 = vst [vmem:[#allocation71_spill] sm:$0xff] %v8037_v6 }
 0x172   : > { %v2584_v19 = vpop.f32.mrf.mxu2  ;;  %v2440_v48 = vpop.f32.mrf.mxu0 }
 0x173   : > { %v2585_v27 = vadd.f32 %v2584_v19, %v2512_v44  ;;  %v2657_v9 = vpop.f32.mrf.mxu3  ;;  %v2513_v31 = vpop.f32.mrf.mxu1  ;;  %v6921_v44 = vld [vmem:[%s10515_s1 + $0x634] sm:$0xf]  ;;  %v6293_v19 = vld [vmem:[%s10515_s1 + $0x648] sm:$0xf0] }
 0x174   : > { %v6296_v48 = vor.u32 %v6921_v44, %v6293_v19  ;;  %v6825_v31 = vld [vmem:[%s10515_s1 + $0x334] sm:$0xf] }
 0x175   : > { %v8029_v0 = vadd.f32 %v2657_v9, %v2585_v27  ;;  %v6969_v27 = vld [vmem:[%s10515_s1 + $0x7b4] sm:$0xf]  ;;  %v5912_v1 = vor.u32 %v6825_v31, %v5909_v41 }
 0x176   : > { %3105 = vmatpush.bf16.msra.mxu2 %v6296_v48 }
 0x177   : > { %2959 = vmatpush.bf16.msra.mxu0 %v5912_v1 }
 0x17a   : > { %v2586_v43 = vpop.f32.mrf.mxu2  ;;  %v2670_v16 = vpop.f32.mrf.mxu0 }
 0x17b   : > { %v2659_v58 = vpop.f32.mrf.mxu3  ;;  %v2671_v33 = vadd.f32 %v2670_v16, %v7620_v50  ;;  %v2743_v32 = vpop.f32.mrf.mxu1  ;;  %v6485_v50 = vld [vmem:[%s10515_s1 + $0x7c8] sm:$0xf0] }
 0x17c   : > { %v6488_v60 = vor.u32 %v6969_v27, %v6485_v50  ;;  %v6101_v43 = vld [vmem:[%s10515_s1 + $0x4c8] sm:$0xf0] }
 0x17d   : > { %v8049_v9 = vadd.f32 %v2743_v32, %v2671_v33  ;;  %2709 = vmatmul.bf16.gmra.mxu0 %v8035_v17  ;;  %v7020_v32 = vld [vmem:[%s10516_s2] sm:$0x3f]  ;;  %v6104_v58 = vor.u32 %v6873_v39, %v6101_v43 }
 0x17e   : > { %2782 = vmatmul.bf16.gmra.mxu1 %v8037_v6  ;;  %v8066_v33 = vperm.slane %v7020_v32, 1  ;;  %3178 = vmatpush.bf16.msra.mxu3 %v6488_v60  ;;  %v5443_v32 = vld [vmem:[%s7272_s26 + $0x1c0] sm:$0xf] }
 0x17f   : > { %10790 = vst [vmem:[#allocation72_spill] sm:$0xff] %v8049_v9  ;;  %2855 = vmatmul.bf16.gmra.mxu2 %v7582_v62  ;;  %3032 = vmatpush.bf16.msra.mxu1 %v6104_v58  ;;  %v6707_v62 = vld [vmem:[%s7272_s26 + $0x1c4] sm:$0xf]  ;;  %v5445_v9 = vld [vmem:[%s7272_s26 + $0x1d8] sm:$0xf0] }
 0x180   : > { %2928 = vmatmul.bf16.gmra.mxu3 %v7584_v4  ;;  %v6710_v4 = vld [vmem:[%s7272_s26 + $0x1d4] sm:$0xf0]  ;;  %v8088_v6 = vor.u32 %v6707_v62, %v5445_v9 }
 0x181   : > { %v8085_v1 = vor.u32 %v6710_v4, %v5443_v32  ;;  %v5467_v32 = vld [vmem:[%s7272_s26 + $0x1f0] sm:$0xf] }
 0x182   : > { %v2816_v16 = vpop.f32.mrf.mxu2  ;;  %v2672_v27 = vpop.f32.mrf.mxu0  ;;  %10793 = vst [vmem:[#allocation75_spill] sm:$0xff] %v8088_v6 }
 0x183   : > { %v2817_v44 = vadd.f32 %v2816_v16, %v8066_v33  ;;  %v2889_v19 = vpop.f32.mrf.mxu3  ;;  %v2673_v48 = vadd.f32 %v2672_v27, %v7639_v29  ;;  %v2745_v50 = vpop.f32.mrf.mxu1  ;;  %10792 = vst [vmem:[#allocation74_spill] sm:$0xff] %v8085_v1 }
 0x185   : > { %v8077_v31 = vadd.f32 %v2889_v19, %v2817_v44  ;;  %v8079_v41 = vadd.f32 %v2745_v50, %v2673_v48 }
 0x187   : > { %10791 = vst [vmem:[#allocation73_spill] sm:$0xff] %v8079_v41 }
 0x18a   : > { %v2818_v60 = vpop.f32.mrf.mxu2  ;;  %v2675_v16 = vpop.f32.mrf.mxu0 }
 0x18b   : > { %v2819_v39 = vadd.f32 %v2818_v60, %v8066_v33  ;;  %v2891_v43 = vpop.f32.mrf.mxu3  ;;  %v2676_v29 = vadd.f32 %v2675_v16, %v7646_v52  ;;  %v2748_v58 = vpop.f32.mrf.mxu1  ;;  %v6716_v60 = vld [vmem:[%s7272_s26 + $0x204] sm:$0xf0]  ;;  %v6269_v16 = vld [vmem:[%s10515_s1 + $0x618] sm:$0xf0] }
 0x18d   : > { %v8091_v44 = vadd.f32 %v2891_v43, %v2819_v39  ;;  %v8093_v19 = vadd.f32 %v2748_v58, %v2676_v29  ;;  %2714 = vmatmul.bf16.gmra.mxu0 %v8085_v1  ;;  %v6915_v43 = vld [vmem:[%s10515_s1 + $0x604] sm:$0xf]  ;;  %v6461_v58 = vld [vmem:[%s10515_s1 + $0x798] sm:$0xf0] }
 0x18e   : > { %2787 = vmatmul.bf16.gmra.mxu1 %v8088_v6  ;;  %v6963_v29 = vld [vmem:[%s10515_s1 + $0x784] sm:$0xf] }
 0x18f   : > { %10794 = vst [vmem:[#allocation76_spill] sm:$0xff] %v8093_v19  ;;  %2860 = vmatmul.bf16.gmra.mxu2 %v7630_v20  ;;  %v8127_v20 = vor.u32 %v6716_v60, %v5467_v32  ;;  %v6077_v32 = vld [vmem:[%s10515_s1 + $0x498] sm:$0xf0] }
 0x190   : > { %2933 = vmatmul.bf16.gmra.mxu3 %v7632_v24 }
 0x191   : > { %10796 = vst [vmem:[#allocation78_spill] sm:$0xff] %v8127_v20 }
 0x192   : > { %v2821_v4 = vpop.f32.mrf.mxu2  ;;  %v2677_v52 = vpop.f32.mrf.mxu0 }
 0x193   : > { %v2822_v62 = vadd.f32 %v2821_v4, %v8066_v33  ;;  %v2894_v9 = vpop.f32.mrf.mxu3  ;;  %v2678_v27 = vadd.f32 %v2677_v52, %v7683_v21  ;;  %v2750_v48 = vpop.f32.mrf.mxu1  ;;  %v6272_v21 = vor.u32 %v6915_v43, %v6269_v16  ;;  %v6819_v4 = vld [vmem:[%s10515_s1 + $0x304] sm:$0xf]  ;;  %v5469_v52 = vld [vmem:[%s7272_s26 + $0x208] sm:$0xf0] }
 0x195   : > { %v8101_v50 = vadd.f32 %v2894_v9, %v2822_v62  ;;  %v8105_v39 = vadd.f32 %v2750_v48, %v2678_v27  ;;  %v5885_v62 = vld [vmem:[%s10515_s1 + $0x318] sm:$0xf0]  ;;  %v6713_v9 = vld [vmem:[%s7272_s26 + $0x1f4] sm:$0xf]  ;;  %v6464_v27 = vor.u32 %v6963_v29, %v6461_v58  ;;  %3106 = vmatpush.bf16.msra.mxu2 %v6272_v21  ;;  %v6867_v29 = vld [vmem:[%s10515_s1 + $0x484] sm:$0xf] }
 0x196   : > { %v5888_v48 = vor.u32 %v6819_v4, %v5885_v62  ;;  %v8130_v19 = vor.u32 %v6713_v9, %v5469_v52  ;;  %v5491_v9 = vld [vmem:[%s7272_s26 + $0x220] sm:$0xf]  ;;  %v6722_v52 = vld [vmem:[%s7272_s26 + $0x234] sm:$0xf0] }
 0x197   : > { %10795 = vst [vmem:[#allocation77_spill] sm:$0xff] %v8105_v39  ;;  %3179 = vmatpush.bf16.msra.mxu3 %v6464_v27  ;;  %v6719_v27 = vld [vmem:[%s7272_s26 + $0x224] sm:$0xf] }
 0x198   : > { %2960 = vmatpush.bf16.msra.mxu0 %v5888_v48  ;;  %10797 = vst [vmem:[#allocation79_spill] sm:$0xff] %v8130_v19  ;;  %v5493_v48 = vld [vmem:[%s7272_s26 + $0x238] sm:$0xf0] }
 0x19a   : > { %v2823_v24 = vpop.f32.mrf.mxu2  ;;  %v2680_v39 = vpop.f32.mrf.mxu0 }
 0x19b   : > { %v2824_v43 = vadd.f32 %v2823_v24, %v8066_v33  ;;  %v2896_v16 = vpop.f32.mrf.mxu3  ;;  %v2681_v6 = vadd.f32 %v2680_v39, %v7696_v26  ;;  %v2753_v1 = vpop.f32.mrf.mxu1  ;;  %v6080_v24 = vor.u32 %v6867_v29, %v6077_v32 }
 0x19d   : > { %v8133_v41 = vadd.f32 %v2896_v16, %v2824_v43  ;;  %v8141_v60 = vadd.f32 %v2753_v1, %v2681_v6  ;;  %2719 = vmatmul.bf16.gmra.mxu0 %v8127_v20  ;;  %3033 = vmatpush.bf16.msra.mxu1 %v6080_v24  ;;  %v8157_v16 = vor.u32 %v6722_v52, %v5491_v9  ;;  %v6913_v52 = vld [vmem:[%s10515_s1 + $0x5ec] sm:$0xf0] }
 0x19e   : > { %2792 = vmatmul.bf16.gmra.mxu1 %v8130_v19 }
 0x19f   : > { %2865 = vmatmul.bf16.gmra.mxu2 %v7674_v51 }
 0x1a0   : > { %2938 = vmatmul.bf16.gmra.mxu3 %v7676_v25 }
 0x1a2   : > { %v2826_v26 = vpop.f32.mrf.mxu2  ;;  %v2682_v58 = vpop.f32.mrf.mxu0 }
 0x1a3   : > { %v2827_v39 = vadd.f32 %v2826_v26, %v8066_v33  ;;  %v2899_v21 = vpop.f32.mrf.mxu3  ;;  %v2683_v6 = vadd.f32 %v2682_v58, %v7715_v23  ;;  %v2755_v1 = vpop.f32.mrf.mxu1  ;;  %v8160_v26 = vor.u32 %v6719_v27, %v5493_v48 }
 0x1a5   : > { %v8149_v4 = vadd.f32 %v2899_v21, %v2827_v39  ;;  %v8151_v62 = vadd.f32 %v2755_v1, %v2683_v6  ;;  %v6059_v6 = vld [vmem:[%s10515_s1 + $0x458] sm:$0xf] }
 0x1a6   : > { %v6251_v1 = vld [vmem:[%s10515_s1 + $0x5d8] sm:$0xf] }
 0x1a7   : > { %v6252_v48 = vor.u32 %v6913_v52, %v6251_v1 }
 0x1a9   : > { %3464 = vmatpush.bf16.msrb.mxu3 %v6252_v48 }
 0x1aa   : > { %v2828_v43 = vpop.f32.mrf.mxu2  ;;  %v2685_v24 = vpop.f32.mrf.mxu0 }
 0x1ab   : > { %v2829_v29 = vadd.f32 %v2828_v43, %v8066_v33  ;;  %v2901_v32 = vpop.f32.mrf.mxu3  ;;  %v2686_v23 = vadd.f32 %v2685_v24, %v7736_v35  ;;  %v2758_v58 = vpop.f32.mrf.mxu1  ;;  %v6865_v35 = vld [vmem:[%s10515_s1 + $0x46c] sm:$0xf0] }
 0x1ac   : > { %v6060_v9 = vor.u32 %v6865_v35, %v6059_v6  ;;  %v245_v24 = vld [vmem:[%s7272_s26 + $0x250] sm:$0x33]  ;;  %v5675_v6 = vld [vmem:[%s10515_s1 + $0x158] sm:$0xf] }
 0x1ad   : > { %v8163_v39 = vadd.f32 %v2901_v32, %v2829_v29  ;;  %v8165_v21 = vadd.f32 %v2758_v58, %v2686_v23  ;;  %2724 = vmatmul.bf16.gmra.mxu0 %v8157_v16  ;;  %v6769_v35 = vld [vmem:[%s10515_s1 + $0x16c] sm:$0xf0]  ;;  %v771_v52 = vunpack.c.l.b16 %v245_v24  ;;  %v772_v48 = vunpack.c.h.b16 %v245_v24 }
 0x1ae   : > { %2797 = vmatmul.bf16.gmra.mxu1 %v8160_v26  ;;  %3391 = vmatpush.bf16.msrb.mxu2 %v6060_v9  ;;  %v6817_v9 = vld [vmem:[%s10515_s1 + $0x2ec] sm:$0xf0] }
 0x1af   : > { %2870 = vmatmul.bf16.gmra.mxu2 %v7706_v56 }
 0x1b0   : > { %2943 = vmatmul.bf16.gmra.mxu3 %v7708_v10 }
 0x1b2   : > { %v2831_v27 = vpop.f32.mrf.mxu2  ;;  %v2687_v32 = vpop.f32.mrf.mxu0 }
 0x1b3   : > { %v2832_v43 = vadd.f32 %v2831_v27, %v8066_v33  ;;  %v2904_v29 = vpop.f32.mrf.mxu3  ;;  %v2688_v23 = vadd.f32 %v2687_v32, %v7759_v63  ;;  %v2760_v58 = vpop.f32.mrf.mxu1  ;;  %v5676_v27 = vor.u32 %v6769_v35, %v5675_v6  ;;  %v5867_v63 = vld [vmem:[%s10515_s1 + $0x2d8] sm:$0xf]  ;;  %v8202_v32 = vpack.c.b16 %v771_v52, %v771_v52 }
 0x1b4   : > { %v8205_v6 = vpack.c.b16 %v772_v48, %v772_v48  ;;  %v6035_v48 = vld [vmem:[%s10515_s1 + $0x428] sm:$0xf] }
 0x1b5   : > { %v8186_v10 = vadd.f32 %v2904_v29, %v2832_v43  ;;  %v8194_v1 = vadd.f32 %v2760_v58, %v2688_v23  ;;  %v5868_v43 = vor.u32 %v6817_v9, %v5867_v63  ;;  %3245 = vmatpush.bf16.msrb.mxu0 %v5676_v27 }
 0x1b7   : > { %10798 = vst [vmem:[#allocation80_spill] sm:$0xff] %v8194_v1  ;;  %3318 = vmatpush.bf16.msrb.mxu1 %v5868_v43  ;;  %v6859_v43 = vld [vmem:[%s10515_s1 + $0x43c] sm:$0xf0] }
 0x1ba   : > { %v2833_v29 = vpop.f32.mrf.mxu2  ;;  %v2690_v56 = vpop.f32.mrf.mxu0 }
 0x1bb   : > { %v2834_v23 = vadd.f32 %v2833_v29, %v8066_v33  ;;  %v2906_v58 = vpop.f32.mrf.mxu3  ;;  %v2691_v35 = vadd.f32 %v2690_v56, %v7766_v2  ;;  %v2763_v25 = vpop.f32.mrf.mxu1  ;;  %v6227_v29 = vld [vmem:[%s10515_s1 + $0x5a8] sm:$0xf] }
 0x1bd   : > { %v8208_v51 = vadd.f32 %v2906_v58, %v2834_v23  ;;  %v8210_v1 = vadd.f32 %v2763_v25, %v2691_v35  ;;  %2729 = vmatmul.bf16.gmra.mxu0 %v8202_v32  ;;  %v6036_v23 = vor.u32 %v6859_v43, %v6035_v48  ;;  %v5651_v48 = vld [vmem:[%s10515_s1 + $0x128] sm:$0xf]  ;;  %v6763_v43 = vld [vmem:[%s10515_s1 + $0x13c] sm:$0xf0] }
 0x1be   : > { %2802 = vmatmul.bf16.gmra.mxu1 %v8205_v6 }
 0x1bf   : > { %2875 = vmatmul.bf16.gmra.mxu2 %v7750_v5 }
 0x1c0   : > { %2948 = vmatmul.bf16.gmra.mxu3 %v7752_v30  ;;  %3392 = vmatpush.bf16.msrb.mxu2 %v6036_v23  ;;  %v6811_v23 = vld [vmem:[%s10515_s1 + $0x2bc] sm:$0xf0] }
 0x1c2   : > { %v2836_v24 = vpop.f32.mrf.mxu2  ;;  %v2692_v63 = vpop.f32.mrf.mxu0 }
 0x1c3   : > { %v2837_v52 = vadd.f32 %v2836_v24, %v8066_v33  ;;  %v2909_v27 = vpop.f32.mrf.mxu3  ;;  %v2693_v56 = vadd.f32 %v2692_v63, %v7789_v7  ;;  %v2765_v2 = vpop.f32.mrf.mxu1  ;;  %v6907_v7 = vld [vmem:[%s10515_s1 + $0x5bc] sm:$0xf0] }
 0x1c4   : > { %v6228_v58 = vor.u32 %v6907_v7, %v6227_v29  ;;  %v5843_v29 = vld [vmem:[%s10515_s1 + $0x2a8] sm:$0xf] }
 0x1c5   : > { %v8218_v9 = vadd.f32 %v2909_v27, %v2837_v52  ;;  %v8220_v25 = vadd.f32 %v2765_v2, %v2693_v56  ;;  %v5844_v7 = vor.u32 %v6811_v23, %v5843_v29 }
 0x1c6   : > { %3465 = vmatpush.bf16.msrb.mxu3 %v6228_v58 }
 0x1c7   : > { %3319 = vmatpush.bf16.msrb.mxu1 %v5844_v7 }
 0x1ca   : > { %v2838_v35 = vpop.f32.mrf.mxu2  ;;  %v2695_v27 = vpop.f32.mrf.mxu0 }
 0x1cb   : > { %v2839_v24 = vadd.f32 %v2838_v35, %v8066_v33  ;;  %v2911_v52 = vpop.f32.mrf.mxu3  ;;  %v2696_v63 = vadd.f32 %v2695_v27, %v7808_v40  ;;  %v2768_v56 = vpop.f32.mrf.mxu1  ;;  %v5652_v40 = vor.u32 %v6763_v43, %v5651_v48 }
 0x1cd   : > { %v8236_v2 = vadd.f32 %v2911_v52, %v2839_v24  ;;  %v8238_v30 = vadd.f32 %v2768_v56, %v2696_v63  ;;  %2961 = vmatmul.bf16.vlgmr.msra.gmra.mxu0 %v7307_v54 }
 0x1ce   : > { %3034 = vmatmul.bf16.vlgmr.msra.gmra.mxu1 %v7315_v57  ;;  %3246 = vmatpush.bf16.msrb.mxu0 %v5652_v40 }
 0x1cf   : > { %3107 = vmatmul.bf16.vlgmr.msra.gmra.mxu2 %v7784_v42 }
 0x1d0   : > { %3180 = vmatmul.bf16.vlgmr.msra.gmra.mxu3 %v7786_v34 }
 0x1d2   : > { %v2841_v58 = vpop.f32.mrf.mxu2  ;;  %v2697_v52 = vpop.f32.mrf.mxu0 }
 0x1d3   : > { %v2842_v35 = vadd.f32 %v2841_v58, %v8066_v33  ;;  %v2914_v24 = vpop.f32.mrf.mxu3  ;;  %v2698_v27 = vadd.f32 %v2697_v52, %v7819_v22  ;;  %v2770_v63 = vpop.f32.mrf.mxu1  ;;  %v6853_v52 = vld [vmem:[%s10515_s1 + $0x40c] sm:$0xf0] }
 0x1d5   : > { %v8258_v56 = vadd.f32 %v2914_v24, %v2842_v35  ;;  %v8260_v48 = vadd.f32 %v2770_v63, %v2698_v27  ;;  %v6203_v27 = vld [vmem:[%s10515_s1 + $0x578] sm:$0xf] }
 0x1da   : > { %v2843_v43 = vpop.f32.mrf.mxu2  ;;  %v2700_v34 = vpop.f32.mrf.mxu0 }
 0x1db   : > { %v2844_v42 = vadd.f32 %v2843_v43, %v8066_v33  ;;  %v2916_v5 = vpop.f32.mrf.mxu3  ;;  %v2701_v29 = vadd.f32 %v2700_v34, %v7826_v49  ;;  %v2773_v40 = vpop.f32.mrf.mxu1 }
 0x1dd   : > { %v8264_v23 = vadd.f32 %v2916_v5, %v2844_v42  ;;  %v8266_v7 = vadd.f32 %v2773_v40, %v2701_v29  ;;  %2966 = vmatmul.bf16.gmra.mxu0 %v7345_v14  ;;  %v6011_v42 = vld [vmem:[%s10515_s1 + $0x3f8] sm:$0xf]  ;;  %v6757_v40 = vld [vmem:[%s10515_s1 + $0x10c] sm:$0xf0] }
 0x1de   : > { %3039 = vmatmul.bf16.gmra.mxu1 %v7347_v15  ;;  %v6012_v43 = vor.u32 %v6853_v52, %v6011_v42  ;;  %v5627_v29 = vld [vmem:[%s10515_s1 + $0xf8] sm:$0xf] }
 0x1df   : > { %3112 = vmatmul.bf16.gmra.mxu2 %v7814_v61  ;;  %v10801_v61 = vld [vmem:[#allocation11_spill] sm:$0xff] }
 0x1e0   : > { %3185 = vmatmul.bf16.gmra.mxu3 %v7816_v28  ;;  %3393 = vmatpush.bf16.msrb.mxu2 %v6012_v43 }
 0x1e2   : > { %v2846_v22 = vpop.f32.mrf.mxu2  ;;  %v2702_v24 = vpop.f32.mrf.mxu0 }
 0x1e3   : > { %v2847_v58 = vadd.f32 %v2846_v22, %v8066_v33  ;;  %v2919_v35 = vpop.f32.mrf.mxu3  ;;  %v2703_v34 = vadd.f32 %v2702_v24, %v7861_v38  ;;  %v2775_v49 = vpop.f32.mrf.mxu1  ;;  %v6901_v38 = vld [vmem:[%s10515_s1 + $0x58c] sm:$0xf0] }
 0x1e4   : > { %v6204_v22 = vor.u32 %v6901_v38, %v6203_v27  ;;  %v6805_v24 = vld [vmem:[%s10515_s1 + $0x28c] sm:$0xf0] }
 0x1e5   : > { %v8274_v5 = vadd.f32 %v2919_v35, %v2847_v58  ;;  %v8285_v63 = vadd.f32 %v2775_v49, %v2703_v34  ;;  %v5628_v58 = vor.u32 %v6757_v40, %v5627_v29  ;;  %v5819_v35 = vld [vmem:[%s10515_s1 + $0x278] sm:$0xf] }
 0x1e6   : > { %v5820_v34 = vor.u32 %v6805_v24, %v5819_v35  ;;  %3466 = vmatpush.bf16.msrb.mxu3 %v6204_v22 }
 0x1e7   : > { %10799 = vst [vmem:[#allocation81_spill] sm:$0xff] %v8285_v63  ;;  %3247 = vmatpush.bf16.msrb.mxu0 %v5628_v58  ;;  %v10802_v63 = vld [vmem:[#allocation12_spill] sm:$0xff] }
 0x1e8   : > { %3320 = vmatpush.bf16.msrb.mxu1 %v5820_v34 }
 0x1ea   : > { %v2848_v49 = vpop.f32.mrf.mxu2  ;;  %v2705_v28 = vpop.f32.mrf.mxu0 }
 0x1eb   : > { %v2849_v42 = vadd.f32 %v2848_v49, %v8066_v33  ;;  %v2921_v52 = vpop.f32.mrf.mxu3  ;;  %v2706_v27 = vadd.f32 %v2705_v28, %v7868_v8  ;;  %v2778_v38 = vpop.f32.mrf.mxu1 }
 0x1ed   : > { %v8304_v29 = vadd.f32 %v2921_v52, %v2849_v42  ;;  %v8306_v40 = vadd.f32 %v2778_v38, %v2706_v27  ;;  %2971 = vmatmul.bf16.gmra.mxu0 %v10801_v61  ;;  %v10804_v38 = vld [vmem:[#allocation61_spill] sm:$0xff] }
 0x1ee   : > { %3044 = vmatmul.bf16.gmra.mxu1 %v10802_v63  ;;  %v10806_v63 = vld [vmem:[#allocation15_spill] sm:$0xff] }
 0x1ef   : > { %10800 = vst [vmem:[#allocation82_spill] sm:$0xff] %v8306_v40  ;;  %3117 = vmatmul.bf16.gmra.mxu2 %v7856_v53 }
 0x1f0   : > { %3190 = vmatmul.bf16.gmra.mxu3 %v7858_v18 }
 0x1f2   : > { %v2851_v43 = vpop.f32.mrf.mxu2  ;;  %v2707_v35 = vpop.f32.mrf.mxu0 }
 0x1f3   : > { %v2852_v22 = vadd.f32 %v2851_v43, %v8066_v33  ;;  %v2924_v58 = vpop.f32.mrf.mxu3  ;;  %v2708_v28 = vadd.f32 %v2707_v35, %v7879_v47  ;;  %v2780_v8 = vpop.f32.mrf.mxu1  ;;  %v5987_v47 = vld [vmem:[%s10515_s1 + $0x3c8] sm:$0xf]  ;;  %v10807_v35 = vld [vmem:[#allocation16_spill] sm:$0xff] }
 0x1f5   : > { %v8314_v24 = vadd.f32 %v2924_v58, %v2852_v22  ;;  %v8316_v34 = vadd.f32 %v2780_v8, %v2708_v28  ;;  %v6847_v22 = vld [vmem:[%s10515_s1 + $0x3dc] sm:$0xf0]  ;;  %v6179_v58 = vld [vmem:[%s10515_s1 + $0x548] sm:$0xf]  ;;  %v10809_v8 = vld [vmem:[#allocation60_spill] sm:$0xff] }
 0x1f6   : > { %v10808_v28 = vld [vmem:[#allocation59_spill] sm:$0xff] }
 0x1f7   : > { %10803 = vst [vmem:[#allocation83_spill] sm:$0xff] %v8316_v34  ;;  %v10812_v34 = vld [vmem:[#allocation20_spill] sm:$0xff] }
 0x1fa   : > { %v2853_v49 = vpop.f32.mrf.mxu2  ;;  %v2710_v27 = vpop.f32.mrf.mxu0 }
 0x1fb   : > { %v2854_v42 = vadd.f32 %v2853_v49, %v8066_v33  ;;  %v2926_v52 = vpop.f32.mrf.mxu3  ;;  %v2711_v53 = vadd.f32 %v2710_v27, %v10804_v38  ;;  %v2783_v18 = vpop.f32.mrf.mxu1 }
 0x1fd   : > { %v8320_v40 = vadd.f32 %v2926_v52, %v2854_v42  ;;  %v8322_v43 = vadd.f32 %v2783_v18, %v2711_v53  ;;  %2976 = vmatmul.bf16.gmra.mxu0 %v10806_v63  ;;  %v5988_v53 = vor.u32 %v6847_v22, %v5987_v47  ;;  %v6895_v18 = vld [vmem:[%s10515_s1 + $0x55c] sm:$0xf0]  ;;  %v5603_v42 = vld [vmem:[%s10515_s1 + $0xc8] sm:$0xf] }
 0x1fe   : > { %3049 = vmatmul.bf16.gmra.mxu1 %v10807_v35  ;;  %v6180_v49 = vor.u32 %v6895_v18, %v6179_v58  ;;  %v6751_v52 = vld [vmem:[%s10515_s1 + $0xdc] sm:$0xf0]  ;;  %v10811_v63 = vld [vmem:[#allocation19_spill] sm:$0xff] }
 0x1ff   : > { %10805 = vst [vmem:[#allocation61_spill] sm:$0xff] %v8322_v43  ;;  %3122 = vmatmul.bf16.gmra.mxu2 %v10808_v28  ;;  %v5604_v27 = vor.u32 %v6751_v52, %v5603_v42  ;;  %v5795_v43 = vld [vmem:[%s10515_s1 + $0x248] sm:$0xf] }
 0x200   : > { %3195 = vmatmul.bf16.gmra.mxu3 %v10809_v8  ;;  %3394 = vmatpush.bf16.msrb.mxu2 %v5988_v53  ;;  %v6799_v53 = vld [vmem:[%s10515_s1 + $0x25c] sm:$0xf0] }
 0x201   : > { %3467 = vmatpush.bf16.msrb.mxu3 %v6180_v49  ;;  %3248 = vmatpush.bf16.msrb.mxu0 %v5604_v27  ;;  %v5796_v49 = vor.u32 %v6799_v53, %v5795_v43  ;;  %v10814_v43 = vld [vmem:[#allocation63_spill] sm:$0xff] }
 0x202   : > { %v2856_v38 = vpop.f32.mrf.mxu2  ;;  %v2712_v28 = vpop.f32.mrf.mxu0 }
 0x203   : > { %v2857_v47 = vadd.f32 %v2856_v38, %v8066_v33  ;;  %v2929_v22 = vpop.f32.mrf.mxu3  ;;  %v2713_v8 = vadd.f32 %v2712_v28, %v7921_v11  ;;  %v2785_v58 = vpop.f32.mrf.mxu1  ;;  %3321 = vmatpush.bf16.msrb.mxu1 %v5796_v49 }
 0x205   : > { %v8348_v18 = vadd.f32 %v2929_v22, %v2857_v47  ;;  %v8356_v42 = vadd.f32 %v2785_v58, %v2713_v8  ;;  %v10813_v8 = vld [vmem:[#allocation62_spill] sm:$0xff] }
 0x20a   : > { %v2858_v52 = vpop.f32.mrf.mxu2  ;;  %v2715_v11 = vpop.f32.mrf.mxu0 }
 0x20b   : > { %v2859_v27 = vadd.f32 %v2858_v52, %v8066_v33  ;;  %v2931_v38 = vpop.f32.mrf.mxu3  ;;  %v2716_v28 = vadd.f32 %v2715_v11, %v7928_v36  ;;  %v2788_v47 = vpop.f32.mrf.mxu1 }
 0x20d   : > { %v8360_v22 = vadd.f32 %v2931_v38, %v2859_v27  ;;  %v8362_v35 = vadd.f32 %v2788_v47, %v2716_v28  ;;  %2981 = vmatmul.bf16.gmra.mxu0 %v10811_v63  ;;  %v5963_v28 = vld [vmem:[%s10515_s1 + $0x398] sm:$0xf]  ;;  %v6841_v47 = vld [vmem:[%s10515_s1 + $0x3ac] sm:$0xf0] }
 0x20e   : > { %3054 = vmatmul.bf16.gmra.mxu1 %v10812_v34  ;;  %v10822_v34 = vld [vmem:[#allocation27_spill] sm:$0xff] }
 0x20f   : > { %10810 = vst [vmem:[#allocation84_spill] sm:$0xff] %v8362_v35  ;;  %3127 = vmatmul.bf16.gmra.mxu2 %v10813_v8 }
 0x210   : > { %3200 = vmatmul.bf16.gmra.mxu3 %v10814_v43  ;;  %v5964_v43 = vor.u32 %v6841_v47, %v5963_v28  ;;  %v5579_v28 = vld [vmem:[%s10515_s1 + $0x98] sm:$0xf]  ;;  %v6745_v47 = vld [vmem:[%s10515_s1 + $0xac] sm:$0xf0] }
 0x212   : > { %v2861_v58 = vpop.f32.mrf.mxu2  ;;  %v2717_v52 = vpop.f32.mrf.mxu0  ;;  %3395 = vmatpush.bf16.msrb.mxu2 %v5964_v43 }
 0x213   : > { %v2862_v53 = vadd.f32 %v2861_v58, %v8066_v33  ;;  %v2934_v49 = vpop.f32.mrf.mxu3  ;;  %v2718_v36 = vadd.f32 %v2717_v52, %v7951_v13  ;;  %v2790_v11 = vpop.f32.mrf.mxu1  ;;  %v6155_v58 = vld [vmem:[%s10515_s1 + $0x518] sm:$0xf]  ;;  %v6889_v13 = vld [vmem:[%s10515_s1 + $0x52c] sm:$0xf0] }
 0x215   : > { %v8370_v27 = vadd.f32 %v2934_v49, %v2862_v53  ;;  %v8372_v38 = vadd.f32 %v2790_v11, %v2718_v36  ;;  %v6156_v53 = vor.u32 %v6889_v13, %v6155_v58  ;;  %v10818_v58 = vld [vmem:[#allocation23_spill] sm:$0xff]  ;;  %v5580_v13 = vor.u32 %v6745_v47, %v5579_v28 }
 0x217   : > { %10815 = vst [vmem:[#allocation85_spill] sm:$0xff] %v8372_v38  ;;  %3468 = vmatpush.bf16.msrb.mxu3 %v6156_v53  ;;  %v6793_v53 = vld [vmem:[%s10515_s1 + $0x22c] sm:$0xf0]  ;;  %3249 = vmatpush.bf16.msrb.mxu0 %v5580_v13 }
 0x21a   : > { %v2863_v49 = vpop.f32.mrf.mxu2  ;;  %v2720_v11 = vpop.f32.mrf.mxu0 }
 0x21b   : > { %v2864_v52 = vadd.f32 %v2863_v49, %v8066_v33  ;;  %v2936_v36 = vpop.f32.mrf.mxu3  ;;  %v2721_v8 = vadd.f32 %v2720_v11, %v7970_v37  ;;  %v2793_v38 = vpop.f32.mrf.mxu1  ;;  %v5771_v37 = vld [vmem:[%s10515_s1 + $0x218] sm:$0xf]  ;;  %v10819_v49 = vld [vmem:[#allocation24_spill] sm:$0xff] }
 0x21d   : > { %v8388_v35 = vadd.f32 %v2936_v36, %v2864_v52  ;;  %v8396_v43 = vadd.f32 %v2793_v38, %v2721_v8  ;;  %2986 = vmatmul.bf16.gmra.mxu0 %v10818_v58  ;;  %v5772_v52 = vor.u32 %v6793_v53, %v5771_v37  ;;  %v10820_v36 = vld [vmem:[#allocation65_spill] sm:$0xff] }
 0x21e   : > { %3059 = vmatmul.bf16.gmra.mxu1 %v10819_v49 }
 0x21f   : > { %10816 = vst [vmem:[#allocation86_spill] sm:$0xff] %v8388_v35  ;;  %3132 = vmatmul.bf16.gmra.mxu2 %v7946_v59  ;;  %3322 = vmatpush.bf16.msrb.mxu1 %v5772_v52 }
 0x220   : > { %10817 = vst [vmem:[#allocation87_spill] sm:$0xff] %v8396_v43  ;;  %3205 = vmatmul.bf16.gmra.mxu3 %v10820_v36 }
 0x222   : > { %v2866_v8 = vpop.f32.mrf.mxu2  ;;  %v2722_v28 = vpop.f32.mrf.mxu0 }
 0x223   : > { %v2867_v38 = vadd.f32 %v2866_v8, %v8066_v33  ;;  %v2939_v11 = vpop.f32.mrf.mxu3  ;;  %v2723_v47 = vadd.f32 %v2722_v28, %v7981_v12  ;;  %v2795_v43 = vpop.f32.mrf.mxu1  ;;  %v10823_v12 = vld [vmem:[#allocation28_spill] sm:$0xff]  ;;  %v6883_v28 = vld [vmem:[%s10515_s1 + $0x4fc] sm:$0xf0] }
 0x225   : > { %v8410_v58 = vadd.f32 %v2939_v11, %v2867_v38  ;;  %v8412_v35 = vadd.f32 %v2795_v43, %v2723_v47  ;;  %v10824_v38 = vld [vmem:[#allocation66_spill] sm:$0xff]  ;;  %v10825_v43 = vld [vmem:[#allocation67_spill] sm:$0xff] }
 0x22a   : > { %v2868_v49 = vpop.f32.mrf.mxu2  ;;  %v2725_v53 = vpop.f32.mrf.mxu0 }
 0x22b   : > { %v2869_v59 = vadd.f32 %v2868_v49, %v8066_v33  ;;  %v2941_v37 = vpop.f32.mrf.mxu3  ;;  %v2726_v13 = vadd.f32 %v2725_v53, %v8000_v55  ;;  %v2798_v52 = vpop.f32.mrf.mxu1  ;;  %v5939_v49 = vld [vmem:[%s10515_s1 + $0x368] sm:$0xf]  ;;  %v6835_v55 = vld [vmem:[%s10515_s1 + $0x37c] sm:$0xf0] }
 0x22c   : > { %v5940_v11 = vor.u32 %v6835_v55, %v5939_v49  ;;  %v5555_v49 = vld [vmem:[%s10515_s1 + $0x68] sm:$0xf]  ;;  %v6739_v55 = vld [vmem:[%s10515_s1 + $0x7c] sm:$0xf0] }
 0x22d   : > { %v8416_v36 = vadd.f32 %v2941_v37, %v2869_v59  ;;  %v8418_v8 = vadd.f32 %v2798_v52, %v2726_v13  ;;  %2991 = vmatmul.bf16.gmra.mxu0 %v10822_v34  ;;  %v6131_v59 = vld [vmem:[%s10515_s1 + $0x4e8] sm:$0xf] }
 0x22e   : > { %3064 = vmatmul.bf16.gmra.mxu1 %v10823_v12  ;;  %v6132_v37 = vor.u32 %v6883_v28, %v6131_v59  ;;  %3396 = vmatpush.bf16.msrb.mxu2 %v5940_v11  ;;  %v5747_v59 = vld [vmem:[%s10515_s1 + $0x1e8] sm:$0xf]  ;;  %v6787_v28 = vld [vmem:[%s10515_s1 + $0x1fc] sm:$0xf0] }
 0x22f   : > { %10821 = vst [vmem:[#allocation88_spill] sm:$0xff] %v8418_v8  ;;  %3137 = vmatmul.bf16.gmra.mxu2 %v10824_v38  ;;  %v10828_v34 = vld [vmem:[#allocation31_spill] sm:$0xff] }
 0x230   : > { %3210 = vmatmul.bf16.gmra.mxu3 %v10825_v43 }
 0x231   : > { %3469 = vmatpush.bf16.msrb.mxu3 %v6132_v37  ;;  %v5748_v37 = vor.u32 %v6787_v28, %v5747_v59 }
 0x232   : > { %v2871_v47 = vpop.f32.mrf.mxu2  ;;  %v2727_v52 = vpop.f32.mrf.mxu0 }
 0x233   : > { %v2872_v53 = vadd.f32 %v2871_v47, %v8066_v33  ;;  %v2944_v13 = vpop.f32.mrf.mxu3  ;;  %v2728_v43 = vadd.f32 %v2727_v52, %v8023_v3  ;;  %v2800_v38 = vpop.f32.mrf.mxu1  ;;  %v5556_v3 = vor.u32 %v6739_v55, %v5555_v49  ;;  %3323 = vmatpush.bf16.msrb.mxu1 %v5748_v37  ;;  %v10829_v49 = vld [vmem:[#allocation32_spill] sm:$0xff] }
 0x235   : > { %v8438_v8 = vadd.f32 %v2944_v13, %v2872_v53  ;;  %v8440_v12 = vadd.f32 %v2800_v38, %v2728_v43  ;;  %3250 = vmatpush.bf16.msrb.mxu0 %v5556_v3 }
 0x237   : > { %10826 = vst [vmem:[#allocation89_spill] sm:$0xff] %v8440_v12 }
 0x23a   : > { %v2873_v11 = vpop.f32.mrf.mxu2  ;;  %v2730_v47 = vpop.f32.mrf.mxu0 }
 0x23b   : > { %v2874_v38 = vadd.f32 %v2873_v11, %v8066_v33  ;;  %v2946_v43 = vpop.f32.mrf.mxu3  ;;  %v2731_v53 = vadd.f32 %v2730_v47, %v8029_v0  ;;  %v2803_v13 = vpop.f32.mrf.mxu1 }
 0x23d   : > { %v8456_v52 = vadd.f32 %v2946_v43, %v2874_v38  ;;  %v8458_v12 = vadd.f32 %v2803_v13, %v2731_v53  ;;  %2996 = vmatmul.bf16.gmra.mxu0 %v10828_v34  ;;  %v10830_v13 = vld [vmem:[#allocation35_spill] sm:$0xff] }
 0x23e   : > { %3069 = vmatmul.bf16.gmra.mxu1 %v10829_v49 }
 0x23f   : > { %10827 = vst [vmem:[#allocation90_spill] sm:$0xff] %v8458_v12  ;;  %3142 = vmatmul.bf16.gmra.mxu2 %v8018_v46  ;;  %v10831_v12 = vld [vmem:[#allocation36_spill] sm:$0xff] }
 0x240   : > { %3215 = vmatmul.bf16.gmra.mxu3 %v8020_v45  ;;  %v10832_v45 = vld [vmem:[#allocation71_spill] sm:$0xff] }
 0x242   : > { %v2876_v55 = vpop.f32.mrf.mxu2  ;;  %v2732_v0 = vpop.f32.mrf.mxu0 }
 0x243   : > { %v2877_v59 = vadd.f32 %v2876_v55, %v8066_v33  ;;  %v2949_v11 = vpop.f32.mrf.mxu3  ;;  %v2805_v28 = vpop.f32.mrf.mxu1  ;;  %v5915_v55 = vld [vmem:[%s10515_s1 + $0x338] sm:$0xf] }
 0x244   : > { %v6877_v28 = vld [vmem:[%s10515_s1 + $0x4cc] sm:$0xf0] }
 0x245   : > { %v8465_v3 = vadd.f32 %v2949_v11, %v2877_v59  ;;  %v6829_v59 = vld [vmem:[%s10515_s1 + $0x34c] sm:$0xf0] }
 0x246   : > { %v5916_v0 = vor.u32 %v6829_v59, %v5915_v55  ;;  %v5723_v55 = vld [vmem:[%s10515_s1 + $0x1b8] sm:$0xf]  ;;  %v6781_v59 = vld [vmem:[%s10515_s1 + $0x1cc] sm:$0xf0] }
 0x248   : > { %3397 = vmatpush.bf16.msrb.mxu2 %v5916_v0 }
 0x24a   : > { %v2878_v38 = vpop.f32.mrf.mxu2  ;;  %v2962_v47 = vpop.f32.mrf.mxu0 }
 0x24b   : > { %v2951_v43 = vpop.f32.mrf.mxu3  ;;  %v3035_v37 = vpop.f32.mrf.mxu1  ;;  %v2963_v53 = vadd.f32 %v2962_v47, %v8077_v31  ;;  %v6107_v31 = vld [vmem:[%s10515_s1 + $0x4b8] sm:$0xf] }
 0x24c   : > { %v5531_v38 = vld [vmem:[%s10515_s1 + $0x38] sm:$0xf]  ;;  %v6733_v43 = vld [vmem:[%s10515_s1 + $0x4c] sm:$0xf0] }
 0x24d   : > { %3001 = vmatmul.bf16.gmra.mxu0 %v10830_v13  ;;  %v3036_v33 = vadd.f32 %v3035_v37, %v2963_v53 }
 0x24e   : > { %3074 = vmatmul.bf16.gmra.mxu1 %v10831_v12  ;;  %v5724_v12 = vor.u32 %v6781_v59, %v5723_v55  ;;  %v10836_v55 = vld [vmem:[#allocation40_spill] sm:$0xff] }
 0x24f   : > { %3147 = vmatmul.bf16.gmra.mxu2 %v8035_v17  ;;  %v5532_v17 = vor.u32 %v6733_v43, %v5531_v38 }
 0x250   : > { %3220 = vmatmul.bf16.gmra.mxu3 %v10832_v45  ;;  %v6108_v45 = vor.u32 %v6877_v28, %v6107_v31  ;;  %3324 = vmatpush.bf16.msrb.mxu1 %v5724_v12  ;;  %v10837_v12 = vld [vmem:[#allocation74_spill] sm:$0xff] }
 0x251   : > { %3251 = vmatpush.bf16.msrb.mxu0 %v5532_v17 }
 0x252   : > { %v3108_v11 = vpop.f32.mrf.mxu2  ;;  %v2964_v53 = vpop.f32.mrf.mxu0  ;;  %3470 = vmatpush.bf16.msrb.mxu3 %v6108_v45 }
 0x253   : > { %v3109_v47 = vadd.f32 %v3108_v11, %v3036_v33  ;;  %v3181_v37 = vpop.f32.mrf.mxu3  ;;  %v3037_v46 = vpop.f32.mrf.mxu1  ;;  %v2965_v49 = vadd.f32 %v2964_v53, %v8091_v44  ;;  %v10833_v33 = vld [vmem:[#allocation72_spill] sm:$0xff] }
 0x255   : > { %v3182_v13 = vadd.f32 %v3181_v37, %v3109_v47  ;;  %v3038_v11 = vadd.f32 %v3037_v46, %v2965_v49  ;;  %v10834_v47 = vld [vmem:[#allocation39_spill] sm:$0xff]  ;;  %v10835_v37 = vld [vmem:[#allocation73_spill] sm:$0xff] }
 0x257   : > { %v4997_v31 = vpack.c.bf16 %v3182_v13, %v10833_v33  ;;  %v10838_v13 = vld [vmem:[#allocation75_spill] sm:$0xff] }
 0x259   : > { %5072 = vst [vmem:[%s8502_s21] sm:$0xff] %v4997_v31 }
 0x25a   : > { %v3110_v0 = vpop.f32.mrf.mxu2  ;;  %v2967_v43 = vpop.f32.mrf.mxu0 }
 0x25b   : > { %v3111_v28 = vadd.f32 %v3110_v0, %v3038_v11  ;;  %v3183_v38 = vpop.f32.mrf.mxu3  ;;  %v3040_v44 = vpop.f32.mrf.mxu1  ;;  %v2968_v17 = vadd.f32 %v2967_v43, %v8101_v50 }
 0x25d   : > { %v3184_v45 = vadd.f32 %v3183_v38, %v3111_v28  ;;  %3006 = vmatmul.bf16.gmra.mxu0 %v10834_v47  ;;  %v3041_v46 = vadd.f32 %v3040_v44, %v2968_v17  ;;  %v10839_v28 = vld [vmem:[#allocation76_spill] sm:$0xff]  ;;  %v6823_v44 = vld [vmem:[%s10515_s1 + $0x31c] sm:$0xf0] }
 0x25e   : > { %3079 = vmatmul.bf16.gmra.mxu1 %v10836_v55 }
 0x25f   : > { %v5000_v53 = vpack.c.bf16 %v3184_v45, %v10835_v37  ;;  %3152 = vmatmul.bf16.gmra.mxu2 %v10837_v12  ;;  %v5891_v45 = vld [vmem:[%s10515_s1 + $0x308] sm:$0xf] }
 0x260   : > { %3225 = vmatmul.bf16.gmra.mxu3 %v10838_v13  ;;  %v5892_v37 = vor.u32 %v6823_v44, %v5891_v45  ;;  %v10840_v45 = vld [vmem:[#allocation43_spill] sm:$0xff]  ;;  %v10841_v44 = vld [vmem:[#allocation77_spill] sm:$0xff] }
 0x261   : > { %5075 = vst [vmem:[%s8502_s21 + $0x18] sm:$0xff] %v5000_v53  ;;  %v6083_v53 = vld [vmem:[%s10515_s1 + $0x488] sm:$0xf] }
 0x262   : > { %v3113_v49 = vpop.f32.mrf.mxu2  ;;  %v2969_v31 = vpop.f32.mrf.mxu0  ;;  %3398 = vmatpush.bf16.msrb.mxu2 %v5892_v37  ;;  %v5699_v37 = vld [vmem:[%s10515_s1 + $0x188] sm:$0xf] }
 0x263   : > { %v3114_v59 = vadd.f32 %v3113_v49, %v3041_v46  ;;  %v3186_v33 = vpop.f32.mrf.mxu3  ;;  %v3042_v11 = vpop.f32.mrf.mxu1  ;;  %v2970_v50 = vadd.f32 %v2969_v31, %v8133_v41  ;;  %v6871_v41 = vld [vmem:[%s10515_s1 + $0x49c] sm:$0xf0]  ;;  %v5507_v46 = vld [vmem:[%s10515_s1 + $0x8] sm:$0xf] }
 0x264   : > { %v6084_v31 = vor.u32 %v6871_v41, %v6083_v53 }
 0x265   : > { %v3187_v0 = vadd.f32 %v3186_v33, %v3114_v59  ;;  %v3043_v43 = vadd.f32 %v3042_v11, %v2970_v50  ;;  %v6727_v11 = vld [vmem:[%s10515_s1 + $0x1c] sm:$0xf0] }
 0x266   : > { %v5508_v50 = vor.u32 %v6727_v11, %v5507_v46  ;;  %3471 = vmatpush.bf16.msrb.mxu3 %v6084_v31 }
 0x267   : > { %v5003_v38 = vpack.c.bf16 %v3187_v0, %v10839_v28 }
 0x268   : > { %3252 = vmatpush.bf16.msrb.mxu0 %v5508_v50 }
 0x269   : > { %5078 = vst [vmem:[%s8502_s21 + $0x30] sm:$0xff] %v5003_v38 }
 0x26a   : > { %v3115_v17 = vpop.f32.mrf.mxu2  ;;  %v2972_v33 = vpop.f32.mrf.mxu0 }
 0x26b   : > { %v3116_v49 = vadd.f32 %v3115_v17, %v3043_v43  ;;  %v3188_v59 = vpop.f32.mrf.mxu3  ;;  %v3045_v0 = vpop.f32.mrf.mxu1  ;;  %v2973_v38 = vadd.f32 %v2972_v33, %v8149_v4  ;;  %v10842_v43 = vld [vmem:[#allocation44_spill] sm:$0xff]  ;;  %v6775_v4 = vld [vmem:[%s10515_s1 + $0x19c] sm:$0xf0] }
 0x26c   : > { %v5700_v41 = vor.u32 %v6775_v4, %v5699_v37  ;;  %v10843_v37 = vld [vmem:[#allocation47_spill] sm:$0xff] }
 0x26d   : > { %v3189_v28 = vadd.f32 %v3188_v59, %v3116_v49  ;;  %3011 = vmatmul.bf16.gmra.mxu0 %v10840_v45  ;;  %v3046_v17 = vadd.f32 %v3045_v0, %v2973_v38 }
 0x26e   : > { %3084 = vmatmul.bf16.gmra.mxu1 %v10842_v43 }
 0x26f   : > { %v5006_v13 = vpack.c.bf16 %v3189_v28, %v10841_v44  ;;  %3157 = vmatmul.bf16.gmra.mxu2 %v8127_v20  ;;  %3325 = vmatpush.bf16.msrb.mxu1 %v5700_v41 }
 0x270   : > { %3230 = vmatmul.bf16.gmra.mxu3 %v8130_v19 }
 0x271   : > { %5081 = vst [vmem:[%s8502_s21 + $0x48] sm:$0xff] %v5006_v13 }
 0x272   : > { %v3118_v53 = vpop.f32.mrf.mxu2  ;;  %v2974_v59 = vpop.f32.mrf.mxu0 }
 0x273   : > { %v3119_v46 = vadd.f32 %v3118_v53, %v3046_v17  ;;  %v3191_v49 = vpop.f32.mrf.mxu3  ;;  %v3047_v33 = vpop.f32.mrf.mxu1  ;;  %v2975_v11 = vadd.f32 %v2974_v59, %v8163_v39  ;;  %v10844_v53 = vld [vmem:[#allocation48_spill] sm:$0xff]  ;;  %v6766_v39 = vld [vmem:[%s10515_s1 + $0x15c] sm:$0xf] }
 0x275   : > { %v3192_v31 = vadd.f32 %v3191_v49, %v3119_v46  ;;  %v3048_v0 = vadd.f32 %v3047_v33, %v2975_v11 }
 0x277   : > { %v5009_v13 = vpack.c.bf16 %v3192_v31, %v8141_v60 }
 0x279   : > { %5084 = vst [vmem:[%s8502_s21 + $0x60] sm:$0xff] %v5009_v13 }
 0x27a   : > { %v3120_v50 = vpop.f32.mrf.mxu2  ;;  %v2977_v44 = vpop.f32.mrf.mxu0 }
 0x27b   : > { %v3121_v28 = vadd.f32 %v3120_v50, %v3048_v0  ;;  %v3193_v38 = vpop.f32.mrf.mxu3  ;;  %v3050_v19 = vpop.f32.mrf.mxu1  ;;  %v2978_v17 = vadd.f32 %v2977_v44, %v8186_v10  ;;  %v5677_v10 = vld [vmem:[%s10515_s1 + $0x170] sm:$0xf0] }
 0x27c   : > { %v5680_v46 = vor.u32 %v6766_v39, %v5677_v10 }
 0x27d   : > { %v3194_v20 = vadd.f32 %v3193_v38, %v3121_v28  ;;  %3016 = vmatmul.bf16.gmra.mxu0 %v10843_v37  ;;  %v3051_v60 = vadd.f32 %v3050_v19, %v2978_v17  ;;  %v6443_v28 = vld [vmem:[%s10515_s1 + $0x758] sm:$0xf]  ;;  %v6961_v38 = vld [vmem:[%s10515_s1 + $0x76c] sm:$0xf0] }
 0x27e   : > { %3089 = vmatmul.bf16.gmra.mxu1 %v10844_v53  ;;  %3683 = vmatpush.bf16.msra.mxu2 %v5680_v46  ;;  %v6444_v17 = vor.u32 %v6961_v38, %v6443_v28 }
 0x27f   : > { %v5012_v4 = vpack.c.bf16 %v3194_v20, %v8151_v62  ;;  %3162 = vmatmul.bf16.gmra.mxu2 %v8157_v16  ;;  %v6814_v20 = vld [vmem:[%s10515_s1 + $0x2dc] sm:$0xf]  ;;  %v5869_v62 = vld [vmem:[%s10515_s1 + $0x2f0] sm:$0xf0] }
 0x280   : > { %3235 = vmatmul.bf16.gmra.mxu3 %v8160_v26  ;;  %v5872_v33 = vor.u32 %v6814_v20, %v5869_v62  ;;  %3537 = vmatpush.bf16.msra.mxu0 %v6444_v17  ;;  %v10845_v62 = vld [vmem:[#allocation51_spill] sm:$0xff] }
 0x281   : > { %5087 = vst [vmem:[%s8502_s21 + $0x78] sm:$0xff] %v5012_v4  ;;  %v6635_v4 = vld [vmem:[%s10515_s1 + $0x8d8] sm:$0xf]  ;;  %v6760_v17 = vld [vmem:[%s10515_s1 + $0x12c] sm:$0xf] }
 0x282   : > { %v3123_v41 = vpop.f32.mrf.mxu2  ;;  %v2979_v59 = vpop.f32.mrf.mxu0  ;;  %3756 = vmatpush.bf16.msra.mxu3 %v5872_v33 }
 0x283   : > { %v3124_v19 = vadd.f32 %v3123_v41, %v3051_v60  ;;  %v3196_v49 = vpop.f32.mrf.mxu3  ;;  %v3052_v31 = vpop.f32.mrf.mxu1  ;;  %v2980_v13 = vadd.f32 %v2979_v59, %v8208_v51  ;;  %v7009_v51 = vld [vmem:[%s10515_s1 + $0x8ec] sm:$0xf0] }
 0x284   : > { %v6636_v10 = vor.u32 %v7009_v51, %v6635_v4  ;;  %v10847_v59 = vld [vmem:[#allocation52_spill] sm:$0xff]  ;;  %v5653_v4 = vld [vmem:[%s10515_s1 + $0x140] sm:$0xf0] }
 0x285   : > { %v3197_v11 = vadd.f32 %v3196_v49, %v3124_v19  ;;  %v3053_v50 = vadd.f32 %v3052_v31, %v2980_v13  ;;  %v10846_v19 = vld [vmem:[#allocation80_spill] sm:$0xff] }
 0x286   : > { %3610 = vmatpush.bf16.msra.mxu1 %v6636_v10 }
 0x287   : > { %v5015_v0 = vpack.c.bf16 %v3197_v11, %v8165_v21 }
 0x289   : > { %5090 = vst [vmem:[%s8502_s21 + $0x90] sm:$0xff] %v5015_v0 }
 0x28a   : > { %v3125_v44 = vpop.f32.mrf.mxu2  ;;  %v2982_v39 = vpop.f32.mrf.mxu0 }
 0x28b   : > { %v3126_v21 = vadd.f32 %v3125_v44, %v3053_v50  ;;  %v3198_v60 = vpop.f32.mrf.mxu3  ;;  %v3055_v41 = vpop.f32.mrf.mxu1  ;;  %v2983_v20 = vadd.f32 %v2982_v39, %v8218_v9 }
 0x28d   : > { %v3199_v46 = vadd.f32 %v3198_v60, %v3126_v21  ;;  %3021 = vmatmul.bf16.gmra.mxu0 %v10845_v62  ;;  %v3056_v33 = vadd.f32 %v3055_v41, %v2983_v20  ;;  %v5656_v21 = vor.u32 %v6760_v17, %v5653_v4  ;;  %v6808_v60 = vld [vmem:[%s10515_s1 + $0x2ac] sm:$0xf] }
 0x28e   : > { %3094 = vmatmul.bf16.gmra.mxu1 %v10847_v59 }
 0x28f   : > { %v5018_v49 = vpack.c.bf16 %v3199_v46, %v10846_v19  ;;  %3167 = vmatmul.bf16.gmra.mxu2 %v8202_v32 }
 0x290   : > { %3240 = vmatmul.bf16.gmra.mxu3 %v8205_v6  ;;  %3684 = vmatpush.bf16.msra.mxu2 %v5656_v21 }
 0x291   : > { %5093 = vst [vmem:[%s8502_s21 + $0xa8] sm:$0xff] %v5018_v49  ;;  %v10848_v49 = vld [vmem:[#allocation2_spill] sm:$0xff] }
 0x292   : > { %v3128_v31 = vpop.f32.mrf.mxu2  ;;  %v2984_v0 = vpop.f32.mrf.mxu0 }
 0x293   : > { %v3129_v11 = vadd.f32 %v3128_v31, %v3056_v33  ;;  %v3201_v13 = vpop.f32.mrf.mxu3  ;;  %v3057_v50 = vpop.f32.mrf.mxu1  ;;  %v2985_v28 = vadd.f32 %v2984_v0, %v8236_v2  ;;  %v10849_v31 = vld [vmem:[#allocation3_spill] sm:$0xff] }
 0x295   : > { %v3202_v9 = vadd.f32 %v3201_v13, %v3129_v11  ;;  %v3058_v44 = vadd.f32 %v3057_v50, %v2985_v28  ;;  %v6419_v13 = vld [vmem:[%s10515_s1 + $0x728] sm:$0xf] }
 0x297   : > { %v5021_v38 = vpack.c.bf16 %v3202_v9, %v8210_v1  ;;  %v5845_v1 = vld [vmem:[%s10515_s1 + $0x2c0] sm:$0xf0]  ;;  %v7003_v9 = vld [vmem:[%s10515_s1 + $0x8bc] sm:$0xf0] }
 0x298   : > { %v5848_v41 = vor.u32 %v6808_v60, %v5845_v1 }
 0x299   : > { %5096 = vst [vmem:[%s8502_s21 + $0xc0] sm:$0xff] %v5021_v38 }
 0x29a   : > { %v3130_v51 = vpop.f32.mrf.mxu2  ;;  %v2987_v10 = vpop.f32.mrf.mxu0  ;;  %3757 = vmatpush.bf16.msra.mxu3 %v5848_v41 }
 0x29b   : > { %v3131_v2 = vadd.f32 %v3130_v51, %v3058_v44  ;;  %v3203_v39 = vpop.f32.mrf.mxu3  ;;  %v3060_v46 = vpop.f32.mrf.mxu1  ;;  %v2988_v19 = vadd.f32 %v2987_v10, %v8258_v56  ;;  %v6955_v56 = vld [vmem:[%s10515_s1 + $0x73c] sm:$0xf0] }
 0x29c   : > { %v6420_v50 = vor.u32 %v6955_v56, %v6419_v13 }
 0x29d   : > { %v3204_v20 = vadd.f32 %v3203_v39, %v3131_v2  ;;  %3253 = vmatmul.bf16.vlgmr.msrb.gmra.mxu0 %v10848_v49  ;;  %v3061_v11 = vadd.f32 %v3060_v46, %v2988_v19 }
 0x29e   : > { %3326 = vmatmul.bf16.vlgmr.msrb.gmra.mxu1 %v10849_v31  ;;  %3538 = vmatpush.bf16.msra.mxu0 %v6420_v50 }
 0x29f   : > { %v5024_v33 = vpack.c.bf16 %v3204_v20, %v8220_v25  ;;  %3399 = vmatmul.bf16.vlgmr.msrb.gmra.mxu2 %v7307_v54  ;;  %v6611_v25 = vld [vmem:[%s10515_s1 + $0x8a8] sm:$0xf] }
 0x2a0   : > { %3472 = vmatmul.bf16.vlgmr.msrb.gmra.mxu3 %v7315_v57  ;;  %v6612_v17 = vor.u32 %v7003_v9, %v6611_v25 }
 0x2a1   : > { %5099 = vst [vmem:[%s8502_s21 + $0xd8] sm:$0xff] %v5024_v33  ;;  %v10850_v33 = vld [vmem:[#allocation5_spill] sm:$0xff] }
 0x2a2   : > { %v3133_v0 = vpop.f32.mrf.mxu2  ;;  %v2989_v44 = vpop.f32.mrf.mxu0  ;;  %3611 = vmatpush.bf16.msra.mxu1 %v6612_v17 }
 0x2a3   : > { %v3134_v28 = vadd.f32 %v3133_v0, %v3061_v11  ;;  %v3206_v38 = vpop.f32.mrf.mxu3  ;;  %v3062_v4 = vpop.f32.mrf.mxu1  ;;  %v2990_v21 = vadd.f32 %v2989_v44, %v8264_v23  ;;  %v10851_v23 = vld [vmem:[#allocation6_spill] sm:$0xff]  ;;  %v5629_v44 = vld [vmem:[%s10515_s1 + $0x110] sm:$0xf0] }
 0x2a5   : > { %v3207_v51 = vadd.f32 %v3206_v38, %v3134_v28  ;;  %v3063_v1 = vadd.f32 %v3062_v4, %v2990_v21  ;;  %v6754_v38 = vld [vmem:[%s10515_s1 + $0xfc] sm:$0xf] }
 0x2a6   : > { %v5632_v4 = vor.u32 %v6754_v38, %v5629_v44 }
 0x2a7   : > { %v5027_v60 = vpack.c.bf16 %v3207_v51, %v8238_v30  ;;  %v6802_v51 = vld [vmem:[%s10515_s1 + $0x27c] sm:$0xf] }
 0x2a8   : > { %3685 = vmatpush.bf16.msra.mxu2 %v5632_v4  ;;  %v10856_v4 = vld [vmem:[#allocation82_spill] sm:$0xff] }
 0x2a9   : > { %5102 = vst [vmem:[%s8502_s21 + $0xf0] sm:$0xff] %v5027_v60 }
 0x2aa   : > { %v3135_v2 = vpop.f32.mrf.mxu2  ;;  %v2992_v41 = vpop.f32.mrf.mxu0 }
 0x2ab   : > { %v3136_v39 = vadd.f32 %v3135_v2, %v3063_v1  ;;  %v3208_v10 = vpop.f32.mrf.mxu3  ;;  %v3065_v46 = vpop.f32.mrf.mxu1  ;;  %v2993_v19 = vadd.f32 %v2992_v41, %v8274_v5  ;;  %v6997_v41 = vld [vmem:[%s10515_s1 + $0x88c] sm:$0xf0] }
 0x2ad   : > { %v3209_v20 = vadd.f32 %v3208_v10, %v3136_v39  ;;  %3258 = vmatmul.bf16.gmra.mxu0 %v10850_v33  ;;  %v3066_v30 = vadd.f32 %v3065_v46, %v2993_v19  ;;  %v6949_v39 = vld [vmem:[%s10515_s1 + $0x70c] sm:$0xf0]  ;;  %v6587_v10 = vld [vmem:[%s10515_s1 + $0x878] sm:$0xf] }
 0x2ae   : > { %3331 = vmatmul.bf16.gmra.mxu1 %v10851_v23  ;;  %v6588_v19 = vor.u32 %v6997_v41, %v6587_v10  ;;  %v10857_v41 = vld [vmem:[#allocation13_spill] sm:$0xff] }
 0x2af   : > { %v5030_v11 = vpack.c.bf16 %v3209_v20, %v8260_v48  ;;  %3404 = vmatmul.bf16.gmra.mxu2 %v7345_v14 }
 0x2b0   : > { %3477 = vmatmul.bf16.gmra.mxu3 %v7347_v15  ;;  %3612 = vmatpush.bf16.msra.mxu1 %v6588_v19  ;;  %v10859_v19 = vld [vmem:[#allocation14_spill] sm:$0xff] }
 0x2b1   : > { %5105 = vst [vmem:[%s8502_s21 + $0x108] sm:$0xff] %v5030_v11 }
 0x2b2   : > { %v3138_v13 = vpop.f32.mrf.mxu2  ;;  %v2994_v50 = vpop.f32.mrf.mxu0 }
 0x2b3   : > { %v3139_v56 = vadd.f32 %v3138_v13, %v3066_v30  ;;  %v3211_v0 = vpop.f32.mrf.mxu3  ;;  %v3067_v25 = vpop.f32.mrf.mxu1  ;;  %v2995_v5 = vadd.f32 %v2994_v50, %v8304_v29  ;;  %v6395_v29 = vld [vmem:[%s10515_s1 + $0x6f8] sm:$0xf]  ;;  %v10854_v50 = vld [vmem:[#allocation10_spill] sm:$0xff] }
 0x2b4   : > { %v6396_v20 = vor.u32 %v6949_v39, %v6395_v29  ;;  %v10852_v13 = vld [vmem:[#allocation9_spill] sm:$0xff] }
 0x2b5   : > { %v3212_v9 = vadd.f32 %v3211_v0, %v3139_v56  ;;  %v3068_v48 = vadd.f32 %v3067_v25, %v2995_v5  ;;  %v10853_v56 = vld [vmem:[#allocation81_spill] sm:$0xff]  ;;  %v10855_v25 = vld [vmem:[#allocation12_spill] sm:$0xff] }
 0x2b6   : > { %3539 = vmatpush.bf16.msra.mxu0 %v6396_v20 }
 0x2b7   : > { %v5033_v28 = vpack.c.bf16 %v3212_v9, %v8266_v7  ;;  %v5821_v7 = vld [vmem:[%s10515_s1 + $0x290] sm:$0xf0] }
 0x2b8   : > { %v5824_v2 = vor.u32 %v6802_v51, %v5821_v7 }
 0x2b9   : > { %5108 = vst [vmem:[%s8502_s21 + $0x120] sm:$0xff] %v5033_v28 }
 0x2ba   : > { %v3140_v17 = vpop.f32.mrf.mxu2  ;;  %v2997_v1 = vpop.f32.mrf.mxu0  ;;  %3758 = vmatpush.bf16.msra.mxu3 %v5824_v2 }
 0x2bb   : > { %v3141_v21 = vadd.f32 %v3140_v17, %v3068_v48  ;;  %v3213_v60 = vpop.f32.mrf.mxu3  ;;  %v3070_v46 = vpop.f32.mrf.mxu1  ;;  %v2998_v30 = vadd.f32 %v2997_v1, %v8314_v24 }
 0x2bd   : > { %v3214_v11 = vadd.f32 %v3213_v60, %v3141_v21  ;;  %3263 = vmatmul.bf16.gmra.mxu0 %v10852_v13  ;;  %v3071_v9 = vadd.f32 %v3070_v46, %v2998_v30  ;;  %v10858_v46 = vld [vmem:[#allocation83_spill] sm:$0xff] }
 0x2be   : > { %3336 = vmatmul.bf16.gmra.mxu1 %v10854_v50 }
 0x2bf   : > { %v5036_v0 = vpack.c.bf16 %v3214_v11, %v10853_v56  ;;  %3409 = vmatmul.bf16.gmra.mxu2 %v10801_v61  ;;  %v10861_v11 = vld [vmem:[#allocation16_spill] sm:$0xff]  ;;  %v6748_v56 = vld [vmem:[%s10515_s1 + $0xcc] sm:$0xf] }
 0x2c0   : > { %3482 = vmatmul.bf16.gmra.mxu3 %v10855_v25 }
 0x2c1   : > { %5111 = vst [vmem:[%s8502_s21 + $0x138] sm:$0xff] %v5036_v0 }
 0x2c2   : > { %v3143_v5 = vpop.f32.mrf.mxu2  ;;  %v2999_v24 = vpop.f32.mrf.mxu0 }
 0x2c3   : > { %v3144_v28 = vadd.f32 %v3143_v5, %v3071_v9  ;;  %v3216_v48 = vpop.f32.mrf.mxu3  ;;  %v3072_v38 = vpop.f32.mrf.mxu1  ;;  %v3000_v17 = vadd.f32 %v2999_v24, %v8320_v40  ;;  %v10860_v40 = vld [vmem:[#allocation15_spill] sm:$0xff] }
 0x2c4   : > { %v6796_v5 = vld [vmem:[%s10515_s1 + $0x24c] sm:$0xf] }
 0x2c5   : > { %v3217_v44 = vadd.f32 %v3216_v48, %v3144_v28  ;;  %v3073_v7 = vadd.f32 %v3072_v38, %v3000_v17  ;;  %v5797_v28 = vld [vmem:[%s10515_s1 + $0x260] sm:$0xf0]  ;;  %v6371_v48 = vld [vmem:[%s10515_s1 + $0x6c8] sm:$0xf] }
 0x2c6   : > { %v5800_v17 = vor.u32 %v6796_v5, %v5797_v28  ;;  %v10863_v5 = vld [vmem:[#allocation17_spill] sm:$0xff] }
 0x2c7   : > { %v5039_v51 = vpack.c.bf16 %v3217_v44, %v10856_v4  ;;  %v6943_v4 = vld [vmem:[%s10515_s1 + $0x6dc] sm:$0xf0] }
 0x2c8   : > { %3759 = vmatpush.bf16.msra.mxu3 %v5800_v17 }
 0x2c9   : > { %5114 = vst [vmem:[%s8502_s21 + $0x150] sm:$0xff] %v5039_v51 }
 0x2ca   : > { %v3145_v29 = vpop.f32.mrf.mxu2  ;;  %v3002_v1 = vpop.f32.mrf.mxu0 }
 0x2cb   : > { %v3146_v21 = vadd.f32 %v3145_v29, %v3073_v7  ;;  %v3218_v60 = vpop.f32.mrf.mxu3  ;;  %v3075_v2 = vpop.f32.mrf.mxu1  ;;  %v3003_v10 = vadd.f32 %v3002_v1, %v8348_v18  ;;  %v5605_v18 = vld [vmem:[%s10515_s1 + $0xe0] sm:$0xf0]  ;;  %v6372_v7 = vor.u32 %v6943_v4, %v6371_v48 }
 0x2cc   : > { %v5608_v9 = vor.u32 %v6748_v56, %v5605_v18  ;;  %v10864_v48 = vld [vmem:[#allocation18_spill] sm:$0xff] }
 0x2cd   : > { %v3219_v39 = vadd.f32 %v3218_v60, %v3146_v21  ;;  %3268 = vmatmul.bf16.gmra.mxu0 %v10857_v41  ;;  %v3076_v30 = vadd.f32 %v3075_v2, %v3003_v10  ;;  %v10862_v60 = vld [vmem:[#allocation61_spill] sm:$0xff]  ;;  %v6991_v10 = vld [vmem:[%s10515_s1 + $0x85c] sm:$0xf0] }
 0x2ce   : > { %3341 = vmatmul.bf16.gmra.mxu1 %v10859_v19  ;;  %3686 = vmatpush.bf16.msra.mxu2 %v5608_v9 }
 0x2cf   : > { %v5042_v20 = vpack.c.bf16 %v3219_v39, %v10858_v46  ;;  %3414 = vmatmul.bf16.gmra.mxu2 %v10860_v40  ;;  %3540 = vmatpush.bf16.msra.mxu0 %v6372_v7  ;;  %v6563_v39 = vld [vmem:[%s10515_s1 + $0x848] sm:$0xf]  ;;  %v10896_v40 = vld [vmem:[#allocation53_spill] sm:$0xff] }
 0x2d0   : > { %3487 = vmatmul.bf16.gmra.mxu3 %v10861_v11 }
 0x2d1   : > { %5117 = vst [vmem:[%s8502_s21 + $0x168] sm:$0xff] %v5042_v20  ;;  %v6564_v20 = vor.u32 %v6991_v10, %v6563_v39  ;;  %v5581_v39 = vld [vmem:[%s10515_s1 + $0xb0] sm:$0xf0] }
 0x2d2   : > { %v3148_v0 = vpop.f32.mrf.mxu2  ;;  %v3004_v44 = vpop.f32.mrf.mxu0 }
 0x2d3   : > { %v3149_v24 = vadd.f32 %v3148_v0, %v3076_v30  ;;  %v3221_v38 = vpop.f32.mrf.mxu3  ;;  %v3077_v51 = vpop.f32.mrf.mxu1  ;;  %v3005_v21 = vadd.f32 %v3004_v44, %v8360_v22  ;;  %3613 = vmatpush.bf16.msra.mxu1 %v6564_v20  ;;  %v6790_v20 = vld [vmem:[%s10515_s1 + $0x21c] sm:$0xf] }
 0x2d5   : > { %v3222_v29 = vadd.f32 %v3221_v38, %v3149_v24  ;;  %v3078_v2 = vadd.f32 %v3077_v51, %v3005_v21  ;;  %v10865_v24 = vld [vmem:[#allocation20_spill] sm:$0xff] }
 0x2d7   : > { %v5045_v1 = vpack.c.bf16 %v3222_v29, %v10862_v60  ;;  %v10867_v60 = vld [vmem:[#allocation84_spill] sm:$0xff] }
 0x2d9   : > { %5120 = vst [vmem:[%s8502_s21 + $0x180] sm:$0xff] %v5045_v1 }
 0x2da   : > { %v3150_v46 = vpop.f32.mrf.mxu2  ;;  %v3007_v22 = vpop.f32.mrf.mxu0 }
 0x2db   : > { %v3151_v30 = vadd.f32 %v3150_v46, %v3078_v2  ;;  %v3223_v56 = vpop.f32.mrf.mxu3  ;;  %v3080_v18 = vpop.f32.mrf.mxu1  ;;  %v3008_v9 = vadd.f32 %v3007_v22, %v8370_v27  ;;  %v10866_v27 = vld [vmem:[#allocation86_spill] sm:$0xff]  ;;  %v6742_v2 = vld [vmem:[%s10515_s1 + $0x9c] sm:$0xf] }
 0x2dc   : > { %v5584_v46 = vor.u32 %v6742_v2, %v5581_v39  ;;  %v6985_v2 = vld [vmem:[%s10515_s1 + $0x82c] sm:$0xf0] }
 0x2dd   : > { %v3224_v0 = vadd.f32 %v3223_v56, %v3151_v30  ;;  %3273 = vmatmul.bf16.gmra.mxu0 %v10863_v5  ;;  %v3081_v38 = vadd.f32 %v3080_v18, %v3008_v9  ;;  %v5773_v30 = vld [vmem:[%s10515_s1 + $0x230] sm:$0xf0] }
 0x2de   : > { %3346 = vmatmul.bf16.gmra.mxu1 %v10864_v48  ;;  %3687 = vmatpush.bf16.msra.mxu2 %v5584_v46 }
 0x2df   : > { %v5048_v28 = vpack.c.bf16 %v3224_v0, %v8356_v42  ;;  %3419 = vmatmul.bf16.gmra.mxu2 %v10811_v63  ;;  %v5776_v0 = vor.u32 %v6790_v20, %v5773_v30 }
 0x2e0   : > { %3492 = vmatmul.bf16.gmra.mxu3 %v10865_v24 }
 0x2e1   : > { %5123 = vst [vmem:[%s8502_s21 + $0x198] sm:$0xff] %v5048_v28  ;;  %3760 = vmatpush.bf16.msra.mxu3 %v5776_v0 }
 0x2e2   : > { %v3153_v44 = vpop.f32.mrf.mxu2  ;;  %v3009_v51 = vpop.f32.mrf.mxu0 }
 0x2e3   : > { %v3154_v17 = vadd.f32 %v3153_v44, %v3081_v38  ;;  %v3226_v4 = vpop.f32.mrf.mxu3  ;;  %v3082_v7 = vpop.f32.mrf.mxu1  ;;  %v3010_v21 = vadd.f32 %v3009_v51, %v10866_v27  ;;  %v10868_v44 = vld [vmem:[#allocation21_spill] sm:$0xff]  ;;  %v10870_v51 = vld [vmem:[#allocation22_spill] sm:$0xff] }
 0x2e5   : > { %v3227_v29 = vadd.f32 %v3226_v4, %v3154_v17  ;;  %v3083_v42 = vadd.f32 %v3082_v7, %v3010_v21  ;;  %v10869_v17 = vld [vmem:[#allocation85_spill] sm:$0xff]  ;;  %v10871_v7 = vld [vmem:[#allocation23_spill] sm:$0xff] }
 0x2e6   : > { %v6347_v21 = vld [vmem:[%s10515_s1 + $0x698] sm:$0xf] }
 0x2e7   : > { %v5051_v1 = vpack.c.bf16 %v3227_v29, %v10867_v60  ;;  %v10872_v29 = vld [vmem:[#allocation24_spill] sm:$0xff] }
 0x2e9   : > { %5126 = vst [vmem:[%s8502_s21 + $0x1b0] sm:$0xff] %v5051_v1 }
 0x2ea   : > { %v3155_v10 = vpop.f32.mrf.mxu2  ;;  %v3012_v18 = vpop.f32.mrf.mxu0 }
 0x2eb   : > { %v3156_v56 = vadd.f32 %v3155_v10, %v3083_v42  ;;  %v3228_v22 = vpop.f32.mrf.mxu3  ;;  %v3085_v9 = vpop.f32.mrf.mxu1  ;;  %v3013_v38 = vadd.f32 %v3012_v18, %v8410_v58  ;;  %v6937_v58 = vld [vmem:[%s10515_s1 + $0x6ac] sm:$0xf0]  ;;  %v6539_v42 = vld [vmem:[%s10515_s1 + $0x818] sm:$0xf]  ;;  %v10873_v18 = vld [vmem:[#allocation87_spill] sm:$0xff] }
 0x2ec   : > { %v6348_v1 = vor.u32 %v6937_v58, %v6347_v21  ;;  %v6540_v20 = vor.u32 %v6985_v2, %v6539_v42  ;;  %v10875_v42 = vld [vmem:[#allocation26_spill] sm:$0xff]  ;;  %v10877_v2 = vld [vmem:[#allocation28_spill] sm:$0xff] }
 0x2ed   : > { %v3229_v28 = vadd.f32 %v3228_v22, %v3156_v56  ;;  %3278 = vmatmul.bf16.gmra.mxu0 %v10868_v44  ;;  %v3086_v27 = vadd.f32 %v3085_v9, %v3013_v38 }
 0x2ee   : > { %3351 = vmatmul.bf16.gmra.mxu1 %v10870_v51  ;;  %3541 = vmatpush.bf16.msra.mxu0 %v6348_v1 }
 0x2ef   : > { %v5054_v4 = vpack.c.bf16 %v3229_v28, %v10869_v17  ;;  %3424 = vmatmul.bf16.gmra.mxu2 %v10871_v7  ;;  %3614 = vmatpush.bf16.msra.mxu1 %v6540_v20  ;;  %v5749_v20 = vld [vmem:[%s10515_s1 + $0x200] sm:$0xf0] }
 0x2f0   : > { %3497 = vmatmul.bf16.gmra.mxu3 %v10872_v29 }
 0x2f1   : > { %5129 = vst [vmem:[%s8502_s21 + $0x1c8] sm:$0xff] %v5054_v4 }
 0x2f2   : > { %v3158_v60 = vpop.f32.mrf.mxu2  ;;  %v3014_v46 = vpop.f32.mrf.mxu0 }
 0x2f3   : > { %v3159_v39 = vadd.f32 %v3158_v60, %v3086_v27  ;;  %v3231_v10 = vpop.f32.mrf.mxu3  ;;  %v3087_v30 = vpop.f32.mrf.mxu1  ;;  %v3015_v22 = vadd.f32 %v3014_v46, %v8416_v36  ;;  %v10874_v60 = vld [vmem:[#allocation25_spill] sm:$0xff]  ;;  %v10876_v36 = vld [vmem:[#allocation27_spill] sm:$0xff] }
 0x2f5   : > { %v3232_v56 = vadd.f32 %v3231_v10, %v3159_v39  ;;  %v3088_v9 = vadd.f32 %v3087_v30, %v3015_v22  ;;  %v6736_v39 = vld [vmem:[%s10515_s1 + $0x6c] sm:$0xf]  ;;  %v5557_v10 = vld [vmem:[%s10515_s1 + $0x80] sm:$0xf0] }
 0x2f6   : > { %v5560_v46 = vor.u32 %v6736_v39, %v5557_v10  ;;  %v6979_v39 = vld [vmem:[%s10515_s1 + $0x7fc] sm:$0xf0] }
 0x2f7   : > { %v5057_v0 = vpack.c.bf16 %v3232_v56, %v10873_v18 }
 0x2f8   : > { %3688 = vmatpush.bf16.msra.mxu2 %v5560_v46 }
 0x2f9   : > { %5132 = vst [vmem:[%s8502_s21 + $0x1e0] sm:$0xff] %v5057_v0 }
 0x2fa   : > { %v3160_v28 = vpop.f32.mrf.mxu2  ;;  %v3017_v4 = vpop.f32.mrf.mxu0 }
 0x2fb   : > { %v3161_v38 = vadd.f32 %v3160_v28, %v3088_v9  ;;  %v3233_v17 = vpop.f32.mrf.mxu3  ;;  %v3090_v21 = vpop.f32.mrf.mxu1  ;;  %v3018_v58 = vadd.f32 %v3017_v4, %v8438_v8  ;;  %v6784_v8 = vld [vmem:[%s10515_s1 + $0x1ec] sm:$0xf]  ;;  %v6931_v4 = vld [vmem:[%s10515_s1 + $0x67c] sm:$0xf0] }
 0x2fc   : > { %v5752_v56 = vor.u32 %v6784_v8, %v5749_v20 }
 0x2fd   : > { %v3234_v27 = vadd.f32 %v3233_v17, %v3161_v38  ;;  %3283 = vmatmul.bf16.gmra.mxu0 %v10874_v60  ;;  %v6323_v17 = vld [vmem:[%s10515_s1 + $0x668] sm:$0xf] }
 0x2fe   : > { %3356 = vmatmul.bf16.gmra.mxu1 %v10875_v42  ;;  %3761 = vmatpush.bf16.msra.mxu3 %v5752_v56 }
 0x2ff   : > { %v5060_v1 = vpack.c.bf16 %v3234_v27, %v8412_v35  ;;  %3429 = vmatmul.bf16.gmra.mxu2 %v10876_v36  ;;  %v3091_v35 = vadd.f32 %v3090_v21, %v3018_v58  ;;  %v6515_v21 = vld [vmem:[%s10515_s1 + $0x7e8] sm:$0xf]  ;;  %v10878_v27 = vld [vmem:[#allocation88_spill] sm:$0xff] }
 0x300   : > { %3502 = vmatmul.bf16.gmra.mxu3 %v10877_v2 }
 0x301   : > { %5135 = vst [vmem:[%s8502_s21 + $0x1f8] sm:$0xff] %v5060_v1  ;;  %v6324_v1 = vor.u32 %v6931_v4, %v6323_v17  ;;  %v10881_v17 = vld [vmem:[#allocation30_spill] sm:$0xff] }
 0x302   : > { %v3163_v30 = vpop.f32.mrf.mxu2  ;;  %v3019_v0 = vpop.f32.mrf.mxu0 }
 0x303   : > { %v3164_v22 = vadd.f32 %v3163_v30, %v3091_v35  ;;  %v3236_v18 = vpop.f32.mrf.mxu3  ;;  %v3092_v9 = vpop.f32.mrf.mxu1  ;;  %v3020_v38 = vadd.f32 %v3019_v0, %v8456_v52  ;;  %v6516_v52 = vor.u32 %v6979_v39, %v6515_v21  ;;  %3542 = vmatpush.bf16.msra.mxu0 %v6324_v1  ;;  %v10880_v0 = vld [vmem:[#allocation89_spill] sm:$0xff] }
 0x305   : > { %v3237_v28 = vadd.f32 %v3236_v18, %v3164_v22  ;;  %v3093_v10 = vadd.f32 %v3092_v9, %v3020_v38  ;;  %3615 = vmatpush.bf16.msra.mxu1 %v6516_v52  ;;  %v10879_v18 = vld [vmem:[#allocation29_spill] sm:$0xff]  ;;  %v10882_v9 = vld [vmem:[#allocation32_spill] sm:$0xff] }
 0x307   : > { %v5063_v58 = vpack.c.bf16 %v3237_v28, %v10878_v27 }
 0x309   : > { %5138 = vst [vmem:[%s8502_s21 + $0x210] sm:$0xff] %v5063_v58 }
 0x30a   : > { %v3165_v8 = vpop.f32.mrf.mxu2  ;;  %v3022_v20 = vpop.f32.mrf.mxu0 }
 0x30b   : > { %v3166_v35 = vadd.f32 %v3165_v8, %v3093_v10  ;;  %v3238_v46 = vpop.f32.mrf.mxu3  ;;  %v3095_v30 = vpop.f32.mrf.mxu1  ;;  %v3023_v22 = vadd.f32 %v3022_v20, %v8465_v3  ;;  %v10883_v3 = vld [vmem:[#allocation90_spill] sm:$0xff] }
 0x30c   : > { %v8795_v10 = vld [vmem:[%s10516_s2] sm:$0x3f] }
 0x30d   : > { %v3239_v56 = vadd.f32 %v3238_v46, %v3166_v35  ;;  %3288 = vmatmul.bf16.gmra.mxu0 %v10879_v18  ;;  %v3096_v38 = vadd.f32 %v3095_v30, %v3023_v22  ;;  %v8798_v8 = vperm.slane %v8795_v10, 2  ;;  %v6730_v22 = vld [vmem:[%s10515_s1 + $0x3c] sm:$0xf] }
 0x30e   : > { %3361 = vmatmul.bf16.gmra.mxu1 %v10881_v17 }
 0x30f   : > { %v5066_v28 = vpack.c.bf16 %v3239_v56, %v10880_v0  ;;  %3434 = vmatmul.bf16.gmra.mxu2 %v10828_v34  ;;  %v5533_v0 = vld [vmem:[%s10515_s1 + $0x50] sm:$0xf0] }
 0x310   : > { %3507 = vmatmul.bf16.gmra.mxu3 %v10882_v9 }
 0x311   : > { %5141 = vst [vmem:[%s8502_s21 + $0x228] sm:$0xff] %v5066_v28  ;;  %v6778_v28 = vld [vmem:[%s10515_s1 + $0x1bc] sm:$0xf] }
 0x312   : > { %v3168_v4 = vpop.f32.mrf.mxu2  ;;  %v3024_v58 = vpop.f32.mrf.mxu0 }
 0x313   : > { %v3169_v21 = vadd.f32 %v3168_v4, %v3096_v38  ;;  %v3241_v27 = vpop.f32.mrf.mxu3  ;;  %v3097_v1 = vpop.f32.mrf.mxu1  ;;  %v10884_v4 = vld [vmem:[#allocation33_spill] sm:$0xff] }
 0x314   : > { %v6299_v58 = vld [vmem:[%s10515_s1 + $0x638] sm:$0xf]  ;;  %v6925_v1 = vld [vmem:[%s10515_s1 + $0x64c] sm:$0xf0] }
 0x315   : > { %v3242_v39 = vadd.f32 %v3241_v27, %v3169_v21  ;;  %v5536_v21 = vor.u32 %v6730_v22, %v5533_v0  ;;  %v5725_v27 = vld [vmem:[%s10515_s1 + $0x1d0] sm:$0xf0] }
 0x317   : > { %v5069_v52 = vpack.c.bf16 %v3242_v39, %v10883_v3  ;;  %v10885_v39 = vld [vmem:[#allocation34_spill] sm:$0xff]  ;;  %v10886_v3 = vld [vmem:[#allocation35_spill] sm:$0xff]  ;;  %3689 = vmatpush.bf16.msra.mxu2 %v5536_v21 }
 0x319   : > { %5144 = vst [vmem:[%s8502_s21 + $0x240] sm:$0x33] %v5069_v52  ;;  %v5728_v52 = vor.u32 %v6778_v28, %v5725_v27 }
 0x31a   : > { %v3170_v35 = vpop.f32.mrf.mxu2  ;;  %v3254_v20 = vpop.f32.mrf.mxu0 }
 0x31b   : > { %v3243_v46 = vpop.f32.mrf.mxu3  ;;  %v3255_v30 = vadd.f32 %v3254_v20, %v8798_v8  ;;  %v3327_v56 = vpop.f32.mrf.mxu1  ;;  %v6300_v35 = vor.u32 %v6925_v1, %v6299_v58  ;;  %v6491_v20 = vld [vmem:[%s10515_s1 + $0x7b8] sm:$0xf]  ;;  %3762 = vmatpush.bf16.msra.mxu3 %v5728_v52 }
 0x31c   : > { %v10887_v46 = vld [vmem:[#allocation36_spill] sm:$0xff] }
 0x31d   : > { %v3328_v38 = vadd.f32 %v3327_v56, %v3255_v30  ;;  %3293 = vmatmul.bf16.gmra.mxu0 %v10884_v4  ;;  %v6973_v30 = vld [vmem:[%s10515_s1 + $0x7cc] sm:$0xf0] }
 0x31e   : > { %3366 = vmatmul.bf16.gmra.mxu1 %v10885_v39  ;;  %3543 = vmatpush.bf16.msra.mxu0 %v6300_v35  ;;  %v6492_v56 = vor.u32 %v6973_v30, %v6491_v20  ;;  %v10889_v30 = vld [vmem:[#allocation38_spill] sm:$0xff] }
 0x31f   : > { %3439 = vmatmul.bf16.gmra.mxu2 %v10886_v3 }
 0x320   : > { %3512 = vmatmul.bf16.gmra.mxu3 %v10887_v46  ;;  %3616 = vmatpush.bf16.msra.mxu1 %v6492_v56 }
 0x322   : > { %v3400_v22 = vpop.f32.mrf.mxu2  ;;  %v3256_v3 = vpop.f32.mrf.mxu0 }
 0x323   : > { %v3401_v0 = vadd.f32 %v3400_v22, %v3328_v38  ;;  %v3473_v9 = vpop.f32.mrf.mxu3  ;;  %v3257_v28 = vadd.f32 %v3256_v3, %v8798_v8  ;;  %v3329_v27 = vpop.f32.mrf.mxu1  ;;  %v10888_v38 = vld [vmem:[#allocation37_spill] sm:$0xff] }
 0x325   : > { %v8831_v21 = vadd.f32 %v3473_v9, %v3401_v0  ;;  %v3330_v58 = vadd.f32 %v3329_v27, %v3257_v28  ;;  %v6772_v27 = vld [vmem:[%s10515_s1 + $0x18c] sm:$0xf] }
 0x32a   : > { %v3402_v1 = vpop.f32.mrf.mxu2  ;;  %v3259_v2 = vpop.f32.mrf.mxu0 }
 0x32b   : > { %v3403_v46 = vadd.f32 %v3402_v1, %v3330_v58  ;;  %v3475_v34 = vpop.f32.mrf.mxu3  ;;  %v3260_v36 = vadd.f32 %v3259_v2, %v8798_v8  ;;  %v3332_v52 = vpop.f32.mrf.mxu1  ;;  %v5701_v1 = vld [vmem:[%s10515_s1 + $0x1a0] sm:$0xf0] }
 0x32d   : > { %v8834_v35 = vadd.f32 %v3475_v34, %v3403_v46  ;;  %v3333_v20 = vadd.f32 %v3332_v52, %v3260_v36  ;;  %3298 = vmatmul.bf16.gmra.mxu0 %v10888_v38  ;;  %v6724_v36 = vld [vmem:[%s10515_s1 + $0xc] sm:$0xf]  ;;  %v5509_v46 = vld [vmem:[%s10515_s1 + $0x20] sm:$0xf0]  ;;  %v6275_v52 = vld [vmem:[%s10515_s1 + $0x608] sm:$0xf] }
 0x32e   : > { %3371 = vmatmul.bf16.gmra.mxu1 %v10889_v30  ;;  %v5512_v58 = vor.u32 %v6724_v36, %v5509_v46 }
 0x32f   : > { %3444 = vmatmul.bf16.gmra.mxu2 %v10834_v47  ;;  %v6467_v47 = vld [vmem:[%s10515_s1 + $0x788] sm:$0xf] }
 0x330   : > { %3517 = vmatmul.bf16.gmra.mxu3 %v10836_v55  ;;  %3690 = vmatpush.bf16.msra.mxu2 %v5512_v58 }
 0x332   : > { %v3405_v9 = vpop.f32.mrf.mxu2  ;;  %v3261_v22 = vpop.f32.mrf.mxu0 }
 0x333   : > { %v3406_v3 = vadd.f32 %v3405_v9, %v3333_v20  ;;  %v3478_v56 = vpop.f32.mrf.mxu3  ;;  %v3262_v0 = vadd.f32 %v3261_v22, %v8798_v8  ;;  %v3334_v28 = vpop.f32.mrf.mxu1  ;;  %v6919_v20 = vld [vmem:[%s10515_s1 + $0x61c] sm:$0xf0]  ;;  %v5704_v9 = vor.u32 %v6772_v27, %v5701_v1  ;;  %v10890_v1 = vld [vmem:[#allocation41_spill] sm:$0xff] }
 0x334   : > { %v6967_v27 = vld [vmem:[%s10515_s1 + $0x79c] sm:$0xf0] }
 0x335   : > { %v8841_v2 = vadd.f32 %v3478_v56, %v3406_v3  ;;  %v3335_v34 = vadd.f32 %v3334_v28, %v3262_v0  ;;  %v6276_v3 = vor.u32 %v6919_v20, %v6275_v52  ;;  %3763 = vmatpush.bf16.msra.mxu3 %v5704_v9  ;;  %v6468_v52 = vor.u32 %v6967_v27, %v6467_v47 }
 0x337   : > { %3544 = vmatpush.bf16.msra.mxu0 %v6276_v3  ;;  %3617 = vmatpush.bf16.msra.mxu1 %v6468_v52 }
 0x33a   : > { %v3407_v56 = vpop.f32.mrf.mxu2  ;;  %v3264_v28 = vpop.f32.mrf.mxu0 }
 0x33b   : > { %v3408_v22 = vadd.f32 %v3407_v56, %v3335_v34  ;;  %v3480_v0 = vpop.f32.mrf.mxu3  ;;  %v3265_v36 = vadd.f32 %v3264_v28, %v8798_v8  ;;  %v3337_v46 = vpop.f32.mrf.mxu1  ;;  %v10891_v34 = vld [vmem:[#allocation42_spill] sm:$0xff] }
 0x33d   : > { %v8862_v55 = vadd.f32 %v3480_v0, %v3408_v22  ;;  %v3338_v58 = vadd.f32 %v3337_v46, %v3265_v36  ;;  %3303 = vmatmul.bf16.gmra.mxu0 %v10890_v1 }
 0x33e   : > { %3376 = vmatmul.bf16.gmra.mxu1 %v10891_v34 }
 0x33f   : > { %3449 = vmatmul.bf16.gmra.mxu2 %v10840_v45 }
 0x340   : > { %3522 = vmatmul.bf16.gmra.mxu3 %v10842_v43  ;;  %v10892_v43 = vld [vmem:[#allocation45_spill] sm:$0xff] }
 0x342   : > { %v3410_v20 = vpop.f32.mrf.mxu2  ;;  %v3266_v56 = vpop.f32.mrf.mxu0 }
 0x343   : > { %v3411_v9 = vadd.f32 %v3410_v20, %v3338_v58  ;;  %v3483_v3 = vpop.f32.mrf.mxu3  ;;  %v3267_v22 = vadd.f32 %v3266_v56, %v8798_v8  ;;  %v3339_v0 = vpop.f32.mrf.mxu1  ;;  %v10893_v58 = vld [vmem:[#allocation46_spill] sm:$0xff]  ;;  %v6958_v20 = vld [vmem:[%s10515_s1 + $0x75c] sm:$0xf] }
 0x345   : > { %v8875_v28 = vadd.f32 %v3483_v3, %v3411_v9  ;;  %v3340_v36 = vadd.f32 %v3339_v0, %v3267_v22  ;;  %v6445_v9 = vld [vmem:[%s10515_s1 + $0x770] sm:$0xf0] }
 0x34a   : > { %v3412_v46 = vpop.f32.mrf.mxu2  ;;  %v3269_v27 = vpop.f32.mrf.mxu0 }
 0x34b   : > { %v3413_v29 = vadd.f32 %v3412_v46, %v3340_v36  ;;  %v3485_v47 = vpop.f32.mrf.mxu3  ;;  %v3270_v7 = vadd.f32 %v3269_v27, %v8798_v8  ;;  %v3342_v45 = vpop.f32.mrf.mxu1 }
 0x34d   : > { %v8878_v24 = vadd.f32 %v3485_v47, %v3413_v29  ;;  %v3343_v52 = vadd.f32 %v3342_v45, %v3270_v7  ;;  %3308 = vmatmul.bf16.gmra.mxu0 %v10892_v43  ;;  %v7006_v45 = vld [vmem:[%s10515_s1 + $0x8dc] sm:$0xf]  ;;  %v6448_v7 = vor.u32 %v6958_v20, %v6445_v9  ;;  %v6637_v29 = vld [vmem:[%s10515_s1 + $0x8f0] sm:$0xf0] }
 0x34e   : > { %3381 = vmatmul.bf16.gmra.mxu1 %v10893_v58  ;;  %v6640_v56 = vor.u32 %v7006_v45, %v6637_v29  ;;  %v6862_v20 = vld [vmem:[%s10515_s1 + $0x45c] sm:$0xf]  ;;  %v6061_v9 = vld [vmem:[%s10515_s1 + $0x470] sm:$0xf0] }
 0x34f   : > { %3454 = vmatmul.bf16.gmra.mxu2 %v10843_v37  ;;  %v6064_v45 = vor.u32 %v6862_v20, %v6061_v9  ;;  %v10894_v20 = vld [vmem:[#allocation49_spill] sm:$0xff]  ;;  %v10895_v9 = vld [vmem:[#allocation50_spill] sm:$0xff] }
 0x350   : > { %3527 = vmatmul.bf16.gmra.mxu3 %v10844_v53  ;;  %3975 = vmatpush.bf16.msrb.mxu2 %v6448_v7  ;;  %v6253_v7 = vld [vmem:[%s10515_s1 + $0x5f0] sm:$0xf0] }
 0x351   : > { %4048 = vmatpush.bf16.msrb.mxu3 %v6640_v56  ;;  %3829 = vmatpush.bf16.msrb.mxu0 %v6064_v45 }
 0x352   : > { %v3415_v3 = vpop.f32.mrf.mxu2  ;;  %v3271_v36 = vpop.f32.mrf.mxu0 }
 0x353   : > { %v3416_v22 = vadd.f32 %v3415_v3, %v3343_v52  ;;  %v3488_v0 = vpop.f32.mrf.mxu3  ;;  %v3272_v46 = vadd.f32 %v3271_v36, %v8798_v8  ;;  %v3344_v47 = vpop.f32.mrf.mxu1  ;;  %v6910_v52 = vld [vmem:[%s10515_s1 + $0x5dc] sm:$0xf] }
 0x354   : > { %v6256_v29 = vor.u32 %v6910_v52, %v6253_v7 }
 0x355   : > { %v8897_v27 = vadd.f32 %v3488_v0, %v3416_v22  ;;  %v3345_v53 = vadd.f32 %v3344_v47, %v3272_v46 }
 0x356   : > { %3902 = vmatpush.bf16.msrb.mxu1 %v6256_v29 }
 0x35a   : > { %v3417_v3 = vpop.f32.mrf.mxu2  ;;  %v3274_v0 = vpop.f32.mrf.mxu0 }
 0x35b   : > { %v3418_v56 = vadd.f32 %v3417_v3, %v3345_v53  ;;  %v3490_v22 = vpop.f32.mrf.mxu3  ;;  %v3275_v36 = vadd.f32 %v3274_v0, %v8798_v8  ;;  %v3347_v37 = vpop.f32.mrf.mxu1 }
 0x35d   : > { %v8912_v46 = vadd.f32 %v3490_v22, %v3418_v56  ;;  %v3348_v47 = vadd.f32 %v3347_v37, %v3275_v36  ;;  %3313 = vmatmul.bf16.gmra.mxu0 %v10894_v20  ;;  %v6952_v37 = vld [vmem:[%s10515_s1 + $0x72c] sm:$0xf]  ;;  %v6421_v22 = vld [vmem:[%s10515_s1 + $0x740] sm:$0xf0] }
 0x35e   : > { %3386 = vmatmul.bf16.gmra.mxu1 %v10895_v9  ;;  %v7000_v36 = vld [vmem:[%s10515_s1 + $0x8ac] sm:$0xf] }
 0x35f   : > { %3459 = vmatmul.bf16.gmra.mxu2 %v10845_v62 }
 0x360   : > { %3532 = vmatmul.bf16.gmra.mxu3 %v10847_v59 }
 0x362   : > { %v3420_v45 = vpop.f32.mrf.mxu2  ;;  %v3276_v53 = vpop.f32.mrf.mxu0 }
 0x363   : > { %v3421_v52 = vadd.f32 %v3420_v45, %v3348_v47  ;;  %v3493_v7 = vpop.f32.mrf.mxu3  ;;  %v3277_v29 = vadd.f32 %v3276_v53, %v8798_v8  ;;  %v3349_v3 = vpop.f32.mrf.mxu1  ;;  %v6424_v47 = vor.u32 %v6952_v37, %v6421_v22  ;;  %v6613_v45 = vld [vmem:[%s10515_s1 + $0x8c0] sm:$0xf0]  ;;  %v6856_v37 = vld [vmem:[%s10515_s1 + $0x42c] sm:$0xf] }
 0x364   : > { %v6037_v22 = vld [vmem:[%s10515_s1 + $0x440] sm:$0xf0] }
 0x365   : > { %v8919_v0 = vadd.f32 %v3493_v7, %v3421_v52  ;;  %v3350_v56 = vadd.f32 %v3349_v3, %v3277_v29  ;;  %v6616_v52 = vor.u32 %v7000_v36, %v6613_v45  ;;  %3976 = vmatpush.bf16.msrb.mxu2 %v6424_v47  ;;  %v10897_v36 = vld [vmem:[#allocation54_spill] sm:$0xff]  ;;  %v6040_v47 = vor.u32 %v6856_v37, %v6037_v22 }
 0x367   : > { %4049 = vmatpush.bf16.msrb.mxu3 %v6616_v52  ;;  %3830 = vmatpush.bf16.msrb.mxu0 %v6040_v47 }
 0x36a   : > { %v3422_v7 = vpop.f32.mrf.mxu2  ;;  %v3279_v3 = vpop.f32.mrf.mxu0 }
 0x36b   : > { %v3423_v53 = vadd.f32 %v3422_v7, %v3350_v56  ;;  %v3495_v29 = vpop.f32.mrf.mxu3  ;;  %v3280_v59 = vadd.f32 %v3279_v3, %v8798_v8  ;;  %v3352_v62 = vpop.f32.mrf.mxu1  ;;  %v6904_v56 = vld [vmem:[%s10515_s1 + $0x5ac] sm:$0xf] }
 0x36d   : > { %v8934_v63 = vadd.f32 %v3495_v29, %v3423_v53  ;;  %v3353_v11 = vadd.f32 %v3352_v62, %v3280_v59  ;;  %3545 = vmatmul.bf16.vlgmr.msra.gmra.mxu0 %v10896_v40  ;;  %v6229_v62 = vld [vmem:[%s10515_s1 + $0x5c0] sm:$0xf0] }
 0x36e   : > { %3618 = vmatmul.bf16.vlgmr.msra.gmra.mxu1 %v10897_v36  ;;  %v6232_v59 = vor.u32 %v6904_v56, %v6229_v62  ;;  %v10898_v62 = vld [vmem:[#allocation55_spill] sm:$0xff] }
 0x36f   : > { %3691 = vmatmul.bf16.vlgmr.msra.gmra.mxu2 %v10848_v49 }
 0x370   : > { %3764 = vmatmul.bf16.vlgmr.msra.gmra.mxu3 %v10849_v31  ;;  %3903 = vmatpush.bf16.msrb.mxu1 %v6232_v59 }
 0x372   : > { %v3425_v45 = vpop.f32.mrf.mxu2  ;;  %v3281_v53 = vpop.f32.mrf.mxu0 }
 0x373   : > { %v3426_v52 = vadd.f32 %v3425_v45, %v3353_v11  ;;  %v3498_v7 = vpop.f32.mrf.mxu3  ;;  %v3282_v29 = vadd.f32 %v3281_v53, %v8798_v8  ;;  %v3354_v3 = vpop.f32.mrf.mxu1  ;;  %v10899_v11 = vld [vmem:[#allocation56_spill] sm:$0xff] }
 0x375   : > { %v8953_v25 = vadd.f32 %v3498_v7, %v3426_v52  ;;  %v3355_v49 = vadd.f32 %v3354_v3, %v3282_v29 }
 0x37a   : > { %v3427_v37 = vpop.f32.mrf.mxu2  ;;  %v3284_v15 = vpop.f32.mrf.mxu0 }
 0x37b   : > { %v3428_v22 = vadd.f32 %v3427_v37, %v3355_v49  ;;  %v3500_v61 = vpop.f32.mrf.mxu3  ;;  %v3285_v14 = vadd.f32 %v3284_v15, %v8798_v8  ;;  %v3357_v31 = vpop.f32.mrf.mxu1  ;;  %v6589_v37 = vld [vmem:[%s10515_s1 + $0x890] sm:$0xf0] }
 0x37d   : > { %v8956_v56 = vadd.f32 %v3500_v61, %v3428_v22  ;;  %v3358_v47 = vadd.f32 %v3357_v31, %v3285_v14  ;;  %3550 = vmatmul.bf16.gmra.mxu0 %v10898_v62  ;;  %v6946_v14 = vld [vmem:[%s10515_s1 + $0x6fc] sm:$0xf]  ;;  %v6397_v61 = vld [vmem:[%s10515_s1 + $0x710] sm:$0xf0] }
 0x37e   : > { %3623 = vmatmul.bf16.gmra.mxu1 %v10899_v11  ;;  %v6994_v31 = vld [vmem:[%s10515_s1 + $0x87c] sm:$0xf]  ;;  %v6400_v3 = vor.u32 %v6946_v14, %v6397_v61  ;;  %v10901_v11 = vld [vmem:[#allocation58_spill] sm:$0xff] }
 0x37f   : > { %3696 = vmatmul.bf16.gmra.mxu2 %v10850_v33  ;;  %v6850_v22 = vld [vmem:[%s10515_s1 + $0x3fc] sm:$0xf] }
 0x380   : > { %3769 = vmatmul.bf16.gmra.mxu3 %v10851_v23  ;;  %3977 = vmatpush.bf16.msrb.mxu2 %v6400_v3  ;;  %v10900_v33 = vld [vmem:[#allocation57_spill] sm:$0xff] }
 0x382   : > { %v3430_v59 = vpop.f32.mrf.mxu2  ;;  %v3286_v49 = vpop.f32.mrf.mxu0 }
 0x383   : > { %v3431_v45 = vadd.f32 %v3430_v59, %v3358_v47  ;;  %v3503_v52 = vpop.f32.mrf.mxu3  ;;  %v3287_v7 = vadd.f32 %v3286_v49, %v8798_v8  ;;  %v3359_v53 = vpop.f32.mrf.mxu1  ;;  %v6013_v47 = vld [vmem:[%s10515_s1 + $0x410] sm:$0xf0]  ;;  %v6592_v59 = vor.u32 %v6994_v31, %v6589_v37 }
 0x384   : > { %v6205_v49 = vld [vmem:[%s10515_s1 + $0x590] sm:$0xf0] }
 0x385   : > { %v8963_v15 = vadd.f32 %v3503_v52, %v3431_v45  ;;  %v3360_v29 = vadd.f32 %v3359_v53, %v3287_v7  ;;  %v6016_v45 = vor.u32 %v6850_v22, %v6013_v47  ;;  %v6898_v52 = vld [vmem:[%s10515_s1 + $0x57c] sm:$0xf]  ;;  %4050 = vmatpush.bf16.msrb.mxu3 %v6592_v59 }
 0x386   : > { %v6208_v7 = vor.u32 %v6898_v52, %v6205_v49 }
 0x387   : > { %3831 = vmatpush.bf16.msrb.mxu0 %v6016_v45 }
 0x388   : > { %3904 = vmatpush.bf16.msrb.mxu1 %v6208_v7 }
 0x38a   : > { %v3432_v53 = vpop.f32.mrf.mxu2  ;;  %v3289_v23 = vpop.f32.mrf.mxu0 }
 0x38b   : > { %v3433_v14 = vadd.f32 %v3432_v53, %v3360_v29  ;;  %v3505_v61 = vpop.f32.mrf.mxu3  ;;  %v3290_v31 = vadd.f32 %v3289_v23, %v8798_v8  ;;  %v3362_v37 = vpop.f32.mrf.mxu1 }
 0x38d   : > { %v8990_v22 = vadd.f32 %v3505_v61, %v3433_v14  ;;  %v3363_v47 = vadd.f32 %v3362_v37, %v3290_v31  ;;  %3555 = vmatmul.bf16.gmra.mxu0 %v10900_v33  ;;  %v10902_v33 = vld [vmem:[#allocation59_spill] sm:$0xff] }
 0x38e   : > { %3628 = vmatmul.bf16.gmra.mxu1 %v10901_v11 }
 0x38f   : > { %3701 = vmatmul.bf16.gmra.mxu2 %v10852_v13 }
 0x390   : > { %3774 = vmatmul.bf16.gmra.mxu3 %v10854_v50 }
 0x392   : > { %v3435_v3 = vpop.f32.mrf.mxu2  ;;  %v3291_v29 = vpop.f32.mrf.mxu0 }
 0x393   : > { %v3436_v59 = vadd.f32 %v3435_v3, %v3363_v47  ;;  %v3508_v45 = vpop.f32.mrf.mxu3  ;;  %v3292_v52 = vadd.f32 %v3291_v29, %v8798_v8  ;;  %v3364_v49 = vpop.f32.mrf.mxu1  ;;  %v6940_v47 = vld [vmem:[%s10515_s1 + $0x6cc] sm:$0xf]  ;;  %v6373_v3 = vld [vmem:[%s10515_s1 + $0x6e0] sm:$0xf0] }
 0x394   : > { %v6376_v29 = vor.u32 %v6940_v47, %v6373_v3 }
 0x395   : > { %v8997_v23 = vadd.f32 %v3508_v45, %v3436_v59  ;;  %v3365_v7 = vadd.f32 %v3364_v49, %v3292_v52  ;;  %v6988_v59 = vld [vmem:[%s10515_s1 + $0x84c] sm:$0xf]  ;;  %v10903_v45 = vld [vmem:[#allocation60_spill] sm:$0xff] }
 0x396   : > { %v6844_v49 = vld [vmem:[%s10515_s1 + $0x3cc] sm:$0xf]  ;;  %3978 = vmatpush.bf16.msrb.mxu2 %v6376_v29  ;;  %v6181_v29 = vld [vmem:[%s10515_s1 + $0x560] sm:$0xf0] }
 0x39a   : > { %v3437_v53 = vpop.f32.mrf.mxu2  ;;  %v3294_v31 = vpop.f32.mrf.mxu0 }
 0x39b   : > { %v3438_v14 = vadd.f32 %v3437_v53, %v3365_v7  ;;  %v3510_v61 = vpop.f32.mrf.mxu3  ;;  %v3295_v37 = vadd.f32 %v3294_v31, %v8798_v8  ;;  %v3367_v11 = vpop.f32.mrf.mxu1  ;;  %v5989_v7 = vld [vmem:[%s10515_s1 + $0x3e0] sm:$0xf0] }
 0x39c   : > { %v5992_v53 = vor.u32 %v6844_v49, %v5989_v7 }
 0x39d   : > { %v9000_v13 = vadd.f32 %v3510_v61, %v3438_v14  ;;  %v3368_v50 = vadd.f32 %v3367_v11, %v3295_v37  ;;  %3560 = vmatmul.bf16.gmra.mxu0 %v10902_v33  ;;  %v6565_v11 = vld [vmem:[%s10515_s1 + $0x860] sm:$0xf0] }
 0x39e   : > { %3633 = vmatmul.bf16.gmra.mxu1 %v10903_v45  ;;  %v6568_v52 = vor.u32 %v6988_v59, %v6565_v11  ;;  %3832 = vmatpush.bf16.msrb.mxu0 %v5992_v53  ;;  %v6892_v11 = vld [vmem:[%s10515_s1 + $0x54c] sm:$0xf] }
 0x39f   : > { %3706 = vmatmul.bf16.gmra.mxu2 %v10857_v41  ;;  %v6184_v7 = vor.u32 %v6892_v11, %v6181_v29  ;;  %v10904_v41 = vld [vmem:[#allocation62_spill] sm:$0xff]  ;;  %v10905_v45 = vld [vmem:[#allocation63_spill] sm:$0xff] }
 0x3a0   : > { %3779 = vmatmul.bf16.gmra.mxu3 %v10859_v19 }
 0x3a1   : > { %4051 = vmatpush.bf16.msrb.mxu3 %v6568_v52  ;;  %3905 = vmatpush.bf16.msrb.mxu1 %v6184_v7 }
 0x3a2   : > { %v3440_v14 = vpop.f32.mrf.mxu2  ;;  %v3296_v37 = vpop.f32.mrf.mxu0 }
 0x3a3   : > { %v3441_v61 = vadd.f32 %v3440_v14, %v3368_v50  ;;  %v3513_v31 = vpop.f32.mrf.mxu3  ;;  %v3297_v47 = vadd.f32 %v3296_v37, %v8798_v8  ;;  %v3369_v3 = vpop.f32.mrf.mxu1 }
 0x3a5   : > { %v9025_v59 = vadd.f32 %v3513_v31, %v3441_v61  ;;  %v3370_v49 = vadd.f32 %v3369_v3, %v3297_v47 }
 0x3aa   : > { %v3442_v50 = vpop.f32.mrf.mxu2  ;;  %v3299_v53 = vpop.f32.mrf.mxu0 }
 0x3ab   : > { %v3443_v52 = vadd.f32 %v3442_v50, %v3370_v49  ;;  %v3515_v14 = vpop.f32.mrf.mxu3  ;;  %v3300_v37 = vadd.f32 %v3299_v53, %v8798_v8  ;;  %v3372_v19 = vpop.f32.mrf.mxu1  ;;  %v6982_v53 = vld [vmem:[%s10515_s1 + $0x81c] sm:$0xf] }
 0x3ad   : > { %v9034_v61 = vadd.f32 %v3515_v14, %v3443_v52  ;;  %v3373_v31 = vadd.f32 %v3372_v19, %v3300_v37  ;;  %3565 = vmatmul.bf16.gmra.mxu0 %v10904_v41  ;;  %v6934_v19 = vld [vmem:[%s10515_s1 + $0x69c] sm:$0xf]  ;;  %v6349_v14 = vld [vmem:[%s10515_s1 + $0x6b0] sm:$0xf0] }
 0x3ae   : > { %3638 = vmatmul.bf16.gmra.mxu1 %v10905_v45  ;;  %v6352_v37 = vor.u32 %v6934_v19, %v6349_v14  ;;  %v6838_v19 = vld [vmem:[%s10515_s1 + $0x39c] sm:$0xf]  ;;  %v5965_v14 = vld [vmem:[%s10515_s1 + $0x3b0] sm:$0xf0] }
 0x3af   : > { %3711 = vmatmul.bf16.gmra.mxu2 %v10863_v5 }
 0x3b0   : > { %3784 = vmatmul.bf16.gmra.mxu3 %v10864_v48  ;;  %3979 = vmatpush.bf16.msrb.mxu2 %v6352_v37  ;;  %v10908_v37 = vld [vmem:[#allocation64_spill] sm:$0xff] }
 0x3b2   : > { %v3445_v47 = vpop.f32.mrf.mxu2  ;;  %v3301_v29 = vpop.f32.mrf.mxu0 }
 0x3b3   : > { %v3446_v3 = vadd.f32 %v3445_v47, %v3373_v31  ;;  %v3518_v11 = vpop.f32.mrf.mxu3  ;;  %v3302_v49 = vadd.f32 %v3301_v29, %v8798_v8  ;;  %v3374_v7 = vpop.f32.mrf.mxu1  ;;  %v6541_v31 = vld [vmem:[%s10515_s1 + $0x830] sm:$0xf0] }
 0x3b4   : > { %v6544_v47 = vor.u32 %v6982_v53, %v6541_v31  ;;  %v5968_v31 = vor.u32 %v6838_v19, %v5965_v14 }
 0x3b5   : > { %v9041_v50 = vadd.f32 %v3518_v11, %v3446_v3  ;;  %v3375_v52 = vadd.f32 %v3374_v7, %v3302_v49 }
 0x3b6   : > { %4052 = vmatpush.bf16.msrb.mxu3 %v6544_v47  ;;  %v6157_v47 = vld [vmem:[%s10515_s1 + $0x530] sm:$0xf0]  ;;  %3833 = vmatpush.bf16.msrb.mxu0 %v5968_v31 }
 0x3b7   : > { %10906 = vst [vmem:[#allocation72_spill] sm:$0xff] %v9041_v50 }
 0x3ba   : > { %v3447_v3 = vpop.f32.mrf.mxu2  ;;  %v3304_v49 = vpop.f32.mrf.mxu0 }
 0x3bb   : > { %v3448_v11 = vadd.f32 %v3447_v3, %v3375_v52  ;;  %v3520_v29 = vpop.f32.mrf.mxu3  ;;  %v3305_v7 = vadd.f32 %v3304_v49, %v8798_v8  ;;  %v3377_v48 = vpop.f32.mrf.mxu1  ;;  %v6886_v52 = vld [vmem:[%s10515_s1 + $0x51c] sm:$0xf] }
 0x3bc   : > { %v10909_v3 = vld [vmem:[#allocation65_spill] sm:$0xff] }
 0x3bd   : > { %v9056_v5 = vadd.f32 %v3520_v29, %v3448_v11  ;;  %v3378_v53 = vadd.f32 %v3377_v48, %v3305_v7  ;;  %3570 = vmatmul.bf16.gmra.mxu0 %v10908_v37  ;;  %v6160_v11 = vor.u32 %v6886_v52, %v6157_v47 }
 0x3be   : > { %3643 = vmatmul.bf16.gmra.mxu1 %v10909_v3 }
 0x3bf   : > { %10907 = vst [vmem:[#allocation73_spill] sm:$0xff] %v9056_v5  ;;  %3716 = vmatmul.bf16.gmra.mxu2 %v10868_v44  ;;  %3906 = vmatpush.bf16.msrb.mxu1 %v6160_v11  ;;  %v10910_v11 = vld [vmem:[#allocation66_spill] sm:$0xff]  ;;  %v10912_v44 = vld [vmem:[#allocation68_spill] sm:$0xff] }
 0x3c0   : > { %3789 = vmatmul.bf16.gmra.mxu3 %v10870_v51 }
 0x3c2   : > { %v3450_v48 = vpop.f32.mrf.mxu2  ;;  %v3306_v7 = vpop.f32.mrf.mxu0 }
 0x3c3   : > { %v3451_v29 = vadd.f32 %v3450_v48, %v3378_v53  ;;  %v3523_v49 = vpop.f32.mrf.mxu3  ;;  %v3307_v19 = vadd.f32 %v3306_v7, %v8798_v8  ;;  %v3379_v14 = vpop.f32.mrf.mxu1  ;;  %v10911_v53 = vld [vmem:[#allocation67_spill] sm:$0xff] }
 0x3c5   : > { %v9075_v37 = vadd.f32 %v3523_v49, %v3451_v29  ;;  %v3380_v5 = vadd.f32 %v3379_v14, %v3307_v19 }
 0x3ca   : > { %v3452_v45 = vpop.f32.mrf.mxu2  ;;  %v3309_v50 = vpop.f32.mrf.mxu0 }
 0x3cb   : > { %v3453_v41 = vadd.f32 %v3452_v45, %v3380_v5  ;;  %v3525_v3 = vpop.f32.mrf.mxu3  ;;  %v3310_v52 = vadd.f32 %v3309_v50, %v8798_v8  ;;  %v3382_v47 = vpop.f32.mrf.mxu1  ;;  %v6928_v5 = vld [vmem:[%s10515_s1 + $0x66c] sm:$0xf]  ;;  %v6325_v45 = vld [vmem:[%s10515_s1 + $0x680] sm:$0xf0] }
 0x3cc   : > { %v6328_v50 = vor.u32 %v6928_v5, %v6325_v45  ;;  %v6832_v5 = vld [vmem:[%s10515_s1 + $0x36c] sm:$0xf]  ;;  %v5941_v45 = vld [vmem:[%s10515_s1 + $0x380] sm:$0xf0] }
 0x3cd   : > { %v9078_v51 = vadd.f32 %v3525_v3, %v3453_v41  ;;  %v3383_v31 = vadd.f32 %v3382_v47, %v3310_v52  ;;  %3575 = vmatmul.bf16.gmra.mxu0 %v10910_v11  ;;  %v6976_v41 = vld [vmem:[%s10515_s1 + $0x7ec] sm:$0xf]  ;;  %v6517_v3 = vld [vmem:[%s10515_s1 + $0x800] sm:$0xf0] }
 0x3ce   : > { %3648 = vmatmul.bf16.gmra.mxu1 %v10911_v53  ;;  %v6520_v29 = vor.u32 %v6976_v41, %v6517_v3  ;;  %3980 = vmatpush.bf16.msrb.mxu2 %v6328_v50  ;;  %v5944_v41 = vor.u32 %v6832_v5, %v5941_v45  ;;  %v6133_v50 = vld [vmem:[%s10515_s1 + $0x500] sm:$0xf0]  ;;  %v10913_v5 = vld [vmem:[#allocation69_spill] sm:$0xff] }
 0x3cf   : > { %3721 = vmatmul.bf16.gmra.mxu2 %v10874_v60 }
 0x3d0   : > { %3794 = vmatmul.bf16.gmra.mxu3 %v10875_v42  ;;  %3834 = vmatpush.bf16.msrb.mxu0 %v5944_v41 }
 0x3d1   : > { %4053 = vmatpush.bf16.msrb.mxu3 %v6520_v29 }
 0x3d2   : > { %v3455_v48 = vpop.f32.mrf.mxu2  ;;  %v3311_v19 = vpop.f32.mrf.mxu0 }
 0x3d3   : > { %v3456_v49 = vadd.f32 %v3455_v48, %v3383_v31  ;;  %v3528_v7 = vpop.f32.mrf.mxu3  ;;  %v3312_v14 = vadd.f32 %v3311_v19, %v8798_v8  ;;  %v3384_v52 = vpop.f32.mrf.mxu1  ;;  %v6880_v31 = vld [vmem:[%s10515_s1 + $0x4ec] sm:$0xf] }
 0x3d4   : > { %v6136_v3 = vor.u32 %v6880_v31, %v6133_v50 }
 0x3d5   : > { %v9097_v47 = vadd.f32 %v3528_v7, %v3456_v49  ;;  %v3385_v42 = vadd.f32 %v3384_v52, %v3312_v14 }
 0x3d6   : > { %3907 = vmatpush.bf16.msrb.mxu1 %v6136_v3 }
 0x3da   : > { %v3457_v48 = vpop.f32.mrf.mxu2  ;;  %v3314_v7 = vpop.f32.mrf.mxu0 }
 0x3db   : > { %v3458_v29 = vadd.f32 %v3457_v48, %v3385_v42  ;;  %v3530_v49 = vpop.f32.mrf.mxu3  ;;  %v3315_v19 = vadd.f32 %v3314_v7, %v8798_v8  ;;  %v3387_v14 = vpop.f32.mrf.mxu1 }
 0x3dd   : > { %v9112_v52 = vadd.f32 %v3530_v49, %v3458_v29  ;;  %v3388_v60 = vadd.f32 %v3387_v14, %v3315_v19  ;;  %3580 = vmatmul.bf16.gmra.mxu0 %v10912_v44  ;;  %v6922_v19 = vld [vmem:[%s10515_s1 + $0x63c] sm:$0xf]  ;;  %v6301_v14 = vld [vmem:[%s10515_s1 + $0x650] sm:$0xf0] }
 0x3de   : > { %3653 = vmatmul.bf16.gmra.mxu1 %v10913_v5 }
 0x3df   : > { %3726 = vmatmul.bf16.gmra.mxu2 %v10879_v18 }
 0x3e0   : > { %3799 = vmatmul.bf16.gmra.mxu3 %v10881_v17 }
 0x3e2   : > { %v3460_v45 = vpop.f32.mrf.mxu2  ;;  %v3316_v42 = vpop.f32.mrf.mxu0 }
 0x3e3   : > { %v3461_v31 = vadd.f32 %v3460_v45, %v3388_v60  ;;  %v3533_v41 = vpop.f32.mrf.mxu3  ;;  %v3389_v50 = vpop.f32.mrf.mxu1  ;;  %v6970_v60 = vld [vmem:[%s10515_s1 + $0x7bc] sm:$0xf] }
 0x3e4   : > { %v6826_v42 = vld [vmem:[%s10515_s1 + $0x33c] sm:$0xf]  ;;  %v5917_v50 = vld [vmem:[%s10515_s1 + $0x350] sm:$0xf0] }
 0x3e5   : > { %v9118_v3 = vadd.f32 %v3533_v41, %v3461_v31  ;;  %v10915_v31 = vld [vmem:[#allocation70_spill] sm:$0xff]  ;;  %v6304_v41 = vor.u32 %v6922_v19, %v6301_v14  ;;  %v6109_v19 = vld [vmem:[%s10515_s1 + $0x4d0] sm:$0xf0] }
 0x3e7   : > { %3981 = vmatpush.bf16.msrb.mxu2 %v6304_v41 }
 0x3ea   : > { %v3462_v8 = vpop.f32.mrf.mxu2  ;;  %v3546_v29 = vpop.f32.mrf.mxu0 }
 0x3eb   : > { %v3535_v48 = vpop.f32.mrf.mxu3  ;;  %v3547_v49 = vadd.f32 %v3546_v29, %v8831_v21  ;;  %v3619_v7 = vpop.f32.mrf.mxu1  ;;  %v6493_v21 = vld [vmem:[%s10515_s1 + $0x7d0] sm:$0xf0]  ;;  %v10916_v8 = vld [vmem:[#allocation71_spill] sm:$0xff] }
 0x3ec   : > { %v9145_v48 = vperm.slane %v8795_v10, 3  ;;  %v6496_v29 = vor.u32 %v6970_v60, %v6493_v21 }
 0x3ed   : > { %v9130_v45 = vadd.f32 %v3619_v7, %v3547_v49  ;;  %3585 = vmatmul.bf16.gmra.mxu0 %v10915_v31  ;;  %v5920_v49 = vor.u32 %v6826_v42, %v5917_v50  ;;  %v6874_v7 = vld [vmem:[%s10515_s1 + $0x4bc] sm:$0xf] }
 0x3ee   : > { %3658 = vmatmul.bf16.gmra.mxu1 %v10916_v8  ;;  %4054 = vmatpush.bf16.msrb.mxu3 %v6496_v29  ;;  %v6112_v14 = vor.u32 %v6874_v7, %v6109_v19 }
 0x3ef   : > { %10914 = vst [vmem:[#allocation74_spill] sm:$0xff] %v9130_v45  ;;  %3731 = vmatmul.bf16.gmra.mxu2 %v10884_v4  ;;  %3835 = vmatpush.bf16.msrb.mxu0 %v5920_v49 }
 0x3f0   : > { %3804 = vmatmul.bf16.gmra.mxu3 %v10885_v39  ;;  %3908 = vmatpush.bf16.msrb.mxu1 %v6112_v14 }
 0x3f2   : > { %v3692_v4 = vpop.f32.mrf.mxu2  ;;  %v3548_v60 = vpop.f32.mrf.mxu0 }
 0x3f3   : > { %v3693_v10 = vadd.f32 %v3692_v4, %v9145_v48  ;;  %v3765_v17 = vpop.f32.mrf.mxu3  ;;  %v3549_v21 = vadd.f32 %v3548_v60, %v8834_v35  ;;  %v3621_v41 = vpop.f32.mrf.mxu1  ;;  %v10917_v35 = vld [vmem:[#allocation75_spill] sm:$0xff] }
 0x3f5   : > { %v9156_v42 = vadd.f32 %v3765_v17, %v3693_v10  ;;  %v9158_v50 = vadd.f32 %v3621_v41, %v3549_v21  ;;  %v6916_v21 = vld [vmem:[%s10515_s1 + $0x60c] sm:$0xf]  ;;  %v6277_v41 = vld [vmem:[%s10515_s1 + $0x620] sm:$0xf0] }
 0x3fa   : > { %v3694_v39 = vpop.f32.mrf.mxu2  ;;  %v3551_v29 = vpop.f32.mrf.mxu0 }
 0x3fb   : > { %v3695_v18 = vadd.f32 %v3694_v39, %v9145_v48  ;;  %v3767_v45 = vpop.f32.mrf.mxu3  ;;  %v3552_v49 = vadd.f32 %v3551_v29, %v8841_v2  ;;  %v3624_v7 = vpop.f32.mrf.mxu1  ;;  %v6964_v29 = vld [vmem:[%s10515_s1 + $0x78c] sm:$0xf] }
 0x3fd   : > { %v9162_v19 = vadd.f32 %v3767_v45, %v3695_v18  ;;  %v9164_v4 = vadd.f32 %v3624_v7, %v3552_v49  ;;  %3590 = vmatmul.bf16.gmra.mxu0 %v10837_v12  ;;  %v6280_v49 = vor.u32 %v6916_v21, %v6277_v41  ;;  %v6820_v7 = vld [vmem:[%s10515_s1 + $0x30c] sm:$0xf] }
 0x3fe   : > { %3663 = vmatmul.bf16.gmra.mxu1 %v10917_v35 }
 0x3ff   : > { %3736 = vmatmul.bf16.gmra.mxu2 %v10888_v38 }
 0x400   : > { %3809 = vmatmul.bf16.gmra.mxu3 %v10889_v30  ;;  %3982 = vmatpush.bf16.msrb.mxu2 %v6280_v49 }
 0x402   : > { %v3697_v17 = vpop.f32.mrf.mxu2  ;;  %v3553_v10 = vpop.f32.mrf.mxu0 }
 0x403   : > { %v3698_v39 = vadd.f32 %v3697_v17, %v9145_v48  ;;  %v3770_v14 = vpop.f32.mrf.mxu3  ;;  %v3554_v2 = vadd.f32 %v3553_v10, %v8862_v55  ;;  %v3626_v60 = vpop.f32.mrf.mxu1  ;;  %v6469_v55 = vld [vmem:[%s10515_s1 + $0x7a0] sm:$0xf0] }
 0x404   : > { %v5893_v17 = vld [vmem:[%s10515_s1 + $0x320] sm:$0xf0] }
 0x405   : > { %v9172_v18 = vadd.f32 %v3770_v14, %v3698_v39  ;;  %v9174_v45 = vadd.f32 %v3626_v60, %v3554_v2  ;;  %v6472_v39 = vor.u32 %v6964_v29, %v6469_v55  ;;  %v5896_v14 = vor.u32 %v6820_v7, %v5893_v17  ;;  %v6085_v29 = vld [vmem:[%s10515_s1 + $0x4a0] sm:$0xf0]  ;;  %v10921_v17 = vld [vmem:[#allocation79_spill] sm:$0xff] }
 0x406   : > { %v10920_v55 = vld [vmem:[#allocation78_spill] sm:$0xff] }
 0x407   : > { %10918 = vst [vmem:[#allocation76_spill] sm:$0xff] %v9174_v45  ;;  %4055 = vmatpush.bf16.msrb.mxu3 %v6472_v39  ;;  %3836 = vmatpush.bf16.msrb.mxu0 %v5896_v14  ;;  %v6868_v45 = vld [vmem:[%s10515_s1 + $0x48c] sm:$0xf] }
 0x408   : > { %v6088_v7 = vor.u32 %v6868_v45, %v6085_v29 }
 0x40a   : > { %v3699_v10 = vpop.f32.mrf.mxu2  ;;  %v3556_v21 = vpop.f32.mrf.mxu0  ;;  %3909 = vmatpush.bf16.msrb.mxu1 %v6088_v7 }
 0x40b   : > { %v3700_v2 = vadd.f32 %v3699_v10, %v9145_v48  ;;  %v3772_v60 = vpop.f32.mrf.mxu3  ;;  %v3557_v41 = vadd.f32 %v3556_v21, %v8875_v28  ;;  %v3629_v30 = vpop.f32.mrf.mxu1 }
 0x40d   : > { %v9196_v38 = vadd.f32 %v3772_v60, %v3700_v2  ;;  %v9204_v49 = vadd.f32 %v3629_v30, %v3557_v41  ;;  %3595 = vmatmul.bf16.gmra.mxu0 %v10920_v55 }
 0x40e   : > { %3668 = vmatmul.bf16.gmra.mxu1 %v10921_v17 }
 0x40f   : > { %10919 = vst [vmem:[#allocation77_spill] sm:$0xff] %v9204_v49  ;;  %3741 = vmatmul.bf16.gmra.mxu2 %v10890_v1 }
 0x410   : > { %3814 = vmatmul.bf16.gmra.mxu3 %v10891_v34 }
 0x412   : > { %v3702_v28 = vpop.f32.mrf.mxu2  ;;  %v3558_v10 = vpop.f32.mrf.mxu0 }
 0x413   : > { %v3703_v39 = vadd.f32 %v3702_v28, %v9145_v48  ;;  %v3775_v14 = vpop.f32.mrf.mxu3  ;;  %v3559_v2 = vadd.f32 %v3558_v10, %v8878_v24  ;;  %v3631_v60 = vpop.f32.mrf.mxu1  ;;  %v6067_v24 = vld [vmem:[%s10515_s1 + $0x460] sm:$0xf] }
 0x415   : > { %v9212_v30 = vadd.f32 %v3775_v14, %v3703_v39  ;;  %v9214_v21 = vadd.f32 %v3631_v60, %v3559_v2  ;;  %v6914_v39 = vld [vmem:[%s10515_s1 + $0x5f4] sm:$0xf0] }
 0x41a   : > { %v3704_v45 = vpop.f32.mrf.mxu2  ;;  %v3561_v1 = vpop.f32.mrf.mxu0 }
 0x41b   : > { %v3705_v41 = vadd.f32 %v3704_v45, %v9145_v48  ;;  %v3777_v29 = vpop.f32.mrf.mxu3  ;;  %v3562_v34 = vadd.f32 %v3561_v1, %v8897_v27  ;;  %v3634_v7 = vpop.f32.mrf.mxu1  ;;  %v6866_v1 = vld [vmem:[%s10515_s1 + $0x474] sm:$0xf0] }
 0x41c   : > { %v6068_v27 = vor.u32 %v6866_v1, %v6067_v24  ;;  %v5683_v24 = vld [vmem:[%s10515_s1 + $0x160] sm:$0xf]  ;;  %v6770_v1 = vld [vmem:[%s10515_s1 + $0x174] sm:$0xf0] }
 0x41d   : > { %v9218_v49 = vadd.f32 %v3777_v29, %v3705_v41  ;;  %v9220_v28 = vadd.f32 %v3634_v7, %v3562_v34  ;;  %3600 = vmatmul.bf16.gmra.mxu0 %v8157_v16  ;;  %v6259_v34 = vld [vmem:[%s10515_s1 + $0x5e0] sm:$0xf] }
 0x41e   : > { %3673 = vmatmul.bf16.gmra.mxu1 %v8160_v26  ;;  %v6260_v10 = vor.u32 %v6914_v39, %v6259_v34  ;;  %4267 = vmatpush.bf16.msra.mxu2 %v6068_v27  ;;  %v5684_v39 = vor.u32 %v6770_v1, %v5683_v24  ;;  %v5875_v27 = vld [vmem:[%s10515_s1 + $0x2e0] sm:$0xf] }
 0x41f   : > { %3746 = vmatmul.bf16.gmra.mxu2 %v10892_v43 }
 0x420   : > { %3819 = vmatmul.bf16.gmra.mxu3 %v10893_v58  ;;  %4121 = vmatpush.bf16.msra.mxu0 %v5684_v39 }
 0x421   : > { %4340 = vmatpush.bf16.msra.mxu3 %v6260_v10 }
 0x422   : > { %v3707_v14 = vpop.f32.mrf.mxu2  ;;  %v3563_v45 = vpop.f32.mrf.mxu0 }
 0x423   : > { %v3708_v2 = vadd.f32 %v3707_v14, %v9145_v48  ;;  %v3780_v60 = vpop.f32.mrf.mxu3  ;;  %v3564_v41 = vadd.f32 %v3563_v45, %v8912_v46  ;;  %v3636_v29 = vpop.f32.mrf.mxu1  ;;  %v6818_v46 = vld [vmem:[%s10515_s1 + $0x2f4] sm:$0xf0] }
 0x424   : > { %v5876_v14 = vor.u32 %v6818_v46, %v5875_v27 }
 0x425   : > { %v9240_v7 = vadd.f32 %v3780_v60, %v3708_v2  ;;  %v9248_v34 = vadd.f32 %v3636_v29, %v3564_v41 }
 0x426   : > { %4194 = vmatpush.bf16.msra.mxu1 %v5876_v14 }
 0x42a   : > { %v3709_v10 = vpop.f32.mrf.mxu2  ;;  %v3566_v45 = vpop.f32.mrf.mxu0 }
 0x42b   : > { %v3710_v2 = vadd.f32 %v3709_v10, %v9145_v48  ;;  %v3782_v60 = vpop.f32.mrf.mxu3  ;;  %v3567_v41 = vadd.f32 %v3566_v45, %v8919_v0  ;;  %v3639_v29 = vpop.f32.mrf.mxu1  ;;  %v6043_v45 = vld [vmem:[%s10515_s1 + $0x430] sm:$0xf] }
 0x42d   : > { %v9258_v24 = vadd.f32 %v3782_v60, %v3710_v2  ;;  %v9260_v1 = vadd.f32 %v3639_v29, %v3567_v41  ;;  %3605 = vmatmul.bf16.gmra.mxu0 %v8202_v32  ;;  %v6860_v41 = vld [vmem:[%s10515_s1 + $0x444] sm:$0xf0]  ;;  %v6235_v29 = vld [vmem:[%s10515_s1 + $0x5b0] sm:$0xf] }
 0x42e   : > { %3678 = vmatmul.bf16.gmra.mxu1 %v8205_v6 }
 0x42f   : > { %3751 = vmatmul.bf16.gmra.mxu2 %v10894_v20 }
 0x430   : > { %3824 = vmatmul.bf16.gmra.mxu3 %v10895_v9 }
 0x432   : > { %v3712_v39 = vpop.f32.mrf.mxu2  ;;  %v3568_v14 = vpop.f32.mrf.mxu0 }
 0x433   : > { %v3713_v27 = vadd.f32 %v3712_v39, %v9145_v48  ;;  %v3785_v46 = vpop.f32.mrf.mxu3  ;;  %v3569_v0 = vadd.f32 %v3568_v14, %v8934_v63  ;;  %v3641_v10 = vpop.f32.mrf.mxu1  ;;  %v6044_v39 = vor.u32 %v6860_v41, %v6043_v45  ;;  %v6908_v63 = vld [vmem:[%s10515_s1 + $0x5c4] sm:$0xf0]  ;;  %v5659_v45 = vld [vmem:[%s10515_s1 + $0x130] sm:$0xf] }
 0x434   : > { %v6764_v41 = vld [vmem:[%s10515_s1 + $0x144] sm:$0xf0] }
 0x435   : > { %v9268_v2 = vadd.f32 %v3785_v46, %v3713_v27  ;;  %v9270_v60 = vadd.f32 %v3641_v10, %v3569_v0  ;;  %v6236_v27 = vor.u32 %v6908_v63, %v6235_v29  ;;  %4268 = vmatpush.bf16.msra.mxu2 %v6044_v39  ;;  %v5851_v29 = vld [vmem:[%s10515_s1 + $0x2b0] sm:$0xf] }
 0x437   : > { %4341 = vmatpush.bf16.msra.mxu3 %v6236_v27 }
 0x43a   : > { %v3714_v46 = vpop.f32.mrf.mxu2  ;;  %v3571_v10 = vpop.f32.mrf.mxu0 }
 0x43b   : > { %v3715_v14 = vadd.f32 %v3714_v46, %v9145_v48  ;;  %v3787_v0 = vpop.f32.mrf.mxu3  ;;  %v3572_v9 = vadd.f32 %v3571_v10, %v8953_v25  ;;  %v3644_v20 = vpop.f32.mrf.mxu1  ;;  %v5660_v25 = vor.u32 %v6764_v41, %v5659_v45 }
 0x43d   : > { %v9286_v58 = vadd.f32 %v3787_v0, %v3715_v14  ;;  %v9288_v43 = vadd.f32 %v3644_v20, %v3572_v9  ;;  %3837 = vmatmul.bf16.vlgmr.msrb.gmra.mxu0 %v7307_v54  ;;  %v6812_v20 = vld [vmem:[%s10515_s1 + $0x2c4] sm:$0xf0] }
 0x43e   : > { %3910 = vmatmul.bf16.vlgmr.msrb.gmra.mxu1 %v7315_v57  ;;  %v5852_v9 = vor.u32 %v6812_v20, %v5851_v29  ;;  %4122 = vmatpush.bf16.msra.mxu0 %v5660_v25 }
 0x43f   : > { %10922 = vst [vmem:[#allocation80_spill] sm:$0xff] %v9288_v43  ;;  %3983 = vmatmul.bf16.vlgmr.msrb.gmra.mxu2 %v10896_v40 }
 0x440   : > { %4056 = vmatmul.bf16.vlgmr.msrb.gmra.mxu3 %v10897_v36  ;;  %4195 = vmatpush.bf16.msra.mxu1 %v5852_v9 }
 0x442   : > { %v3717_v39 = vpop.f32.mrf.mxu2  ;;  %v3573_v46 = vpop.f32.mrf.mxu0 }
 0x443   : > { %v3718_v63 = vadd.f32 %v3717_v39, %v9145_v48  ;;  %v3790_v27 = vpop.f32.mrf.mxu3  ;;  %v3574_v14 = vadd.f32 %v3573_v46, %v8956_v56  ;;  %v3646_v0 = vpop.f32.mrf.mxu1  ;;  %v10924_v39 = vld [vmem:[#allocation7_spill] sm:$0xff]  ;;  %v10925_v56 = vld [vmem:[#allocation8_spill] sm:$0xff] }
 0x445   : > { %v9308_v10 = vadd.f32 %v3790_v27, %v3718_v63  ;;  %v9310_v45 = vadd.f32 %v3646_v0, %v3574_v14  ;;  %v10926_v63 = vld [vmem:[#allocation56_spill] sm:$0xff] }
 0x44a   : > { %v3719_v41 = vpop.f32.mrf.mxu2  ;;  %v3576_v36 = vpop.f32.mrf.mxu0 }
 0x44b   : > { %v3720_v40 = vadd.f32 %v3719_v41, %v9145_v48  ;;  %v3792_v43 = vpop.f32.mrf.mxu3  ;;  %v3577_v29 = vadd.f32 %v3576_v36, %v8963_v15  ;;  %v3649_v25 = vpop.f32.mrf.mxu1  ;;  %v6854_v41 = vld [vmem:[%s10515_s1 + $0x414] sm:$0xf0] }
 0x44d   : > { %v9314_v20 = vadd.f32 %v3792_v43, %v3720_v40  ;;  %v9316_v9 = vadd.f32 %v3649_v25, %v3577_v29  ;;  %3842 = vmatmul.bf16.gmra.mxu0 %v10924_v39  ;;  %v6019_v40 = vld [vmem:[%s10515_s1 + $0x400] sm:$0xf]  ;;  %v10930_v39 = vld [vmem:[#allocation12_spill] sm:$0xff] }
 0x44e   : > { %3915 = vmatmul.bf16.gmra.mxu1 %v10925_v56  ;;  %v6211_v29 = vld [vmem:[%s10515_s1 + $0x580] sm:$0xf]  ;;  %v10929_v56 = vld [vmem:[#allocation11_spill] sm:$0xff] }
 0x44f   : > { %10923 = vst [vmem:[#allocation81_spill] sm:$0xff] %v9316_v9  ;;  %3988 = vmatmul.bf16.gmra.mxu2 %v10898_v62 }
 0x450   : > { %4061 = vmatmul.bf16.gmra.mxu3 %v10926_v63 }
 0x452   : > { %v3722_v27 = vpop.f32.mrf.mxu2  ;;  %v3578_v0 = vpop.f32.mrf.mxu0 }
 0x453   : > { %v3723_v46 = vadd.f32 %v3722_v27, %v9145_v48  ;;  %v3795_v14 = vpop.f32.mrf.mxu3  ;;  %v3579_v36 = vadd.f32 %v3578_v0, %v8990_v22  ;;  %v3651_v15 = vpop.f32.mrf.mxu1  ;;  %v6020_v27 = vor.u32 %v6854_v41, %v6019_v40  ;;  %v6902_v22 = vld [vmem:[%s10515_s1 + $0x594] sm:$0xf0] }
 0x454   : > { %v6212_v0 = vor.u32 %v6902_v22, %v6211_v29 }
 0x455   : > { %v9324_v43 = vadd.f32 %v3795_v14, %v3723_v46  ;;  %v9335_v25 = vadd.f32 %v3651_v15, %v3579_v36  ;;  %v5635_v46 = vld [vmem:[%s10515_s1 + $0x100] sm:$0xf]  ;;  %v6758_v14 = vld [vmem:[%s10515_s1 + $0x114] sm:$0xf0]  ;;  %4269 = vmatpush.bf16.msra.mxu2 %v6020_v27 }
 0x456   : > { %v5636_v63 = vor.u32 %v6758_v14, %v5635_v46  ;;  %v5827_v36 = vld [vmem:[%s10515_s1 + $0x280] sm:$0xf]  ;;  %v6806_v15 = vld [vmem:[%s10515_s1 + $0x294] sm:$0xf0]  ;;  %4342 = vmatpush.bf16.msra.mxu3 %v6212_v0 }
 0x457   : > { %10927 = vst [vmem:[#allocation82_spill] sm:$0xff] %v9335_v25  ;;  %v5828_v40 = vor.u32 %v6806_v15, %v5827_v36  ;;  %v10931_v27 = vld [vmem:[#allocation57_spill] sm:$0xff] }
 0x458   : > { %4123 = vmatpush.bf16.msra.mxu0 %v5636_v63  ;;  %v10932_v63 = vld [vmem:[#allocation58_spill] sm:$0xff] }
 0x459   : > { %4196 = vmatpush.bf16.msra.mxu1 %v5828_v40 }
 0x45a   : > { %v3724_v41 = vpop.f32.mrf.mxu2  ;;  %v3581_v9 = vpop.f32.mrf.mxu0 }
 0x45b   : > { %v3725_v62 = vadd.f32 %v3724_v41, %v9145_v48  ;;  %v3797_v25 = vpop.f32.mrf.mxu3  ;;  %v3582_v29 = vadd.f32 %v3581_v9, %v8997_v23  ;;  %v3654_v22 = vpop.f32.mrf.mxu1 }
 0x45d   : > { %v9354_v46 = vadd.f32 %v3797_v25, %v3725_v62  ;;  %v9356_v14 = vadd.f32 %v3654_v22, %v3582_v29  ;;  %3847 = vmatmul.bf16.gmra.mxu0 %v10929_v56  ;;  %v10935_v56 = vld [vmem:[#allocation15_spill] sm:$0xff] }
 0x45e   : > { %3920 = vmatmul.bf16.gmra.mxu1 %v10930_v39 }
 0x45f   : > { %10928 = vst [vmem:[#allocation83_spill] sm:$0xff] %v9356_v14  ;;  %3993 = vmatmul.bf16.gmra.mxu2 %v10931_v27 }
 0x460   : > { %4066 = vmatmul.bf16.gmra.mxu3 %v10932_v63 }
 0x462   : > { %v3727_v0 = vpop.f32.mrf.mxu2  ;;  %v3583_v40 = vpop.f32.mrf.mxu0 }
 0x463   : > { %v3728_v36 = vadd.f32 %v3727_v0, %v9145_v48  ;;  %v3800_v15 = vpop.f32.mrf.mxu3  ;;  %v3584_v23 = vadd.f32 %v3583_v40, %v9000_v13  ;;  %v3656_v9 = vpop.f32.mrf.mxu1  ;;  %v5995_v13 = vld [vmem:[%s10515_s1 + $0x3d0] sm:$0xf] }
 0x465   : > { %v9364_v62 = vadd.f32 %v3800_v15, %v3728_v36  ;;  %v9366_v25 = vadd.f32 %v3656_v9, %v3584_v23  ;;  %v6848_v36 = vld [vmem:[%s10515_s1 + $0x3e4] sm:$0xf0]  ;;  %v6187_v15 = vld [vmem:[%s10515_s1 + $0x550] sm:$0xf] }
 0x466   : > { %v5611_v23 = vld [vmem:[%s10515_s1 + $0xd0] sm:$0xf]  ;;  %v6752_v9 = vld [vmem:[%s10515_s1 + $0xe4] sm:$0xf0] }
 0x467   : > { %10933 = vst [vmem:[#allocation61_spill] sm:$0xff] %v9366_v25  ;;  %v10942_v25 = vld [vmem:[#allocation20_spill] sm:$0xff] }
 0x46a   : > { %v3729_v41 = vpop.f32.mrf.mxu2  ;;  %v3586_v14 = vpop.f32.mrf.mxu0 }
 0x46b   : > { %v3730_v29 = vadd.f32 %v3729_v41, %v9145_v48  ;;  %v3802_v22 = vpop.f32.mrf.mxu3  ;;  %v3587_v27 = vadd.f32 %v3586_v14, %v9025_v59  ;;  %v3659_v63 = vpop.f32.mrf.mxu1  ;;  %v10936_v59 = vld [vmem:[#allocation16_spill] sm:$0xff]  ;;  %v5996_v14 = vor.u32 %v6848_v36, %v5995_v13  ;;  %v5612_v41 = vor.u32 %v6752_v9, %v5611_v23 }
 0x46d   : > { %v9370_v39 = vadd.f32 %v3802_v22, %v3730_v29  ;;  %v9372_v0 = vadd.f32 %v3659_v63, %v3587_v27  ;;  %3852 = vmatmul.bf16.gmra.mxu0 %v10935_v56  ;;  %v6896_v27 = vld [vmem:[%s10515_s1 + $0x564] sm:$0xf0]  ;;  %v10937_v63 = vld [vmem:[#allocation60_spill] sm:$0xff]  ;;  %4270 = vmatpush.bf16.msra.mxu2 %v5996_v14 }
 0x46e   : > { %3925 = vmatmul.bf16.gmra.mxu1 %v10936_v59  ;;  %v6188_v40 = vor.u32 %v6896_v27, %v6187_v15  ;;  %4124 = vmatpush.bf16.msra.mxu0 %v5612_v41  ;;  %v6800_v14 = vld [vmem:[%s10515_s1 + $0x264] sm:$0xf0] }
 0x46f   : > { %10934 = vst [vmem:[#allocation86_spill] sm:$0xff] %v9372_v0  ;;  %3998 = vmatmul.bf16.gmra.mxu2 %v10902_v33  ;;  %v5803_v33 = vld [vmem:[%s10515_s1 + $0x250] sm:$0xf]  ;;  %v10941_v56 = vld [vmem:[#allocation19_spill] sm:$0xff] }
 0x470   : > { %4071 = vmatmul.bf16.gmra.mxu3 %v10937_v63 }
 0x471   : > { %4343 = vmatpush.bf16.msra.mxu3 %v6188_v40  ;;  %v5804_v40 = vor.u32 %v6800_v14, %v5803_v33  ;;  %v10944_v33 = vld [vmem:[#allocation63_spill] sm:$0xff] }
 0x472   : > { %v3732_v29 = vpop.f32.mrf.mxu2  ;;  %v3588_v36 = vpop.f32.mrf.mxu0 }
 0x473   : > { %v3733_v22 = vadd.f32 %v3732_v29, %v9145_v48  ;;  %v3805_v13 = vpop.f32.mrf.mxu3  ;;  %v3589_v63 = vadd.f32 %v3588_v36, %v9034_v61  ;;  %v3661_v15 = vpop.f32.mrf.mxu1  ;;  %4197 = vmatpush.bf16.msra.mxu1 %v5804_v40  ;;  %v10939_v36 = vld [vmem:[#allocation72_spill] sm:$0xff] }
 0x475   : > { %v9398_v27 = vadd.f32 %v3805_v13, %v3733_v22  ;;  %v9406_v23 = vadd.f32 %v3661_v15, %v3589_v63  ;;  %v10943_v63 = vld [vmem:[#allocation62_spill] sm:$0xff] }
 0x477   : > { %10938 = vst [vmem:[#allocation84_spill] sm:$0xff] %v9406_v23  ;;  %v10945_v23 = vld [vmem:[#allocation73_spill] sm:$0xff] }
 0x47a   : > { %v3734_v9 = vpop.f32.mrf.mxu2  ;;  %v3591_v61 = vpop.f32.mrf.mxu0 }
 0x47b   : > { %v3735_v41 = vadd.f32 %v3734_v9, %v9145_v48  ;;  %v3807_v29 = vpop.f32.mrf.mxu3  ;;  %v3592_v22 = vadd.f32 %v3591_v61, %v10939_v36  ;;  %v3664_v13 = vpop.f32.mrf.mxu1 }
 0x47d   : > { %v9410_v0 = vadd.f32 %v3807_v29, %v3735_v41  ;;  %v9412_v59 = vadd.f32 %v3664_v13, %v3592_v22  ;;  %3857 = vmatmul.bf16.gmra.mxu0 %v10941_v56  ;;  %v5971_v22 = vld [vmem:[%s10515_s1 + $0x3a0] sm:$0xf]  ;;  %v6842_v13 = vld [vmem:[%s10515_s1 + $0x3b4] sm:$0xf0]  ;;  %v10954_v56 = vld [vmem:[#allocation27_spill] sm:$0xff] }
 0x47e   : > { %3930 = vmatmul.bf16.gmra.mxu1 %v10942_v25 }
 0x47f   : > { %10940 = vst [vmem:[#allocation85_spill] sm:$0xff] %v9412_v59  ;;  %4003 = vmatmul.bf16.gmra.mxu2 %v10943_v63 }
 0x480   : > { %4076 = vmatmul.bf16.gmra.mxu3 %v10944_v33  ;;  %v5972_v33 = vor.u32 %v6842_v13, %v5971_v22  ;;  %v5587_v22 = vld [vmem:[%s10515_s1 + $0xa0] sm:$0xf]  ;;  %v6746_v13 = vld [vmem:[%s10515_s1 + $0xb4] sm:$0xf0] }
 0x482   : > { %v3737_v15 = vpop.f32.mrf.mxu2  ;;  %v3593_v9 = vpop.f32.mrf.mxu0  ;;  %4271 = vmatpush.bf16.msra.mxu2 %v5972_v33 }
 0x483   : > { %v3738_v14 = vadd.f32 %v3737_v15, %v9145_v48  ;;  %v3810_v40 = vpop.f32.mrf.mxu3  ;;  %v3594_v61 = vadd.f32 %v3593_v9, %v10945_v23  ;;  %v3666_v36 = vpop.f32.mrf.mxu1  ;;  %v6163_v15 = vld [vmem:[%s10515_s1 + $0x520] sm:$0xf]  ;;  %v6890_v23 = vld [vmem:[%s10515_s1 + $0x534] sm:$0xf0] }
 0x485   : > { %v9420_v41 = vadd.f32 %v3810_v40, %v3738_v14  ;;  %v9422_v29 = vadd.f32 %v3666_v36, %v3594_v61  ;;  %v6164_v14 = vor.u32 %v6890_v23, %v6163_v15  ;;  %v10949_v15 = vld [vmem:[#allocation23_spill] sm:$0xff]  ;;  %v5588_v23 = vor.u32 %v6746_v13, %v5587_v22 }
 0x487   : > { %10946 = vst [vmem:[#allocation87_spill] sm:$0xff] %v9422_v29  ;;  %4344 = vmatpush.bf16.msra.mxu3 %v6164_v14  ;;  %v6794_v14 = vld [vmem:[%s10515_s1 + $0x234] sm:$0xf0]  ;;  %4125 = vmatpush.bf16.msra.mxu0 %v5588_v23 }
 0x48a   : > { %v3739_v40 = vpop.f32.mrf.mxu2  ;;  %v3596_v36 = vpop.f32.mrf.mxu0 }
 0x48b   : > { %v3740_v9 = vadd.f32 %v3739_v40, %v9145_v48  ;;  %v3812_v61 = vpop.f32.mrf.mxu3  ;;  %v3597_v63 = vadd.f32 %v3596_v36, %v9075_v37  ;;  %v3669_v29 = vpop.f32.mrf.mxu1  ;;  %v5779_v37 = vld [vmem:[%s10515_s1 + $0x220] sm:$0xf]  ;;  %v10950_v40 = vld [vmem:[#allocation24_spill] sm:$0xff]  ;;  %v10952_v36 = vld [vmem:[#allocation65_spill] sm:$0xff] }
 0x48d   : > { %v9438_v59 = vadd.f32 %v3812_v61, %v3740_v9  ;;  %v9446_v33 = vadd.f32 %v3669_v29, %v3597_v63  ;;  %3862 = vmatmul.bf16.gmra.mxu0 %v10949_v15  ;;  %v10951_v9 = vld [vmem:[#allocation64_spill] sm:$0xff]  ;;  %v5780_v61 = vor.u32 %v6794_v14, %v5779_v37 }
 0x48e   : > { %3935 = vmatmul.bf16.gmra.mxu1 %v10950_v40 }
 0x48f   : > { %10947 = vst [vmem:[#allocation88_spill] sm:$0xff] %v9438_v59  ;;  %4008 = vmatmul.bf16.gmra.mxu2 %v10951_v9  ;;  %4198 = vmatpush.bf16.msra.mxu1 %v5780_v61 }
 0x490   : > { %10948 = vst [vmem:[#allocation89_spill] sm:$0xff] %v9446_v33  ;;  %4081 = vmatmul.bf16.gmra.mxu3 %v10952_v36 }
 0x492   : > { %v3742_v63 = vpop.f32.mrf.mxu2  ;;  %v3598_v13 = vpop.f32.mrf.mxu0 }
 0x493   : > { %v3743_v29 = vadd.f32 %v3742_v63, %v9145_v48  ;;  %v3815_v22 = vpop.f32.mrf.mxu3  ;;  %v3599_v33 = vadd.f32 %v3598_v13, %v9078_v51  ;;  %v3671_v15 = vpop.f32.mrf.mxu1  ;;  %v10955_v51 = vld [vmem:[#allocation28_spill] sm:$0xff] }
 0x495   : > { %v9460_v59 = vadd.f32 %v3815_v22, %v3743_v29  ;;  %v9462_v25 = vadd.f32 %v3671_v15, %v3599_v33  ;;  %v5947_v33 = vld [vmem:[%s10515_s1 + $0x370] sm:$0xf] }
 0x496   : > { %v6139_v15 = vld [vmem:[%s10515_s1 + $0x4f0] sm:$0xf] }
 0x49a   : > { %v3744_v40 = vpop.f32.mrf.mxu2  ;;  %v3601_v14 = vpop.f32.mrf.mxu0 }
 0x49b   : > { %v3745_v9 = vadd.f32 %v3744_v40, %v9145_v48  ;;  %v3817_v37 = vpop.f32.mrf.mxu3  ;;  %v3602_v23 = vadd.f32 %v3601_v14, %v9097_v47  ;;  %v3674_v61 = vpop.f32.mrf.mxu1  ;;  %v6836_v47 = vld [vmem:[%s10515_s1 + $0x384] sm:$0xf0] }
 0x49c   : > { %v5948_v40 = vor.u32 %v6836_v47, %v5947_v33  ;;  %v5563_v33 = vld [vmem:[%s10515_s1 + $0x70] sm:$0xf]  ;;  %v6740_v47 = vld [vmem:[%s10515_s1 + $0x84] sm:$0xf0] }
 0x49d   : > { %v9466_v36 = vadd.f32 %v3817_v37, %v3745_v9  ;;  %v9468_v63 = vadd.f32 %v3674_v61, %v3602_v23  ;;  %3867 = vmatmul.bf16.gmra.mxu0 %v10954_v56  ;;  %v6884_v9 = vld [vmem:[%s10515_s1 + $0x504] sm:$0xf0] }
 0x49e   : > { %3940 = vmatmul.bf16.gmra.mxu1 %v10955_v51  ;;  %v6140_v22 = vor.u32 %v6884_v9, %v6139_v15  ;;  %4272 = vmatpush.bf16.msra.mxu2 %v5948_v40  ;;  %v5755_v15 = vld [vmem:[%s10515_s1 + $0x1f0] sm:$0xf]  ;;  %v6788_v9 = vld [vmem:[%s10515_s1 + $0x204] sm:$0xf0] }
 0x49f   : > { %10953 = vst [vmem:[#allocation90_spill] sm:$0xff] %v9468_v63  ;;  %4013 = vmatmul.bf16.gmra.mxu2 %v10910_v11  ;;  %v10958_v63 = vld [vmem:[#allocation31_spill] sm:$0xff] }
 0x4a0   : > { %4086 = vmatmul.bf16.gmra.mxu3 %v10911_v53 }
 0x4a1   : > { %4345 = vmatpush.bf16.msra.mxu3 %v6140_v22 }
 0x4a2   : > { %v3747_v29 = vpop.f32.mrf.mxu2  ;;  %v3603_v14 = vpop.f32.mrf.mxu0 }
 0x4a3   : > { %v3748_v13 = vadd.f32 %v3747_v29, %v9145_v48  ;;  %v3820_v37 = vpop.f32.mrf.mxu3  ;;  %v3604_v23 = vadd.f32 %v3603_v14, %v9112_v52  ;;  %v3676_v61 = vpop.f32.mrf.mxu1  ;;  %v5564_v52 = vor.u32 %v6740_v47, %v5563_v33  ;;  %v10959_v33 = vld [vmem:[#allocation32_spill] sm:$0xff] }
 0x4a5   : > { %v9488_v53 = vadd.f32 %v3820_v37, %v3748_v13  ;;  %v9490_v11 = vadd.f32 %v3676_v61, %v3604_v23  ;;  %v5756_v37 = vor.u32 %v6788_v9, %v5755_v15  ;;  %4126 = vmatpush.bf16.msra.mxu0 %v5564_v52 }
 0x4a7   : > { %10956 = vst [vmem:[#allocation75_spill] sm:$0xff] %v9490_v11  ;;  %4199 = vmatpush.bf16.msra.mxu1 %v5756_v37 }
 0x4aa   : > { %v3749_v40 = vpop.f32.mrf.mxu2  ;;  %v3606_v13 = vpop.f32.mrf.mxu0 }
 0x4ab   : > { %v3750_v29 = vadd.f32 %v3749_v40, %v9145_v48  ;;  %v3822_v22 = vpop.f32.mrf.mxu3  ;;  %v3607_v14 = vadd.f32 %v3606_v13, %v9118_v3  ;;  %v3679_v23 = vpop.f32.mrf.mxu1 }
 0x4ad   : > { %v9506_v61 = vadd.f32 %v3822_v22, %v3750_v29  ;;  %v9508_v11 = vadd.f32 %v3679_v23, %v3607_v14  ;;  %3872 = vmatmul.bf16.gmra.mxu0 %v10958_v63  ;;  %v10961_v23 = vld [vmem:[#allocation35_spill] sm:$0xff] }
 0x4ae   : > { %3945 = vmatmul.bf16.gmra.mxu1 %v10959_v33 }
 0x4af   : > { %10957 = vst [vmem:[#allocation78_spill] sm:$0xff] %v9508_v11  ;;  %4018 = vmatmul.bf16.gmra.mxu2 %v10912_v44  ;;  %v10962_v11 = vld [vmem:[#allocation36_spill] sm:$0xff] }
 0x4b0   : > { %4091 = vmatmul.bf16.gmra.mxu3 %v10913_v5 }
 0x4b2   : > { %v3752_v47 = vpop.f32.mrf.mxu2  ;;  %v3608_v3 = vpop.f32.mrf.mxu0 }
 0x4b3   : > { %v3753_v15 = vadd.f32 %v3752_v47, %v9145_v48  ;;  %v3825_v40 = vpop.f32.mrf.mxu3  ;;  %v3681_v9 = vpop.f32.mrf.mxu1  ;;  %v5923_v47 = vld [vmem:[%s10515_s1 + $0x340] sm:$0xf] }
 0x4b4   : > { %v6878_v9 = vld [vmem:[%s10515_s1 + $0x4d4] sm:$0xf0] }
 0x4b5   : > { %v9515_v52 = vadd.f32 %v3825_v40, %v3753_v15  ;;  %v6830_v15 = vld [vmem:[%s10515_s1 + $0x354] sm:$0xf0] }
 0x4b6   : > { %v5924_v3 = vor.u32 %v6830_v15, %v5923_v47  ;;  %v5731_v47 = vld [vmem:[%s10515_s1 + $0x1c0] sm:$0xf]  ;;  %v6782_v15 = vld [vmem:[%s10515_s1 + $0x1d4] sm:$0xf0] }
 0x4b7   : > { %10960 = vst [vmem:[#allocation79_spill] sm:$0xff] %v9515_v52  ;;  %v5732_v44 = vor.u32 %v6782_v15, %v5731_v47  ;;  %v10964_v47 = vld [vmem:[#allocation39_spill] sm:$0xff] }
 0x4b8   : > { %4273 = vmatpush.bf16.msra.mxu2 %v5924_v3 }
 0x4b9   : > { %4200 = vmatpush.bf16.msra.mxu1 %v5732_v44 }
 0x4ba   : > { %v3754_v29 = vpop.f32.mrf.mxu2  ;;  %v3838_v13 = vpop.f32.mrf.mxu0 }
 0x4bb   : > { %v3827_v22 = vpop.f32.mrf.mxu3  ;;  %v3911_v37 = vpop.f32.mrf.mxu1  ;;  %v3839_v14 = vadd.f32 %v3838_v13, %v9156_v42  ;;  %v6115_v42 = vld [vmem:[%s10515_s1 + $0x4c0] sm:$0xf] }
 0x4bc   : > { %v5539_v29 = vld [vmem:[%s10515_s1 + $0x40] sm:$0xf]  ;;  %v6734_v22 = vld [vmem:[%s10515_s1 + $0x54] sm:$0xf0] }
 0x4bd   : > { %3877 = vmatmul.bf16.gmra.mxu0 %v10961_v23  ;;  %v3912_v48 = vadd.f32 %v3911_v37, %v3839_v14 }
 0x4be   : > { %3950 = vmatmul.bf16.gmra.mxu1 %v10962_v11 }
 0x4bf   : > { %4023 = vmatmul.bf16.gmra.mxu2 %v10915_v31  ;;  %v5540_v31 = vor.u32 %v6734_v22, %v5539_v29 }
 0x4c0   : > { %4096 = vmatmul.bf16.gmra.mxu3 %v10916_v8  ;;  %v6116_v8 = vor.u32 %v6878_v9, %v6115_v42 }
 0x4c1   : > { %4127 = vmatpush.bf16.msra.mxu0 %v5540_v31  ;;  %v10965_v31 = vld [vmem:[#allocation40_spill] sm:$0xff] }
 0x4c2   : > { %v3984_v40 = vpop.f32.mrf.mxu2  ;;  %v3840_v14 = vpop.f32.mrf.mxu0  ;;  %4346 = vmatpush.bf16.msra.mxu3 %v6116_v8 }
 0x4c3   : > { %v3985_v13 = vadd.f32 %v3984_v40, %v3912_v48  ;;  %v4057_v37 = vpop.f32.mrf.mxu3  ;;  %v3913_v5 = vpop.f32.mrf.mxu1  ;;  %v3841_v23 = vadd.f32 %v3840_v14, %v9162_v19  ;;  %v10963_v48 = vld [vmem:[#allocation74_spill] sm:$0xff] }
 0x4c5   : > { %v4058_v11 = vadd.f32 %v4057_v37, %v3985_v13  ;;  %v3914_v40 = vadd.f32 %v3913_v5, %v3841_v23 }
 0x4c7   : > { %v4998_v42 = vpack.c.bf16 %v4058_v11, %v10963_v48  ;;  %v6091_v48 = vld [vmem:[%s10515_s1 + $0x490] sm:$0xf] }
 0x4c9   : > { %5073 = vst [vmem:[%s8502_s21 + $0x8] sm:$0xff] %v4998_v42 }
 0x4ca   : > { %v3986_v9 = vpop.f32.mrf.mxu2  ;;  %v3843_v33 = vpop.f32.mrf.mxu0 }
 0x4cb   : > { %v3987_v29 = vadd.f32 %v3986_v9, %v3914_v40  ;;  %v4059_v22 = vpop.f32.mrf.mxu3  ;;  %v3916_v63 = vpop.f32.mrf.mxu1  ;;  %v3844_v3 = vadd.f32 %v3843_v33, %v9172_v18 }
 0x4cd   : > { %v4060_v52 = vadd.f32 %v4059_v22, %v3987_v29  ;;  %3882 = vmatmul.bf16.gmra.mxu0 %v10964_v47  ;;  %v3917_v44 = vadd.f32 %v3916_v63, %v3844_v3  ;;  %v6824_v63 = vld [vmem:[%s10515_s1 + $0x324] sm:$0xf0] }
 0x4ce   : > { %3955 = vmatmul.bf16.gmra.mxu1 %v10965_v31  ;;  %v6728_v22 = vld [vmem:[%s10515_s1 + $0x24] sm:$0xf0] }
 0x4cf   : > { %v5001_v8 = vpack.c.bf16 %v4060_v52, %v9158_v50  ;;  %4028 = vmatmul.bf16.gmra.mxu2 %v10837_v12  ;;  %v5899_v52 = vld [vmem:[%s10515_s1 + $0x310] sm:$0xf] }
 0x4d0   : > { %4101 = vmatmul.bf16.gmra.mxu3 %v10917_v35  ;;  %v5900_v15 = vor.u32 %v6824_v63, %v5899_v52 }
 0x4d1   : > { %5076 = vst [vmem:[%s8502_s21 + $0x20] sm:$0xff] %v5001_v8 }
 0x4d2   : > { %v3989_v11 = vpop.f32.mrf.mxu2  ;;  %v3845_v23 = vpop.f32.mrf.mxu0  ;;  %4274 = vmatpush.bf16.msra.mxu2 %v5900_v15 }
 0x4d3   : > { %v3990_v5 = vadd.f32 %v3989_v11, %v3917_v44  ;;  %v4062_v19 = vpop.f32.mrf.mxu3  ;;  %v3918_v13 = vpop.f32.mrf.mxu1  ;;  %v3846_v18 = vadd.f32 %v3845_v23, %v9196_v38  ;;  %v6872_v38 = vld [vmem:[%s10515_s1 + $0x4a4] sm:$0xf0] }
 0x4d4   : > { %v6092_v29 = vor.u32 %v6872_v38, %v6091_v48 }
 0x4d5   : > { %v4063_v37 = vadd.f32 %v4062_v19, %v3990_v5  ;;  %v3919_v50 = vadd.f32 %v3918_v13, %v3846_v18  ;;  %v10966_v5 = vld [vmem:[#allocation43_spill] sm:$0xff]  ;;  %v10967_v19 = vld [vmem:[#allocation76_spill] sm:$0xff] }
 0x4d6   : > { %4347 = vmatpush.bf16.msra.mxu3 %v6092_v29  ;;  %v10968_v13 = vld [vmem:[#allocation44_spill] sm:$0xff] }
 0x4d7   : > { %v5004_v33 = vpack.c.bf16 %v4063_v37, %v9164_v4  ;;  %v5515_v4 = vld [vmem:[%s10515_s1 + $0x10] sm:$0xf] }
 0x4d8   : > { %v5516_v8 = vor.u32 %v6728_v22, %v5515_v4  ;;  %v5707_v18 = vld [vmem:[%s10515_s1 + $0x190] sm:$0xf]  ;;  %v10969_v4 = vld [vmem:[#allocation77_spill] sm:$0xff] }
 0x4d9   : > { %5079 = vst [vmem:[%s8502_s21 + $0x38] sm:$0xff] %v5004_v33 }
 0x4da   : > { %v3991_v14 = vpop.f32.mrf.mxu2  ;;  %v3848_v9 = vpop.f32.mrf.mxu0  ;;  %4128 = vmatpush.bf16.msra.mxu0 %v5516_v8 }
 0x4db   : > { %v3992_v42 = vadd.f32 %v3991_v14, %v3919_v50  ;;  %v4064_v40 = vpop.f32.mrf.mxu3  ;;  %v3921_v3 = vpop.f32.mrf.mxu1  ;;  %v3849_v11 = vadd.f32 %v3848_v9, %v9212_v30  ;;  %v6776_v30 = vld [vmem:[%s10515_s1 + $0x1a4] sm:$0xf0] }
 0x4dc   : > { %v5708_v50 = vor.u32 %v6776_v30, %v5707_v18  ;;  %v6767_v18 = vld [vmem:[%s10515_s1 + $0x164] sm:$0xf] }
 0x4dd   : > { %v4065_v44 = vadd.f32 %v4064_v40, %v3992_v42  ;;  %3887 = vmatmul.bf16.gmra.mxu0 %v10966_v5  ;;  %v3922_v37 = vadd.f32 %v3921_v3, %v3849_v11 }
 0x4de   : > { %3960 = vmatmul.bf16.gmra.mxu1 %v10968_v13 }
 0x4df   : > { %v5007_v23 = vpack.c.bf16 %v4065_v44, %v10967_v19  ;;  %4033 = vmatmul.bf16.gmra.mxu2 %v10920_v55  ;;  %4201 = vmatpush.bf16.msra.mxu1 %v5708_v50  ;;  %v10970_v19 = vld [vmem:[#allocation47_spill] sm:$0xff]  ;;  %v5877_v50 = vld [vmem:[%s10515_s1 + $0x2f8] sm:$0xf0] }
 0x4e0   : > { %4106 = vmatmul.bf16.gmra.mxu3 %v10921_v17 }
 0x4e1   : > { %5082 = vst [vmem:[%s8502_s21 + $0x50] sm:$0xff] %v5007_v23 }
 0x4e2   : > { %v3994_v33 = vpop.f32.mrf.mxu2  ;;  %v3850_v14 = vpop.f32.mrf.mxu0 }
 0x4e3   : > { %v3995_v52 = vadd.f32 %v3994_v33, %v3922_v37  ;;  %v4067_v63 = vpop.f32.mrf.mxu3  ;;  %v3923_v15 = vpop.f32.mrf.mxu1  ;;  %v3851_v38 = vadd.f32 %v3850_v14, %v9218_v49  ;;  %v10971_v37 = vld [vmem:[#allocation48_spill] sm:$0xff] }
 0x4e5   : > { %v4068_v48 = vadd.f32 %v4067_v63, %v3995_v52  ;;  %v3924_v40 = vadd.f32 %v3923_v15, %v3851_v38 }
 0x4e7   : > { %v5010_v42 = vpack.c.bf16 %v4068_v48, %v10969_v4 }
 0x4e9   : > { %5085 = vst [vmem:[%s8502_s21 + $0x68] sm:$0xff] %v5010_v42 }
 0x4ea   : > { %v3996_v9 = vpop.f32.mrf.mxu2  ;;  %v3853_v3 = vpop.f32.mrf.mxu0 }
 0x4eb   : > { %v3997_v29 = vadd.f32 %v3996_v9, %v3924_v40  ;;  %v4069_v22 = vpop.f32.mrf.mxu3  ;;  %v3926_v8 = vpop.f32.mrf.mxu1  ;;  %v3854_v11 = vadd.f32 %v3853_v3, %v9240_v7  ;;  %v5685_v7 = vld [vmem:[%s10515_s1 + $0x178] sm:$0xf0]  ;;  %v6451_v9 = vld [vmem:[%s10515_s1 + $0x760] sm:$0xf] }
 0x4ec   : > { %v5688_v33 = vor.u32 %v6767_v18, %v5685_v7 }
 0x4ed   : > { %v4070_v44 = vadd.f32 %v4069_v22, %v3997_v29  ;;  %3892 = vmatmul.bf16.gmra.mxu0 %v10970_v19  ;;  %v3927_v49 = vadd.f32 %v3926_v8, %v3854_v11  ;;  %v6962_v29 = vld [vmem:[%s10515_s1 + $0x774] sm:$0xf0]  ;;  %v6643_v8 = vld [vmem:[%s10515_s1 + $0x8e0] sm:$0xf] }
 0x4ee   : > { %3965 = vmatmul.bf16.gmra.mxu1 %v10971_v37  ;;  %4559 = vmatpush.bf16.msrb.mxu2 %v5688_v33  ;;  %v6452_v3 = vor.u32 %v6962_v29, %v6451_v9 }
 0x4ef   : > { %v5013_v23 = vpack.c.bf16 %v4070_v44, %v9214_v21  ;;  %4038 = vmatmul.bf16.gmra.mxu2 %v8157_v16  ;;  %v6815_v21 = vld [vmem:[%s10515_s1 + $0x2e4] sm:$0xf] }
 0x4f0   : > { %4111 = vmatmul.bf16.gmra.mxu3 %v8160_v26  ;;  %v5880_v15 = vor.u32 %v6815_v21, %v5877_v50  ;;  %4413 = vmatpush.bf16.msrb.mxu0 %v6452_v3  ;;  %v10973_v21 = vld [vmem:[#allocation52_spill] sm:$0xff] }
 0x4f1   : > { %5088 = vst [vmem:[%s8502_s21 + $0x80] sm:$0xff] %v5013_v23 }
 0x4f2   : > { %v3999_v30 = vpop.f32.mrf.mxu2  ;;  %v3855_v14 = vpop.f32.mrf.mxu0  ;;  %4632 = vmatpush.bf16.msrb.mxu3 %v5880_v15 }
 0x4f3   : > { %v4000_v52 = vadd.f32 %v3999_v30, %v3927_v49  ;;  %v4072_v63 = vpop.f32.mrf.mxu3  ;;  %v3928_v48 = vpop.f32.mrf.mxu1  ;;  %v3856_v4 = vadd.f32 %v3855_v14, %v9258_v24  ;;  %v10972_v30 = vld [vmem:[#allocation51_spill] sm:$0xff] }
 0x4f5   : > { %v4073_v38 = vadd.f32 %v4072_v63, %v4000_v52  ;;  %v3929_v40 = vadd.f32 %v3928_v48, %v3856_v4 }
 0x4f7   : > { %v5016_v42 = vpack.c.bf16 %v4073_v38, %v9220_v28  ;;  %v7010_v28 = vld [vmem:[%s10515_s1 + $0x8f4] sm:$0xf0] }
 0x4f8   : > { %v6644_v23 = vor.u32 %v7010_v28, %v6643_v8 }
 0x4f9   : > { %5091 = vst [vmem:[%s8502_s21 + $0x98] sm:$0xff] %v5016_v42  ;;  %v6761_v42 = vld [vmem:[%s10515_s1 + $0x134] sm:$0xf] }
 0x4fa   : > { %v4001_v22 = vpop.f32.mrf.mxu2  ;;  %v3858_v11 = vpop.f32.mrf.mxu0  ;;  %4486 = vmatpush.bf16.msrb.mxu1 %v6644_v23  ;;  %v10974_v23 = vld [vmem:[#allocation2_spill] sm:$0xff] }
 0x4fb   : > { %v4002_v24 = vadd.f32 %v4001_v22, %v3929_v40  ;;  %v4074_v44 = vpop.f32.mrf.mxu3  ;;  %v3931_v49 = vpop.f32.mrf.mxu1  ;;  %v3859_v7 = vadd.f32 %v3858_v11, %v9268_v2  ;;  %v5661_v40 = vld [vmem:[%s10515_s1 + $0x148] sm:$0xf0]  ;;  %v6809_v22 = vld [vmem:[%s10515_s1 + $0x2b4] sm:$0xf] }
 0x4fc   : > { %v5664_v29 = vor.u32 %v6761_v42, %v5661_v40  ;;  %v10976_v42 = vld [vmem:[#allocation80_spill] sm:$0xff] }
 0x4fd   : > { %v4075_v18 = vadd.f32 %v4074_v44, %v4002_v24  ;;  %3897 = vmatmul.bf16.gmra.mxu0 %v10972_v30  ;;  %v3932_v50 = vadd.f32 %v3931_v49, %v3859_v7 }
 0x4fe   : > { %3970 = vmatmul.bf16.gmra.mxu1 %v10973_v21  ;;  %4560 = vmatpush.bf16.msrb.mxu2 %v5664_v29 }
 0x4ff   : > { %v5019_v33 = vpack.c.bf16 %v4075_v18, %v9248_v34  ;;  %4043 = vmatmul.bf16.gmra.mxu2 %v8202_v32  ;;  %v10975_v18 = vld [vmem:[#allocation3_spill] sm:$0xff] }
 0x500   : > { %4116 = vmatmul.bf16.gmra.mxu3 %v8205_v6 }
 0x501   : > { %5094 = vst [vmem:[%s8502_s21 + $0xb0] sm:$0xff] %v5019_v33  ;;  %v6427_v33 = vld [vmem:[%s10515_s1 + $0x730] sm:$0xf] }
 0x502   : > { %v4004_v52 = vpop.f32.mrf.mxu2  ;;  %v3860_v15 = vpop.f32.mrf.mxu0 }
 0x503   : > { %v4005_v63 = vadd.f32 %v4004_v52, %v3932_v50  ;;  %v4077_v14 = vpop.f32.mrf.mxu3  ;;  %v3933_v48 = vpop.f32.mrf.mxu1  ;;  %v3861_v38 = vadd.f32 %v3860_v15, %v9286_v58  ;;  %v5853_v58 = vld [vmem:[%s10515_s1 + $0x2c8] sm:$0xf0] }
 0x504   : > { %v5856_v28 = vor.u32 %v6809_v22, %v5853_v58 }
 0x505   : > { %v4078_v2 = vadd.f32 %v4077_v14, %v4005_v63  ;;  %v3934_v34 = vadd.f32 %v3933_v48, %v3861_v38  ;;  %v7004_v63 = vld [vmem:[%s10515_s1 + $0x8c4] sm:$0xf0] }
 0x506   : > { %4633 = vmatpush.bf16.msrb.mxu3 %v5856_v28 }
 0x507   : > { %v5022_v4 = vpack.c.bf16 %v4078_v2, %v9260_v1 }
 0x509   : > { %5097 = vst [vmem:[%s8502_s21 + $0xc8] sm:$0xff] %v5022_v4 }
 0x50a   : > { %v4006_v9 = vpop.f32.mrf.mxu2  ;;  %v3863_v8 = vpop.f32.mrf.mxu0 }
 0x50b   : > { %v4007_v1 = vadd.f32 %v4006_v9, %v3934_v34  ;;  %v4079_v3 = vpop.f32.mrf.mxu3  ;;  %v3936_v24 = vpop.f32.mrf.mxu1  ;;  %v3864_v11 = vadd.f32 %v3863_v8, %v9308_v10  ;;  %v6956_v10 = vld [vmem:[%s10515_s1 + $0x744] sm:$0xf0] }
 0x50c   : > { %v6428_v52 = vor.u32 %v6956_v10, %v6427_v33 }
 0x50d   : > { %v4080_v44 = vadd.f32 %v4079_v3, %v4007_v1  ;;  %4129 = vmatmul.bf16.vlgmr.msra.gmra.mxu0 %v10974_v23  ;;  %v3937_v7 = vadd.f32 %v3936_v24, %v3864_v11  ;;  %v10977_v24 = vld [vmem:[#allocation5_spill] sm:$0xff]  ;;  %v10979_v11 = vld [vmem:[#allocation7_spill] sm:$0xff] }
 0x50e   : > { %4202 = vmatmul.bf16.vlgmr.msra.gmra.mxu1 %v10975_v18  ;;  %4414 = vmatpush.bf16.msrb.mxu0 %v6428_v52 }
 0x50f   : > { %v5025_v49 = vpack.c.bf16 %v4080_v44, %v9270_v60  ;;  %4275 = vmatmul.bf16.vlgmr.msra.gmra.mxu2 %v7307_v54  ;;  %v6619_v60 = vld [vmem:[%s10515_s1 + $0x8b0] sm:$0xf] }
 0x510   : > { %4348 = vmatmul.bf16.vlgmr.msra.gmra.mxu3 %v7315_v57  ;;  %v6620_v2 = vor.u32 %v7004_v63, %v6619_v60 }
 0x511   : > { %5100 = vst [vmem:[%s8502_s21 + $0xe0] sm:$0xff] %v5025_v49  ;;  %v10980_v49 = vld [vmem:[#allocation8_spill] sm:$0xff] }
 0x512   : > { %v4009_v50 = vpop.f32.mrf.mxu2  ;;  %v3865_v48 = vpop.f32.mrf.mxu0  ;;  %4487 = vmatpush.bf16.msrb.mxu1 %v6620_v2  ;;  %v5637_v2 = vld [vmem:[%s10515_s1 + $0x118] sm:$0xf0] }
 0x513   : > { %v4010_v14 = vadd.f32 %v4009_v50, %v3937_v7  ;;  %v4082_v15 = vpop.f32.mrf.mxu3  ;;  %v3938_v38 = vpop.f32.mrf.mxu1  ;;  %v3866_v34 = vadd.f32 %v3865_v48, %v9314_v20  ;;  %v10978_v20 = vld [vmem:[#allocation6_spill] sm:$0xff] }
 0x514   : > { %v6755_v48 = vld [vmem:[%s10515_s1 + $0x104] sm:$0xf] }
 0x515   : > { %v4083_v4 = vadd.f32 %v4082_v15, %v4010_v14  ;;  %v3939_v9 = vadd.f32 %v3938_v38, %v3866_v34  ;;  %v10981_v14 = vld [vmem:[#allocation81_spill] sm:$0xff]  ;;  %v6803_v34 = vld [vmem:[%s10515_s1 + $0x284] sm:$0xf] }
 0x517   : > { %v5028_v40 = vpack.c.bf16 %v4083_v4, %v10976_v42  ;;  %v5640_v4 = vor.u32 %v6755_v48, %v5637_v2  ;;  %v6403_v42 = vld [vmem:[%s10515_s1 + $0x700] sm:$0xf] }
 0x519   : > { %5103 = vst [vmem:[%s8502_s21 + $0xf8] sm:$0xff] %v5028_v40  ;;  %4561 = vmatpush.bf16.msrb.mxu2 %v5640_v4 }
 0x51a   : > { %v4011_v29 = vpop.f32.mrf.mxu2  ;;  %v3868_v1 = vpop.f32.mrf.mxu0 }
 0x51b   : > { %v4012_v22 = vadd.f32 %v4011_v29, %v3939_v9  ;;  %v4084_v58 = vpop.f32.mrf.mxu3  ;;  %v3941_v3 = vpop.f32.mrf.mxu1  ;;  %v3869_v28 = vadd.f32 %v3868_v1, %v9324_v43  ;;  %v6595_v1 = vld [vmem:[%s10515_s1 + $0x880] sm:$0xf] }
 0x51d   : > { %v4085_v8 = vadd.f32 %v4084_v58, %v4012_v22  ;;  %4134 = vmatmul.bf16.gmra.mxu0 %v10977_v24  ;;  %v3942_v7 = vadd.f32 %v3941_v3, %v3869_v28  ;;  %v6950_v58 = vld [vmem:[%s10515_s1 + $0x714] sm:$0xf0] }
 0x51e   : > { %4207 = vmatmul.bf16.gmra.mxu1 %v10978_v20  ;;  %v6998_v3 = vld [vmem:[%s10515_s1 + $0x894] sm:$0xf0]  ;;  %v6404_v28 = vor.u32 %v6950_v58, %v6403_v42 }
 0x51f   : > { %v5031_v44 = vpack.c.bf16 %v4085_v8, %v9310_v45  ;;  %4280 = vmatmul.bf16.gmra.mxu2 %v10979_v11 }
 0x520   : > { %4353 = vmatmul.bf16.gmra.mxu3 %v10980_v49  ;;  %4415 = vmatpush.bf16.msrb.mxu0 %v6404_v28  ;;  %v10989_v28 = vld [vmem:[#allocation61_spill] sm:$0xff] }
 0x521   : > { %5106 = vst [vmem:[%s8502_s21 + $0x110] sm:$0xff] %v5031_v44  ;;  %v6596_v44 = vor.u32 %v6998_v3, %v6595_v1  ;;  %v11029_v49 = vld [vmem:[#allocation53_spill] sm:$0xff] }
 0x522   : > { %v4014_v33 = vpop.f32.mrf.mxu2  ;;  %v3870_v52 = vpop.f32.mrf.mxu0 }
 0x523   : > { %v4015_v10 = vadd.f32 %v4014_v33, %v3942_v7  ;;  %v4087_v50 = vpop.f32.mrf.mxu3  ;;  %v3943_v60 = vpop.f32.mrf.mxu1  ;;  %v3871_v43 = vadd.f32 %v3870_v52, %v9354_v46  ;;  %v5829_v46 = vld [vmem:[%s10515_s1 + $0x298] sm:$0xf0]  ;;  %4488 = vmatpush.bf16.msrb.mxu1 %v6596_v44 }
 0x524   : > { %v5832_v22 = vor.u32 %v6803_v34, %v5829_v46  ;;  %v10987_v34 = vld [vmem:[#allocation83_spill] sm:$0xff] }
 0x525   : > { %v4088_v63 = vadd.f32 %v4087_v50, %v4015_v10  ;;  %v3944_v45 = vadd.f32 %v3943_v60, %v3871_v43  ;;  %v10982_v10 = vld [vmem:[#allocation9_spill] sm:$0xff]  ;;  %v10983_v50 = vld [vmem:[#allocation82_spill] sm:$0xff]  ;;  %v10986_v43 = vld [vmem:[#allocation12_spill] sm:$0xff] }
 0x526   : > { %4634 = vmatpush.bf16.msrb.mxu3 %v5832_v22  ;;  %v10984_v60 = vld [vmem:[#allocation10_spill] sm:$0xff] }
 0x527   : > { %v5034_v15 = vpack.c.bf16 %v4088_v63, %v10981_v14  ;;  %v10985_v63 = vld [vmem:[#allocation11_spill] sm:$0xff] }
 0x529   : > { %5109 = vst [vmem:[%s8502_s21 + $0x128] sm:$0xff] %v5034_v15 }
 0x52a   : > { %v4016_v38 = vpop.f32.mrf.mxu2  ;;  %v3873_v29 = vpop.f32.mrf.mxu0 }
 0x52b   : > { %v4017_v40 = vadd.f32 %v4016_v38, %v3944_v45  ;;  %v4089_v9 = vpop.f32.mrf.mxu3  ;;  %v3946_v8 = vpop.f32.mrf.mxu1  ;;  %v3874_v33 = vadd.f32 %v3873_v29, %v9364_v62 }
 0x52d   : > { %v4090_v7 = vadd.f32 %v4089_v9, %v4017_v40  ;;  %4139 = vmatmul.bf16.gmra.mxu0 %v10982_v10  ;;  %v3947_v14 = vadd.f32 %v3946_v8, %v3874_v33  ;;  %v10988_v8 = vld [vmem:[#allocation13_spill] sm:$0xff]  ;;  %v10992_v33 = vld [vmem:[#allocation16_spill] sm:$0xff] }
 0x52e   : > { %4212 = vmatmul.bf16.gmra.mxu1 %v10984_v60 }
 0x52f   : > { %v5037_v52 = vpack.c.bf16 %v4090_v7, %v10983_v50  ;;  %4285 = vmatmul.bf16.gmra.mxu2 %v10985_v63  ;;  %v10990_v7 = vld [vmem:[#allocation14_spill] sm:$0xff] }
 0x530   : > { %4358 = vmatmul.bf16.gmra.mxu3 %v10986_v43 }
 0x531   : > { %5112 = vst [vmem:[%s8502_s21 + $0x140] sm:$0xff] %v5037_v52  ;;  %v6749_v52 = vld [vmem:[%s10515_s1 + $0xd4] sm:$0xf] }
 0x532   : > { %v4019_v15 = vpop.f32.mrf.mxu2  ;;  %v3875_v62 = vpop.f32.mrf.mxu0 }
 0x533   : > { %v4020_v45 = vadd.f32 %v4019_v15, %v3947_v14  ;;  %v4092_v48 = vpop.f32.mrf.mxu3  ;;  %v3948_v2 = vpop.f32.mrf.mxu1  ;;  %v3876_v4 = vadd.f32 %v3875_v62, %v9370_v39  ;;  %v10991_v39 = vld [vmem:[#allocation15_spill] sm:$0xff]  ;;  %v6379_v62 = vld [vmem:[%s10515_s1 + $0x6d0] sm:$0xf] }
 0x535   : > { %v4093_v38 = vadd.f32 %v4092_v48, %v4020_v45  ;;  %v3949_v42 = vadd.f32 %v3948_v2, %v3876_v4  ;;  %v6797_v45 = vld [vmem:[%s10515_s1 + $0x254] sm:$0xf]  ;;  %v5805_v48 = vld [vmem:[%s10515_s1 + $0x268] sm:$0xf0] }
 0x537   : > { %v5040_v46 = vpack.c.bf16 %v4093_v38, %v10987_v34  ;;  %v5808_v34 = vor.u32 %v6797_v45, %v5805_v48  ;;  %v10994_v48 = vld [vmem:[#allocation17_spill] sm:$0xff] }
 0x539   : > { %5115 = vst [vmem:[%s8502_s21 + $0x158] sm:$0xff] %v5040_v46  ;;  %v6944_v46 = vld [vmem:[%s10515_s1 + $0x6e4] sm:$0xf0]  ;;  %4635 = vmatpush.bf16.msrb.mxu3 %v5808_v34  ;;  %v10998_v34 = vld [vmem:[#allocation20_spill] sm:$0xff] }
 0x53a   : > { %v4021_v40 = vpop.f32.mrf.mxu2  ;;  %v3878_v22 = vpop.f32.mrf.mxu0 }
 0x53b   : > { %v4022_v9 = vadd.f32 %v4021_v40, %v3949_v42  ;;  %v4094_v29 = vpop.f32.mrf.mxu3  ;;  %v3951_v58 = vpop.f32.mrf.mxu1  ;;  %v3879_v3 = vadd.f32 %v3878_v22, %v9398_v27  ;;  %v5613_v27 = vld [vmem:[%s10515_s1 + $0xe8] sm:$0xf0]  ;;  %v6380_v40 = vor.u32 %v6944_v46, %v6379_v62  ;;  %v10993_v22 = vld [vmem:[#allocation86_spill] sm:$0xff]  ;;  %v10995_v62 = vld [vmem:[#allocation84_spill] sm:$0xff] }
 0x53c   : > { %v5616_v15 = vor.u32 %v6749_v52, %v5613_v27 }
 0x53d   : > { %v4095_v1 = vadd.f32 %v4094_v29, %v4022_v9  ;;  %4144 = vmatmul.bf16.gmra.mxu0 %v10988_v8  ;;  %v3952_v50 = vadd.f32 %v3951_v58, %v3879_v3  ;;  %v6571_v3 = vld [vmem:[%s10515_s1 + $0x850] sm:$0xf] }
 0x53e   : > { %4217 = vmatmul.bf16.gmra.mxu1 %v10990_v7  ;;  %4562 = vmatpush.bf16.msrb.mxu2 %v5616_v15 }
 0x53f   : > { %v5043_v44 = vpack.c.bf16 %v4095_v1, %v10989_v28  ;;  %4290 = vmatmul.bf16.gmra.mxu2 %v10991_v39  ;;  %4416 = vmatpush.bf16.msrb.mxu0 %v6380_v40  ;;  %v6992_v28 = vld [vmem:[%s10515_s1 + $0x864] sm:$0xf0] }
 0x540   : > { %4363 = vmatmul.bf16.gmra.mxu3 %v10992_v33 }
 0x541   : > { %5118 = vst [vmem:[%s8502_s21 + $0x170] sm:$0xff] %v5043_v44 }
 0x542   : > { %v4024_v14 = vpop.f32.mrf.mxu2  ;;  %v3880_v4 = vpop.f32.mrf.mxu0 }
 0x543   : > { %v4025_v2 = vadd.f32 %v4024_v14, %v3952_v50  ;;  %v4097_v38 = vpop.f32.mrf.mxu3  ;;  %v3953_v42 = vpop.f32.mrf.mxu1  ;;  %v3881_v29 = vadd.f32 %v3880_v4, %v9410_v0  ;;  %v6572_v50 = vor.u32 %v6992_v28, %v6571_v3  ;;  %v10997_v4 = vld [vmem:[#allocation19_spill] sm:$0xff]  ;;  %v11000_v3 = vld [vmem:[#allocation85_spill] sm:$0xff] }
 0x545   : > { %v4098_v9 = vadd.f32 %v4097_v38, %v4025_v2  ;;  %v3954_v1 = vadd.f32 %v3953_v42, %v3881_v29  ;;  %4489 = vmatpush.bf16.msrb.mxu1 %v6572_v50  ;;  %v10996_v38 = vld [vmem:[#allocation18_spill] sm:$0xff] }
 0x546   : > { %v6743_v50 = vld [vmem:[%s10515_s1 + $0xa4] sm:$0xf] }
 0x547   : > { %v5046_v58 = vpack.c.bf16 %v4098_v9, %v10993_v22 }
 0x549   : > { %5121 = vst [vmem:[%s8502_s21 + $0x188] sm:$0xff] %v5046_v58 }
 0x54a   : > { %v4026_v44 = vpop.f32.mrf.mxu2  ;;  %v3883_v0 = vpop.f32.mrf.mxu0 }
 0x54b   : > { %v4027_v52 = vadd.f32 %v4026_v44, %v3954_v1  ;;  %v4099_v27 = vpop.f32.mrf.mxu3  ;;  %v3956_v14 = vpop.f32.mrf.mxu1  ;;  %v3884_v45 = vadd.f32 %v3883_v0, %v9420_v41  ;;  %v10999_v41 = vld [vmem:[#allocation88_spill] sm:$0xff] }
 0x54d   : > { %v4100_v15 = vadd.f32 %v4099_v27, %v4027_v52  ;;  %4149 = vmatmul.bf16.gmra.mxu0 %v10994_v48  ;;  %v3957_v46 = vadd.f32 %v3956_v14, %v3884_v45  ;;  %v5589_v52 = vld [vmem:[%s10515_s1 + $0xb8] sm:$0xf0]  ;;  %v6791_v14 = vld [vmem:[%s10515_s1 + $0x224] sm:$0xf] }
 0x54e   : > { %4222 = vmatmul.bf16.gmra.mxu1 %v10996_v38  ;;  %v5592_v0 = vor.u32 %v6743_v50, %v5589_v52 }
 0x54f   : > { %v5049_v2 = vpack.c.bf16 %v4100_v15, %v10995_v62  ;;  %4295 = vmatmul.bf16.gmra.mxu2 %v10997_v4  ;;  %v5781_v15 = vld [vmem:[%s10515_s1 + $0x238] sm:$0xf0] }
 0x550   : > { %4368 = vmatmul.bf16.gmra.mxu3 %v10998_v34  ;;  %4563 = vmatpush.bf16.msrb.mxu2 %v5592_v0  ;;  %v6986_v0 = vld [vmem:[%s10515_s1 + $0x834] sm:$0xf0] }
 0x551   : > { %5124 = vst [vmem:[%s8502_s21 + $0x1a0] sm:$0xff] %v5049_v2 }
 0x552   : > { %v4029_v42 = vpop.f32.mrf.mxu2  ;;  %v3885_v29 = vpop.f32.mrf.mxu0 }
 0x553   : > { %v4030_v40 = vadd.f32 %v4029_v42, %v3957_v46  ;;  %v4102_v9 = vpop.f32.mrf.mxu3  ;;  %v3958_v22 = vpop.f32.mrf.mxu1  ;;  %v3886_v1 = vadd.f32 %v3885_v29, %v10999_v41  ;;  %v5784_v46 = vor.u32 %v6791_v14, %v5781_v15  ;;  %v11001_v29 = vld [vmem:[#allocation21_spill] sm:$0xff]  ;;  %v11003_v41 = vld [vmem:[#allocation22_spill] sm:$0xff] }
 0x555   : > { %v4103_v58 = vadd.f32 %v4102_v9, %v4030_v40  ;;  %v3959_v44 = vadd.f32 %v3958_v22, %v3886_v1  ;;  %4636 = vmatpush.bf16.msrb.mxu3 %v5784_v46  ;;  %v11002_v22 = vld [vmem:[#allocation87_spill] sm:$0xff] }
 0x556   : > { %v11004_v1 = vld [vmem:[#allocation23_spill] sm:$0xff] }
 0x557   : > { %v5052_v28 = vpack.c.bf16 %v4103_v58, %v11000_v3  ;;  %v11005_v3 = vld [vmem:[#allocation24_spill] sm:$0xff] }
 0x559   : > { %5127 = vst [vmem:[%s8502_s21 + $0x1b8] sm:$0xff] %v5052_v28 }
 0x55a   : > { %v4031_v27 = vpop.f32.mrf.mxu2  ;;  %v3888_v2 = vpop.f32.mrf.mxu0 }
 0x55b   : > { %v4032_v45 = vadd.f32 %v4031_v27, %v3959_v44  ;;  %v4104_v62 = vpop.f32.mrf.mxu3  ;;  %v3961_v42 = vpop.f32.mrf.mxu1  ;;  %v3889_v9 = vadd.f32 %v3888_v2, %v9460_v59  ;;  %v6355_v44 = vld [vmem:[%s10515_s1 + $0x6a0] sm:$0xf]  ;;  %v6938_v59 = vld [vmem:[%s10515_s1 + $0x6b4] sm:$0xf0] }
 0x55c   : > { %v6356_v52 = vor.u32 %v6938_v59, %v6355_v44  ;;  %v6547_v27 = vld [vmem:[%s10515_s1 + $0x820] sm:$0xf] }
 0x55d   : > { %v4105_v40 = vadd.f32 %v4104_v62, %v4032_v45  ;;  %4154 = vmatmul.bf16.gmra.mxu0 %v11001_v29  ;;  %v3962_v28 = vadd.f32 %v3961_v42, %v3889_v9  ;;  %v6548_v62 = vor.u32 %v6986_v0, %v6547_v27  ;;  %v11007_v27 = vld [vmem:[#allocation25_spill] sm:$0xff]  ;;  %v11008_v0 = vld [vmem:[#allocation26_spill] sm:$0xff] }
 0x55e   : > { %4227 = vmatmul.bf16.gmra.mxu1 %v11003_v41  ;;  %4417 = vmatpush.bf16.msrb.mxu0 %v6356_v52 }
 0x55f   : > { %v5055_v58 = vpack.c.bf16 %v4105_v40, %v11002_v22  ;;  %4300 = vmatmul.bf16.gmra.mxu2 %v11004_v1  ;;  %4490 = vmatpush.bf16.msrb.mxu1 %v6548_v62  ;;  %v11006_v40 = vld [vmem:[#allocation89_spill] sm:$0xff] }
 0x560   : > { %4373 = vmatmul.bf16.gmra.mxu3 %v11005_v3 }
 0x561   : > { %5130 = vst [vmem:[%s8502_s21 + $0x1d0] sm:$0xff] %v5055_v58 }
 0x562   : > { %v4034_v50 = vpop.f32.mrf.mxu2  ;;  %v3890_v45 = vpop.f32.mrf.mxu0 }
 0x563   : > { %v4035_v14 = vadd.f32 %v4034_v50, %v3962_v28  ;;  %v4107_v15 = vpop.f32.mrf.mxu3  ;;  %v3963_v2 = vpop.f32.mrf.mxu1  ;;  %v3891_v42 = vadd.f32 %v3890_v45, %v9466_v36  ;;  %v6737_v36 = vld [vmem:[%s10515_s1 + $0x74] sm:$0xf] }
 0x565   : > { %v4108_v46 = vadd.f32 %v4107_v15, %v4035_v14  ;;  %v3964_v22 = vadd.f32 %v3963_v2, %v3891_v42  ;;  %v5565_v14 = vld [vmem:[%s10515_s1 + $0x88] sm:$0xf0] }
 0x566   : > { %v5757_v15 = vld [vmem:[%s10515_s1 + $0x208] sm:$0xf0] }
 0x567   : > { %v5058_v9 = vpack.c.bf16 %v4108_v46, %v11006_v40 }
 0x569   : > { %5133 = vst [vmem:[%s8502_s21 + $0x1e8] sm:$0xff] %v5058_v9 }
 0x56a   : > { %v4036_v58 = vpop.f32.mrf.mxu2  ;;  %v3893_v3 = vpop.f32.mrf.mxu0 }
 0x56b   : > { %v4037_v44 = vadd.f32 %v4036_v58, %v3964_v22  ;;  %v4109_v59 = vpop.f32.mrf.mxu3  ;;  %v3966_v1 = vpop.f32.mrf.mxu1  ;;  %v3894_v50 = vadd.f32 %v3893_v3, %v9488_v53  ;;  %v6785_v53 = vld [vmem:[%s10515_s1 + $0x1f4] sm:$0xf]  ;;  %v5568_v3 = vor.u32 %v6737_v36, %v5565_v14  ;;  %v6932_v58 = vld [vmem:[%s10515_s1 + $0x684] sm:$0xf0] }
 0x56c   : > { %v5760_v62 = vor.u32 %v6785_v53, %v5757_v15 }
 0x56d   : > { %v4110_v28 = vadd.f32 %v4109_v59, %v4037_v44  ;;  %4159 = vmatmul.bf16.gmra.mxu0 %v11007_v27  ;;  %4564 = vmatpush.bf16.msrb.mxu2 %v5568_v3  ;;  %v6523_v44 = vld [vmem:[%s10515_s1 + $0x7f0] sm:$0xf]  ;;  %v11009_v59 = vld [vmem:[#allocation90_spill] sm:$0xff] }
 0x56e   : > { %4232 = vmatmul.bf16.gmra.mxu1 %v11008_v0  ;;  %4637 = vmatpush.bf16.msrb.mxu3 %v5760_v62  ;;  %v11010_v62 = vld [vmem:[#allocation79_spill] sm:$0xff] }
 0x56f   : > { %v5061_v52 = vpack.c.bf16 %v4110_v28, %v9462_v25  ;;  %4305 = vmatmul.bf16.gmra.mxu2 %v10954_v56  ;;  %v3967_v25 = vadd.f32 %v3966_v1, %v3894_v50  ;;  %v6331_v1 = vld [vmem:[%s10515_s1 + $0x670] sm:$0xf] }
 0x570   : > { %4378 = vmatmul.bf16.gmra.mxu3 %v10955_v51  ;;  %v6332_v50 = vor.u32 %v6932_v58, %v6331_v1  ;;  %v11013_v1 = vld [vmem:[#allocation30_spill] sm:$0xff]  ;;  %v11014_v58 = vld [vmem:[#allocation31_spill] sm:$0xff] }
 0x571   : > { %5136 = vst [vmem:[%s8502_s21 + $0x200] sm:$0xff] %v5061_v52  ;;  %v6980_v52 = vld [vmem:[%s10515_s1 + $0x804] sm:$0xf0] }
 0x572   : > { %v4039_v45 = vpop.f32.mrf.mxu2  ;;  %v3895_v42 = vpop.f32.mrf.mxu0  ;;  %4418 = vmatpush.bf16.msrb.mxu0 %v6332_v50 }
 0x573   : > { %v4040_v2 = vadd.f32 %v4039_v45, %v3967_v25  ;;  %v4112_v46 = vpop.f32.mrf.mxu3  ;;  %v3968_v40 = vpop.f32.mrf.mxu1  ;;  %v3896_v22 = vadd.f32 %v3895_v42, %v9506_v61  ;;  %v6524_v61 = vor.u32 %v6980_v52, %v6523_v44  ;;  %v11012_v42 = vld [vmem:[#allocation75_spill] sm:$0xff] }
 0x575   : > { %v4113_v9 = vadd.f32 %v4112_v46, %v4040_v2  ;;  %v3969_v36 = vadd.f32 %v3968_v40, %v3896_v22  ;;  %4491 = vmatpush.bf16.msrb.mxu1 %v6524_v61  ;;  %v11011_v46 = vld [vmem:[#allocation29_spill] sm:$0xff]  ;;  %v11015_v40 = vld [vmem:[#allocation32_spill] sm:$0xff] }
 0x577   : > { %v5064_v28 = vpack.c.bf16 %v4113_v9, %v11009_v59 }
 0x579   : > { %5139 = vst [vmem:[%s8502_s21 + $0x218] sm:$0xff] %v5064_v28 }
 0x57a   : > { %v4041_v14 = vpop.f32.mrf.mxu2  ;;  %v3898_v3 = vpop.f32.mrf.mxu0 }
 0x57b   : > { %v4042_v53 = vadd.f32 %v4041_v14, %v3969_v36  ;;  %v4114_v25 = vpop.f32.mrf.mxu3  ;;  %v3971_v15 = vpop.f32.mrf.mxu1  ;;  %v3899_v2 = vadd.f32 %v3898_v3, %v11010_v62  ;;  %v11016_v36 = vld [vmem:[#allocation78_spill] sm:$0xff] }
 0x57d   : > { %v4115_v45 = vadd.f32 %v4114_v25, %v4042_v53  ;;  %4164 = vmatmul.bf16.gmra.mxu0 %v11011_v46  ;;  %v3972_v22 = vadd.f32 %v3971_v15, %v3899_v2  ;;  %v9838_v53 = vld [vmem:[%s10516_s2] sm:$0x3f] }
 0x57e   : > { %4237 = vmatmul.bf16.gmra.mxu1 %v11013_v1  ;;  %v9841_v25 = vperm.slane %v9838_v53, 4 }
 0x57f   : > { %v5067_v9 = vpack.c.bf16 %v4115_v45, %v11012_v42  ;;  %4310 = vmatmul.bf16.gmra.mxu2 %v11014_v58  ;;  %v6731_v42 = vld [vmem:[%s10515_s1 + $0x44] sm:$0xf] }
 0x580   : > { %4383 = vmatmul.bf16.gmra.mxu3 %v11015_v40 }
 0x581   : > { %5142 = vst [vmem:[%s8502_s21 + $0x230] sm:$0xff] %v5067_v9  ;;  %v5541_v9 = vld [vmem:[%s10515_s1 + $0x58] sm:$0xf0] }
 0x582   : > { %v4044_v44 = vpop.f32.mrf.mxu2  ;;  %v3900_v50 = vpop.f32.mrf.mxu0 }
 0x583   : > { %v4045_v59 = vadd.f32 %v4044_v44, %v3972_v22  ;;  %v4117_v28 = vpop.f32.mrf.mxu3  ;;  %v3973_v52 = vpop.f32.mrf.mxu1  ;;  %v6779_v22 = vld [vmem:[%s10515_s1 + $0x1c4] sm:$0xf]  ;;  %v5733_v50 = vld [vmem:[%s10515_s1 + $0x1d8] sm:$0xf0] }
 0x584   : > { %v6307_v52 = vld [vmem:[%s10515_s1 + $0x640] sm:$0xf] }
 0x585   : > { %v4118_v61 = vadd.f32 %v4117_v28, %v4045_v59  ;;  %v11017_v59 = vld [vmem:[#allocation33_spill] sm:$0xff]  ;;  %v5544_v28 = vor.u32 %v6731_v42, %v5541_v9 }
 0x587   : > { %v5070_v14 = vpack.c.bf16 %v4118_v61, %v11016_v36  ;;  %v6926_v61 = vld [vmem:[%s10515_s1 + $0x654] sm:$0xf0]  ;;  %v11018_v36 = vld [vmem:[#allocation34_spill] sm:$0xff]  ;;  %4565 = vmatpush.bf16.msrb.mxu2 %v5544_v28 }
 0x589   : > { %5145 = vst [vmem:[%s8502_s21 + $0x248] sm:$0x33] %v5070_v14  ;;  %v11019_v14 = vld [vmem:[#allocation35_spill] sm:$0xff] }
 0x58a   : > { %v4046_v3 = vpop.f32.mrf.mxu2  ;;  %v4130_v15 = vpop.f32.mrf.mxu0 }
 0x58b   : > { %v4119_v45 = vpop.f32.mrf.mxu3  ;;  %v4131_v62 = vadd.f32 %v4130_v15, %v9841_v25  ;;  %v4203_v2 = vpop.f32.mrf.mxu1  ;;  %v5736_v3 = vor.u32 %v6779_v22, %v5733_v50  ;;  %v11020_v15 = vld [vmem:[#allocation36_spill] sm:$0xff] }
 0x58c   : > { %v6308_v45 = vor.u32 %v6926_v61, %v6307_v52 }
 0x58d   : > { %v4204_v44 = vadd.f32 %v4203_v2, %v4131_v62  ;;  %4169 = vmatmul.bf16.gmra.mxu0 %v11017_v59  ;;  %v6499_v62 = vld [vmem:[%s10515_s1 + $0x7c0] sm:$0xf]  ;;  %v6974_v2 = vld [vmem:[%s10515_s1 + $0x7d4] sm:$0xf0]  ;;  %4638 = vmatpush.bf16.msrb.mxu3 %v5736_v3 }
 0x58e   : > { %4242 = vmatmul.bf16.gmra.mxu1 %v11018_v36  ;;  %4419 = vmatpush.bf16.msrb.mxu0 %v6308_v45  ;;  %v6500_v42 = vor.u32 %v6974_v2, %v6499_v62  ;;  %v11022_v2 = vld [vmem:[#allocation38_spill] sm:$0xff] }
 0x58f   : > { %4315 = vmatmul.bf16.gmra.mxu2 %v11019_v14 }
 0x590   : > { %4388 = vmatmul.bf16.gmra.mxu3 %v11020_v15  ;;  %4492 = vmatpush.bf16.msrb.mxu1 %v6500_v42 }
 0x592   : > { %v4276_v9 = vpop.f32.mrf.mxu2  ;;  %v4132_v14 = vpop.f32.mrf.mxu0 }
 0x593   : > { %v4277_v40 = vadd.f32 %v4276_v9, %v4204_v44  ;;  %v4349_v58 = vpop.f32.mrf.mxu3  ;;  %v4133_v22 = vadd.f32 %v4132_v14, %v9841_v25  ;;  %v4205_v50 = vpop.f32.mrf.mxu1  ;;  %v11021_v44 = vld [vmem:[#allocation37_spill] sm:$0xff] }
 0x595   : > { %v9874_v28 = vadd.f32 %v4349_v58, %v4277_v40  ;;  %v4206_v52 = vadd.f32 %v4205_v50, %v4133_v22  ;;  %v6773_v50 = vld [vmem:[%s10515_s1 + $0x194] sm:$0xf] }
 0x59a   : > { %v4278_v61 = vpop.f32.mrf.mxu2  ;;  %v4135_v56 = vpop.f32.mrf.mxu0 }
 0x59b   : > { %v4279_v15 = vadd.f32 %v4278_v61, %v4206_v52  ;;  %v4351_v51 = vpop.f32.mrf.mxu3  ;;  %v4136_v34 = vadd.f32 %v4135_v56, %v9841_v25  ;;  %v4208_v3 = vpop.f32.mrf.mxu1  ;;  %v5709_v61 = vld [vmem:[%s10515_s1 + $0x1a8] sm:$0xf0] }
 0x59d   : > { %v9877_v45 = vadd.f32 %v4351_v51, %v4279_v15  ;;  %v4209_v62 = vadd.f32 %v4208_v3, %v4136_v34  ;;  %4174 = vmatmul.bf16.gmra.mxu0 %v11021_v44  ;;  %v6725_v34 = vld [vmem:[%s10515_s1 + $0x14] sm:$0xf]  ;;  %v5517_v15 = vld [vmem:[%s10515_s1 + $0x28] sm:$0xf0]  ;;  %v6283_v3 = vld [vmem:[%s10515_s1 + $0x610] sm:$0xf] }
 0x59e   : > { %4247 = vmatmul.bf16.gmra.mxu1 %v11022_v2  ;;  %v5520_v52 = vor.u32 %v6725_v34, %v5517_v15 }
 0x59f   : > { %4320 = vmatmul.bf16.gmra.mxu2 %v10964_v47  ;;  %v6475_v47 = vld [vmem:[%s10515_s1 + $0x790] sm:$0xf] }
 0x5a0   : > { %4393 = vmatmul.bf16.gmra.mxu3 %v10965_v31  ;;  %4566 = vmatpush.bf16.msrb.mxu2 %v5520_v52 }
 0x5a2   : > { %v4281_v58 = vpop.f32.mrf.mxu2  ;;  %v4137_v42 = vpop.f32.mrf.mxu0 }
 0x5a3   : > { %v4282_v40 = vadd.f32 %v4281_v58, %v4209_v62  ;;  %v4354_v14 = vpop.f32.mrf.mxu3  ;;  %v4138_v9 = vadd.f32 %v4137_v42, %v9841_v25  ;;  %v4210_v22 = vpop.f32.mrf.mxu1  ;;  %v6920_v62 = vld [vmem:[%s10515_s1 + $0x624] sm:$0xf0]  ;;  %v5712_v58 = vor.u32 %v6773_v50, %v5709_v61  ;;  %v11023_v61 = vld [vmem:[#allocation41_spill] sm:$0xff] }
 0x5a4   : > { %v6968_v50 = vld [vmem:[%s10515_s1 + $0x7a4] sm:$0xf0] }
 0x5a5   : > { %v9884_v56 = vadd.f32 %v4354_v14, %v4282_v40  ;;  %v4211_v51 = vadd.f32 %v4210_v22, %v4138_v9  ;;  %v6284_v40 = vor.u32 %v6920_v62, %v6283_v3  ;;  %4639 = vmatpush.bf16.msrb.mxu3 %v5712_v58  ;;  %v6476_v3 = vor.u32 %v6968_v50, %v6475_v47 }
 0x5a7   : > { %4420 = vmatpush.bf16.msrb.mxu0 %v6284_v40  ;;  %4493 = vmatpush.bf16.msrb.mxu1 %v6476_v3 }
 0x5aa   : > { %v4283_v14 = vpop.f32.mrf.mxu2  ;;  %v4140_v22 = vpop.f32.mrf.mxu0 }
 0x5ab   : > { %v4284_v42 = vadd.f32 %v4283_v14, %v4211_v51  ;;  %v4356_v9 = vpop.f32.mrf.mxu3  ;;  %v4141_v34 = vadd.f32 %v4140_v22, %v9841_v25  ;;  %v4213_v15 = vpop.f32.mrf.mxu1  ;;  %v11024_v51 = vld [vmem:[#allocation42_spill] sm:$0xff] }
 0x5ad   : > { %v9905_v31 = vadd.f32 %v4356_v9, %v4284_v42  ;;  %v4214_v52 = vadd.f32 %v4213_v15, %v4141_v34  ;;  %4179 = vmatmul.bf16.gmra.mxu0 %v11023_v61 }
 0x5ae   : > { %4252 = vmatmul.bf16.gmra.mxu1 %v11024_v51 }
 0x5af   : > { %4325 = vmatmul.bf16.gmra.mxu2 %v10966_v5 }
 0x5b0   : > { %4398 = vmatmul.bf16.gmra.mxu3 %v10968_v13  ;;  %v11025_v13 = vld [vmem:[#allocation45_spill] sm:$0xff] }
 0x5b2   : > { %v4286_v62 = vpop.f32.mrf.mxu2  ;;  %v4142_v14 = vpop.f32.mrf.mxu0 }
 0x5b3   : > { %v4287_v58 = vadd.f32 %v4286_v62, %v4214_v52  ;;  %v4359_v40 = vpop.f32.mrf.mxu3  ;;  %v4143_v42 = vadd.f32 %v4142_v14, %v9841_v25  ;;  %v4215_v9 = vpop.f32.mrf.mxu1  ;;  %v11026_v52 = vld [vmem:[#allocation46_spill] sm:$0xff] }
 0x5b4   : > { %v6959_v62 = vld [vmem:[%s10515_s1 + $0x764] sm:$0xf] }
 0x5b5   : > { %v9918_v22 = vadd.f32 %v4359_v40, %v4287_v58  ;;  %v4216_v34 = vadd.f32 %v4215_v9, %v4143_v42  ;;  %v6453_v58 = vld [vmem:[%s10515_s1 + $0x778] sm:$0xf0] }
 0x5ba   : > { %v4288_v15 = vpop.f32.mrf.mxu2  ;;  %v4145_v50 = vpop.f32.mrf.mxu0 }
 0x5bb   : > { %v4289_v4 = vadd.f32 %v4288_v15, %v4216_v34  ;;  %v4361_v47 = vpop.f32.mrf.mxu3  ;;  %v4146_v33 = vadd.f32 %v4145_v50, %v9841_v25  ;;  %v4218_v5 = vpop.f32.mrf.mxu1 }
 0x5bd   : > { %v9921_v39 = vadd.f32 %v4361_v47, %v4289_v4  ;;  %v4219_v3 = vadd.f32 %v4218_v5, %v4146_v33  ;;  %4184 = vmatmul.bf16.gmra.mxu0 %v11025_v13  ;;  %v7007_v5 = vld [vmem:[%s10515_s1 + $0x8e4] sm:$0xf]  ;;  %v6456_v33 = vor.u32 %v6959_v62, %v6453_v58  ;;  %v6645_v4 = vld [vmem:[%s10515_s1 + $0x8f8] sm:$0xf0] }
 0x5be   : > { %4257 = vmatmul.bf16.gmra.mxu1 %v11026_v52  ;;  %v6648_v14 = vor.u32 %v7007_v5, %v6645_v4  ;;  %v6863_v62 = vld [vmem:[%s10515_s1 + $0x464] sm:$0xf]  ;;  %v6069_v58 = vld [vmem:[%s10515_s1 + $0x478] sm:$0xf0] }
 0x5bf   : > { %4330 = vmatmul.bf16.gmra.mxu2 %v10970_v19  ;;  %v6072_v5 = vor.u32 %v6863_v62, %v6069_v58  ;;  %v11027_v62 = vld [vmem:[#allocation49_spill] sm:$0xff]  ;;  %v11028_v58 = vld [vmem:[#allocation50_spill] sm:$0xff] }
 0x5c0   : > { %4403 = vmatmul.bf16.gmra.mxu3 %v10971_v37  ;;  %4851 = vmatpush.bf16.msra.mxu2 %v6456_v33  ;;  %v6261_v33 = vld [vmem:[%s10515_s1 + $0x5f8] sm:$0xf0] }
 0x5c1   : > { %4924 = vmatpush.bf16.msra.mxu3 %v6648_v14  ;;  %4705 = vmatpush.bf16.msra.mxu0 %v6072_v5 }
 0x5c2   : > { %v4291_v40 = vpop.f32.mrf.mxu2  ;;  %v4147_v34 = vpop.f32.mrf.mxu0 }
 0x5c3   : > { %v4292_v42 = vadd.f32 %v4291_v40, %v4219_v3  ;;  %v4364_v9 = vpop.f32.mrf.mxu3  ;;  %v4148_v15 = vadd.f32 %v4147_v34, %v9841_v25  ;;  %v4220_v47 = vpop.f32.mrf.mxu1  ;;  %v6911_v3 = vld [vmem:[%s10515_s1 + $0x5e4] sm:$0xf] }
 0x5c4   : > { %v6264_v4 = vor.u32 %v6911_v3, %v6261_v33 }
 0x5c5   : > { %v9940_v50 = vadd.f32 %v4364_v9, %v4292_v42  ;;  %v4221_v37 = vadd.f32 %v4220_v47, %v4148_v15 }
 0x5c6   : > { %4778 = vmatpush.bf16.msra.mxu1 %v6264_v4 }
 0x5ca   : > { %v4293_v40 = vpop.f32.mrf.mxu2  ;;  %v4150_v9 = vpop.f32.mrf.mxu0 }
 0x5cb   : > { %v4294_v14 = vadd.f32 %v4293_v40, %v4221_v37  ;;  %v4366_v42 = vpop.f32.mrf.mxu3  ;;  %v4151_v34 = vadd.f32 %v4150_v9, %v9841_v25  ;;  %v4223_v19 = vpop.f32.mrf.mxu1 }
 0x5cd   : > { %v9955_v15 = vadd.f32 %v4366_v42, %v4294_v14  ;;  %v4224_v47 = vadd.f32 %v4223_v19, %v4151_v34  ;;  %4189 = vmatmul.bf16.gmra.mxu0 %v11027_v62  ;;  %v6953_v19 = vld [vmem:[%s10515_s1 + $0x734] sm:$0xf]  ;;  %v6429_v42 = vld [vmem:[%s10515_s1 + $0x748] sm:$0xf0] }
 0x5ce   : > { %4262 = vmatmul.bf16.gmra.mxu1 %v11028_v58  ;;  %v7001_v34 = vld [vmem:[%s10515_s1 + $0x8b4] sm:$0xf] }
 0x5cf   : > { %4335 = vmatmul.bf16.gmra.mxu2 %v10972_v30 }
 0x5d0   : > { %4408 = vmatmul.bf16.gmra.mxu3 %v10973_v21 }
 0x5d2   : > { %v4296_v5 = vpop.f32.mrf.mxu2  ;;  %v4152_v37 = vpop.f32.mrf.mxu0 }
 0x5d3   : > { %v4297_v3 = vadd.f32 %v4296_v5, %v4224_v47  ;;  %v4369_v33 = vpop.f32.mrf.mxu3  ;;  %v4153_v4 = vadd.f32 %v4152_v37, %v9841_v25  ;;  %v4225_v40 = vpop.f32.mrf.mxu1  ;;  %v6432_v47 = vor.u32 %v6953_v19, %v6429_v42  ;;  %v6621_v5 = vld [vmem:[%s10515_s1 + $0x8c8] sm:$0xf0]  ;;  %v6857_v19 = vld [vmem:[%s10515_s1 + $0x434] sm:$0xf] }
 0x5d4   : > { %v6045_v42 = vld [vmem:[%s10515_s1 + $0x448] sm:$0xf0] }
 0x5d5   : > { %v9962_v9 = vadd.f32 %v4369_v33, %v4297_v3  ;;  %v4226_v14 = vadd.f32 %v4225_v40, %v4153_v4  ;;  %v6624_v3 = vor.u32 %v7001_v34, %v6621_v5  ;;  %4852 = vmatpush.bf16.msra.mxu2 %v6432_v47  ;;  %v11030_v34 = vld [vmem:[#allocation54_spill] sm:$0xff]  ;;  %v6048_v47 = vor.u32 %v6857_v19, %v6045_v42 }
 0x5d7   : > { %4925 = vmatpush.bf16.msra.mxu3 %v6624_v3  ;;  %4706 = vmatpush.bf16.msra.mxu0 %v6048_v47 }
 0x5da   : > { %v4298_v33 = vpop.f32.mrf.mxu2  ;;  %v4155_v40 = vpop.f32.mrf.mxu0 }
 0x5db   : > { %v4299_v37 = vadd.f32 %v4298_v33, %v4226_v14  ;;  %v4371_v4 = vpop.f32.mrf.mxu3  ;;  %v4156_v21 = vadd.f32 %v4155_v40, %v9841_v25  ;;  %v4228_v30 = vpop.f32.mrf.mxu1  ;;  %v6905_v14 = vld [vmem:[%s10515_s1 + $0x5b4] sm:$0xf] }
 0x5dd   : > { %v9977_v43 = vadd.f32 %v4371_v4, %v4299_v37  ;;  %v4229_v63 = vadd.f32 %v4228_v30, %v4156_v21  ;;  %4421 = vmatmul.bf16.vlgmr.msrb.gmra.mxu0 %v11029_v49  ;;  %v6237_v30 = vld [vmem:[%s10515_s1 + $0x5c8] sm:$0xf0] }
 0x5de   : > { %4494 = vmatmul.bf16.vlgmr.msrb.gmra.mxu1 %v11030_v34  ;;  %v6240_v21 = vor.u32 %v6905_v14, %v6237_v30  ;;  %v11031_v30 = vld [vmem:[#allocation55_spill] sm:$0xff] }
 0x5df   : > { %4567 = vmatmul.bf16.vlgmr.msrb.gmra.mxu2 %v10974_v23 }
 0x5e0   : > { %4640 = vmatmul.bf16.vlgmr.msrb.gmra.mxu3 %v10975_v18  ;;  %4779 = vmatpush.bf16.msra.mxu1 %v6240_v21 }
 0x5e2   : > { %v4301_v5 = vpop.f32.mrf.mxu2  ;;  %v4157_v37 = vpop.f32.mrf.mxu0 }
 0x5e3   : > { %v4302_v3 = vadd.f32 %v4301_v5, %v4229_v63  ;;  %v4374_v33 = vpop.f32.mrf.mxu3  ;;  %v4158_v4 = vadd.f32 %v4157_v37, %v9841_v25  ;;  %v4230_v40 = vpop.f32.mrf.mxu1  ;;  %v11032_v63 = vld [vmem:[#allocation56_spill] sm:$0xff] }
 0x5e5   : > { %v9996_v11 = vadd.f32 %v4374_v33, %v4302_v3  ;;  %v4231_v23 = vadd.f32 %v4230_v40, %v4158_v4 }
 0x5ea   : > { %v4303_v19 = vpop.f32.mrf.mxu2  ;;  %v4160_v49 = vpop.f32.mrf.mxu0 }
 0x5eb   : > { %v4304_v42 = vadd.f32 %v4303_v19, %v4231_v23  ;;  %v4376_v34 = vpop.f32.mrf.mxu3  ;;  %v4161_v57 = vadd.f32 %v4160_v49, %v9841_v25  ;;  %v4233_v18 = vpop.f32.mrf.mxu1  ;;  %v6597_v23 = vld [vmem:[%s10515_s1 + $0x898] sm:$0xf0]  ;;  %v6851_v19 = vld [vmem:[%s10515_s1 + $0x404] sm:$0xf] }
 0x5ed   : > { %v9999_v14 = vadd.f32 %v4376_v34, %v4304_v42  ;;  %v4234_v47 = vadd.f32 %v4233_v18, %v4161_v57  ;;  %4426 = vmatmul.bf16.gmra.mxu0 %v11031_v30  ;;  %v6947_v57 = vld [vmem:[%s10515_s1 + $0x704] sm:$0xf]  ;;  %v6405_v34 = vld [vmem:[%s10515_s1 + $0x718] sm:$0xf0] }
 0x5ee   : > { %4499 = vmatmul.bf16.gmra.mxu1 %v11032_v63  ;;  %v6408_v40 = vor.u32 %v6947_v57, %v6405_v34  ;;  %v6021_v42 = vld [vmem:[%s10515_s1 + $0x418] sm:$0xf0]  ;;  %v11034_v63 = vld [vmem:[#allocation58_spill] sm:$0xff] }
 0x5ef   : > { %4572 = vmatmul.bf16.gmra.mxu2 %v10977_v24  ;;  %v6995_v24 = vld [vmem:[%s10515_s1 + $0x884] sm:$0xf] }
 0x5f0   : > { %4645 = vmatmul.bf16.gmra.mxu3 %v10978_v20  ;;  %v6600_v18 = vor.u32 %v6995_v24, %v6597_v23  ;;  %4853 = vmatpush.bf16.msra.mxu2 %v6408_v40 }
 0x5f2   : > { %v4306_v21 = vpop.f32.mrf.mxu2  ;;  %v4162_v33 = vpop.f32.mrf.mxu0  ;;  %4926 = vmatpush.bf16.msra.mxu3 %v6600_v18 }
 0x5f3   : > { %v4307_v5 = vadd.f32 %v4306_v21, %v4234_v47  ;;  %v4379_v3 = vpop.f32.mrf.mxu3  ;;  %v4163_v37 = vadd.f32 %v4162_v33, %v9841_v25  ;;  %v4235_v4 = vpop.f32.mrf.mxu1  ;;  %v6024_v47 = vor.u32 %v6851_v19, %v6021_v42  ;;  %v6899_v21 = vld [vmem:[%s10515_s1 + $0x584] sm:$0xf]  ;;  %v11033_v42 = vld [vmem:[#allocation57_spill] sm:$0xff] }
 0x5f5   : > { %v10006_v49 = vadd.f32 %v4379_v3, %v4307_v5  ;;  %v4236_v20 = vadd.f32 %v4235_v4, %v4163_v37  ;;  %v6213_v5 = vld [vmem:[%s10515_s1 + $0x598] sm:$0xf0]  ;;  %4707 = vmatpush.bf16.msra.mxu0 %v6024_v47 }
 0x5f6   : > { %v6216_v3 = vor.u32 %v6899_v21, %v6213_v5 }
 0x5f8   : > { %4780 = vmatpush.bf16.msra.mxu1 %v6216_v3 }
 0x5fa   : > { %v4308_v33 = vpop.f32.mrf.mxu2  ;;  %v4165_v57 = vpop.f32.mrf.mxu0 }
 0x5fb   : > { %v4309_v37 = vadd.f32 %v4308_v33, %v4236_v20  ;;  %v4381_v4 = vpop.f32.mrf.mxu3  ;;  %v4166_v34 = vadd.f32 %v4165_v57, %v9841_v25  ;;  %v4238_v24 = vpop.f32.mrf.mxu1 }
 0x5fd   : > { %v10033_v23 = vadd.f32 %v4381_v4, %v4309_v37  ;;  %v4239_v19 = vadd.f32 %v4238_v24, %v4166_v34  ;;  %4431 = vmatmul.bf16.gmra.mxu0 %v11033_v42  ;;  %v11035_v42 = vld [vmem:[#allocation59_spill] sm:$0xff] }
 0x5fe   : > { %4504 = vmatmul.bf16.gmra.mxu1 %v11034_v63 }
 0x5ff   : > { %4577 = vmatmul.bf16.gmra.mxu2 %v10982_v10 }
 0x600   : > { %4650 = vmatmul.bf16.gmra.mxu3 %v10984_v60 }
 0x602   : > { %v4311_v40 = vpop.f32.mrf.mxu2  ;;  %v4167_v20 = vpop.f32.mrf.mxu0 }
 0x603   : > { %v4312_v18 = vadd.f32 %v4311_v40, %v4239_v19  ;;  %v4384_v47 = vpop.f32.mrf.mxu3  ;;  %v4168_v21 = vadd.f32 %v4167_v20, %v9841_v25  ;;  %v4240_v5 = vpop.f32.mrf.mxu1  ;;  %v6941_v19 = vld [vmem:[%s10515_s1 + $0x6d4] sm:$0xf]  ;;  %v6381_v40 = vld [vmem:[%s10515_s1 + $0x6e8] sm:$0xf0] }
 0x604   : > { %v6384_v20 = vor.u32 %v6941_v19, %v6381_v40  ;;  %v6893_v40 = vld [vmem:[%s10515_s1 + $0x554] sm:$0xf] }
 0x605   : > { %v10040_v3 = vadd.f32 %v4384_v47, %v4312_v18  ;;  %v4241_v33 = vadd.f32 %v4240_v5, %v4168_v21  ;;  %v6989_v18 = vld [vmem:[%s10515_s1 + $0x854] sm:$0xf] }
 0x606   : > { %v11036_v47 = vld [vmem:[#allocation60_spill] sm:$0xff]  ;;  %4854 = vmatpush.bf16.msra.mxu2 %v6384_v20 }
 0x607   : > { %v6845_v5 = vld [vmem:[%s10515_s1 + $0x3d4] sm:$0xf] }
 0x60a   : > { %v4313_v37 = vpop.f32.mrf.mxu2  ;;  %v4170_v34 = vpop.f32.mrf.mxu0 }
 0x60b   : > { %v4314_v4 = vadd.f32 %v4313_v37, %v4241_v33  ;;  %v4386_v57 = vpop.f32.mrf.mxu3  ;;  %v4171_v24 = vadd.f32 %v4170_v34, %v9841_v25  ;;  %v4243_v63 = vpop.f32.mrf.mxu1  ;;  %v5997_v33 = vld [vmem:[%s10515_s1 + $0x3e8] sm:$0xf0] }
 0x60c   : > { %v6000_v37 = vor.u32 %v6845_v5, %v5997_v33 }
 0x60d   : > { %v10043_v10 = vadd.f32 %v4386_v57, %v4314_v4  ;;  %v4244_v60 = vadd.f32 %v4243_v63, %v4171_v24  ;;  %4436 = vmatmul.bf16.gmra.mxu0 %v11035_v42  ;;  %v6573_v63 = vld [vmem:[%s10515_s1 + $0x868] sm:$0xf0] }
 0x60e   : > { %4509 = vmatmul.bf16.gmra.mxu1 %v11036_v47  ;;  %v6576_v21 = vor.u32 %v6989_v18, %v6573_v63  ;;  %4708 = vmatpush.bf16.msra.mxu0 %v6000_v37  ;;  %v6189_v18 = vld [vmem:[%s10515_s1 + $0x568] sm:$0xf0] }
 0x60f   : > { %4582 = vmatmul.bf16.gmra.mxu2 %v10988_v8  ;;  %v6192_v63 = vor.u32 %v6893_v40, %v6189_v18  ;;  %v11038_v47 = vld [vmem:[#allocation63_spill] sm:$0xff] }
 0x610   : > { %4655 = vmatmul.bf16.gmra.mxu3 %v10990_v7 }
 0x611   : > { %4927 = vmatpush.bf16.msra.mxu3 %v6576_v21  ;;  %4781 = vmatpush.bf16.msra.mxu1 %v6192_v63 }
 0x612   : > { %v4316_v4 = vpop.f32.mrf.mxu2  ;;  %v4172_v34 = vpop.f32.mrf.mxu0 }
 0x613   : > { %v4317_v8 = vadd.f32 %v4316_v4, %v4244_v60  ;;  %v4389_v57 = vpop.f32.mrf.mxu3  ;;  %v4173_v24 = vadd.f32 %v4172_v34, %v9841_v25  ;;  %v4245_v7 = vpop.f32.mrf.mxu1  ;;  %v11037_v34 = vld [vmem:[#allocation62_spill] sm:$0xff] }
 0x615   : > { %v10068_v19 = vadd.f32 %v4389_v57, %v4317_v8  ;;  %v4246_v20 = vadd.f32 %v4245_v7, %v4173_v24 }
 0x61a   : > { %v4318_v60 = vpop.f32.mrf.mxu2  ;;  %v4175_v33 = vpop.f32.mrf.mxu0 }
 0x61b   : > { %v4319_v21 = vadd.f32 %v4318_v60, %v4246_v20  ;;  %v4391_v5 = vpop.f32.mrf.mxu3  ;;  %v4176_v37 = vadd.f32 %v4175_v33, %v9841_v25  ;;  %v4248_v4 = vpop.f32.mrf.mxu1 }
 0x61d   : > { %v10077_v8 = vadd.f32 %v4391_v5, %v4319_v21  ;;  %v4249_v57 = vadd.f32 %v4248_v4, %v4176_v37  ;;  %4441 = vmatmul.bf16.gmra.mxu0 %v11037_v34  ;;  %v6935_v5 = vld [vmem:[%s10515_s1 + $0x6a4] sm:$0xf]  ;;  %v6549_v37 = vld [vmem:[%s10515_s1 + $0x838] sm:$0xf0] }
 0x61e   : > { %4514 = vmatmul.bf16.gmra.mxu1 %v11038_v47 }
 0x61f   : > { %4587 = vmatmul.bf16.gmra.mxu2 %v10994_v48  ;;  %v6357_v48 = vld [vmem:[%s10515_s1 + $0x6b8] sm:$0xf0] }
 0x620   : > { %4660 = vmatmul.bf16.gmra.mxu3 %v10996_v38  ;;  %v6983_v38 = vld [vmem:[%s10515_s1 + $0x824] sm:$0xf]  ;;  %v6360_v33 = vor.u32 %v6935_v5, %v6357_v48  ;;  %v5973_v48 = vld [vmem:[%s10515_s1 + $0x3b8] sm:$0xf0] }
 0x621   : > { %v6552_v4 = vor.u32 %v6983_v38, %v6549_v37  ;;  %v6839_v5 = vld [vmem:[%s10515_s1 + $0x3a4] sm:$0xf] }
 0x622   : > { %v4321_v24 = vpop.f32.mrf.mxu2  ;;  %v4177_v18 = vpop.f32.mrf.mxu0  ;;  %4855 = vmatpush.bf16.msra.mxu2 %v6360_v33  ;;  %v11041_v33 = vld [vmem:[#allocation64_spill] sm:$0xff]  ;;  %v5976_v37 = vor.u32 %v6839_v5, %v5973_v48 }
 0x623   : > { %v4322_v7 = vadd.f32 %v4321_v24, %v4249_v57  ;;  %v4394_v40 = vpop.f32.mrf.mxu3  ;;  %v4178_v20 = vadd.f32 %v4177_v18, %v9841_v25  ;;  %v4250_v63 = vpop.f32.mrf.mxu1  ;;  %4928 = vmatpush.bf16.msra.mxu3 %v6552_v4  ;;  %v6165_v4 = vld [vmem:[%s10515_s1 + $0x538] sm:$0xf0] }
 0x624   : > { %4709 = vmatpush.bf16.msra.mxu0 %v5976_v37 }
 0x625   : > { %v10084_v60 = vadd.f32 %v4394_v40, %v4322_v7  ;;  %v4251_v21 = vadd.f32 %v4250_v63, %v4178_v20 }
 0x627   : > { %11039 = vst [vmem:[#allocation72_spill] sm:$0xff] %v10084_v60 }
 0x62a   : > { %v4323_v57 = vpop.f32.mrf.mxu2  ;;  %v4180_v40 = vpop.f32.mrf.mxu0 }
 0x62b   : > { %v4324_v24 = vadd.f32 %v4323_v57, %v4251_v21  ;;  %v4396_v7 = vpop.f32.mrf.mxu3  ;;  %v4181_v18 = vadd.f32 %v4180_v40, %v9841_v25  ;;  %v4253_v20 = vpop.f32.mrf.mxu1  ;;  %v6887_v21 = vld [vmem:[%s10515_s1 + $0x524] sm:$0xf]  ;;  %v11042_v57 = vld [vmem:[#allocation65_spill] sm:$0xff] }
 0x62d   : > { %v10099_v63 = vadd.f32 %v4396_v7, %v4324_v24  ;;  %v4254_v38 = vadd.f32 %v4253_v20, %v4181_v18  ;;  %4446 = vmatmul.bf16.gmra.mxu0 %v11041_v33  ;;  %v6168_v24 = vor.u32 %v6887_v21, %v6165_v4  ;;  %v11043_v4 = vld [vmem:[#allocation66_spill] sm:$0xff] }
 0x62e   : > { %4519 = vmatmul.bf16.gmra.mxu1 %v11042_v57 }
 0x62f   : > { %11040 = vst [vmem:[#allocation73_spill] sm:$0xff] %v10099_v63  ;;  %4592 = vmatmul.bf16.gmra.mxu2 %v11001_v29  ;;  %4782 = vmatpush.bf16.msra.mxu1 %v6168_v24 }
 0x630   : > { %4665 = vmatmul.bf16.gmra.mxu3 %v11003_v41 }
 0x632   : > { %v4326_v7 = vpop.f32.mrf.mxu2  ;;  %v4182_v20 = vpop.f32.mrf.mxu0 }
 0x633   : > { %v4327_v40 = vadd.f32 %v4326_v7, %v4254_v38  ;;  %v4399_v18 = vpop.f32.mrf.mxu3  ;;  %v4183_v5 = vadd.f32 %v4182_v20, %v9841_v25  ;;  %v4255_v48 = vpop.f32.mrf.mxu1  ;;  %v11044_v38 = vld [vmem:[#allocation67_spill] sm:$0xff] }
 0x635   : > { %v10118_v33 = vadd.f32 %v4399_v18, %v4327_v40  ;;  %v4256_v63 = vadd.f32 %v4255_v48, %v4183_v5 }
 0x63a   : > { %v4328_v47 = vpop.f32.mrf.mxu2  ;;  %v4185_v60 = vpop.f32.mrf.mxu0 }
 0x63b   : > { %v4329_v34 = vadd.f32 %v4328_v47, %v4256_v63  ;;  %v4401_v57 = vpop.f32.mrf.mxu3  ;;  %v4186_v29 = vadd.f32 %v4185_v60, %v9841_v25  ;;  %v4258_v21 = vpop.f32.mrf.mxu1  ;;  %v6929_v47 = vld [vmem:[%s10515_s1 + $0x674] sm:$0xf]  ;;  %v6333_v60 = vld [vmem:[%s10515_s1 + $0x688] sm:$0xf0] }
 0x63c   : > { %v6336_v63 = vor.u32 %v6929_v47, %v6333_v60  ;;  %v6141_v60 = vld [vmem:[%s10515_s1 + $0x508] sm:$0xf0] }
 0x63d   : > { %v10121_v41 = vadd.f32 %v4401_v57, %v4329_v34  ;;  %v4259_v37 = vadd.f32 %v4258_v21, %v4186_v29  ;;  %4451 = vmatmul.bf16.gmra.mxu0 %v11043_v4  ;;  %v6977_v34 = vld [vmem:[%s10515_s1 + $0x7f4] sm:$0xf]  ;;  %v6525_v57 = vld [vmem:[%s10515_s1 + $0x808] sm:$0xf0] }
 0x63e   : > { %4524 = vmatmul.bf16.gmra.mxu1 %v11044_v38  ;;  %v6528_v24 = vor.u32 %v6977_v34, %v6525_v57  ;;  %4856 = vmatpush.bf16.msra.mxu2 %v6336_v63  ;;  %v6833_v29 = vld [vmem:[%s10515_s1 + $0x374] sm:$0xf]  ;;  %v5949_v21 = vld [vmem:[%s10515_s1 + $0x388] sm:$0xf0] }
 0x63f   : > { %4597 = vmatmul.bf16.gmra.mxu2 %v11007_v27  ;;  %v5952_v47 = vor.u32 %v6833_v29, %v5949_v21  ;;  %v11046_v29 = vld [vmem:[#allocation69_spill] sm:$0xff] }
 0x640   : > { %4670 = vmatmul.bf16.gmra.mxu3 %v11008_v0 }
 0x641   : > { %4929 = vmatpush.bf16.msra.mxu3 %v6528_v24  ;;  %4710 = vmatpush.bf16.msra.mxu0 %v5952_v47 }
 0x642   : > { %v4331_v27 = vpop.f32.mrf.mxu2  ;;  %v4187_v40 = vpop.f32.mrf.mxu0 }
 0x643   : > { %v4332_v0 = vadd.f32 %v4331_v27, %v4259_v37  ;;  %v4404_v7 = vpop.f32.mrf.mxu3  ;;  %v4188_v18 = vadd.f32 %v4187_v40, %v9841_v25  ;;  %v4260_v20 = vpop.f32.mrf.mxu1  ;;  %v6881_v37 = vld [vmem:[%s10515_s1 + $0x4f4] sm:$0xf] }
 0x644   : > { %v6144_v34 = vor.u32 %v6881_v37, %v6141_v60 }
 0x645   : > { %v10140_v5 = vadd.f32 %v4404_v7, %v4332_v0  ;;  %v4261_v48 = vadd.f32 %v4260_v20, %v4188_v18  ;;  %v11045_v20 = vld [vmem:[#allocation68_spill] sm:$0xff] }
 0x646   : > { %4783 = vmatpush.bf16.msra.mxu1 %v6144_v34 }
 0x64a   : > { %v4333_v63 = vpop.f32.mrf.mxu2  ;;  %v4190_v24 = vpop.f32.mrf.mxu0 }
 0x64b   : > { %v4334_v57 = vadd.f32 %v4333_v63, %v4261_v48  ;;  %v4406_v27 = vpop.f32.mrf.mxu3  ;;  %v4191_v0 = vadd.f32 %v4190_v24, %v9841_v25  ;;  %v4263_v7 = vpop.f32.mrf.mxu1 }
 0x64d   : > { %v10155_v40 = vadd.f32 %v4406_v27, %v4334_v57  ;;  %v4264_v18 = vadd.f32 %v4263_v7, %v4191_v0  ;;  %4456 = vmatmul.bf16.gmra.mxu0 %v11045_v20  ;;  %v6923_v0 = vld [vmem:[%s10515_s1 + $0x644] sm:$0xf] }
 0x64e   : > { %4529 = vmatmul.bf16.gmra.mxu1 %v11046_v29 }
 0x64f   : > { %4602 = vmatmul.bf16.gmra.mxu2 %v11011_v46  ;;  %v6309_v46 = vld [vmem:[%s10515_s1 + $0x658] sm:$0xf0] }
 0x650   : > { %4675 = vmatmul.bf16.gmra.mxu3 %v11013_v1  ;;  %v6971_v1 = vld [vmem:[%s10515_s1 + $0x7c4] sm:$0xf] }
 0x652   : > { %v4336_v21 = vpop.f32.mrf.mxu2  ;;  %v4192_v48 = vpop.f32.mrf.mxu0 }
 0x653   : > { %v4337_v37 = vadd.f32 %v4336_v21, %v4264_v18  ;;  %v4409_v47 = vpop.f32.mrf.mxu3  ;;  %v4265_v60 = vpop.f32.mrf.mxu1  ;;  %v11048_v18 = vld [vmem:[#allocation70_spill] sm:$0xff]  ;;  %v6312_v21 = vor.u32 %v6923_v0, %v6309_v46  ;;  %v11049_v48 = vld [vmem:[#allocation71_spill] sm:$0xff] }
 0x654   : > { %v10188_v60 = vperm.slane %v9838_v53, 5 }
 0x655   : > { %v10161_v34 = vadd.f32 %v4409_v47, %v4337_v37  ;;  %v6827_v37 = vld [vmem:[%s10515_s1 + $0x344] sm:$0xf]  ;;  %v5925_v47 = vld [vmem:[%s10515_s1 + $0x358] sm:$0xf0]  ;;  %4857 = vmatpush.bf16.msra.mxu2 %v6312_v21 }
 0x65a   : > { %v4338_v25 = vpop.f32.mrf.mxu2  ;;  %v4422_v57 = vpop.f32.mrf.mxu0 }
 0x65b   : > { %v4411_v63 = vpop.f32.mrf.mxu3  ;;  %v4423_v27 = vadd.f32 %v4422_v57, %v9874_v28  ;;  %v4495_v24 = vpop.f32.mrf.mxu1  ;;  %v6501_v28 = vld [vmem:[%s10515_s1 + $0x7d8] sm:$0xf0]  ;;  %v6875_v57 = vld [vmem:[%s10515_s1 + $0x4c4] sm:$0xf] }
 0x65c   : > { %v6504_v25 = vor.u32 %v6971_v1, %v6501_v28  ;;  %v5928_v63 = vor.u32 %v6827_v37, %v5925_v47 }
 0x65d   : > { %v10173_v7 = vadd.f32 %v4495_v24, %v4423_v27  ;;  %4461 = vmatmul.bf16.gmra.mxu0 %v11048_v18  ;;  %v6117_v27 = vld [vmem:[%s10515_s1 + $0x4d8] sm:$0xf0] }
 0x65e   : > { %4534 = vmatmul.bf16.gmra.mxu1 %v11049_v48  ;;  %4930 = vmatpush.bf16.msra.mxu3 %v6504_v25  ;;  %v6120_v24 = vor.u32 %v6875_v57, %v6117_v27 }
 0x65f   : > { %11047 = vst [vmem:[#allocation74_spill] sm:$0xff] %v10173_v7  ;;  %4607 = vmatmul.bf16.gmra.mxu2 %v11017_v59  ;;  %4711 = vmatpush.bf16.msra.mxu0 %v5928_v63 }
 0x660   : > { %4680 = vmatmul.bf16.gmra.mxu3 %v11018_v36  ;;  %4784 = vmatpush.bf16.msra.mxu1 %v6120_v24 }
 0x662   : > { %v4568_v59 = vpop.f32.mrf.mxu2  ;;  %v4424_v46 = vpop.f32.mrf.mxu0 }
 0x663   : > { %v4569_v53 = vadd.f32 %v4568_v59, %v10188_v60  ;;  %v4641_v0 = vpop.f32.mrf.mxu3  ;;  %v4425_v36 = vadd.f32 %v4424_v46, %v9877_v45  ;;  %v4497_v1 = vpop.f32.mrf.mxu1 }
 0x665   : > { %v10199_v21 = vadd.f32 %v4641_v0, %v4569_v53  ;;  %v10201_v28 = vadd.f32 %v4497_v1, %v4425_v36  ;;  %v6917_v1 = vld [vmem:[%s10515_s1 + $0x614] sm:$0xf] }
 0x66a   : > { %v4570_v37 = vpop.f32.mrf.mxu2  ;;  %v4427_v25 = vpop.f32.mrf.mxu0 }
 0x66b   : > { %v4571_v47 = vadd.f32 %v4570_v37, %v10188_v60  ;;  %v4643_v7 = vpop.f32.mrf.mxu3  ;;  %v4428_v63 = vadd.f32 %v4427_v25, %v9884_v56  ;;  %v4500_v57 = vpop.f32.mrf.mxu1  ;;  %v5901_v25 = vld [vmem:[%s10515_s1 + $0x328] sm:$0xf0] }
 0x66d   : > { %v10205_v27 = vadd.f32 %v4643_v7, %v4571_v47  ;;  %v10207_v59 = vadd.f32 %v4500_v57, %v4428_v63  ;;  %4466 = vmatmul.bf16.gmra.mxu0 %v10837_v12  ;;  %v6821_v47 = vld [vmem:[%s10515_s1 + $0x314] sm:$0xf] }
 0x66e   : > { %4539 = vmatmul.bf16.gmra.mxu1 %v10917_v35  ;;  %v5904_v57 = vor.u32 %v6821_v47, %v5901_v25 }
 0x66f   : > { %4612 = vmatmul.bf16.gmra.mxu2 %v11021_v44  ;;  %v6285_v44 = vld [vmem:[%s10515_s1 + $0x628] sm:$0xf0] }
 0x670   : > { %4685 = vmatmul.bf16.gmra.mxu3 %v11022_v2  ;;  %v6965_v2 = vld [vmem:[%s10515_s1 + $0x794] sm:$0xf]  ;;  %v6288_v37 = vor.u32 %v6917_v1, %v6285_v44  ;;  %4712 = vmatpush.bf16.msra.mxu0 %v5904_v57 }
 0x671   : > { %v6869_v44 = vld [vmem:[%s10515_s1 + $0x494] sm:$0xf] }
 0x672   : > { %v4573_v45 = vpop.f32.mrf.mxu2  ;;  %v4429_v0 = vpop.f32.mrf.mxu0  ;;  %4858 = vmatpush.bf16.msra.mxu2 %v6288_v37 }
 0x673   : > { %v4574_v24 = vadd.f32 %v4573_v45, %v10188_v60  ;;  %v4646_v53 = vpop.f32.mrf.mxu3  ;;  %v4430_v56 = vadd.f32 %v4429_v0, %v9905_v31  ;;  %v4502_v46 = vpop.f32.mrf.mxu1  ;;  %v6477_v31 = vld [vmem:[%s10515_s1 + $0x7a8] sm:$0xf0] }
 0x674   : > { %v6480_v63 = vor.u32 %v6965_v2, %v6477_v31  ;;  %v6093_v2 = vld [vmem:[%s10515_s1 + $0x4a8] sm:$0xf0] }
 0x675   : > { %v10215_v7 = vadd.f32 %v4646_v53, %v4574_v24  ;;  %v10217_v36 = vadd.f32 %v4502_v46, %v4430_v56  ;;  %v6096_v31 = vor.u32 %v6869_v44, %v6093_v2 }
 0x676   : > { %4931 = vmatpush.bf16.msra.mxu3 %v6480_v63 }
 0x677   : > { %4785 = vmatpush.bf16.msra.mxu1 %v6096_v31 }
 0x67a   : > { %v4575_v45 = vpop.f32.mrf.mxu2  ;;  %v4432_v0 = vpop.f32.mrf.mxu0 }
 0x67b   : > { %v4576_v24 = vadd.f32 %v4575_v45, %v10188_v60  ;;  %v4648_v53 = vpop.f32.mrf.mxu3  ;;  %v4433_v56 = vadd.f32 %v4432_v0, %v9918_v22  ;;  %v4505_v46 = vpop.f32.mrf.mxu1 }
 0x67d   : > { %v10239_v1 = vadd.f32 %v4648_v53, %v4576_v24  ;;  %v10247_v37 = vadd.f32 %v4505_v46, %v4433_v56  ;;  %4471 = vmatmul.bf16.gmra.mxu0 %v10920_v55 }
 0x67e   : > { %4544 = vmatmul.bf16.gmra.mxu1 %v10921_v17 }
 0x67f   : > { %4617 = vmatmul.bf16.gmra.mxu2 %v11023_v61 }
 0x680   : > { %4690 = vmatmul.bf16.gmra.mxu3 %v11024_v51 }
 0x682   : > { %v4578_v22 = vpop.f32.mrf.mxu2  ;;  %v4434_v63 = vpop.f32.mrf.mxu0 }
 0x683   : > { %v4579_v47 = vadd.f32 %v4578_v22, %v10188_v60  ;;  %v4651_v25 = vpop.f32.mrf.mxu3  ;;  %v4435_v57 = vadd.f32 %v4434_v63, %v9921_v39  ;;  %v4507_v45 = vpop.f32.mrf.mxu1 }
 0x685   : > { %v10255_v24 = vadd.f32 %v4651_v25, %v4579_v47  ;;  %v10257_v53 = vadd.f32 %v4507_v45, %v4435_v57 }
 0x68a   : > { %v4580_v0 = vpop.f32.mrf.mxu2  ;;  %v4437_v61 = vpop.f32.mrf.mxu0 }
 0x68b   : > { %v4581_v56 = vadd.f32 %v4580_v0, %v10188_v60  ;;  %v4653_v46 = vpop.f32.mrf.mxu3  ;;  %v4438_v51 = vadd.f32 %v4437_v61, %v9940_v50  ;;  %v4510_v44 = vpop.f32.mrf.mxu1 }
 0x68d   : > { %v10261_v2 = vadd.f32 %v4653_v46, %v4581_v56  ;;  %v10263_v31 = vadd.f32 %v4510_v44, %v4438_v51  ;;  %4476 = vmatmul.bf16.gmra.mxu0 %v8157_v16 }
 0x68e   : > { %4549 = vmatmul.bf16.gmra.mxu1 %v8160_v26 }
 0x68f   : > { %4622 = vmatmul.bf16.gmra.mxu2 %v11025_v13 }
 0x690   : > { %4695 = vmatmul.bf16.gmra.mxu3 %v11026_v52 }
 0x692   : > { %v4583_v39 = vpop.f32.mrf.mxu2  ;;  %v4439_v25 = vpop.f32.mrf.mxu0 }
 0x693   : > { %v4584_v22 = vadd.f32 %v4583_v39, %v10188_v60  ;;  %v4656_v47 = vpop.f32.mrf.mxu3  ;;  %v4440_v50 = vadd.f32 %v4439_v25, %v9955_v15  ;;  %v4512_v63 = vpop.f32.mrf.mxu1 }
 0x695   : > { %v10271_v57 = vadd.f32 %v4656_v47, %v4584_v22  ;;  %v10273_v45 = vadd.f32 %v4512_v63, %v4440_v50 }
 0x69a   : > { %v4585_v0 = vpop.f32.mrf.mxu2  ;;  %v4442_v61 = vpop.f32.mrf.mxu0 }
 0x69b   : > { %v4586_v56 = vadd.f32 %v4585_v0, %v10188_v60  ;;  %v4658_v46 = vpop.f32.mrf.mxu3  ;;  %v4443_v13 = vadd.f32 %v4442_v61, %v9962_v9  ;;  %v4515_v52 = vpop.f32.mrf.mxu1 }
 0x69d   : > { %v10277_v51 = vadd.f32 %v4658_v46, %v4586_v56  ;;  %v10279_v44 = vadd.f32 %v4515_v52, %v4443_v13  ;;  %4481 = vmatmul.bf16.gmra.mxu0 %v8202_v32 }
 0x69e   : > { %4554 = vmatmul.bf16.gmra.mxu1 %v8205_v6 }
 0x69f   : > { %4627 = vmatmul.bf16.gmra.mxu2 %v11027_v62 }
 0x6a0   : > { %4700 = vmatmul.bf16.gmra.mxu3 %v11028_v58 }
 0x6a2   : > { %v4588_v15 = vpop.f32.mrf.mxu2  ;;  %v4444_v47 = vpop.f32.mrf.mxu0 }
 0x6a3   : > { %v4589_v39 = vadd.f32 %v4588_v15, %v10188_v60  ;;  %v4661_v22 = vpop.f32.mrf.mxu3  ;;  %v4445_v9 = vadd.f32 %v4444_v47, %v9977_v43  ;;  %v4517_v25 = vpop.f32.mrf.mxu1  ;;  %v11051_v43 = vld [vmem:[#allocation4_spill] sm:$0xff]  ;;  %v11052_v15 = vld [vmem:[#allocation53_spill] sm:$0xff] }
 0x6a5   : > { %v10287_v50 = vadd.f32 %v4661_v22, %v4589_v39  ;;  %v10289_v63 = vadd.f32 %v4517_v25, %v4445_v9  ;;  %v11053_v39 = vld [vmem:[#allocation54_spill] sm:$0xff] }
 0x6aa   : > { %v4590_v0 = vpop.f32.mrf.mxu2  ;;  %v4447_v61 = vpop.f32.mrf.mxu0 }
 0x6ab   : > { %v4591_v56 = vadd.f32 %v4590_v0, %v10188_v60  ;;  %v4663_v46 = vpop.f32.mrf.mxu3  ;;  %v4448_v62 = vadd.f32 %v4447_v61, %v9996_v11  ;;  %v4520_v58 = vpop.f32.mrf.mxu1 }
 0x6ad   : > { %v10293_v13 = vadd.f32 %v4663_v46, %v4591_v56  ;;  %v10295_v52 = vadd.f32 %v4520_v58, %v4448_v62  ;;  %4713 = vmatmul.bf16.vlgmr.msra.gmra.mxu0 %v7307_v54 }
 0x6ae   : > { %4786 = vmatmul.bf16.vlgmr.msra.gmra.mxu1 %v11051_v43 }
 0x6af   : > { %11050 = vst [vmem:[#allocation76_spill] sm:$0xff] %v10295_v52  ;;  %4859 = vmatmul.bf16.vlgmr.msra.gmra.mxu2 %v11052_v15  ;;  %v11055_v52 = vld [vmem:[#allocation7_spill] sm:$0xff] }
 0x6b0   : > { %4932 = vmatmul.bf16.vlgmr.msra.gmra.mxu3 %v11053_v39 }
 0x6b2   : > { %v4593_v22 = vpop.f32.mrf.mxu2  ;;  %v4449_v25 = vpop.f32.mrf.mxu0 }
 0x6b3   : > { %v4594_v47 = vadd.f32 %v4593_v22, %v10188_v60  ;;  %v4666_v9 = vpop.f32.mrf.mxu3  ;;  %v4450_v11 = vadd.f32 %v4449_v25, %v9999_v14  ;;  %v4522_v0 = vpop.f32.mrf.mxu1  ;;  %v11056_v14 = vld [vmem:[#allocation8_spill] sm:$0xff] }
 0x6b5   : > { %v10303_v56 = vadd.f32 %v4666_v9, %v4594_v47  ;;  %v10305_v46 = vadd.f32 %v4522_v0, %v4450_v11  ;;  %v11057_v47 = vld [vmem:[#allocation56_spill] sm:$0xff] }
 0x6ba   : > { %v4595_v61 = vpop.f32.mrf.mxu2  ;;  %v4452_v58 = vpop.f32.mrf.mxu0 }
 0x6bb   : > { %v4596_v54 = vadd.f32 %v4595_v61, %v10188_v60  ;;  %v4668_v62 = vpop.f32.mrf.mxu3  ;;  %v4453_v43 = vadd.f32 %v4452_v58, %v10006_v49  ;;  %v4525_v15 = vpop.f32.mrf.mxu1 }
 0x6bd   : > { %v10309_v39 = vadd.f32 %v4668_v62, %v4596_v54  ;;  %v10311_v22 = vadd.f32 %v4525_v15, %v4453_v43  ;;  %4718 = vmatmul.bf16.gmra.mxu0 %v11055_v52 }
 0x6be   : > { %4791 = vmatmul.bf16.gmra.mxu1 %v11056_v14 }
 0x6bf   : > { %11054 = vst [vmem:[#allocation77_spill] sm:$0xff] %v10311_v22  ;;  %4864 = vmatmul.bf16.gmra.mxu2 %v11031_v30  ;;  %v11060_v22 = vld [vmem:[#allocation11_spill] sm:$0xff] }
 0x6c0   : > { %4937 = vmatmul.bf16.gmra.mxu3 %v11057_v47 }
 0x6c2   : > { %v4598_v9 = vpop.f32.mrf.mxu2  ;;  %v4454_v0 = vpop.f32.mrf.mxu0 }
 0x6c3   : > { %v4599_v25 = vadd.f32 %v4598_v9, %v10188_v60  ;;  %v4671_v11 = vpop.f32.mrf.mxu3  ;;  %v4455_v49 = vadd.f32 %v4454_v0, %v10033_v23  ;;  %v4527_v61 = vpop.f32.mrf.mxu1  ;;  %v11061_v23 = vld [vmem:[#allocation12_spill] sm:$0xff] }
 0x6c5   : > { %v10319_v54 = vadd.f32 %v4671_v11, %v4599_v25  ;;  %v10321_v62 = vadd.f32 %v4527_v61, %v4455_v49  ;;  %v11062_v25 = vld [vmem:[#allocation57_spill] sm:$0xff]  ;;  %v11063_v11 = vld [vmem:[#allocation58_spill] sm:$0xff] }
 0x6c7   : > { %11058 = vst [vmem:[#allocation2_spill] sm:$0xff] %v10321_v62  ;;  %v11066_v62 = vld [vmem:[#allocation15_spill] sm:$0xff] }
 0x6ca   : > { %v4600_v58 = vpop.f32.mrf.mxu2  ;;  %v4457_v15 = vpop.f32.mrf.mxu0 }
 0x6cb   : > { %v4601_v52 = vadd.f32 %v4600_v58, %v10188_v60  ;;  %v4673_v43 = vpop.f32.mrf.mxu3  ;;  %v4458_v30 = vadd.f32 %v4457_v15, %v10040_v3  ;;  %v4530_v14 = vpop.f32.mrf.mxu1 }
 0x6cd   : > { %v10325_v47 = vadd.f32 %v4673_v43, %v4601_v52  ;;  %v10327_v9 = vadd.f32 %v4530_v14, %v4458_v30  ;;  %4723 = vmatmul.bf16.gmra.mxu0 %v11060_v22 }
 0x6ce   : > { %4796 = vmatmul.bf16.gmra.mxu1 %v11061_v23 }
 0x6cf   : > { %11059 = vst [vmem:[#allocation3_spill] sm:$0xff] %v10327_v9  ;;  %4869 = vmatmul.bf16.gmra.mxu2 %v11062_v25 }
 0x6d0   : > { %4942 = vmatmul.bf16.gmra.mxu3 %v11063_v11 }
 0x6d2   : > { %v4603_v0 = vpop.f32.mrf.mxu2  ;;  %v4459_v58 = vpop.f32.mrf.mxu0 }
 0x6d3   : > { %v4604_v49 = vadd.f32 %v4603_v0, %v10188_v60  ;;  %v4676_v61 = vpop.f32.mrf.mxu3  ;;  %v4460_v3 = vadd.f32 %v4459_v58, %v10043_v10  ;;  %v4532_v15 = vpop.f32.mrf.mxu1  ;;  %v11067_v10 = vld [vmem:[#allocation16_spill] sm:$0xff] }
 0x6d5   : > { %v10335_v52 = vadd.f32 %v4676_v61, %v4604_v49  ;;  %v10337_v43 = vadd.f32 %v4532_v15, %v4460_v3  ;;  %v11068_v49 = vld [vmem:[#allocation60_spill] sm:$0xff] }
 0x6d7   : > { %11064 = vst [vmem:[#allocation80_spill] sm:$0xff] %v10337_v43  ;;  %v11073_v43 = vld [vmem:[#allocation19_spill] sm:$0xff] }
 0x6da   : > { %v4605_v30 = vpop.f32.mrf.mxu2  ;;  %v4462_v23 = vpop.f32.mrf.mxu0 }
 0x6db   : > { %v4606_v22 = vadd.f32 %v4605_v30, %v10188_v60  ;;  %v4678_v14 = vpop.f32.mrf.mxu3  ;;  %v4463_v25 = vadd.f32 %v4462_v23, %v10068_v19  ;;  %v4535_v11 = vpop.f32.mrf.mxu1 }
 0x6dd   : > { %v10341_v9 = vadd.f32 %v4678_v14, %v4606_v22  ;;  %v10343_v0 = vadd.f32 %v4535_v11, %v4463_v25  ;;  %4728 = vmatmul.bf16.gmra.mxu0 %v11066_v62 }
 0x6de   : > { %4801 = vmatmul.bf16.gmra.mxu1 %v11067_v10 }
 0x6df   : > { %11065 = vst [vmem:[#allocation5_spill] sm:$0xff] %v10343_v0  ;;  %4874 = vmatmul.bf16.gmra.mxu2 %v11035_v42  ;;  %v11070_v42 = vld [vmem:[#allocation72_spill] sm:$0xff] }
 0x6e0   : > { %4947 = vmatmul.bf16.gmra.mxu3 %v11068_v49 }
 0x6e2   : > { %v4608_v61 = vpop.f32.mrf.mxu2  ;;  %v4464_v15 = vpop.f32.mrf.mxu0 }
 0x6e3   : > { %v4609_v58 = vadd.f32 %v4608_v61, %v10188_v60  ;;  %v4681_v3 = vpop.f32.mrf.mxu3  ;;  %v4465_v19 = vadd.f32 %v4464_v15, %v10077_v8  ;;  %v4537_v30 = vpop.f32.mrf.mxu1  ;;  %v11074_v8 = vld [vmem:[#allocation20_spill] sm:$0xff] }
 0x6e5   : > { %v10351_v22 = vadd.f32 %v4681_v3, %v4609_v58  ;;  %v10353_v14 = vadd.f32 %v4537_v30, %v4465_v19  ;;  %v11075_v58 = vld [vmem:[#allocation62_spill] sm:$0xff]  ;;  %v11076_v3 = vld [vmem:[#allocation63_spill] sm:$0xff] }
 0x6e7   : > { %11069 = vst [vmem:[#allocation6_spill] sm:$0xff] %v10353_v14  ;;  %v11077_v14 = vld [vmem:[#allocation73_spill] sm:$0xff] }
 0x6ea   : > { %v4610_v23 = vpop.f32.mrf.mxu2  ;;  %v4467_v11 = vpop.f32.mrf.mxu0 }
 0x6eb   : > { %v4611_v62 = vadd.f32 %v4610_v23, %v10188_v60  ;;  %v4683_v25 = vpop.f32.mrf.mxu3  ;;  %v4468_v10 = vadd.f32 %v4467_v11, %v11070_v42  ;;  %v4540_v49 = vpop.f32.mrf.mxu1 }
 0x6ed   : > { %v10357_v0 = vadd.f32 %v4683_v25, %v4611_v62  ;;  %v10359_v61 = vadd.f32 %v4540_v49, %v4468_v10  ;;  %4733 = vmatmul.bf16.gmra.mxu0 %v11073_v43 }
 0x6ee   : > { %4806 = vmatmul.bf16.gmra.mxu1 %v11074_v8 }
 0x6ef   : > { %11071 = vst [vmem:[#allocation81_spill] sm:$0xff] %v10357_v0  ;;  %4879 = vmatmul.bf16.gmra.mxu2 %v11075_v58  ;;  %v11080_v0 = vld [vmem:[#allocation23_spill] sm:$0xff] }
 0x6f0   : > { %11072 = vst [vmem:[#allocation9_spill] sm:$0xff] %v10359_v61  ;;  %4952 = vmatmul.bf16.gmra.mxu3 %v11076_v3 }
 0x6f2   : > { %v4613_v15 = vpop.f32.mrf.mxu2  ;;  %v4469_v23 = vpop.f32.mrf.mxu0 }
 0x6f3   : > { %v4614_v19 = vadd.f32 %v4613_v15, %v10188_v60  ;;  %v4686_v30 = vpop.f32.mrf.mxu3  ;;  %v4470_v11 = vadd.f32 %v4469_v23, %v11077_v14  ;;  %v4542_v42 = vpop.f32.mrf.mxu1  ;;  %v11081_v14 = vld [vmem:[#allocation24_spill] sm:$0xff] }
 0x6f5   : > { %v10367_v62 = vadd.f32 %v4686_v30, %v4614_v19  ;;  %v10369_v25 = vadd.f32 %v4542_v42, %v4470_v11  ;;  %v11082_v19 = vld [vmem:[#allocation64_spill] sm:$0xff]  ;;  %v11083_v30 = vld [vmem:[#allocation65_spill] sm:$0xff] }
 0x6f7   : > { %11078 = vst [vmem:[#allocation82_spill] sm:$0xff] %v10369_v25  ;;  %v11084_v25 = vld [vmem:[#allocation27_spill] sm:$0xff] }
 0x6fa   : > { %v4615_v10 = vpop.f32.mrf.mxu2  ;;  %v4472_v8 = vpop.f32.mrf.mxu0 }
 0x6fb   : > { %v4616_v43 = vadd.f32 %v4615_v10, %v10188_v60  ;;  %v4688_v49 = vpop.f32.mrf.mxu3  ;;  %v4473_v58 = vadd.f32 %v4472_v8, %v10118_v33  ;;  %v4545_v3 = vpop.f32.mrf.mxu1 }
 0x6fd   : > { %v10373_v61 = vadd.f32 %v4688_v49, %v4616_v43  ;;  %v10375_v15 = vadd.f32 %v4545_v3, %v4473_v58  ;;  %4738 = vmatmul.bf16.gmra.mxu0 %v11080_v0 }
 0x6fe   : > { %4811 = vmatmul.bf16.gmra.mxu1 %v11081_v14 }
 0x6ff   : > { %11079 = vst [vmem:[#allocation10_spill] sm:$0xff] %v10375_v15  ;;  %4884 = vmatmul.bf16.gmra.mxu2 %v11082_v19 }
 0x700   : > { %4957 = vmatmul.bf16.gmra.mxu3 %v11083_v30 }
 0x702   : > { %v4618_v23 = vpop.f32.mrf.mxu2  ;;  %v4474_v10 = vpop.f32.mrf.mxu0 }
 0x703   : > { %v4619_v11 = vadd.f32 %v4618_v23, %v10188_v60  ;;  %v4691_v42 = vpop.f32.mrf.mxu3  ;;  %v4475_v33 = vadd.f32 %v4474_v10, %v10121_v41  ;;  %v4547_v8 = vpop.f32.mrf.mxu1  ;;  %v11085_v41 = vld [vmem:[#allocation28_spill] sm:$0xff] }
 0x705   : > { %v10383_v43 = vadd.f32 %v4691_v42, %v4619_v11  ;;  %v10385_v49 = vadd.f32 %v4547_v8, %v4475_v33 }
 0x70a   : > { %v4620_v58 = vpop.f32.mrf.mxu2  ;;  %v4477_v14 = vpop.f32.mrf.mxu0 }
 0x70b   : > { %v4621_v0 = vadd.f32 %v4620_v58, %v10188_v60  ;;  %v4693_v3 = vpop.f32.mrf.mxu3  ;;  %v4478_v19 = vadd.f32 %v4477_v14, %v10140_v5  ;;  %v4550_v30 = vpop.f32.mrf.mxu1 }
 0x70d   : > { %v10389_v15 = vadd.f32 %v4693_v3, %v4621_v0  ;;  %v10391_v23 = vadd.f32 %v4550_v30, %v4478_v19  ;;  %4743 = vmatmul.bf16.gmra.mxu0 %v11084_v25 }
 0x70e   : > { %4816 = vmatmul.bf16.gmra.mxu1 %v11085_v41 }
 0x70f   : > { %4889 = vmatmul.bf16.gmra.mxu2 %v11043_v4 }
 0x710   : > { %4962 = vmatmul.bf16.gmra.mxu3 %v11044_v38 }
 0x712   : > { %v4623_v11 = vpop.f32.mrf.mxu2  ;;  %v4479_v33 = vpop.f32.mrf.mxu0 }
 0x713   : > { %v4624_v42 = vadd.f32 %v4623_v11, %v10188_v60  ;;  %v4696_v10 = vpop.f32.mrf.mxu3  ;;  %v4480_v5 = vadd.f32 %v4479_v33, %v10155_v40  ;;  %v4552_v8 = vpop.f32.mrf.mxu1  ;;  %v11086_v11 = vld [vmem:[#allocation31_spill] sm:$0xff]  ;;  %v11087_v40 = vld [vmem:[#allocation32_spill] sm:$0xff] }
 0x715   : > { %v10399_v58 = vadd.f32 %v4696_v10, %v4624_v42  ;;  %v10401_v0 = vadd.f32 %v4552_v8, %v4480_v5 }
 0x71a   : > { %v4625_v3 = vpop.f32.mrf.mxu2  ;;  %v4482_v19 = vpop.f32.mrf.mxu0 }
 0x71b   : > { %v4626_v25 = vadd.f32 %v4625_v3, %v10188_v60  ;;  %v4698_v14 = vpop.f32.mrf.mxu3  ;;  %v4483_v4 = vadd.f32 %v4482_v19, %v10161_v34  ;;  %v4555_v38 = vpop.f32.mrf.mxu1 }
 0x71d   : > { %v10405_v30 = vadd.f32 %v4698_v14, %v4626_v25  ;;  %v10407_v41 = vadd.f32 %v4555_v38, %v4483_v4  ;;  %4748 = vmatmul.bf16.gmra.mxu0 %v11086_v11  ;;  %v11088_v38 = vld [vmem:[#allocation35_spill] sm:$0xff] }
 0x71e   : > { %4821 = vmatmul.bf16.gmra.mxu1 %v11087_v40 }
 0x71f   : > { %4894 = vmatmul.bf16.gmra.mxu2 %v11045_v20  ;;  %v11089_v20 = vld [vmem:[#allocation36_spill] sm:$0xff] }
 0x720   : > { %4967 = vmatmul.bf16.gmra.mxu3 %v11046_v29 }
 0x722   : > { %v4628_v42 = vpop.f32.mrf.mxu2  ;;  %v4484_v5 = vpop.f32.mrf.mxu0 }
 0x723   : > { %v4629_v10 = vadd.f32 %v4628_v42, %v10188_v60  ;;  %v4701_v33 = vpop.f32.mrf.mxu3  ;;  %v4557_v8 = vpop.f32.mrf.mxu1 }
 0x724   : > { %v11090_v8 = vld [vmem:[#allocation74_spill] sm:$0xff] }
 0x725   : > { %v10414_v34 = vadd.f32 %v4701_v33, %v4629_v10 }
 0x72a   : > { %v4630_v3 = vpop.f32.mrf.mxu2  ;;  %v4714_v14 = vpop.f32.mrf.mxu0 }
 0x72b   : > { %v4703_v25 = vpop.f32.mrf.mxu3  ;;  %v4787_v19 = vpop.f32.mrf.mxu1  ;;  %v4715_v4 = vadd.f32 %v4714_v14, %v10199_v21 }
 0x72d   : > { %4753 = vmatmul.bf16.gmra.mxu0 %v11088_v38  ;;  %v4788_v29 = vadd.f32 %v4787_v19, %v4715_v4  ;;  %v11091_v4 = vld [vmem:[#allocation39_spill] sm:$0xff] }
 0x72e   : > { %4826 = vmatmul.bf16.gmra.mxu1 %v11089_v20 }
 0x72f   : > { %4899 = vmatmul.bf16.gmra.mxu2 %v11048_v18 }
 0x730   : > { %4972 = vmatmul.bf16.gmra.mxu3 %v11049_v48 }
 0x732   : > { %v4860_v60 = vpop.f32.mrf.mxu2  ;;  %v4716_v42 = vpop.f32.mrf.mxu0 }
 0x733   : > { %v4861_v11 = vadd.f32 %v4860_v60, %v4788_v29  ;;  %v4933_v40 = vpop.f32.mrf.mxu3  ;;  %v4789_v10 = vpop.f32.mrf.mxu1  ;;  %v4717_v5 = vadd.f32 %v4716_v42, %v10205_v27  ;;  %v11092_v60 = vld [vmem:[#allocation40_spill] sm:$0xff] }
 0x735   : > { %v4934_v33 = vadd.f32 %v4933_v40, %v4861_v11  ;;  %v4790_v3 = vadd.f32 %v4789_v10, %v4717_v5 }
 0x737   : > { %v4999_v21 = vpack.c.bf16 %v4934_v33, %v11090_v8 }
 0x739   : > { %5074 = vst [vmem:[%s8502_s21 + $0x10] sm:$0xff] %v4999_v21 }
 0x73a   : > { %v4862_v25 = vpop.f32.mrf.mxu2  ;;  %v4719_v18 = vpop.f32.mrf.mxu0 }
 0x73b   : > { %v4863_v14 = vadd.f32 %v4862_v25, %v4790_v3  ;;  %v4935_v38 = vpop.f32.mrf.mxu3  ;;  %v4792_v20 = vpop.f32.mrf.mxu1  ;;  %v4720_v19 = vadd.f32 %v4719_v18, %v10215_v7  ;;  %v11093_v18 = vld [vmem:[#allocation43_spill] sm:$0xff] }
 0x73d   : > { %v4936_v48 = vadd.f32 %v4935_v38, %v4863_v14  ;;  %4758 = vmatmul.bf16.gmra.mxu0 %v11091_v4  ;;  %v4793_v27 = vadd.f32 %v4792_v20, %v4720_v19 }
 0x73e   : > { %4831 = vmatmul.bf16.gmra.mxu1 %v11092_v60 }
 0x73f   : > { %v5002_v29 = vpack.c.bf16 %v4936_v48, %v10201_v28  ;;  %4904 = vmatmul.bf16.gmra.mxu2 %v10837_v12  ;;  %v11094_v48 = vld [vmem:[#allocation44_spill] sm:$0xff] }
 0x740   : > { %4977 = vmatmul.bf16.gmra.mxu3 %v10917_v35 }
 0x741   : > { %5077 = vst [vmem:[%s8502_s21 + $0x28] sm:$0xff] %v5002_v29 }
 0x742   : > { %v4865_v11 = vpop.f32.mrf.mxu2  ;;  %v4721_v10 = vpop.f32.mrf.mxu0 }
 0x743   : > { %v4866_v40 = vadd.f32 %v4865_v11, %v4793_v27  ;;  %v4938_v42 = vpop.f32.mrf.mxu3  ;;  %v4794_v33 = vpop.f32.mrf.mxu1  ;;  %v4722_v7 = vadd.f32 %v4721_v10, %v10239_v1 }
 0x745   : > { %v4939_v5 = vadd.f32 %v4938_v42, %v4866_v40  ;;  %v4795_v28 = vadd.f32 %v4794_v33, %v4722_v7  ;;  %v11095_v7 = vld [vmem:[#allocation47_spill] sm:$0xff] }
 0x747   : > { %v5005_v8 = vpack.c.bf16 %v4939_v5, %v10207_v59 }
 0x749   : > { %5080 = vst [vmem:[%s8502_s21 + $0x40] sm:$0xff] %v5005_v8 }
 0x74a   : > { %v4867_v21 = vpop.f32.mrf.mxu2  ;;  %v4724_v25 = vpop.f32.mrf.mxu0 }
 0x74b   : > { %v4868_v3 = vadd.f32 %v4867_v21, %v4795_v28  ;;  %v4940_v12 = vpop.f32.mrf.mxu3  ;;  %v4797_v35 = vpop.f32.mrf.mxu1  ;;  %v4725_v38 = vadd.f32 %v4724_v25, %v10255_v24  ;;  %v11096_v28 = vld [vmem:[#allocation48_spill] sm:$0xff] }
 0x74d   : > { %v4941_v14 = vadd.f32 %v4940_v12, %v4868_v3  ;;  %4763 = vmatmul.bf16.gmra.mxu0 %v11093_v18  ;;  %v4798_v59 = vadd.f32 %v4797_v35, %v4725_v38 }
 0x74e   : > { %4836 = vmatmul.bf16.gmra.mxu1 %v11094_v48 }
 0x74f   : > { %v5008_v20 = vpack.c.bf16 %v4941_v14, %v10217_v36  ;;  %4909 = vmatmul.bf16.gmra.mxu2 %v10920_v55 }
 0x750   : > { %4982 = vmatmul.bf16.gmra.mxu3 %v10921_v17 }
 0x751   : > { %5083 = vst [vmem:[%s8502_s21 + $0x58] sm:$0xff] %v5008_v20 }
 0x752   : > { %v4870_v1 = vpop.f32.mrf.mxu2  ;;  %v4726_v29 = vpop.f32.mrf.mxu0 }
 0x753   : > { %v4871_v19 = vadd.f32 %v4870_v1, %v4798_v59  ;;  %v4943_v4 = vpop.f32.mrf.mxu3  ;;  %v4799_v60 = vpop.f32.mrf.mxu1  ;;  %v4727_v24 = vadd.f32 %v4726_v29, %v10261_v2  ;;  %v11097_v1 = vld [vmem:[#allocation51_spill] sm:$0xff] }
 0x755   : > { %v4944_v27 = vadd.f32 %v4943_v4, %v4871_v19  ;;  %v4800_v36 = vadd.f32 %v4799_v60, %v4727_v24  ;;  %v11098_v4 = vld [vmem:[#allocation52_spill] sm:$0xff] }
 0x757   : > { %v5011_v11 = vpack.c.bf16 %v4944_v27, %v10247_v37 }
 0x759   : > { %5086 = vst [vmem:[%s8502_s21 + $0x70] sm:$0xff] %v5011_v11 }
 0x75a   : > { %v4872_v40 = vpop.f32.mrf.mxu2  ;;  %v4729_v10 = vpop.f32.mrf.mxu0 }
 0x75b   : > { %v4873_v42 = vadd.f32 %v4872_v40, %v4800_v36  ;;  %v4945_v55 = vpop.f32.mrf.mxu3  ;;  %v4802_v17 = vpop.f32.mrf.mxu1  ;;  %v4730_v5 = vadd.f32 %v4729_v10, %v10271_v57 }
 0x75d   : > { %v4946_v33 = vadd.f32 %v4945_v55, %v4873_v42  ;;  %4768 = vmatmul.bf16.gmra.mxu0 %v11095_v7  ;;  %v4803_v37 = vadd.f32 %v4802_v17, %v4730_v5 }
 0x75e   : > { %4841 = vmatmul.bf16.gmra.mxu1 %v11096_v28 }
 0x75f   : > { %v5014_v8 = vpack.c.bf16 %v4946_v33, %v10257_v53  ;;  %4914 = vmatmul.bf16.gmra.mxu2 %v8157_v16 }
 0x760   : > { %4987 = vmatmul.bf16.gmra.mxu3 %v8160_v26 }
 0x761   : > { %5089 = vst [vmem:[%s8502_s21 + $0x88] sm:$0xff] %v5014_v8 }
 0x762   : > { %v4875_v2 = vpop.f32.mrf.mxu2  ;;  %v4731_v12 = vpop.f32.mrf.mxu0 }
 0x763   : > { %v4876_v21 = vadd.f32 %v4875_v2, %v4803_v37  ;;  %v4948_v3 = vpop.f32.mrf.mxu3  ;;  %v4804_v25 = vpop.f32.mrf.mxu1  ;;  %v4732_v57 = vadd.f32 %v4731_v12, %v10277_v51 }
 0x765   : > { %v4949_v35 = vadd.f32 %v4948_v3, %v4876_v21  ;;  %v4805_v53 = vadd.f32 %v4804_v25, %v4732_v57  ;;  %v11099_v21 = vld [vmem:[#allocation76_spill] sm:$0xff] }
 0x767   : > { %v5017_v14 = vpack.c.bf16 %v4949_v35, %v10263_v31 }
 0x769   : > { %5092 = vst [vmem:[%s8502_s21 + $0xa0] sm:$0xff] %v5017_v14 }
 0x76a   : > { %v4877_v38 = vpop.f32.mrf.mxu2  ;;  %v4734_v20 = vpop.f32.mrf.mxu0 }
 0x76b   : > { %v4878_v18 = vadd.f32 %v4877_v38, %v4805_v53  ;;  %v4950_v16 = vpop.f32.mrf.mxu3  ;;  %v4807_v26 = vpop.f32.mrf.mxu1  ;;  %v4735_v59 = vadd.f32 %v4734_v20, %v10287_v50 }
 0x76d   : > { %v4951_v48 = vadd.f32 %v4950_v16, %v4878_v18  ;;  %4773 = vmatmul.bf16.gmra.mxu0 %v11097_v1  ;;  %v4808_v31 = vadd.f32 %v4807_v26, %v4735_v59 }
 0x76e   : > { %4846 = vmatmul.bf16.gmra.mxu1 %v11098_v4 }
 0x76f   : > { %v5020_v19 = vpack.c.bf16 %v4951_v48, %v10273_v45  ;;  %4919 = vmatmul.bf16.gmra.mxu2 %v8202_v32 }
 0x770   : > { %4992 = vmatmul.bf16.gmra.mxu3 %v8205_v6 }
 0x771   : > { %5095 = vst [vmem:[%s8502_s21 + $0xb8] sm:$0xff] %v5020_v19  ;;  %v11100_v19 = vld [vmem:[#allocation77_spill] sm:$0xff] }
 0x772   : > { %v4880_v51 = vpop.f32.mrf.mxu2  ;;  %v4736_v27 = vpop.f32.mrf.mxu0 }
 0x773   : > { %v4881_v29 = vadd.f32 %v4880_v51, %v4808_v31  ;;  %v4953_v60 = vpop.f32.mrf.mxu3  ;;  %v4809_v24 = vpop.f32.mrf.mxu1  ;;  %v4737_v11 = vadd.f32 %v4736_v27, %v10293_v13 }
 0x775   : > { %v4954_v50 = vadd.f32 %v4953_v60, %v4881_v29  ;;  %v4810_v45 = vadd.f32 %v4809_v24, %v4737_v11 }
 0x777   : > { %v5023_v36 = vpack.c.bf16 %v4954_v50, %v10279_v44  ;;  %v11101_v50 = vld [vmem:[#allocation2_spill] sm:$0xff] }
 0x779   : > { %5098 = vst [vmem:[%s8502_s21 + $0xd0] sm:$0xff] %v5023_v36 }
 0x77a   : > { %v4882_v40 = vpop.f32.mrf.mxu2  ;;  %v4739_v6 = vpop.f32.mrf.mxu0 }
 0x77b   : > { %v4883_v42 = vadd.f32 %v4882_v40, %v4810_v45  ;;  %v4955_v32 = vpop.f32.mrf.mxu3  ;;  %v4812_v55 = vpop.f32.mrf.mxu1  ;;  %v4740_v17 = vadd.f32 %v4739_v6, %v10303_v56 }
 0x77d   : > { %v4956_v10 = vadd.f32 %v4955_v32, %v4883_v42  ;;  %v4813_v5 = vadd.f32 %v4812_v55, %v4740_v17 }
 0x77f   : > { %v5026_v33 = vpack.c.bf16 %v4956_v10, %v10289_v63  ;;  %v11102_v10 = vld [vmem:[#allocation3_spill] sm:$0xff] }
 0x781   : > { %5101 = vst [vmem:[%s8502_s21 + $0xe8] sm:$0xff] %v5026_v33 }
 0x782   : > { %v4885_v7 = vpop.f32.mrf.mxu2  ;;  %v4741_v44 = vpop.f32.mrf.mxu0 }
 0x783   : > { %v4886_v8 = vadd.f32 %v4885_v7, %v4813_v5  ;;  %v4958_v13 = vpop.f32.mrf.mxu3  ;;  %v4814_v28 = vpop.f32.mrf.mxu1  ;;  %v4742_v2 = vadd.f32 %v4741_v44, %v10309_v39 }
 0x785   : > { %v4959_v37 = vadd.f32 %v4958_v13, %v4886_v8  ;;  %v4815_v12 = vadd.f32 %v4814_v28, %v4742_v2 }
 0x787   : > { %v5029_v3 = vpack.c.bf16 %v4959_v37, %v11099_v21  ;;  %v11103_v37 = vld [vmem:[#allocation80_spill] sm:$0xff] }
 0x789   : > { %5104 = vst [vmem:[%s8502_s21 + $0x100] sm:$0xff] %v5029_v3 }
 0x78a   : > { %v4887_v25 = vpop.f32.mrf.mxu2  ;;  %v4744_v63 = vpop.f32.mrf.mxu0 }
 0x78b   : > { %v4888_v35 = vadd.f32 %v4887_v25, %v4815_v12  ;;  %v4960_v56 = vpop.f32.mrf.mxu3  ;;  %v4817_v57 = vpop.f32.mrf.mxu1  ;;  %v4745_v53 = vadd.f32 %v4744_v63, %v10319_v54  ;;  %v11104_v63 = vld [vmem:[#allocation81_spill] sm:$0xff] }
 0x78d   : > { %v4961_v14 = vadd.f32 %v4960_v56, %v4888_v35  ;;  %v4818_v18 = vadd.f32 %v4817_v57, %v4745_v53 }
 0x78f   : > { %v5032_v38 = vpack.c.bf16 %v4961_v14, %v10305_v46  ;;  %v11105_v14 = vld [vmem:[#allocation5_spill] sm:$0xff] }
 0x791   : > { %5107 = vst [vmem:[%s8502_s21 + $0x118] sm:$0xff] %v5032_v38 }
 0x792   : > { %v4890_v16 = vpop.f32.mrf.mxu2  ;;  %v4746_v26 = vpop.f32.mrf.mxu0 }
 0x793   : > { %v4891_v20 = vadd.f32 %v4890_v16, %v4818_v18  ;;  %v4963_v39 = vpop.f32.mrf.mxu3  ;;  %v4819_v48 = vpop.f32.mrf.mxu1  ;;  %v4747_v1 = vadd.f32 %v4746_v26, %v10325_v47 }
 0x795   : > { %v4964_v59 = vadd.f32 %v4963_v39, %v4891_v20  ;;  %v4820_v31 = vadd.f32 %v4819_v48, %v4747_v1 }
 0x797   : > { %v5035_v4 = vpack.c.bf16 %v4964_v59, %v11100_v19  ;;  %v11106_v59 = vld [vmem:[#allocation6_spill] sm:$0xff] }
 0x799   : > { %5110 = vst [vmem:[%s8502_s21 + $0x130] sm:$0xff] %v5035_v4 }
 0x79a   : > { %v4892_v51 = vpop.f32.mrf.mxu2  ;;  %v4749_v46 = vpop.f32.mrf.mxu0 }
 0x79b   : > { %v4893_v29 = vadd.f32 %v4892_v51, %v4820_v31  ;;  %v4965_v54 = vpop.f32.mrf.mxu3  ;;  %v4822_v60 = vpop.f32.mrf.mxu1  ;;  %v4750_v24 = vadd.f32 %v4749_v46, %v10335_v52 }
 0x79d   : > { %v4966_v27 = vadd.f32 %v4965_v54, %v4893_v29  ;;  %v4823_v36 = vadd.f32 %v4822_v60, %v4750_v24 }
 0x79f   : > { %v5038_v11 = vpack.c.bf16 %v4966_v27, %v11101_v50  ;;  %v11107_v27 = vld [vmem:[#allocation9_spill] sm:$0xff] }
 0x7a1   : > { %5113 = vst [vmem:[%s8502_s21 + $0x148] sm:$0xff] %v5038_v11 }
 0x7a2   : > { %v4895_v45 = vpop.f32.mrf.mxu2  ;;  %v4751_v42 = vpop.f32.mrf.mxu0 }
 0x7a3   : > { %v4896_v40 = vadd.f32 %v4895_v45, %v4823_v36  ;;  %v4968_v47 = vpop.f32.mrf.mxu3  ;;  %v4824_v32 = vpop.f32.mrf.mxu1  ;;  %v4752_v55 = vadd.f32 %v4751_v42, %v10341_v9 }
 0x7a5   : > { %v4969_v6 = vadd.f32 %v4968_v47, %v4896_v40  ;;  %v4825_v33 = vadd.f32 %v4824_v32, %v4752_v55  ;;  %v11108_v32 = vld [vmem:[#allocation82_spill] sm:$0xff] }
 0x7a7   : > { %v5041_v17 = vpack.c.bf16 %v4969_v6, %v11102_v10 }
 0x7a9   : > { %5116 = vst [vmem:[%s8502_s21 + $0x160] sm:$0xff] %v5041_v17 }
 0x7aa   : > { %v4897_v5 = vpop.f32.mrf.mxu2  ;;  %v4754_v8 = vpop.f32.mrf.mxu0 }
 0x7ab   : > { %v4898_v7 = vadd.f32 %v4897_v5, %v4825_v33  ;;  %v4970_v52 = vpop.f32.mrf.mxu3  ;;  %v4827_v13 = vpop.f32.mrf.mxu1  ;;  %v4755_v28 = vadd.f32 %v4754_v8, %v10351_v22  ;;  %v11109_v8 = vld [vmem:[#allocation10_spill] sm:$0xff] }
 0x7ad   : > { %v4971_v44 = vadd.f32 %v4970_v52, %v4898_v7  ;;  %v4828_v21 = vadd.f32 %v4827_v13, %v4755_v28 }
 0x7af   : > { %v5044_v2 = vpack.c.bf16 %v4971_v44, %v11103_v37 }
 0x7b1   : > { %5119 = vst [vmem:[%s8502_s21 + $0x178] sm:$0xff] %v5044_v2 }
 0x7b2   : > { %v4900_v3 = vpop.f32.mrf.mxu2  ;;  %v4756_v25 = vpop.f32.mrf.mxu0 }
 0x7b3   : > { %v4901_v12 = vadd.f32 %v4900_v3, %v4828_v21  ;;  %v4973_v9 = vpop.f32.mrf.mxu3  ;;  %v4829_v35 = vpop.f32.mrf.mxu1  ;;  %v4757_v57 = vadd.f32 %v4756_v25, %v11104_v63 }
 0x7b5   : > { %v4974_v56 = vadd.f32 %v4973_v9, %v4901_v12  ;;  %v4830_v38 = vadd.f32 %v4829_v35, %v4757_v57 }
 0x7b7   : > { %v5047_v53 = vpack.c.bf16 %v4974_v56, %v11105_v14 }
 0x7b9   : > { %5122 = vst [vmem:[%s8502_s21 + $0x190] sm:$0xff] %v5047_v53 }
 0x7ba   : > { %v4902_v18 = vpop.f32.mrf.mxu2  ;;  %v4759_v20 = vpop.f32.mrf.mxu0 }
 0x7bb   : > { %v4903_v16 = vadd.f32 %v4902_v18, %v4830_v38  ;;  %v4975_v22 = vpop.f32.mrf.mxu3  ;;  %v4832_v39 = vpop.f32.mrf.mxu1  ;;  %v4760_v48 = vadd.f32 %v4759_v20, %v10367_v62 }
 0x7bd   : > { %v4976_v26 = vadd.f32 %v4975_v22, %v4903_v16  ;;  %v4833_v19 = vadd.f32 %v4832_v39, %v4760_v48 }
 0x7bf   : > { %v5050_v1 = vpack.c.bf16 %v4976_v26, %v11106_v59 }
 0x7c1   : > { %5125 = vst [vmem:[%s8502_s21 + $0x1a8] sm:$0xff] %v5050_v1 }
 0x7c2   : > { %v4905_v4 = vpop.f32.mrf.mxu2  ;;  %v4761_v29 = vpop.f32.mrf.mxu0 }
 0x7c3   : > { %v4906_v31 = vadd.f32 %v4905_v4, %v4833_v19  ;;  %v4978_v51 = vpop.f32.mrf.mxu3  ;;  %v4834_v54 = vpop.f32.mrf.mxu1  ;;  %v4762_v60 = vadd.f32 %v4761_v29, %v10373_v61 }
 0x7c5   : > { %v4979_v46 = vadd.f32 %v4978_v51, %v4906_v31  ;;  %v4835_v50 = vadd.f32 %v4834_v54, %v4762_v60 }
 0x7c7   : > { %v5053_v24 = vpack.c.bf16 %v4979_v46, %v11107_v27 }
 0x7c9   : > { %5128 = vst [vmem:[%s8502_s21 + $0x1c0] sm:$0xff] %v5053_v24 }
 0x7ca   : > { %v4907_v11 = vpop.f32.mrf.mxu2  ;;  %v4764_v45 = vpop.f32.mrf.mxu0 }
 0x7cb   : > { %v4908_v36 = vadd.f32 %v4907_v11, %v4835_v50  ;;  %v4980_v62 = vpop.f32.mrf.mxu3  ;;  %v4837_v40 = vpop.f32.mrf.mxu1  ;;  %v4765_v42 = vadd.f32 %v4764_v45, %v10383_v43 }
 0x7cd   : > { %v4981_v47 = vadd.f32 %v4980_v62, %v4908_v36  ;;  %v4838_v55 = vadd.f32 %v4837_v40, %v4765_v42 }
 0x7cf   : > { %v5056_v6 = vpack.c.bf16 %v4981_v47, %v11108_v32 }
 0x7d1   : > { %5131 = vst [vmem:[%s8502_s21 + $0x1d8] sm:$0xff] %v5056_v6 }
 0x7d2   : > { %v4910_v10 = vpop.f32.mrf.mxu2  ;;  %v4766_v33 = vpop.f32.mrf.mxu0 }
 0x7d3   : > { %v4911_v17 = vadd.f32 %v4910_v10, %v4838_v55  ;;  %v4983_v61 = vpop.f32.mrf.mxu3  ;;  %v4839_v5 = vpop.f32.mrf.mxu1  ;;  %v4767_v52 = vadd.f32 %v4766_v33, %v10389_v15 }
 0x7d5   : > { %v4984_v7 = vadd.f32 %v4983_v61, %v4911_v17  ;;  %v4840_v44 = vadd.f32 %v4839_v5, %v4767_v52 }
 0x7d7   : > { %v5059_v13 = vpack.c.bf16 %v4984_v7, %v11109_v8 }
 0x7d9   : > { %5134 = vst [vmem:[%s8502_s21 + $0x1f0] sm:$0xff] %v5059_v13 }
 0x7da   : > { %v4912_v28 = vpop.f32.mrf.mxu2  ;;  %v4769_v2 = vpop.f32.mrf.mxu0 }
 0x7db   : > { %v4913_v37 = vadd.f32 %v4912_v28, %v4840_v44  ;;  %v4985_v43 = vpop.f32.mrf.mxu3  ;;  %v4842_v21 = vpop.f32.mrf.mxu1  ;;  %v4770_v12 = vadd.f32 %v4769_v2, %v10399_v58 }
 0x7dd   : > { %v4986_v3 = vadd.f32 %v4985_v43, %v4913_v37  ;;  %v4843_v25 = vadd.f32 %v4842_v21, %v4770_v12 }
 0x7df   : > { %v5062_v9 = vpack.c.bf16 %v4986_v3, %v10385_v49 }
 0x7e1   : > { %5137 = vst [vmem:[%s8502_s21 + $0x208] sm:$0xff] %v5062_v9 }
 0x7e2   : > { %v4915_v35 = vpop.f32.mrf.mxu2  ;;  %v4771_v63 = vpop.f32.mrf.mxu0 }
 0x7e3   : > { %v4916_v56 = vadd.f32 %v4915_v35, %v4843_v25  ;;  %v4988_v15 = vpop.f32.mrf.mxu3  ;;  %v4844_v57 = vpop.f32.mrf.mxu1  ;;  %v4772_v53 = vadd.f32 %v4771_v63, %v10405_v30 }
 0x7e5   : > { %v4989_v14 = vadd.f32 %v4988_v15, %v4916_v56  ;;  %v4845_v18 = vadd.f32 %v4844_v57, %v4772_v53 }
 0x7e7   : > { %v5065_v38 = vpack.c.bf16 %v4989_v14, %v10391_v23 }
 0x7e9   : > { %5140 = vst [vmem:[%s8502_s21 + $0x220] sm:$0xff] %v5065_v38 }
 0x7ea   : > { %v4917_v16 = vpop.f32.mrf.mxu2  ;;  %v4774_v49 = vpop.f32.mrf.mxu0 }
 0x7eb   : > { %v4918_v22 = vadd.f32 %v4917_v16, %v4845_v18  ;;  %v4990_v58 = vpop.f32.mrf.mxu3  ;;  %v4847_v20 = vpop.f32.mrf.mxu1  ;;  %v4775_v26 = vadd.f32 %v4774_v49, %v10414_v34 }
 0x7ed   : > { %v4991_v39 = vadd.f32 %v4990_v58, %v4918_v22  ;;  %v4848_v59 = vadd.f32 %v4847_v20, %v4775_v26 }
 0x7ef   : > { %v5068_v48 = vpack.c.bf16 %v4991_v39, %v10401_v0 }
 0x7f1   : > { %5143 = vst [vmem:[%s8502_s21 + $0x238] sm:$0xff] %v5068_v48 }
 0x7f2   : > { %v4920_v1 = vpop.f32.mrf.mxu2  ;;  %v4776_v4 = vpop.f32.mrf.mxu0 }
 0x7f3   : > { %v4921_v19 = vadd.f32 %v4920_v1, %v4848_v59  ;;  %v4993_v30 = vpop.f32.mrf.mxu3  ;;  %v4849_v23 = vpop.f32.mrf.mxu1 }
 0x7f5   : > { %v4994_v31 = vadd.f32 %v4993_v30, %v4921_v19 }
 0x7f7   : > { %v5071_v51 = vpack.c.bf16 %v4994_v31, %v10407_v41 }
 0x7f9   : > { %5146 = vst [vmem:[%s8502_s21 + $0x250] sm:$0x33] %v5071_v51 }
 0x7fa   : > { %v4922_v29 = vpop.f32.mrf.mxu2 }
 0x7fb   : > { %v4995_v54 = vpop.f32.mrf.mxu3 }
 0x7fc PF: > { %s13_s12 = sadd.s32 1, %s7029_s12  }
 0x7fd   : > { %p10_p4 = scmp.ge.s32.totalorder %s13_s12, 4  }
 0x7ff   :  { %12 = sbr.rel (!%p10_p4) target bundleno = 1 (0x1), region = 62 }

// kernel: forward.3
= control target key start
LH: loop header
LB: loop body
LE: loop exit
PB: predicated region body
PF: predicated region fallthrough
CT: control target
= control target key end

     0   :  { %vm3008_vm0 = vcmask 1041408   ;;  %s7369_s1 = inlined_call_operand.vmem [shape: bf16[3072,256], index: 1, kind: input, shape index: {}]   ;;  %s7370_s0 = inlined_call_operand.vmem [shape: bf16[2,3072], index: 0, kind: input, shape index: {}]   ;;  %s7371_s2 = inlined_call_operand.vmem [shape: f32[1,256], index: 2, kind: input, shape index: {}]   ;;  %s7372_s3 = inlined_call_operand.vmem [shape: f32[2,256], index: 3, kind: output, shape index: {}]  }
   0x1   :  { %v3074_v0 = vld [vmem:[%s7369_s1 + $0x70] sm:$0xf]  ;;  %v4567_v1 = vld [vmem:[%s7369_s1 + $0x74] sm:$0xf0]  ;;  %v3066_v11 = vld [vmem:[%s7369_s1 + $0x60] sm:$0xf] }
   0x2   :  { %v3138_v2 = vld [vmem:[%s7369_s1 + $0xf0] sm:$0xf]  ;;  %v3075_v3 = vor.u32 %v4567_v1, %v3074_v0  ;;  %v4583_v4 = vld [vmem:[%s7369_s1 + $0xf4] sm:$0xf0]  ;;  %v4565_v13 = vld [vmem:[%s7369_s1 + $0x64] sm:$0xf0] }
   0x3   :  { %v3202_v5 = vld [vmem:[%s7369_s1 + $0x170] sm:$0xf]  ;;  %v4599_v6 = vld [vmem:[%s7369_s1 + $0x174] sm:$0xf0]  ;;  %v3139_v7 = vor.u32 %v4583_v4, %v3138_v2  ;;  %v3130_v14 = vld [vmem:[%s7369_s1 + $0xe0] sm:$0xf]  ;;  %v3067_v16 = vor.u32 %v4565_v13, %v3066_v11 }
   0x4   :  { %v3203_v8 = vor.u32 %v4599_v6, %v3202_v5  ;;  %v3266_v9 = vld [vmem:[%s7369_s1 + $0x1f0] sm:$0xf]  ;;  %v4615_v10 = vld [vmem:[%s7369_s1 + $0x1f4] sm:$0xf0]  ;;  %2381 = vmatpush.bf16.msra.mxu0 %v3075_v3  ;;  %v4581_v15 = vld [vmem:[%s7369_s1 + $0xe4] sm:$0xf0] }
   0x5   :  { %v3267_v12 = vor.u32 %v4615_v10, %v3266_v9  ;;  %2394 = vmatpush.bf16.msra.mxu1 %v3139_v7  ;;  %v3131_v17 = vor.u32 %v4581_v15, %v3130_v14  ;;  %v3194_v18 = vld [vmem:[%s7369_s1 + $0x160] sm:$0xf]  ;;  %v4597_v19 = vld [vmem:[%s7369_s1 + $0x164] sm:$0xf0]  ;;  %v3058_v23 = vld [vmem:[%s7369_s1 + $0x50] sm:$0xf] }
   0x6   :  { %2407 = vmatpush.bf16.msra.mxu2 %v3203_v8  ;;  %v3258_v20 = vld [vmem:[%s7369_s1 + $0x1e0] sm:$0xf]  ;;  %v3195_v21 = vor.u32 %v4597_v19, %v3194_v18  ;;  %v4613_v22 = vld [vmem:[%s7369_s1 + $0x1e4] sm:$0xf0]  ;;  %v4563_v24 = vld [vmem:[%s7369_s1 + $0x54] sm:$0xf0] }
   0x7   :  { %2420 = vmatpush.bf16.msra.mxu3 %v3267_v12  ;;  %v3259_v25 = vor.u32 %v4613_v22, %v3258_v20  ;;  %v3122_v26 = vld [vmem:[%s7369_s1 + $0xd0] sm:$0xf]  ;;  %v4579_v27 = vld [vmem:[%s7369_s1 + $0xd4] sm:$0xf0]  ;;  %v3059_v29 = vor.u32 %v4563_v24, %v3058_v23  ;;  %v3050_v35 = vld [vmem:[%s7369_s1 + $0x40] sm:$0xf] }
   0x8   :  { %v3186_v28 = vld [vmem:[%s7369_s1 + $0x150] sm:$0xf]  ;;  %2382 = vmatpush.bf16.msra.mxu0 %v3067_v16  ;;  %v4595_v30 = vld [vmem:[%s7369_s1 + $0x154] sm:$0xf0]  ;;  %v3123_v33 = vor.u32 %v4579_v27, %v3122_v26  ;;  %v4561_v36 = vld [vmem:[%s7369_s1 + $0x44] sm:$0xf0] }
   0x9   :  { %v3250_v31 = vld [vmem:[%s7369_s1 + $0x1d0] sm:$0xf]  ;;  %v4611_v32 = vld [vmem:[%s7369_s1 + $0x1d4] sm:$0xf0]  ;;  %2395 = vmatpush.bf16.msra.mxu1 %v3131_v17  ;;  %v3187_v34 = vor.u32 %v4595_v30, %v3186_v28  ;;  %v3114_v37 = vld [vmem:[%s7369_s1 + $0xc0] sm:$0xf]  ;;  %v3051_v44 = vor.u32 %v4561_v36, %v3050_v35 }
   0xa   :  { %2408 = vmatpush.bf16.msra.mxu2 %v3195_v21  ;;  %v3251_v38 = vor.u32 %v4611_v32, %v3250_v31  ;;  %v4577_v39 = vld [vmem:[%s7369_s1 + $0xc4] sm:$0xf0]  ;;  %v3178_v40 = vld [vmem:[%s7369_s1 + $0x140] sm:$0xf]  ;;  %v3042_v47 = vld [vmem:[%s7369_s1 + $0x30] sm:$0xf] }
   0xb   :  { %2421 = vmatpush.bf16.msra.mxu3 %v3259_v25  ;;  %v4593_v41 = vld [vmem:[%s7369_s1 + $0x144] sm:$0xf0]  ;;  %v3242_v42 = vld [vmem:[%s7369_s1 + $0x1c0] sm:$0xf]  ;;  %v3115_v45 = vor.u32 %v4577_v39, %v3114_v37  ;;  %v4559_v48 = vld [vmem:[%s7369_s1 + $0x34] sm:$0xf0] }
   0xc   :  { %v4609_v43 = vld [vmem:[%s7369_s1 + $0x1c4] sm:$0xf0]  ;;  %2383 = vmatpush.bf16.msra.mxu0 %v3059_v29  ;;  %v3179_v46 = vor.u32 %v4593_v41, %v3178_v40  ;;  %v3106_v49 = vld [vmem:[%s7369_s1 + $0xb0] sm:$0xf]  ;;  %v4575_v51 = vld [vmem:[%s7369_s1 + $0xb4] sm:$0xf0]  ;;  %v3043_v56 = vor.u32 %v4559_v48, %v3042_v47 }
   0xd   :  { %2396 = vmatpush.bf16.msra.mxu1 %v3123_v33  ;;  %v3243_v50 = vor.u32 %v4609_v43, %v3242_v42  ;;  %v3170_v52 = vld [vmem:[%s7369_s1 + $0x130] sm:$0xf]  ;;  %v4591_v53 = vld [vmem:[%s7369_s1 + $0x134] sm:$0xf0]  ;;  %v3107_v57 = vor.u32 %v4575_v51, %v3106_v49  ;;  %v3034_v59 = vld [vmem:[%s7369_s1 + $0x20] sm:$0xf] }
   0xe   :  { %2409 = vmatpush.bf16.msra.mxu2 %v3187_v34  ;;  %v3234_v54 = vld [vmem:[%s7369_s1 + $0x1b0] sm:$0xf]  ;;  %v4607_v55 = vld [vmem:[%s7369_s1 + $0x1b4] sm:$0xf0]  ;;  %v3171_v58 = vor.u32 %v4591_v53, %v3170_v52  ;;  %v4557_v60 = vld [vmem:[%s7369_s1 + $0x24] sm:$0xf0] }
   0xf   :  { %2422 = vmatpush.bf16.msra.mxu3 %v3251_v38  ;;  %v3098_v61 = vld [vmem:[%s7369_s1 + $0xa0] sm:$0xf]  ;;  %v3235_v62 = vor.u32 %v4607_v55, %v3234_v54  ;;  %v4573_v63 = vld [vmem:[%s7369_s1 + $0xa4] sm:$0xf0]  ;;  %v3035_v4 = vor.u32 %v4557_v60, %v3034_v59  ;;  %v3026_v7 = vld [vmem:[%s7369_s1 + $0x10] sm:$0xf] }
  0x10   :  { %2384 = vmatpush.bf16.msra.mxu0 %v3051_v44  ;;  %v3162_v0 = vld [vmem:[%s7369_s1 + $0x120] sm:$0xf]  ;;  %v4589_v1 = vld [vmem:[%s7369_s1 + $0x124] sm:$0xf0]  ;;  %v3099_v5 = vor.u32 %v4573_v63, %v3098_v61  ;;  %v4555_v8 = vld [vmem:[%s7369_s1 + $0x14] sm:$0xf0] }
  0x11   :  { %2397 = vmatpush.bf16.msra.mxu1 %v3115_v45  ;;  %v3226_v2 = vld [vmem:[%s7369_s1 + $0x1a0] sm:$0xf]  ;;  %v4605_v3 = vld [vmem:[%s7369_s1 + $0x1a4] sm:$0xf0]  ;;  %v3163_v6 = vor.u32 %v4589_v1, %v3162_v0  ;;  %v3090_v9 = vld [vmem:[%s7369_s1 + $0x90] sm:$0xf]  ;;  %v3027_v16 = vor.u32 %v4555_v8, %v3026_v7 }
  0x12   :  { %2410 = vmatpush.bf16.msra.mxu2 %v3179_v46  ;;  %v3227_v10 = vor.u32 %v4605_v3, %v3226_v2  ;;  %v4571_v11 = vld [vmem:[%s7369_s1 + $0x94] sm:$0xf0]  ;;  %v3154_v12 = vld [vmem:[%s7369_s1 + $0x110] sm:$0xf]  ;;  %v3018_v17 = vld [vmem:[%s7369_s1] sm:$0xf] }
  0x13   :  { %2423 = vmatpush.bf16.msra.mxu3 %v3243_v50  ;;  %v4587_v13 = vld [vmem:[%s7369_s1 + $0x114] sm:$0xf0]  ;;  %v3218_v14 = vld [vmem:[%s7369_s1 + $0x190] sm:$0xf]  ;;  %v4553_v18 = vld [vmem:[%s7369_s1 + $0x4] sm:$0xf0]  ;;  %v3091_v19 = vor.u32 %v4571_v11, %v3090_v9 }
  0x14   :  { %2385 = vmatpush.bf16.msra.mxu0 %v3043_v56  ;;  %v4603_v15 = vld [vmem:[%s7369_s1 + $0x194] sm:$0xf0]  ;;  %v3155_v20 = vor.u32 %v4587_v13, %v3154_v12  ;;  %v3082_v21 = vld [vmem:[%s7369_s1 + $0x80] sm:$0xf]  ;;  %v4569_v22 = vld [vmem:[%s7369_s1 + $0x84] sm:$0xf0]  ;;  %v3019_v31 = vor.u32 %v4553_v18, %v3018_v17 }
  0x15   :  { %2398 = vmatpush.bf16.msra.mxu1 %v3107_v57  ;;  %v3146_v23 = vld [vmem:[%s7369_s1 + $0x100] sm:$0xf]  ;;  %v3219_v24 = vor.u32 %v4603_v15, %v3218_v14  ;;  %v4585_v25 = vld [vmem:[%s7369_s1 + $0x104] sm:$0xf0]  ;;  %v3330_v28 = vld [vmem:[%s7369_s1 + $0x270] sm:$0xf]  ;;  %v3083_v35 = vor.u32 %v4569_v22, %v3082_v21 }
  0x16   :  { %2411 = vmatpush.bf16.msra.mxu2 %v3171_v58  ;;  %v3210_v26 = vld [vmem:[%s7369_s1 + $0x180] sm:$0xf]  ;;  %v4601_v27 = vld [vmem:[%s7369_s1 + $0x184] sm:$0xf0]  ;;  %v4631_v29 = vld [vmem:[%s7369_s1 + $0x274] sm:$0xf0]  ;;  %v3147_v36 = vor.u32 %v4585_v25, %v3146_v23 }
  0x17   :  { %2424 = vmatpush.bf16.msra.mxu3 %v3235_v62  ;;  %v3394_v30 = vld [vmem:[%s7369_s1 + $0x2f0] sm:$0xf]  ;;  %v4647_v32 = vld [vmem:[%s7369_s1 + $0x2f4] sm:$0xf0]  ;;  %v3211_v39 = vor.u32 %v4601_v27, %v3210_v26  ;;  %v3331_v40 = vor.u32 %v4631_v29, %v3330_v28  ;;  %v3322_v43 = vld [vmem:[%s7369_s1 + $0x260] sm:$0xf] }
  0x18   :  { %2386 = vmatpush.bf16.msra.mxu0 %v3035_v4  ;;  %v3458_v33 = vld [vmem:[%s7369_s1 + $0x370] sm:$0xf]  ;;  %v4663_v34 = vld [vmem:[%s7369_s1 + $0x374] sm:$0xf0]  ;;  %v3395_v41 = vor.u32 %v4647_v32, %v3394_v30  ;;  %v4629_v44 = vld [vmem:[%s7369_s1 + $0x264] sm:$0xf0] }
  0x19   :  { %2399 = vmatpush.bf16.msra.mxu1 %v3099_v5  ;;  %v3522_v37 = vld [vmem:[%s7369_s1 + $0x3f0] sm:$0xf]  ;;  %v4679_v38 = vld [vmem:[%s7369_s1 + $0x3f4] sm:$0xf0]  ;;  %v3459_v42 = vor.u32 %v4663_v34, %v3458_v33  ;;  %v3386_v45 = vld [vmem:[%s7369_s1 + $0x2e0] sm:$0xf]  ;;  %v3323_v52 = vor.u32 %v4629_v44, %v3322_v43 }
  0x1a   :  { %2412 = vmatpush.bf16.msra.mxu2 %v3163_v6  ;;  %v3523_v46 = vor.u32 %v4679_v38, %v3522_v37  ;;  %v4645_v47 = vld [vmem:[%s7369_s1 + $0x2e4] sm:$0xf0]  ;;  %v3450_v48 = vld [vmem:[%s7369_s1 + $0x360] sm:$0xf]  ;;  %v3314_v53 = vld [vmem:[%s7369_s1 + $0x250] sm:$0xf] }
  0x1b   :  { %2425 = vmatpush.bf16.msra.mxu3 %v3227_v10  ;;  %v4661_v49 = vld [vmem:[%s7369_s1 + $0x364] sm:$0xf0]  ;;  %v3514_v50 = vld [vmem:[%s7369_s1 + $0x3e0] sm:$0xf]  ;;  %v4627_v54 = vld [vmem:[%s7369_s1 + $0x254] sm:$0xf0]  ;;  %v3387_v55 = vor.u32 %v4645_v47, %v3386_v45 }
  0x1c   :  { %2387 = vmatpush.bf16.msra.mxu0 %v3027_v16  ;;  %v4677_v51 = vld [vmem:[%s7369_s1 + $0x3e4] sm:$0xf0]  ;;  %v3451_v56 = vor.u32 %v4661_v49, %v3450_v48  ;;  %v3378_v57 = vld [vmem:[%s7369_s1 + $0x2d0] sm:$0xf]  ;;  %v4643_v58 = vld [vmem:[%s7369_s1 + $0x2d4] sm:$0xf0]  ;;  %v3315_v1 = vor.u32 %v4627_v54, %v3314_v53 }
  0x1d   :  { %2400 = vmatpush.bf16.msra.mxu1 %v3091_v19  ;;  %v14_v59 = vld [vmem:[%s7370_s0] sm:$0xff]  ;;  %v3515_v60 = vor.u32 %v4677_v51, %v3514_v50  ;;  %v3442_v61 = vld [vmem:[%s7369_s1 + $0x350] sm:$0xf]  ;;  %v4659_v62 = vld [vmem:[%s7369_s1 + $0x354] sm:$0xf0]  ;;  %v3379_v2 = vor.u32 %v4643_v58, %v3378_v57 }
  0x1e   :  { %2413 = vmatpush.bf16.msra.mxu2 %v3155_v20  ;;  %408 = vst [vmem:[#allocation1] ss:$9 sm:$0xff] %v14_v59  ;;  %v3506_v63 = vld [vmem:[%s7369_s1 + $0x3d0] sm:$0xf]  ;;  %v4675_v0 = vld [vmem:[%s7369_s1 + $0x3d4] sm:$0xf0]  ;;  %v3443_v3 = vor.u32 %v4659_v62, %v3442_v61 }
  0x1f   :  { %2426 = vmatpush.bf16.msra.mxu3 %v3219_v24  ;;  %v3306_v4 = vld [vmem:[%s7369_s1 + $0x240] sm:$0xf]  ;;  %v4625_v5 = vld [vmem:[%s7369_s1 + $0x244] sm:$0xf0]  ;;  %v3507_v7 = vor.u32 %v4675_v0, %v3506_v63  ;;  %v3298_v13 = vld [vmem:[%s7369_s1 + $0x230] sm:$0xf] }
  0x20   :  { %2388 = vmatpush.bf16.msra.mxu0 %v3019_v31  ;;  %v3370_v6 = vld [vmem:[%s7369_s1 + $0x2c0] sm:$0xf]  ;;  %v4641_v8 = vld [vmem:[%s7369_s1 + $0x2c4] sm:$0xf0]  ;;  %v3307_v14 = vor.u32 %v4625_v5, %v3306_v4  ;;  %v4623_v15 = vld [vmem:[%s7369_s1 + $0x234] sm:$0xf0] }
  0x21   :  { %2401 = vmatpush.bf16.msra.mxu1 %v3083_v35  ;;  %v3434_v9 = vld [vmem:[%s7369_s1 + $0x340] sm:$0xf]  ;;  %v4657_v10 = vld [vmem:[%s7369_s1 + $0x344] sm:$0xf0]  ;;  %v3362_v16 = vld [vmem:[%s7369_s1 + $0x2b0] sm:$0xf]  ;;  %v3371_v18 = vor.u32 %v4641_v8, %v3370_v6  ;;  %v3299_v29 = vor.u32 %v4623_v15, %v3298_v13 }
  0x22   :  { %2414 = vmatpush.bf16.msra.mxu2 %v3147_v36  ;;  %v3498_v11 = vld [vmem:[%s7369_s1 + $0x3c0] sm:$0xf]  ;;  %v4673_v12 = vld [vmem:[%s7369_s1 + $0x3c4] sm:$0xf0]  ;;  %v4639_v17 = vld [vmem:[%s7369_s1 + $0x2b4] sm:$0xf0]  ;;  %v3435_v19 = vor.u32 %v4657_v10, %v3434_v9 }
  0x23   :  { %2427 = vmatpush.bf16.msra.mxu3 %v3211_v39  ;;  %v3499_v23 = vor.u32 %v4673_v12, %v3498_v11  ;;  %v3426_v24 = vld [vmem:[%s7369_s1 + $0x330] sm:$0xf]  ;;  %v4655_v25 = vld [vmem:[%s7369_s1 + $0x334] sm:$0xf0]  ;;  %v3363_v30 = vor.u32 %v4639_v17, %v3362_v16  ;;  %v3290_v32 = vld [vmem:[%s7369_s1 + $0x220] sm:$0xf] }
  0x24   :  { %2433 = vmatpush.bf16.msrb.mxu0 %v3331_v40  ;;  %v3490_v27 = vld [vmem:[%s7369_s1 + $0x3b0] sm:$0xf]  ;;  %v4671_v28 = vld [vmem:[%s7369_s1 + $0x3b4] sm:$0xf0]  ;;  %v3427_v31 = vor.u32 %v4655_v25, %v3426_v24  ;;  %v4621_v33 = vld [vmem:[%s7369_s1 + $0x224] sm:$0xf0] }
  0x25   :  { %2446 = vmatpush.bf16.msrb.mxu1 %v3395_v41  ;;  %v5268_v20 = vld [vmem:[#allocation1 + $0x12] sm:$0xff]  ;;  %v5270_v21 = vld [vmem:[#allocation1] sm:$0xff]  ;;  %v5281_v26 = vld [vmem:[#allocation1 + $0x9] sm:$0xff]  ;;  %v3491_v35 = vor.u32 %v4671_v28, %v3490_v27  ;;  %v3291_v41 = vor.u32 %v4621_v33, %v3290_v32 }
  0x26   :  { %2459 = vmatpush.bf16.msrb.mxu2 %v3459_v42  ;;  %v5272_v22 = vld [vmem:[#allocation1 + $0x1b] sm:$0xff]  ;;  %2389 = vmatmul.bf16.vlgmr.msra.gmra.mxu0 %v5270_v21  ;;  %v4637_v36 = vld [vmem:[%s7369_s1 + $0x2a4] sm:$0xf0]  ;;  %v3282_v42 = vld [vmem:[%s7369_s1 + $0x210] sm:$0xf] }
  0x27   :  { %2472 = vmatpush.bf16.msrb.mxu3 %v3523_v46  ;;  %2415 = vmatmul.bf16.vlgmr.msra.gmra.mxu2 %v5268_v20  ;;  %v3354_v34 = vld [vmem:[%s7369_s1 + $0x2a0] sm:$0xf]  ;;  %v4653_v38 = vld [vmem:[%s7369_s1 + $0x324] sm:$0xf0]  ;;  %v4619_v46 = vld [vmem:[%s7369_s1 + $0x214] sm:$0xf0] }
  0x28   :  { %2434 = vmatpush.bf16.msrb.mxu0 %v3323_v52  ;;  %2428 = vmatmul.bf16.vlgmr.msra.gmra.mxu3 %v5272_v22  ;;  %v3418_v37 = vld [vmem:[%s7369_s1 + $0x320] sm:$0xf]  ;;  %v4669_v40 = vld [vmem:[%s7369_s1 + $0x3a4] sm:$0xf0]  ;;  %v3355_v44 = vor.u32 %v4637_v36, %v3354_v34  ;;  %v3346_v47 = vld [vmem:[%s7369_s1 + $0x290] sm:$0xf] }
  0x29   :  { %2447 = vmatpush.bf16.msrb.mxu1 %v3387_v55  ;;  %v3482_v39 = vld [vmem:[%s7369_s1 + $0x3a0] sm:$0xf]  ;;  %v15_v43 = vld [vmem:[%s7370_s0 + $0x8] sm:$0xff]  ;;  %v3419_v45 = vor.u32 %v4653_v38, %v3418_v37  ;;  %v4635_v48 = vld [vmem:[%s7369_s1 + $0x294] sm:$0xf0] }
  0x2a   :  { %2460 = vmatpush.bf16.msrb.mxu2 %v3451_v56  ;;  %2402 = vmatmul.bf16.vlgmr.msra.gmra.mxu1 %v5281_v26  ;;  %v3483_v49 = vor.u32 %v4669_v40, %v3482_v39  ;;  %v3410_v50 = vld [vmem:[%s7369_s1 + $0x310] sm:$0xf]  ;;  %v4651_v51 = vld [vmem:[%s7369_s1 + $0x314] sm:$0xf0]  ;;  %v3274_v54 = vld [vmem:[%s7369_s1 + $0x200] sm:$0xf]  ;;  %v3283_v56 = vor.u32 %v4619_v46, %v3282_v42  ;;  %v3347_v62 = vor.u32 %v4635_v48, %v3346_v47 }
  0x2b   :  { %2473 = vmatpush.bf16.msrb.mxu3 %v3515_v60  ;;  %v3474_v52 = vld [vmem:[%s7369_s1 + $0x390] sm:$0xf]  ;;  %v4667_v53 = vld [vmem:[%s7369_s1 + $0x394] sm:$0xf0]  ;;  %v4617_v55 = vld [vmem:[%s7369_s1 + $0x204] sm:$0xf0]  ;;  %v3411_v63 = vor.u32 %v4651_v51, %v3410_v50 }
  0x2c   :  { %2435 = vmatpush.bf16.msrb.mxu0 %v3315_v1  ;;  %v3338_v57 = vld [vmem:[%s7369_s1 + $0x280] sm:$0xf]  ;;  %v4633_v58 = vld [vmem:[%s7369_s1 + $0x284] sm:$0xf0]  ;;  %v5361_v61 = vld [vmem:[#allocation1 + $0x36] sm:$0xff]  ;;  %v3275_v9 = vor.u32 %v4617_v55, %v3274_v54 }
  0x2d   :  { %2448 = vmatpush.bf16.msrb.mxu1 %v3379_v2  ;;  %v3402_v59 = vld [vmem:[%s7369_s1 + $0x300] sm:$0xf]  ;;  %v4649_v60 = vld [vmem:[%s7369_s1 + $0x304] sm:$0xf0]  ;;  %v5367_v2 = vld [vmem:[#allocation1 + $0x2d] sm:$0xff]  ;;  %v3339_v13 = vor.u32 %v4633_v58, %v3338_v57 }
  0x2e   :  { %2461 = vmatpush.bf16.msrb.mxu2 %v3443_v3  ;;  %v5363_v0 = vld [vmem:[#allocation1 + $0x24] sm:$0xff]  ;;  %v3475_v3 = vor.u32 %v4667_v53, %v3474_v52  ;;  %v3466_v4 = vld [vmem:[%s7369_s1 + $0x380] sm:$0xf]  ;;  %v3586_v6 = vld [vmem:[%s7369_s1 + $0x470] sm:$0xf] }
  0x2f   :  { %2474 = vmatpush.bf16.msrb.mxu3 %v3507_v7  ;;  %v5365_v1 = vld [vmem:[#allocation1 + $0x3f] sm:$0xff]  ;;  %v4665_v5 = vld [vmem:[%s7369_s1 + $0x384] sm:$0xf0]  ;;  %v4695_v7 = vld [vmem:[%s7369_s1 + $0x474] sm:$0xf0] }
  0x30   :  { %2436 = vmatpush.bf16.msrb.mxu0 %v3307_v14  ;;  %418 = vst [vmem:[#allocation1] ss:$9 sm:$0xff] %v15_v43  ;;  %v3650_v8 = vld [vmem:[%s7369_s1 + $0x4f0] sm:$0xf]  ;;  %v4711_v10 = vld [vmem:[%s7369_s1 + $0x4f4] sm:$0xf0]  ;;  %v3403_v14 = vor.u32 %v4649_v60, %v3402_v59  ;;  %v3467_v17 = vor.u32 %v4665_v5, %v3466_v4 }
  0x31   :  { %2449 = vmatpush.bf16.msrb.mxu1 %v3371_v18  ;;  %v3714_v11 = vld [vmem:[%s7369_s1 + $0x570] sm:$0xf]  ;;  %v4727_v12 = vld [vmem:[%s7369_s1 + $0x574] sm:$0xf0]  ;;  %v3587_v18 = vor.u32 %v4695_v7, %v3586_v6  ;;  %v3578_v24 = vld [vmem:[%s7369_s1 + $0x460] sm:$0xf] }
  0x32   :  { %2462 = vmatpush.bf16.msrb.mxu2 %v3435_v19  ;;  %v3778_v15 = vld [vmem:[%s7369_s1 + $0x5f0] sm:$0xf]  ;;  %v4743_v16 = vld [vmem:[%s7369_s1 + $0x5f4] sm:$0xf0]  ;;  %v3651_v19 = vor.u32 %v4711_v10, %v3650_v8  ;;  %v4693_v25 = vld [vmem:[%s7369_s1 + $0x464] sm:$0xf0] }
  0x33   :  { %2475 = vmatpush.bf16.msrb.mxu3 %v3499_v23  ;;  %v3715_v23 = vor.u32 %v4727_v12, %v3714_v11  ;;  %v3642_v27 = vld [vmem:[%s7369_s1 + $0x4e0] sm:$0xf]  ;;  %v3779_v28 = vor.u32 %v4743_v16, %v3778_v15  ;;  %v4741_v33 = vld [vmem:[%s7369_s1 + $0x5e4] sm:$0xf0]  ;;  %v3579_v34 = vor.u32 %v4693_v25, %v3578_v24  ;;  %v3570_v37 = vld [vmem:[%s7369_s1 + $0x450] sm:$0xf] }
  0x34   :  { %2437 = vmatpush.bf16.msrb.mxu0 %v3299_v29  ;;  %v4709_v29 = vld [vmem:[%s7369_s1 + $0x4e4] sm:$0xf0]  ;;  %v3770_v32 = vld [vmem:[%s7369_s1 + $0x5e0] sm:$0xf]  ;;  %v4691_v38 = vld [vmem:[%s7369_s1 + $0x454] sm:$0xf0] }
  0x35   :  { %2450 = vmatpush.bf16.msrb.mxu1 %v3363_v30  ;;  %v3706_v30 = vld [vmem:[%s7369_s1 + $0x560] sm:$0xf]  ;;  %v3634_v39 = vld [vmem:[%s7369_s1 + $0x4d0] sm:$0xf]  ;;  %v3771_v40 = vor.u32 %v4741_v33, %v3770_v32  ;;  %v4723_v43 = vld [vmem:[%s7369_s1 + $0x554] sm:$0xf0]  ;;  %v3571_v46 = vor.u32 %v4691_v38, %v3570_v37 }
  0x36   :  { %2463 = vmatpush.bf16.msrb.mxu2 %v3427_v31  ;;  %v4725_v31 = vld [vmem:[%s7369_s1 + $0x564] sm:$0xf0]  ;;  %v3698_v42 = vld [vmem:[%s7369_s1 + $0x550] sm:$0xf]  ;;  %v3626_v51 = vld [vmem:[%s7369_s1 + $0x4c0] sm:$0xf] }
  0x37   :  { %2476 = vmatpush.bf16.msrb.mxu3 %v3491_v35  ;;  %v3643_v35 = vor.u32 %v4709_v29, %v3642_v27  ;;  %v3707_v36 = vor.u32 %v4725_v31, %v3706_v30  ;;  %v3699_v48 = vor.u32 %v4723_v43, %v3698_v42  ;;  %v4689_v50 = vld [vmem:[%s7369_s1 + $0x444] sm:$0xf0]  ;;  %v3690_v54 = vld [vmem:[%s7369_s1 + $0x540] sm:$0xf]  ;;  %v4703_v5 = vld [vmem:[%s7369_s1 + $0x4b4] sm:$0xf0] }
  0x38   :  { %2438 = vmatpush.bf16.msrb.mxu0 %v3291_v41  ;;  %v4707_v41 = vld [vmem:[%s7369_s1 + $0x4d4] sm:$0xf0]  ;;  %v4705_v53 = vld [vmem:[%s7369_s1 + $0x4c4] sm:$0xf0]  ;;  %v3682_v6 = vld [vmem:[%s7369_s1 + $0x530] sm:$0xf] }
  0x39   :  { %2451 = vmatpush.bf16.msrb.mxu1 %v3355_v44  ;;  %v3762_v44 = vld [vmem:[%s7369_s1 + $0x5d0] sm:$0xf]  ;;  %v3635_v47 = vor.u32 %v4707_v41, %v3634_v39  ;;  %v4721_v55 = vld [vmem:[%s7369_s1 + $0x544] sm:$0xf0]  ;;  %v3627_v59 = vor.u32 %v4705_v53, %v3626_v51  ;;  %v4719_v7 = vld [vmem:[%s7369_s1 + $0x534] sm:$0xf0] }
  0x3a   :  { %2464 = vmatpush.bf16.msrb.mxu2 %v3419_v45  ;;  %v4739_v45 = vld [vmem:[%s7369_s1 + $0x5d4] sm:$0xf0]  ;;  %v4737_v57 = vld [vmem:[%s7369_s1 + $0x5c4] sm:$0xf0]  ;;  %v3691_v60 = vor.u32 %v4721_v55, %v3690_v54  ;;  %v3746_v8 = vld [vmem:[%s7369_s1 + $0x5b0] sm:$0xf]  ;;  %v3683_v12 = vor.u32 %v4719_v7, %v3682_v6 }
  0x3b   :  { %2477 = vmatpush.bf16.msrb.mxu3 %v3483_v49  ;;  %v3562_v49 = vld [vmem:[%s7369_s1 + $0x440] sm:$0xf]  ;;  %v3763_v52 = vor.u32 %v4739_v45, %v3762_v44  ;;  %v4733_v24 = vld [vmem:[%s7369_s1 + $0x5a4] sm:$0xf0]  ;;  %v3538_v29 = vld [vmem:[%s7369_s1 + $0x410] sm:$0xf] }
  0x3c   :  { %2439 = vmatpush.bf16.msrb.mxu0 %v3283_v56  ;;  %v3754_v56 = vld [vmem:[%s7369_s1 + $0x5c0] sm:$0xf]  ;;  %v3563_v58 = vor.u32 %v4689_v50, %v3562_v49  ;;  %v4683_v30 = vld [vmem:[%s7369_s1 + $0x414] sm:$0xf0]  ;;  %v3602_v31 = vld [vmem:[%s7369_s1 + $0x490] sm:$0xf] }
  0x3d   :  { %2452 = vmatpush.bf16.msrb.mxu1 %v3347_v62  ;;  %v3554_v62 = vld [vmem:[%s7369_s1 + $0x430] sm:$0xf]  ;;  %v3755_v4 = vor.u32 %v4737_v57, %v3754_v56  ;;  %v3610_v15 = vld [vmem:[%s7369_s1 + $0x4a0] sm:$0xf]  ;;  %v4699_v33 = vld [vmem:[%s7369_s1 + $0x494] sm:$0xf0]  ;;  %v3539_v38 = vor.u32 %v4683_v30, %v3538_v29 }
  0x3e   :  { %2465 = vmatpush.bf16.msrb.mxu2 %v3411_v63  ;;  %v4687_v63 = vld [vmem:[%s7369_s1 + $0x434] sm:$0xf0]  ;;  %v3530_v39 = vld [vmem:[%s7369_s1 + $0x400] sm:$0xf]  ;;  %v3603_v41 = vor.u32 %v4699_v33, %v3602_v31  ;;  %v4697_v44 = vld [vmem:[%s7369_s1 + $0x484] sm:$0xf0] }
  0x3f   :  { %2478 = vmatpush.bf16.msrb.mxu3 %v3475_v3  ;;  %v3618_v3 = vld [vmem:[%s7369_s1 + $0x4b0] sm:$0xf]  ;;  %v3555_v10 = vor.u32 %v4687_v63, %v3554_v62  ;;  %v4731_v37 = vld [vmem:[%s7369_s1 + $0x594] sm:$0xf0]  ;;  %v3594_v43 = vld [vmem:[%s7369_s1 + $0x480] sm:$0xf] }
  0x40   :  { %2440 = vmatpush.bf16.msrb.mxu0 %v3275_v9  ;;  %v4735_v9 = vld [vmem:[%s7369_s1 + $0x5b4] sm:$0xf0]  ;;  %v3619_v11 = vor.u32 %v4703_v5, %v3618_v3  ;;  %v3658_v45 = vld [vmem:[%s7369_s1 + $0x500] sm:$0xf]  ;;  %v4729_v49 = vld [vmem:[%s7369_s1 + $0x584] sm:$0xf0]  ;;  %v3595_v57 = vor.u32 %v4697_v44, %v3594_v43 }
  0x41   :  { %2453 = vmatpush.bf16.msrb.mxu1 %v3339_v13  ;;  %v3546_v13 = vld [vmem:[%s7369_s1 + $0x420] sm:$0xf]  ;;  %v3747_v16 = vor.u32 %v4735_v9, %v3746_v8  ;;  %v3842_v50 = vld [vmem:[%s7369_s1 + $0x670] sm:$0xf]  ;;  %v4759_v51 = vld [vmem:[%s7369_s1 + $0x674] sm:$0xf0] }
  0x42   :  { %2466 = vmatpush.bf16.msrb.mxu2 %v3403_v14  ;;  %v4685_v14 = vld [vmem:[%s7369_s1 + $0x424] sm:$0xf0]  ;;  %v4775_v54 = vld [vmem:[%s7369_s1 + $0x6f4] sm:$0xf0]  ;;  %v3970_v55 = vld [vmem:[%s7369_s1 + $0x770] sm:$0xf]  ;;  %v3843_v63 = vor.u32 %v4759_v51, %v3842_v50 }
  0x43   :  { %2479 = vmatpush.bf16.msrb.mxu3 %v3467_v17  ;;  %2441 = vmatmul.bf16.vlgmr.msrb.gmra.mxu0 %v5363_v0  ;;  %v4701_v17 = vld [vmem:[%s7369_s1 + $0x4a4] sm:$0xf0]  ;;  %v3547_v25 = vor.u32 %v4685_v14, %v3546_v13  ;;  %v4791_v56 = vld [vmem:[%s7369_s1 + $0x774] sm:$0xf0]  ;;  %v3834_v3 = vld [vmem:[%s7369_s1 + $0x660] sm:$0xf] }
  0x44   :  { %2485 = vmatpush.bf16.msra.mxu0 %v3587_v18  ;;  %2454 = vmatmul.bf16.vlgmr.msrb.gmra.mxu1 %v5367_v2  ;;  %v3674_v18 = vld [vmem:[%s7369_s1 + $0x520] sm:$0xf]  ;;  %v3611_v27 = vor.u32 %v4701_v17, %v3610_v15  ;;  %v3971_v6 = vor.u32 %v4791_v56, %v3970_v55  ;;  %v4757_v8 = vld [vmem:[%s7369_s1 + $0x664] sm:$0xf0]  ;;  %v5644_v31 = vld [vmem:[#allocation1 + $0x36] sm:$0xff] }
  0x45   :  { %2498 = vmatpush.bf16.msra.mxu1 %v3651_v19  ;;  %2467 = vmatmul.bf16.vlgmr.msrb.gmra.mxu2 %v5361_v61  ;;  %v4717_v19 = vld [vmem:[%s7369_s1 + $0x524] sm:$0xf0]  ;;  %v5601_v7 = vld [vmem:[#allocation1] sm:$0xff]  ;;  %v4751_v55 = vld [vmem:[%s7369_s1 + $0x634] sm:$0xf0] }
  0x46   :  { %2511 = vmatpush.bf16.msra.mxu2 %v3715_v23  ;;  %2480 = vmatmul.bf16.vlgmr.msrb.gmra.mxu3 %v5365_v1  ;;  %v3738_v23 = vld [vmem:[%s7369_s1 + $0x5a0] sm:$0xf]  ;;  %v5614_v13 = vld [vmem:[#allocation1 + $0x9] sm:$0xff] }
  0x47   :  { %2524 = vmatpush.bf16.msra.mxu3 %v3779_v28  ;;  %v3675_v28 = vor.u32 %v4717_v19, %v3674_v18  ;;  %v3739_v32 = vor.u32 %v4733_v24, %v3738_v23  ;;  %v3898_v9 = vld [vmem:[%s7369_s1 + $0x6e0] sm:$0xf]  ;;  %v4789_v15 = vld [vmem:[%s7369_s1 + $0x764] sm:$0xf0]  ;;  %v3826_v19 = vld [vmem:[%s7369_s1 + $0x650] sm:$0xf]  ;;  %v3835_v24 = vor.u32 %v4757_v8, %v3834_v3 }
  0x48   :  { %2486 = vmatpush.bf16.msra.mxu0 %v3579_v34  ;;  %v3666_v34 = vld [vmem:[%s7369_s1 + $0x510] sm:$0xf]  ;;  %v3962_v14 = vld [vmem:[%s7369_s1 + $0x760] sm:$0xf]  ;;  %v4805_v18 = vld [vmem:[%s7369_s1 + $0x7e4] sm:$0xf0] }
  0x49   :  { %2499 = vmatpush.bf16.msra.mxu1 %v3643_v35  ;;  %v4715_v35 = vld [vmem:[%s7369_s1 + $0x514] sm:$0xf0]  ;;  %v3963_v30 = vor.u32 %v4789_v15, %v3962_v14  ;;  %v5648_v33 = vld [vmem:[#allocation1 + $0x3f] sm:$0xff]  ;;  %v4753_v43 = vld [vmem:[%s7369_s1 + $0x644] sm:$0xf0] }
  0x4a   :  { %2512 = vmatpush.bf16.msra.mxu2 %v3707_v36  ;;  %v3730_v36 = vld [vmem:[%s7369_s1 + $0x590] sm:$0xf]  ;;  %v3667_v42 = vor.u32 %v4715_v35, %v3666_v34  ;;  %v5625_v17 = vld [vmem:[#allocation1 + $0x1b] sm:$0xff]  ;;  %v4801_v50 = vld [vmem:[%s7369_s1 + $0x7c4] sm:$0xf0] }
  0x4b   :  { %2525 = vmatpush.bf16.msra.mxu3 %v3771_v40  ;;  %v4681_v40 = vld [vmem:[%s7369_s1 + $0x404] sm:$0xf0]  ;;  %v4755_v23 = vld [vmem:[%s7369_s1 + $0x654] sm:$0xf0]  ;;  %v3954_v35 = vld [vmem:[%s7369_s1 + $0x750] sm:$0xf] }
  0x4c   :  { %2487 = vmatpush.bf16.msra.mxu0 %v3571_v46  ;;  %v3731_v46 = vor.u32 %v4731_v37, %v3730_v36  ;;  %v3531_v53 = vor.u32 %v4681_v40, %v3530_v39  ;;  %v4787_v36 = vld [vmem:[%s7369_s1 + $0x754] sm:$0xf0]  ;;  %v4018_v37 = vld [vmem:[%s7369_s1 + $0x7d0] sm:$0xf]  ;;  %v3827_v39 = vor.u32 %v4755_v23, %v3826_v19  ;;  %v3882_v44 = vld [vmem:[%s7369_s1 + $0x6c0] sm:$0xf] }
  0x4d   :  { %2500 = vmatpush.bf16.msra.mxu1 %v3635_v47  ;;  %v4713_v47 = vld [vmem:[%s7369_s1 + $0x504] sm:$0xf0]  ;;  %v3874_v56 = vld [vmem:[%s7369_s1 + $0x6b0] sm:$0xf]  ;;  %v3930_v14 = vld [vmem:[%s7369_s1 + $0x720] sm:$0xf] }
  0x4e   :  { %2513 = vmatpush.bf16.msra.mxu2 %v3699_v48  ;;  %v3722_v48 = vld [vmem:[%s7369_s1 + $0x580] sm:$0xf]  ;;  %v4749_v8 = vld [vmem:[%s7369_s1 + $0x624] sm:$0xf0] }
  0x4f   :  { %2526 = vmatpush.bf16.msra.mxu3 %v3763_v52  ;;  %v3906_v52 = vld [vmem:[%s7369_s1 + $0x6f0] sm:$0xf]  ;;  %v3723_v62 = vor.u32 %v4729_v49, %v3722_v48  ;;  %v4785_v48 = vld [vmem:[%s7369_s1 + $0x744] sm:$0xf0]  ;;  %v4010_v49 = vld [vmem:[%s7369_s1 + $0x7c0] sm:$0xf] }
  0x50   :  { %2488 = vmatpush.bf16.msra.mxu0 %v3563_v58  ;;  %v3659_v58 = vor.u32 %v4713_v47, %v3658_v45  ;;  %v3907_v5 = vor.u32 %v4775_v54, %v3906_v52  ;;  %v3946_v47 = vld [vmem:[%s7369_s1 + $0x740] sm:$0xf]  ;;  %v3810_v54 = vld [vmem:[%s7369_s1 + $0x630] sm:$0xf]  ;;  %v4781_v15 = vld [vmem:[%s7369_s1 + $0x724] sm:$0xf0] }
  0x51   :  { %2501 = vmatpush.bf16.msra.mxu1 %v3627_v59  ;;  %v4034_v59 = vld [vmem:[%s7369_s1 + $0x7f0] sm:$0xf]  ;;  %v3811_v3 = vor.u32 %v4751_v55, %v3810_v54  ;;  %v4839_v55 = vld [vmem:[%s7369_s1 + $0x8f4] sm:$0xf0] }
  0x52   :  { %2514 = vmatpush.bf16.msra.mxu2 %v3691_v60  ;;  %v4807_v60 = vld [vmem:[%s7369_s1 + $0x7f4] sm:$0xf0] }
  0x53   :  { %2527 = vmatpush.bf16.msra.mxu3 %v3755_v4  ;;  %v16_v4 = vld [vmem:[%s7370_s0 + $0x10] sm:$0xff] }
  0x54   :  { %2489 = vmatpush.bf16.msra.mxu0 %v3555_v10  ;;  %v4773_v10 = vld [vmem:[%s7369_s1 + $0x6e4] sm:$0xf0] }
  0x55   :  { %2502 = vmatpush.bf16.msra.mxu1 %v3619_v11  ;;  %v4035_v11 = vor.u32 %v4807_v60, %v4034_v59  ;;  %v3899_v29 = vor.u32 %v4773_v10, %v3898_v9  ;;  %v3938_v59 = vld [vmem:[%s7369_s1 + $0x730] sm:$0xf]  ;;  %v4783_v60 = vld [vmem:[%s7369_s1 + $0x734] sm:$0xf0]  ;;  %v3866_v9 = vld [vmem:[%s7369_s1 + $0x6a0] sm:$0xf] }
  0x56   :  { %2515 = vmatpush.bf16.msra.mxu2 %v3683_v12  ;;  %v5612_v12 = vld [vmem:[#allocation1 + $0x12] sm:$0xff] }
  0x57   :  { %2528 = vmatpush.bf16.msra.mxu3 %v3747_v16  ;;  %v4026_v16 = vld [vmem:[%s7369_s1 + $0x7e0] sm:$0xf] }
  0x58   :  { %2490 = vmatpush.bf16.msra.mxu0 %v3547_v25  ;;  %v3890_v25 = vld [vmem:[%s7369_s1 + $0x6d0] sm:$0xf]  ;;  %v4027_v34 = vor.u32 %v4805_v18, %v4026_v16  ;;  %v3994_v16 = vld [vmem:[%s7369_s1 + $0x7a0] sm:$0xf]  ;;  %v4797_v18 = vld [vmem:[%s7369_s1 + $0x7a4] sm:$0xf0] }
  0x59   :  { %2503 = vmatpush.bf16.msra.mxu1 %v3611_v27  ;;  %v4771_v27 = vld [vmem:[%s7369_s1 + $0x6d4] sm:$0xf0] }
  0x5a   :  { %2516 = vmatpush.bf16.msra.mxu2 %v3675_v28  ;;  %v5642_v28 = vld [vmem:[#allocation1 + $0x24] sm:$0xff]  ;;  %v3891_v40 = vor.u32 %v4771_v27, %v3890_v25  ;;  %v3794_v25 = vld [vmem:[%s7369_s1 + $0x610] sm:$0xf]  ;;  %v4747_v27 = vld [vmem:[%s7369_s1 + $0x614] sm:$0xf0] }
  0x5b   :  { %2529 = vmatpush.bf16.msra.mxu3 %v3739_v32  ;;  %v5646_v32 = vld [vmem:[#allocation1 + $0x2d] sm:$0xff] }
  0x5c   :  { %2491 = vmatpush.bf16.msra.mxu0 %v3539_v38  ;;  %428 = vst [vmem:[#allocation1] ss:$9 sm:$0xff] %v16_v4  ;;  %v4803_v38 = vld [vmem:[%s7369_s1 + $0x7d4] sm:$0xf0] }
  0x5d   :  { %2504 = vmatpush.bf16.msra.mxu1 %v3603_v41  ;;  %v3955_v41 = vor.u32 %v4787_v36, %v3954_v35  ;;  %v4019_v45 = vor.u32 %v4803_v38, %v4018_v37  ;;  %v3922_v35 = vld [vmem:[%s7369_s1 + $0x710] sm:$0xf]  ;;  %v4779_v36 = vld [vmem:[%s7369_s1 + $0x714] sm:$0xf0] }
  0x5e   :  { %2517 = vmatpush.bf16.msra.mxu2 %v3667_v42  ;;  %v3818_v42 = vld [vmem:[%s7369_s1 + $0x640] sm:$0xf]  ;;  %v3986_v37 = vld [vmem:[%s7369_s1 + $0x790] sm:$0xf]  ;;  %v4795_v38 = vld [vmem:[%s7369_s1 + $0x794] sm:$0xf0] }
  0x5f   :  { %2530 = vmatpush.bf16.msra.mxu3 %v3731_v46  ;;  %v4769_v46 = vld [vmem:[%s7369_s1 + $0x6c4] sm:$0xf0]  ;;  %v3819_v51 = vor.u32 %v4753_v43, %v3818_v42  ;;  %v3923_v43 = vor.u32 %v4779_v36, %v3922_v35  ;;  %v4210_v35 = vld [vmem:[%s7369_s1 + $0x950] sm:$0xf]  ;;  %v4851_v36 = vld [vmem:[%s7369_s1 + $0x954] sm:$0xf0] }
  0x60   :  { %2492 = vmatpush.bf16.msra.mxu0 %v3531_v53  ;;  %v3883_v52 = vor.u32 %v4769_v46, %v3882_v44  ;;  %v3947_v53 = vor.u32 %v4785_v48, %v3946_v47  ;;  %v3850_v44 = vld [vmem:[%s7369_s1 + $0x680] sm:$0xf]  ;;  %v3987_v47 = vor.u32 %v4795_v38, %v3986_v37  ;;  %v4777_v48 = vld [vmem:[%s7369_s1 + $0x704] sm:$0xf0]  ;;  %v4274_v37 = vld [vmem:[%s7369_s1 + $0x9d0] sm:$0xf] }
  0x61   :  { %2505 = vmatpush.bf16.msra.mxu1 %v3595_v57  ;;  %v4011_v57 = vor.u32 %v4801_v50, %v4010_v49  ;;  %v3914_v46 = vld [vmem:[%s7369_s1 + $0x700] sm:$0xf]  ;;  %v4793_v50 = vld [vmem:[%s7369_s1 + $0x784] sm:$0xf0]  ;;  %v4867_v38 = vld [vmem:[%s7369_s1 + $0x9d4] sm:$0xf0] }
  0x62   :  { %2518 = vmatpush.bf16.msra.mxu2 %v3659_v58  ;;  %v4767_v58 = vld [vmem:[%s7369_s1 + $0x6b4] sm:$0xf0]  ;;  %v3978_v49 = vld [vmem:[%s7369_s1 + $0x780] sm:$0xf] }
  0x63   :  { %2531 = vmatpush.bf16.msra.mxu3 %v3723_v62  ;;  %2493 = vmatmul.bf16.vlgmr.msra.gmra.mxu0 %v5601_v7  ;;  %v4002_v62 = vld [vmem:[%s7369_s1 + $0x7b0] sm:$0xf]  ;;  %v3875_v4 = vor.u32 %v4767_v58, %v3874_v56 }
  0x64   :  { %2537 = vmatpush.bf16.msrb.mxu0 %v3843_v63  ;;  %2506 = vmatmul.bf16.vlgmr.msra.gmra.mxu1 %v5614_v13  ;;  %v4799_v63 = vld [vmem:[%s7369_s1 + $0x7b4] sm:$0xf0]  ;;  %v4226_v56 = vld [vmem:[%s7369_s1 + $0x970] sm:$0xf] }
  0x65   :  { %2550 = vmatpush.bf16.msrb.mxu1 %v3907_v5  ;;  %2519 = vmatmul.bf16.vlgmr.msra.gmra.mxu2 %v5612_v12  ;;  %v3939_v5 = vor.u32 %v4783_v60, %v3938_v59  ;;  %v4003_v10 = vor.u32 %v4799_v63, %v4002_v62  ;;  %v3915_v59 = vor.u32 %v4777_v48, %v3914_v46  ;;  %v4290_v60 = vld [vmem:[%s7369_s1 + $0x9f0] sm:$0xf]  ;;  %v4871_v62 = vld [vmem:[%s7369_s1 + $0x9f4] sm:$0xf0]  ;;  %v4833_v46 = vld [vmem:[%s7369_s1 + $0x8c4] sm:$0xf0] }
  0x66   :  { %2563 = vmatpush.bf16.msrb.mxu2 %v3971_v6  ;;  %2532 = vmatmul.bf16.vlgmr.msra.gmra.mxu3 %v5625_v17  ;;  %v3802_v6 = vld [vmem:[%s7369_s1 + $0x620] sm:$0xf]  ;;  %v3979_v63 = vor.u32 %v4793_v50, %v3978_v49  ;;  %v4849_v48 = vld [vmem:[%s7369_s1 + $0x944] sm:$0xf0] }
  0x67   :  { %2576 = vmatpush.bf16.msrb.mxu3 %v4035_v11  ;;  %v4765_v11 = vld [vmem:[%s7369_s1 + $0x6a4] sm:$0xf0]  ;;  %v3803_v19 = vor.u32 %v4749_v8, %v3802_v6  ;;  %v4090_v6 = vld [vmem:[%s7369_s1 + $0x860] sm:$0xf] }
  0x68   :  { %2538 = vmatpush.bf16.msrb.mxu0 %v3835_v24  ;;  %v3867_v23 = vor.u32 %v4765_v11, %v3866_v9  ;;  %v3931_v24 = vor.u32 %v4781_v15, %v3930_v14  ;;  %v4821_v8 = vld [vmem:[%s7369_s1 + $0x864] sm:$0xf0]  ;;  %v4154_v9 = vld [vmem:[%s7369_s1 + $0x8e0] sm:$0xf] }
  0x69   :  { %2551 = vmatpush.bf16.msrb.mxu1 %v3899_v29  ;;  %v3858_v29 = vld [vmem:[%s7369_s1 + $0x690] sm:$0xf]  ;;  %v4837_v11 = vld [vmem:[%s7369_s1 + $0x8e4] sm:$0xf0]  ;;  %v4218_v14 = vld [vmem:[%s7369_s1 + $0x960] sm:$0xf] }
  0x6a   :  { %2564 = vmatpush.bf16.msrb.mxu2 %v3963_v30  ;;  %v3995_v30 = vor.u32 %v4797_v18, %v3994_v16  ;;  %v4853_v15 = vld [vmem:[%s7369_s1 + $0x964] sm:$0xf0]  ;;  %v4282_v16 = vld [vmem:[%s7369_s1 + $0x9e0] sm:$0xf] }
  0x6b   :  { %2577 = vmatpush.bf16.msrb.mxu3 %v4027_v34  ;;  %v4763_v34 = vld [vmem:[%s7369_s1 + $0x694] sm:$0xf0]  ;;  %v4869_v18 = vld [vmem:[%s7369_s1 + $0x9e4] sm:$0xf0]  ;;  %v4266_v49 = vld [vmem:[%s7369_s1 + $0x9c0] sm:$0xf] }
  0x6c   :  { %2539 = vmatpush.bf16.msrb.mxu0 %v3827_v39  ;;  %v3795_v39 = vor.u32 %v4747_v27, %v3794_v25  ;;  %v3859_v42 = vor.u32 %v4763_v34, %v3858_v29  ;;  %v4082_v25 = vld [vmem:[%s7369_s1 + $0x850] sm:$0xf]  ;;  %v4819_v27 = vld [vmem:[%s7369_s1 + $0x854] sm:$0xf0]  ;;  %v4865_v50 = vld [vmem:[%s7369_s1 + $0x9c4] sm:$0xf0] }
  0x6d   :  { %2552 = vmatpush.bf16.msrb.mxu1 %v3891_v40  ;;  %v3786_v40 = vld [vmem:[%s7369_s1 + $0x600] sm:$0xf]  ;;  %v4146_v29 = vld [vmem:[%s7369_s1 + $0x8d0] sm:$0xf]  ;;  %v4835_v34 = vld [vmem:[%s7369_s1 + $0x8d4] sm:$0xf0] }
  0x6e   :  { %2565 = vmatpush.bf16.msrb.mxu2 %v3955_v41  ;;  %v4745_v41 = vld [vmem:[%s7369_s1 + $0x604] sm:$0xf0] }
  0x6f   :  { %2578 = vmatpush.bf16.msrb.mxu3 %v4019_v45  ;;  %v4761_v45 = vld [vmem:[%s7369_s1 + $0x684] sm:$0xf0]  ;;  %v3787_v54 = vor.u32 %v4745_v41, %v3786_v40  ;;  %v4147_v40 = vor.u32 %v4835_v34, %v4146_v29  ;;  %v4211_v41 = vor.u32 %v4851_v36, %v4210_v35  ;;  %v4114_v29 = vld [vmem:[%s7369_s1 + $0x890] sm:$0xf]  ;;  %v4827_v34 = vld [vmem:[%s7369_s1 + $0x894] sm:$0xf0] }
  0x70   :  { %2540 = vmatpush.bf16.msrb.mxu0 %v3819_v51  ;;  %v4098_v51 = vld [vmem:[%s7369_s1 + $0x870] sm:$0xf]  ;;  %v3851_v58 = vor.u32 %v4761_v45, %v3850_v44  ;;  %v4138_v44 = vld [vmem:[%s7369_s1 + $0x8c0] sm:$0xf]  ;;  %v4275_v45 = vor.u32 %v4867_v38, %v4274_v37  ;;  %v4843_v36 = vld [vmem:[%s7369_s1 + $0x914] sm:$0xf0] }
  0x71   :  { %2553 = vmatpush.bf16.msrb.mxu1 %v3883_v52  ;;  %v4823_v52 = vld [vmem:[%s7369_s1 + $0x874] sm:$0xf0]  ;;  %v4178_v35 = vld [vmem:[%s7369_s1 + $0x910] sm:$0xf] }
  0x72   :  { %2566 = vmatpush.bf16.msrb.mxu2 %v3947_v53  ;;  %v4162_v53 = vld [vmem:[%s7369_s1 + $0x8f0] sm:$0xf]  ;;  %v4859_v38 = vld [vmem:[%s7369_s1 + $0x994] sm:$0xf0] }
  0x73   :  { %2579 = vmatpush.bf16.msrb.mxu3 %v4011_v57  ;;  %v4855_v57 = vld [vmem:[%s7369_s1 + $0x974] sm:$0xf0]  ;;  %v4242_v37 = vld [vmem:[%s7369_s1 + $0x990] sm:$0xf] }
  0x74   :  { %2541 = vmatpush.bf16.msrb.mxu0 %v3811_v3  ;;  %v4099_v3 = vor.u32 %v4823_v52, %v4098_v51  ;;  %v4139_v52 = vor.u32 %v4833_v46, %v4138_v44  ;;  %v4106_v44 = vld [vmem:[%s7369_s1 + $0x880] sm:$0xf] }
  0x75   :  { %2554 = vmatpush.bf16.msrb.mxu1 %v3875_v4  ;;  %v4163_v4 = vor.u32 %v4839_v55, %v4162_v53  ;;  %v4815_v55 = vld [vmem:[%s7369_s1 + $0x834] sm:$0xf0]  ;;  %v4170_v46 = vld [vmem:[%s7369_s1 + $0x900] sm:$0xf] }
  0x76   :  { %2567 = vmatpush.bf16.msrb.mxu2 %v3939_v5  ;;  %v4227_v5 = vor.u32 %v4855_v57, %v4226_v56  ;;  %v4130_v56 = vld [vmem:[%s7369_s1 + $0x8b0] sm:$0xf]  ;;  %v4267_v57 = vor.u32 %v4865_v50, %v4266_v49  ;;  %v4234_v49 = vld [vmem:[%s7369_s1 + $0x980] sm:$0xf]  ;;  %v4857_v50 = vld [vmem:[%s7369_s1 + $0x984] sm:$0xf0] }
  0x77   :  { %2580 = vmatpush.bf16.msrb.mxu3 %v4003_v10  ;;  %v4291_v10 = vor.u32 %v4871_v62, %v4290_v60  ;;  %v4847_v60 = vld [vmem:[%s7369_s1 + $0x934] sm:$0xf0]  ;;  %v4258_v62 = vld [vmem:[%s7369_s1 + $0x9b0] sm:$0xf] }
  0x78   :  { %2542 = vmatpush.bf16.msrb.mxu0 %v3803_v19  ;;  %v4091_v19 = vor.u32 %v4821_v8, %v4090_v6  ;;  %v4058_v6 = vld [vmem:[%s7369_s1 + $0x820] sm:$0xf]  ;;  %v4813_v8 = vld [vmem:[%s7369_s1 + $0x824] sm:$0xf0] }
  0x79   :  { %2555 = vmatpush.bf16.msrb.mxu1 %v3867_v23  ;;  %v4155_v23 = vor.u32 %v4837_v11, %v4154_v9  ;;  %v4122_v9 = vld [vmem:[%s7369_s1 + $0x8a0] sm:$0xf]  ;;  %v4829_v11 = vld [vmem:[%s7369_s1 + $0x8a4] sm:$0xf0] }
  0x7a   :  { %2568 = vmatpush.bf16.msrb.mxu2 %v3931_v24  ;;  %v4219_v24 = vor.u32 %v4853_v15, %v4218_v14  ;;  %v4186_v14 = vld [vmem:[%s7369_s1 + $0x920] sm:$0xf]  ;;  %v4845_v15 = vld [vmem:[%s7369_s1 + $0x924] sm:$0xf0] }
  0x7b   :  { %2581 = vmatpush.bf16.msrb.mxu3 %v3995_v30  ;;  %v4283_v30 = vor.u32 %v4869_v18, %v4282_v16  ;;  %v4250_v16 = vld [vmem:[%s7369_s1 + $0x9a0] sm:$0xf]  ;;  %v4861_v18 = vld [vmem:[%s7369_s1 + $0x9a4] sm:$0xf0] }
  0x7c   :  { %2543 = vmatpush.bf16.msrb.mxu0 %v3795_v39  ;;  %v4083_v39 = vor.u32 %v4819_v27, %v4082_v25  ;;  %v4050_v25 = vld [vmem:[%s7369_s1 + $0x810] sm:$0xf]  ;;  %v4811_v27 = vld [vmem:[%s7369_s1 + $0x814] sm:$0xf0] }
  0x7d   :  { %2556 = vmatpush.bf16.msrb.mxu1 %v3859_v42  ;;  %v4074_v42 = vld [vmem:[%s7369_s1 + $0x840] sm:$0xf] }
  0x7e   :  { %2569 = vmatpush.bf16.msrb.mxu2 %v3923_v43  ;;  %v4817_v43 = vld [vmem:[%s7369_s1 + $0x844] sm:$0xf0] }
  0x7f   :  { %2582 = vmatpush.bf16.msrb.mxu3 %v3987_v47  ;;  %v4202_v47 = vld [vmem:[%s7369_s1 + $0x940] sm:$0xf]  ;;  %v4075_v51 = vor.u32 %v4817_v43, %v4074_v42  ;;  %v4115_v42 = vor.u32 %v4827_v34, %v4114_v29  ;;  %v4179_v43 = vor.u32 %v4843_v36, %v4178_v35  ;;  %v4338_v34 = vld [vmem:[%s7369_s1 + $0xa50] sm:$0xf]  ;;  %v4883_v35 = vld [vmem:[%s7369_s1 + $0xa54] sm:$0xf0] }
  0x80   :  { %2544 = vmatpush.bf16.msrb.mxu0 %v3787_v54  ;;  %v4203_v53 = vor.u32 %v4849_v48, %v4202_v47  ;;  %v4066_v54 = vld [vmem:[%s7369_s1 + $0x830] sm:$0xf]  ;;  %v4243_v47 = vor.u32 %v4859_v38, %v4242_v37  ;;  %v4841_v48 = vld [vmem:[%s7369_s1 + $0x904] sm:$0xf0]  ;;  %v4899_v38 = vld [vmem:[%s7369_s1 + $0xad4] sm:$0xf0] }
  0x81   :  { %2557 = vmatpush.bf16.msrb.mxu1 %v3851_v58  ;;  %v4831_v58 = vld [vmem:[%s7369_s1 + $0x8b4] sm:$0xf0]  ;;  %v4402_v36 = vld [vmem:[%s7369_s1 + $0xad0] sm:$0xf] }
  0x82   :  { %2570 = vmatpush.bf16.msrb.mxu2 %v3915_v59  ;;  %v4194_v59 = vld [vmem:[%s7369_s1 + $0x930] sm:$0xf] }
  0x83   :  { %2583 = vmatpush.bf16.msrb.mxu3 %v3979_v63  ;;  %2545 = vmatmul.bf16.vlgmr.msrb.gmra.mxu0 %v5642_v28  ;;  %v4863_v63 = vld [vmem:[%s7369_s1 + $0x9b4] sm:$0xf0] }
  0x84   :  { %2589 = vmatpush.bf16.msra.mxu0 %v4099_v3  ;;  %2558 = vmatmul.bf16.vlgmr.msrb.gmra.mxu1 %v5646_v32  ;;  %v4067_v3 = vor.u32 %v4815_v55, %v4066_v54  ;;  %v4903_v55 = vld [vmem:[%s7369_s1 + $0xaf4] sm:$0xf0] }
  0x85   :  { %2602 = vmatpush.bf16.msra.mxu1 %v4163_v4  ;;  %2571 = vmatmul.bf16.vlgmr.msrb.gmra.mxu2 %v5644_v31  ;;  %v4131_v4 = vor.u32 %v4831_v58, %v4130_v56  ;;  %v4482_v56 = vld [vmem:[%s7369_s1 + $0xb70] sm:$0xf] }
  0x86   :  { %2615 = vmatpush.bf16.msra.mxu2 %v4227_v5  ;;  %2584 = vmatmul.bf16.vlgmr.msrb.gmra.mxu3 %v5648_v33  ;;  %v4195_v5 = vor.u32 %v4847_v60, %v4194_v59  ;;  %v4171_v59 = vor.u32 %v4841_v48, %v4170_v46  ;;  %v4546_v60 = vld [vmem:[%s7369_s1 + $0xbf0] sm:$0xf]  ;;  %v4330_v46 = vld [vmem:[%s7369_s1 + $0xa40] sm:$0xf] }
  0x87   :  { %2628 = vmatpush.bf16.msra.mxu3 %v4291_v10  ;;  %v4259_v10 = vor.u32 %v4863_v63, %v4258_v62  ;;  %v4935_v62 = vld [vmem:[%s7369_s1 + $0xbf4] sm:$0xf0]  ;;  %v4235_v63 = vor.u32 %v4857_v50, %v4234_v49  ;;  %v4394_v48 = vld [vmem:[%s7369_s1 + $0xac0] sm:$0xf]  ;;  %v4897_v50 = vld [vmem:[%s7369_s1 + $0xac4] sm:$0xf0] }
  0x88   :  { %2590 = vmatpush.bf16.msra.mxu0 %v4091_v19  ;;  %v4059_v19 = vor.u32 %v4813_v8, %v4058_v6  ;;  %v4346_v6 = vld [vmem:[%s7369_s1 + $0xa60] sm:$0xf]  ;;  %v4885_v8 = vld [vmem:[%s7369_s1 + $0xa64] sm:$0xf0] }
  0x89   :  { %2603 = vmatpush.bf16.msra.mxu1 %v4155_v23  ;;  %v4123_v23 = vor.u32 %v4829_v11, %v4122_v9  ;;  %v4410_v9 = vld [vmem:[%s7369_s1 + $0xae0] sm:$0xf]  ;;  %v4901_v11 = vld [vmem:[%s7369_s1 + $0xae4] sm:$0xf0] }
  0x8a   :  { %2616 = vmatpush.bf16.msra.mxu2 %v4219_v24  ;;  %v4187_v24 = vor.u32 %v4845_v15, %v4186_v14  ;;  %v4474_v14 = vld [vmem:[%s7369_s1 + $0xb60] sm:$0xf]  ;;  %v4917_v15 = vld [vmem:[%s7369_s1 + $0xb64] sm:$0xf0]  ;;  %v4411_v29 = vor.u32 %v4901_v11, %v4410_v9 }
  0x8b   :  { %2629 = vmatpush.bf16.msra.mxu3 %v4283_v30  ;;  %v4251_v30 = vor.u32 %v4861_v18, %v4250_v16  ;;  %v429_v16 = vld [vmem:[#allocation1] sm:$0xff] }
  0x8c   :  { %2591 = vmatpush.bf16.msra.mxu0 %v4083_v39  ;;  %v4051_v39 = vor.u32 %v4811_v27, %v4050_v25  ;;  %v4538_v18 = vld [vmem:[%s7369_s1 + $0xbe0] sm:$0xf]  ;;  %v4347_v27 = vor.u32 %v4885_v8, %v4346_v6  ;;  %v4514_v6 = vld [vmem:[%s7369_s1 + $0xbb0] sm:$0xf]  ;;  %v4927_v8 = vld [vmem:[%s7369_s1 + $0xbb4] sm:$0xf0] }
  0x8d   :  { %2604 = vmatpush.bf16.msra.mxu1 %v4147_v40  ;;  %v4042_v40 = vld [vmem:[%s7369_s1 + $0x800] sm:$0xf] }
  0x8e   :  { %2617 = vmatpush.bf16.msra.mxu2 %v4211_v41  ;;  %v4809_v41 = vld [vmem:[%s7369_s1 + $0x804] sm:$0xf0]  ;;  %v432_v25 = vld [vmem:[#allocation1 + $0x1b] sm:$0xff] }
  0x8f   :  { %2630 = vmatpush.bf16.msra.mxu3 %v4275_v45  ;;  %v4825_v45 = vld [vmem:[%s7369_s1 + $0x884] sm:$0xf0]  ;;  %v4043_v54 = vor.u32 %v4809_v41, %v4042_v40  ;;  %v4915_v40 = vld [vmem:[%s7369_s1 + $0xb54] sm:$0xf0]  ;;  %v4530_v41 = vld [vmem:[%s7369_s1 + $0xbd0] sm:$0xf] }
  0x90   :  { %2592 = vmatpush.bf16.msra.mxu0 %v4075_v51  ;;  %v4354_v51 = vld [vmem:[%s7369_s1 + $0xa70] sm:$0xf]  ;;  %v4107_v58 = vor.u32 %v4825_v45, %v4106_v44  ;;  %v4403_v44 = vor.u32 %v4899_v38, %v4402_v36  ;;  %v4875_v38 = vld [vmem:[%s7369_s1 + $0xa14] sm:$0xf0] }
  0x91   :  { %2605 = vmatpush.bf16.msra.mxu1 %v4139_v52  ;;  %v4887_v52 = vld [vmem:[%s7369_s1 + $0xa74] sm:$0xf0] }
  0x92   :  { %2618 = vmatpush.bf16.msra.mxu2 %v4203_v53  ;;  %v4418_v53 = vld [vmem:[%s7369_s1 + $0xaf0] sm:$0xf] }
  0x93   :  { %2631 = vmatpush.bf16.msra.mxu3 %v4267_v57  ;;  %v4919_v57 = vld [vmem:[%s7369_s1 + $0xb74] sm:$0xf0] }
  0x94   :  { %2593 = vmatpush.bf16.msra.mxu0 %v4067_v3  ;;  %v4355_v3 = vor.u32 %v4887_v52, %v4354_v51  ;;  %v4458_v51 = vld [vmem:[%s7369_s1 + $0xb40] sm:$0xf]  ;;  %v4913_v52 = vld [vmem:[%s7369_s1 + $0xb44] sm:$0xf0] }
  0x95   :  { %2606 = vmatpush.bf16.msra.mxu1 %v4131_v4  ;;  %v4419_v4 = vor.u32 %v4903_v55, %v4418_v53  ;;  %v4522_v53 = vld [vmem:[%s7369_s1 + $0xbc0] sm:$0xf] }
  0x96   :  { %2619 = vmatpush.bf16.msra.mxu2 %v4195_v5  ;;  %v4483_v5 = vor.u32 %v4919_v57, %v4482_v56  ;;  %v4322_v56 = vld [vmem:[%s7369_s1 + $0xa30] sm:$0xf]  ;;  %v4395_v57 = vor.u32 %v4897_v50, %v4394_v48  ;;  %v4298_v50 = vld [vmem:[%s7369_s1 + $0xa00] sm:$0xf] }
  0x97   :  { %2632 = vmatpush.bf16.msra.mxu3 %v4259_v10  ;;  %v4547_v10 = vor.u32 %v4935_v62, %v4546_v60  ;;  %v4386_v60 = vld [vmem:[%s7369_s1 + $0xab0] sm:$0xf]  ;;  %v4895_v62 = vld [vmem:[%s7369_s1 + $0xab4] sm:$0xf0] }
  0x98   :  { %2594 = vmatpush.bf16.msra.mxu0 %v4059_v19  ;;  %v4933_v19 = vld [vmem:[%s7369_s1 + $0xbe4] sm:$0xf0]  ;;  %v4387_v11 = vor.u32 %v4895_v62, %v4386_v60  ;;  %v4490_v60 = vld [vmem:[%s7369_s1 + $0xb80] sm:$0xf] }
  0x99   :  { %2607 = vmatpush.bf16.msra.mxu1 %v4123_v23  ;;  %v431_v23 = vld [vmem:[#allocation1 + $0x12] sm:$0xff]  ;;  %v4539_v37 = vor.u32 %v4933_v19, %v4538_v18  ;;  %v4515_v19 = vor.u32 %v4927_v8, %v4514_v6  ;;  %v4921_v62 = vld [vmem:[%s7369_s1 + $0xb84] sm:$0xf0] }
  0x9a   :  { %2620 = vmatpush.bf16.msra.mxu2 %v4187_v24  ;;  %v430_v24 = vld [vmem:[#allocation1 + $0x9] sm:$0xff]  ;;  %v4582_v6 = vld [vmem:[%s7369_s1 + $0xf4] sm:$0xf] }
  0x9b   :  { %2633 = vmatpush.bf16.msra.mxu3 %v4251_v30  ;;  %v4475_v30 = vor.u32 %v4917_v15, %v4474_v14  ;;  %v4877_v15 = vld [vmem:[%s7369_s1 + $0xa24] sm:$0xf0] }
  0x9c   :  { %2595 = vmatpush.bf16.msra.mxu0 %v4051_v39  ;;  %v4466_v39 = vld [vmem:[%s7369_s1 + $0xb50] sm:$0xf] }
  0x9d   :  { %2608 = vmatpush.bf16.msra.mxu1 %v4115_v42  ;;  %v4931_v42 = vld [vmem:[%s7369_s1 + $0xbd4] sm:$0xf0]  ;;  %v4467_v45 = vor.u32 %v4915_v40, %v4466_v39  ;;  %v4370_v39 = vld [vmem:[%s7369_s1 + $0xa90] sm:$0xf] }
  0x9e   :  { %2621 = vmatpush.bf16.msra.mxu2 %v4179_v43  ;;  %v4339_v43 = vor.u32 %v4883_v35, %v4338_v34  ;;  %v4531_v49 = vor.u32 %v4931_v42, %v4530_v41 }
  0x9f   :  { %2634 = vmatpush.bf16.msra.mxu3 %v4243_v47  ;;  %v4881_v47 = vld [vmem:[%s7369_s1 + $0xa44] sm:$0xf0] }
  0xa0   :  { %2596 = vmatpush.bf16.msra.mxu0 %v4043_v54  ;;  %v4929_v54 = vld [vmem:[%s7369_s1 + $0xbc4] sm:$0xf0]  ;;  %v4331_v55 = vor.u32 %v4881_v47, %v4330_v46  ;;  %v4498_v46 = vld [vmem:[%s7369_s1 + $0xb90] sm:$0xf]  ;;  %v4923_v47 = vld [vmem:[%s7369_s1 + $0xb94] sm:$0xf0] }
  0xa1   :  { %2609 = vmatpush.bf16.msra.mxu1 %v4107_v58  ;;  %v4459_v58 = vor.u32 %v4913_v52, %v4458_v51  ;;  %v4873_v51 = vld [vmem:[%s7369_s1 + $0xa04] sm:$0xf0] }
  0xa2   :  { %2622 = vmatpush.bf16.msra.mxu2 %v4171_v59  ;;  %v4879_v59 = vld [vmem:[%s7369_s1 + $0xa34] sm:$0xf0]  ;;  %v4299_v8 = vor.u32 %v4873_v51, %v4298_v50 }
  0xa3   :  { %2635 = vmatpush.bf16.msra.mxu3 %v4235_v63  ;;  %2597 = vmatmul.bf16.vlgmr.msra.gmra.mxu0 %v429_v16  ;;  %v4523_v63 = vor.u32 %v4929_v54, %v4522_v53  ;;  %v4323_v9 = vor.u32 %v4879_v59, %v4322_v56  ;;  %v4378_v16 = vld [vmem:[%s7369_s1 + $0xaa0] sm:$0xf]  ;;  %v2390_v34 = vpop.f32.mrf.mxu0  ;;  %v4905_v59 = vld [vmem:[%s7369_s1 + $0xb04] sm:$0xf0] }
  0xa4   :  { %2641 = vmatpush.bf16.msrb.mxu0 %v4355_v3  ;;  %2610 = vmatmul.bf16.vlgmr.msra.gmra.mxu1 %v430_v24  ;;  %v4450_v3 = vld [vmem:[%s7369_s1 + $0xb30] sm:$0xf]  ;;  %v4442_v24 = vld [vmem:[%s7369_s1 + $0xb20] sm:$0xf] }
  0xa5   :  { %2654 = vmatpush.bf16.msrb.mxu1 %v4419_v4  ;;  %2623 = vmatmul.bf16.vlgmr.msra.gmra.mxu2 %v431_v23  ;;  %v4911_v4 = vld [vmem:[%s7369_s1 + $0xb34] sm:$0xf0]  ;;  %v4893_v23 = vld [vmem:[%s7369_s1 + $0xaa4] sm:$0xf0]  ;;  %v4362_v54 = vld [vmem:[%s7369_s1 + $0xa80] sm:$0xf] }
  0xa6   :  { %2667 = vmatpush.bf16.msrb.mxu2 %v4483_v5  ;;  %2636 = vmatmul.bf16.vlgmr.msra.gmra.mxu3 %v432_v25  ;;  %v401_v5 = vld [vmem:[%s7371_s2] sm:$0x3]  ;;  %v4451_v14 = vor.u32 %v4911_v4, %v4450_v3  ;;  %v4909_v25 = vld [vmem:[%s7369_s1 + $0xb24] sm:$0xf0]  ;;  %v4379_v35 = vor.u32 %v4893_v23, %v4378_v16  ;;  %v4566_v4 = vld [vmem:[%s7369_s1 + $0x74] sm:$0xf] }
  0xa7   :  { %2680 = vmatpush.bf16.msrb.mxu3 %v4547_v10  ;;  %v4314_v10 = vld [vmem:[%s7369_s1 + $0xa20] sm:$0xf]  ;;  %v403_v18 = vperm.slane %v401_v5, 0  ;;  %v4443_v36 = vor.u32 %v4909_v25, %v4442_v24  ;;  %v2403_v41 = vpop.f32.mrf.mxu1  ;;  %v3076_v5 = vld [vmem:[%s7369_s1 + $0x78] sm:$0xf0]  ;;  %v4491_v25 = vor.u32 %v4921_v62, %v4490_v60 }
  0xa8   :  { %2642 = vmatpush.bf16.msrb.mxu0 %v4347_v27  ;;  %v4506_v27 = vld [vmem:[%s7369_s1 + $0xba0] sm:$0xf]  ;;  %v3268_v23 = vld [vmem:[%s7369_s1 + $0x1f8] sm:$0xf0] }
  0xa9   :  { %2655 = vmatpush.bf16.msrb.mxu1 %v4411_v29  ;;  %v4925_v29 = vld [vmem:[%s7369_s1 + $0xba4] sm:$0xf0]  ;;  %v2391_v40 = vadd.f32 %v2390_v34, %v403_v18  ;;  %v4426_v56 = vld [vmem:[%s7369_s1 + $0xb00] sm:$0xf]  ;;  %v4564_v34 = vld [vmem:[%s7369_s1 + $0x64] sm:$0xf] }
  0xaa   :  { %2668 = vmatpush.bf16.msrb.mxu2 %v4475_v30  ;;  %v4315_v30 = vor.u32 %v4877_v15, %v4314_v10  ;;  %v4507_v42 = vor.u32 %v4925_v29, %v4506_v27  ;;  %v4598_v10 = vld [vmem:[%s7369_s1 + $0x174] sm:$0xf]  ;;  %v4427_v18 = vor.u32 %v4905_v59, %v4426_v56  ;;  %v3079_v27 = vor.u32 %v4566_v4, %v3076_v5  ;;  %v3124_v56 = vld [vmem:[%s7369_s1 + $0xd8] sm:$0xf0]  ;;  %v4560_v4 = vld [vmem:[%s7369_s1 + $0x44] sm:$0xf] }
  0xab   :  { %2681 = vmatpush.bf16.msrb.mxu3 %v4539_v37  ;;  %v4306_v37 = vld [vmem:[%s7369_s1 + $0xa10] sm:$0xf]  ;;  %v2404_v48 = vadd.f32 %v2403_v41, %v2391_v40  ;;  %v2429_v3 = vpop.f32.mrf.mxu3  ;;  %v2392_v15 = vpop.f32.mrf.mxu0  ;;  %v3196_v40 = vld [vmem:[%s7369_s1 + $0x168] sm:$0xf0]  ;;  %v433_v41 = vld [vmem:[#allocation1 + $0x24] sm:$0xff] }
  0xac   :  { %2643 = vmatpush.bf16.msrb.mxu0 %v4339_v43  ;;  %v4891_v43 = vld [vmem:[%s7369_s1 + $0xa94] sm:$0xf0]  ;;  %v4610_v59 = vld [vmem:[%s7369_s1 + $0x1d4] sm:$0xf]  ;;  %v3252_v60 = vld [vmem:[%s7369_s1 + $0x1d8] sm:$0xf0] }
  0xad   :  { %2656 = vmatpush.bf16.msrb.mxu1 %v4403_v44  ;;  %v4434_v44 = vld [vmem:[%s7369_s1 + $0xb10] sm:$0xf]  ;;  %v4371_v52 = vor.u32 %v4891_v43, %v4370_v39  ;;  %v4596_v39 = vld [vmem:[%s7369_s1 + $0x164] sm:$0xf]  ;;  %v3260_v43 = vld [vmem:[%s7369_s1 + $0x1e8] sm:$0xf0] }
  0xae   :  { %2669 = vmatpush.bf16.msrb.mxu2 %v4467_v45  ;;  %v4907_v45 = vld [vmem:[%s7369_s1 + $0xb14] sm:$0xf0]  ;;  %v3199_v51 = vor.u32 %v4596_v39, %v3196_v40  ;;  %v3052_v5 = vld [vmem:[%s7369_s1 + $0x48] sm:$0xf0]  ;;  %v4608_v15 = vld [vmem:[%s7369_s1 + $0x1c4] sm:$0xf] }
  0xaf   :  { %2682 = vmatpush.bf16.msrb.mxu3 %v4531_v49  ;;  %v4307_v49 = vor.u32 %v4875_v38, %v4306_v37  ;;  %v4435_v53 = vor.u32 %v4907_v45, %v4434_v44  ;;  %v2405_v24 = vpop.f32.mrf.mxu1  ;;  %v3132_v38 = vld [vmem:[%s7369_s1 + $0xe8] sm:$0xf0]  ;;  %v435_v45 = vld [vmem:[#allocation1 + $0x36] sm:$0xff] }
  0xb0   :  { %2644 = vmatpush.bf16.msrb.mxu0 %v4331_v55  ;;  %v4889_v55 = vld [vmem:[%s7369_s1 + $0xa84] sm:$0xf0]  ;;  %v4606_v39 = vld [vmem:[%s7369_s1 + $0x1b4] sm:$0xf] }
  0xb1   :  { %2657 = vmatpush.bf16.msrb.mxu1 %v4395_v57  ;;  %v2416_v57 = vpop.f32.mrf.mxu2  ;;  %v4363_v16 = vor.u32 %v4889_v55, %v4362_v54  ;;  %v4578_v54 = vld [vmem:[%s7369_s1 + $0xd4] sm:$0xf] }
  0xb2   :  { %2670 = vmatpush.bf16.msrb.mxu2 %v4459_v58  ;;  %v4499_v58 = vor.u32 %v4923_v47, %v4498_v46  ;;  %v434_v46 = vld [vmem:[#allocation1 + $0x2d] sm:$0xff]  ;;  %v436_v47 = vld [vmem:[#allocation1 + $0x3f] sm:$0xff] }
  0xb3   :  { %2683 = vmatpush.bf16.msrb.mxu3 %v4523_v63  ;;  %v2417_v63 = vadd.f32 %v2416_v57, %v2404_v48  ;;  %v4594_v57 = vld [vmem:[%s7369_s1 + $0x154] sm:$0xf] }
  0xb4   :  { %2645 = vmatpush.bf16.msrb.mxu0 %v4323_v9  ;;  %v3140_v9 = vld [vmem:[%s7369_s1 + $0xf8] sm:$0xf0] }
  0xb5   :  { %2658 = vmatpush.bf16.msrb.mxu1 %v4387_v11  ;;  %v3204_v11 = vld [vmem:[%s7369_s1 + $0x178] sm:$0xf0]  ;;  %v3143_v29 = vor.u32 %v4582_v6, %v3140_v9  ;;  %v4576_v6 = vld [vmem:[%s7369_s1 + $0xc4] sm:$0xf]  ;;  %v3116_v9 = vld [vmem:[%s7369_s1 + $0xc8] sm:$0xf0] }
  0xb6   :  { %2671 = vmatpush.bf16.msrb.mxu2 %v4451_v14  ;;  %v6195_v14 = vadd.f32 %v2429_v3, %v2417_v63  ;;  %v3127_v63 = vor.u32 %v4578_v54, %v3124_v56  ;;  %v4604_v54 = vld [vmem:[%s7369_s1 + $0x1a4] sm:$0xf] }
  0xb7   :  { %2684 = vmatpush.bf16.msrb.mxu3 %v4515_v19  ;;  %v4614_v19 = vld [vmem:[%s7369_s1 + $0x1f4] sm:$0xf] }
  0xb8   :  { %2646 = vmatpush.bf16.msrb.mxu0 %v4315_v30  ;;  %v3207_v30 = vor.u32 %v4598_v10, %v3204_v11  ;;  %v3271_v37 = vor.u32 %v4614_v19, %v3268_v23  ;;  %v4592_v10 = vld [vmem:[%s7369_s1 + $0x144] sm:$0xf]  ;;  %v3180_v11 = vld [vmem:[%s7369_s1 + $0x148] sm:$0xf0]  ;;  %v3119_v23 = vor.u32 %v4576_v6, %v3116_v9  ;;  %v3092_v6 = vld [vmem:[%s7369_s1 + $0x98] sm:$0xf0] }
  0xb9   :  { %2659 = vmatpush.bf16.msrb.mxu1 %v4379_v35  ;;  %v3068_v35 = vld [vmem:[%s7369_s1 + $0x68] sm:$0xf0]  ;;  %v2418_v44 = vpop.f32.mrf.mxu2  ;;  %v3183_v24 = vor.u32 %v4592_v10, %v3180_v11  ;;  %v3156_v9 = vld [vmem:[%s7369_s1 + $0x118] sm:$0xf0]  ;;  %v4602_v10 = vld [vmem:[%s7369_s1 + $0x194] sm:$0xf] }
  0xba   :  { %2672 = vmatpush.bf16.msrb.mxu2 %v4443_v36  ;;  %v4580_v36 = vld [vmem:[%s7369_s1 + $0xe4] sm:$0xf]  ;;  %v3071_v48 = vor.u32 %v4564_v34, %v3068_v35  ;;  %v3220_v11 = vld [vmem:[%s7369_s1 + $0x198] sm:$0xf0] }
  0xbb   :  { %2685 = vmatpush.bf16.msrb.mxu3 %v4507_v42  ;;  %v4612_v42 = vld [vmem:[%s7369_s1 + $0x1e4] sm:$0xf]  ;;  %v3135_v50 = vor.u32 %v4580_v36, %v3132_v38  ;;  %v3108_v36 = vld [vmem:[%s7369_s1 + $0xb8] sm:$0xf0] }
  0xbc   :  { %2647 = vmatpush.bf16.msrb.mxu0 %v4307_v49  ;;  %v2431_v49 = vpop.f32.mrf.mxu3  ;;  %v3263_v55 = vor.u32 %v4612_v42, %v3260_v43  ;;  %v3172_v38 = vld [vmem:[%s7369_s1 + $0x138] sm:$0xf0]  ;;  %v4556_v44 = vld [vmem:[%s7369_s1 + $0x24] sm:$0xf] }
  0xbd   :  { %2660 = vmatpush.bf16.msrb.mxu1 %v4371_v52  ;;  %v4562_v52 = vld [vmem:[%s7369_s1 + $0x54] sm:$0xf]  ;;  %v3100_v49 = vld [vmem:[%s7369_s1 + $0xa8] sm:$0xf0] }
  0xbe   :  { %2673 = vmatpush.bf16.msrb.mxu2 %v4435_v53  ;;  %v3060_v53 = vld [vmem:[%s7369_s1 + $0x58] sm:$0xf0] }
  0xbf   :  { %2686 = vmatpush.bf16.msrb.mxu3 %v4499_v58  ;;  %v3188_v58 = vld [vmem:[%s7369_s1 + $0x158] sm:$0xf0]  ;;  %v3063_v62 = vor.u32 %v4562_v52, %v3060_v53 }
  0xc0   :  { %2648 = vmatpush.bf16.msrb.mxu0 %v4299_v8  ;;  %v3191_v3 = vor.u32 %v4594_v57, %v3188_v58  ;;  %v3255_v8 = vor.u32 %v4610_v59, %v3252_v60  ;;  %v2442_v19 = vpop.f32.mrf.mxu0 }
  0xc1   :  { %2661 = vmatpush.bf16.msrb.mxu1 %v4363_v16  ;;  %v3244_v16 = vld [vmem:[%s7369_s1 + $0x1c8] sm:$0xf0]  ;;  %v2455_v34 = vpop.f32.mrf.mxu1 }
  0xc2   :  { %2674 = vmatpush.bf16.msrb.mxu2 %v4427_v18  ;;  %v3055_v18 = vor.u32 %v4560_v4, %v3052_v5  ;;  %v3247_v35 = vor.u32 %v4608_v15, %v3244_v16  ;;  %v4552_v16 = vld [vmem:[%s7369_s1 + $0x4] sm:$0xf] }
  0xc3   :  { %2687 = vmatpush.bf16.msrb.mxu3 %v4491_v25  ;;  %2649 = vmatmul.bf16.vlgmr.msrb.gmra.mxu0 %v433_v41  ;;  %v4558_v25 = vld [vmem:[%s7369_s1 + $0x34] sm:$0xf] }
  0xc4   :  { %2693 = vmatpush.bf16.msra.mxu0 %v3079_v27  ;;  %2662 = vmatmul.bf16.vlgmr.msrb.gmra.mxu1 %v434_v46  ;;  %v3044_v27 = vld [vmem:[%s7369_s1 + $0x38] sm:$0xf0]  ;;  %v4572_v46 = vld [vmem:[%s7369_s1 + $0xa4] sm:$0xf] }
  0xc5   :  { %2706 = vmatpush.bf16.msra.mxu1 %v3143_v29  ;;  %2675 = vmatmul.bf16.vlgmr.msrb.gmra.mxu2 %v435_v45  ;;  %v4574_v29 = vld [vmem:[%s7369_s1 + $0xb4] sm:$0xf]  ;;  %v3047_v41 = vor.u32 %v4558_v25, %v3044_v27  ;;  %v3036_v45 = vld [vmem:[%s7369_s1 + $0x28] sm:$0xf0]  ;;  %v3103_v59 = vor.u32 %v4572_v46, %v3100_v49  ;;  %v4584_v27 = vld [vmem:[%s7369_s1 + $0x104] sm:$0xf] }
  0xc6   :  { %2719 = vmatpush.bf16.msra.mxu2 %v3207_v30  ;;  %2688 = vmatmul.bf16.vlgmr.msrb.gmra.mxu3 %v436_v47  ;;  %v2443_v30 = vadd.f32 %v2442_v19, %v6195_v14  ;;  %v3236_v14 = vld [vmem:[%s7369_s1 + $0x1b8] sm:$0xf0]  ;;  %v3111_v42 = vor.u32 %v4574_v29, %v3108_v36  ;;  %v3039_v56 = vor.u32 %v4556_v44, %v3036_v45  ;;  %v3084_v25 = vld [vmem:[%s7369_s1 + $0x88] sm:$0xf0]  ;;  %v4678_v46 = vld [vmem:[%s7369_s1 + $0x3f4] sm:$0xf] }
  0xc7   :  { %2732 = vmatpush.bf16.msra.mxu3 %v3271_v37  ;;  %v4590_v37 = vld [vmem:[%s7369_s1 + $0x134] sm:$0xf]  ;;  %v3212_v36 = vld [vmem:[%s7369_s1 + $0x188] sm:$0xf0] }
  0xc8   :  { %2694 = vmatpush.bf16.msra.mxu0 %v3071_v48  ;;  %v2456_v40 = vadd.f32 %v2455_v34, %v2443_v30  ;;  %v3175_v43 = vor.u32 %v4590_v37, %v3172_v38  ;;  %v2468_v47 = vpop.f32.mrf.mxu2  ;;  %v3239_v48 = vor.u32 %v4606_v39, %v3236_v14  ;;  %v2444_v58 = vpop.f32.mrf.mxu0  ;;  %v3223_v30 = vor.u32 %v4602_v10, %v3220_v11  ;;  %v3148_v34 = vld [vmem:[%s7369_s1 + $0x108] sm:$0xf0]  ;;  %v4630_v38 = vld [vmem:[%s7369_s1 + $0x274] sm:$0xf]  ;;  %v3332_v39 = vld [vmem:[%s7369_s1 + $0x278] sm:$0xf0] }
  0xc9   :  { %2707 = vmatpush.bf16.msra.mxu1 %v3135_v50  ;;  %v4588_v50 = vld [vmem:[%s7369_s1 + $0x124] sm:$0xf]  ;;  %v2481_v53 = vpop.f32.mrf.mxu3  ;;  %v2457_v4 = vpop.f32.mrf.mxu1  ;;  %v4646_v14 = vld [vmem:[%s7369_s1 + $0x2f4] sm:$0xf]  ;;  %v3151_v45 = vor.u32 %v4584_v27, %v3148_v34  ;;  %v3335_v49 = vor.u32 %v4630_v38, %v3332_v39  ;;  %v3380_v10 = vld [vmem:[%s7369_s1 + $0x2d8] sm:$0xf0] }
  0xca   :  { %2720 = vmatpush.bf16.msra.mxu2 %v3199_v51  ;;  %v3164_v51 = vld [vmem:[%s7369_s1 + $0x128] sm:$0xf0]  ;;  %v2469_v52 = vadd.f32 %v2468_v47, %v2456_v40  ;;  %v3524_v47 = vld [vmem:[%s7369_s1 + $0x3f8] sm:$0xf0]  ;;  %v4660_v58 = vld [vmem:[%s7369_s1 + $0x364] sm:$0xf] }
  0xcb   :  { %2733 = vmatpush.bf16.msra.mxu3 %v3263_v55  ;;  %v3228_v55 = vld [vmem:[%s7369_s1 + $0x1a8] sm:$0xf0]  ;;  %v3167_v60 = vor.u32 %v4588_v50, %v3164_v51  ;;  %v4658_v11 = vld [vmem:[%s7369_s1 + $0x354] sm:$0xf]  ;;  %v4656_v27 = vld [vmem:[%s7369_s1 + $0x344] sm:$0xf] }
  0xcc   :  { %2695 = vmatpush.bf16.msra.mxu0 %v3063_v62  ;;  %v6324_v57 = vadd.f32 %v2481_v53, %v2469_v52  ;;  %v4554_v62 = vld [vmem:[%s7369_s1 + $0x14] sm:$0xf]  ;;  %v3231_v5 = vor.u32 %v4604_v54, %v3228_v55  ;;  %v4628_v52 = vld [vmem:[%s7369_s1 + $0x264] sm:$0xf]  ;;  %v3324_v53 = vld [vmem:[%s7369_s1 + $0x268] sm:$0xf0]  ;;  %v3527_v55 = vor.u32 %v4678_v46, %v3524_v47 }
  0xcd   :  { %2708 = vmatpush.bf16.msra.mxu1 %v3127_v63  ;;  %v3028_v63 = vld [vmem:[%s7369_s1 + $0x18] sm:$0xf0]  ;;  %v4644_v54 = vld [vmem:[%s7369_s1 + $0x2e4] sm:$0xf]  ;;  %v4670_v47 = vld [vmem:[%s7369_s1 + $0x3b4] sm:$0xf] }
  0xce   :  { %2721 = vmatpush.bf16.msra.mxu2 %v3191_v3  ;;  %v4570_v3 = vld [vmem:[%s7369_s1 + $0x94] sm:$0xf]  ;;  %v3031_v15 = vor.u32 %v4554_v62, %v3028_v63  ;;  %v3516_v62 = vld [vmem:[%s7369_s1 + $0x3e8] sm:$0xf0]  ;;  %v3327_v63 = vor.u32 %v4628_v52, %v3324_v53  ;;  %v4672_v34 = vld [vmem:[%s7369_s1 + $0x3c4] sm:$0xf] }
  0xcf   :  { %2734 = vmatpush.bf16.msra.mxu3 %v3255_v8  ;;  %v4586_v8 = vld [vmem:[%s7369_s1 + $0x114] sm:$0xf]  ;;  %v3095_v19 = vor.u32 %v4570_v3, %v3092_v6  ;;  %v3316_v6 = vld [vmem:[%s7369_s1 + $0x258] sm:$0xf0]  ;;  %v4620_v52 = vld [vmem:[%s7369_s1 + $0x224] sm:$0xf] }
  0xd0   :  { %2696 = vmatpush.bf16.msra.mxu0 %v3055_v18  ;;  %v3020_v18 = vld [vmem:[%s7369_s1 + $0x8] sm:$0xf0]  ;;  %v2470_v29 = vpop.f32.mrf.mxu2  ;;  %v3428_v46 = vld [vmem:[%s7369_s1 + $0x338] sm:$0xf0] }
  0xd1   :  { %2709 = vmatpush.bf16.msra.mxu1 %v3119_v23  ;;  %v3159_v23 = vor.u32 %v4586_v8, %v3156_v9  ;;  %v2483_v37 = vpop.f32.mrf.mxu3  ;;  %v3023_v40 = vor.u32 %v4552_v16, %v3020_v18  ;;  %v4642_v8 = vld [vmem:[%s7369_s1 + $0x2d4] sm:$0xf]  ;;  %v3508_v18 = vld [vmem:[%s7369_s1 + $0x3d8] sm:$0xf0]  ;;  %v3436_v29 = vld [vmem:[%s7369_s1 + $0x348] sm:$0xf0] }
  0xd2   :  { %2722 = vmatpush.bf16.msra.mxu2 %v3183_v24  ;;  %v4568_v24 = vld [vmem:[%s7369_s1 + $0x84] sm:$0xf]  ;;  %v4674_v16 = vld [vmem:[%s7369_s1 + $0x3d4] sm:$0xf]  ;;  %v3292_v53 = vld [vmem:[%s7369_s1 + $0x228] sm:$0xf0] }
  0xd3   :  { %2735 = vmatpush.bf16.msra.mxu3 %v3247_v35  ;;  %v4600_v35 = vld [vmem:[%s7369_s1 + $0x184] sm:$0xf]  ;;  %v3087_v44 = vor.u32 %v4568_v24, %v3084_v25  ;;  %v3308_v25 = vld [vmem:[%s7369_s1 + $0x248] sm:$0xf0] }
  0xd4   :  { %2697 = vmatpush.bf16.msra.mxu0 %v3047_v41  ;;  %v3396_v41 = vld [vmem:[%s7369_s1 + $0x2f8] sm:$0xf0]  ;;  %v4624_v24 = vld [vmem:[%s7369_s1 + $0x244] sm:$0xf] }
  0xd5   :  { %2710 = vmatpush.bf16.msra.mxu1 %v3111_v42  ;;  %v4662_v42 = vld [vmem:[%s7369_s1 + $0x374] sm:$0xf]  ;;  %v3399_v50 = vor.u32 %v4646_v14, %v3396_v41  ;;  %v3311_v37 = vor.u32 %v4624_v24, %v3308_v25  ;;  %v3439_v14 = vor.u32 %v4656_v27, %v3436_v29  ;;  %v3300_v41 = vld [vmem:[%s7369_s1 + $0x238] sm:$0xf0]  ;;  %v3276_v27 = vld [vmem:[%s7369_s1 + $0x208] sm:$0xf0] }
  0xd6   :  { %2723 = vmatpush.bf16.msra.mxu2 %v3175_v43  ;;  %v3460_v43 = vld [vmem:[%s7369_s1 + $0x378] sm:$0xf0]  ;;  %v4666_v25 = vld [vmem:[%s7369_s1 + $0x394] sm:$0xf] }
  0xd7   :  { %2736 = vmatpush.bf16.msra.mxu3 %v3239_v48  ;;  %v3215_v48 = vor.u32 %v4600_v35, %v3212_v36  ;;  %v3463_v51 = vor.u32 %v4662_v42, %v3460_v43  ;;  %v3500_v35 = vld [vmem:[%s7369_s1 + $0x3c8] sm:$0xf0]  ;;  %v4638_v42 = vld [vmem:[%s7369_s1 + $0x2b4] sm:$0xf]  ;;  %v3412_v24 = vld [vmem:[%s7369_s1 + $0x318] sm:$0xf0] }
  0xd8   :  { %2698 = vmatpush.bf16.msra.mxu0 %v3039_v56  ;;  %v3388_v56 = vld [vmem:[%s7369_s1 + $0x2e8] sm:$0xf0] }
  0xd9   :  { %2711 = vmatpush.bf16.msra.mxu1 %v3103_v59  ;;  %v3452_v59 = vld [vmem:[%s7369_s1 + $0x368] sm:$0xf0]  ;;  %v3391_v3 = vor.u32 %v4644_v54, %v3388_v56  ;;  %v4636_v54 = vld [vmem:[%s7369_s1 + $0x2a4] sm:$0xf] }
  0xda   :  { %2724 = vmatpush.bf16.msra.mxu2 %v3167_v60  ;;  %v4676_v60 = vld [vmem:[%s7369_s1 + $0x3e4] sm:$0xf]  ;;  %v3455_v4 = vor.u32 %v4660_v58, %v3452_v59  ;;  %v3356_v58 = vld [vmem:[%s7369_s1 + $0x2a8] sm:$0xf0] }
  0xdb   :  { %2737 = vmatpush.bf16.msra.mxu3 %v3231_v5  ;;  %v4626_v5 = vld [vmem:[%s7369_s1 + $0x254] sm:$0xf]  ;;  %v3519_v9 = vor.u32 %v4676_v60, %v3516_v62  ;;  %v4652_v59 = vld [vmem:[%s7369_s1 + $0x324] sm:$0xf]  ;;  %v3420_v60 = vld [vmem:[%s7369_s1 + $0x328] sm:$0xf0] }
  0xdc   :  { %2699 = vmatpush.bf16.msra.mxu0 %v3031_v15  ;;  %v3444_v15 = vld [vmem:[%s7369_s1 + $0x358] sm:$0xf0] }
  0xdd   :  { %2712 = vmatpush.bf16.msra.mxu1 %v3095_v19  ;;  %v3319_v19 = vor.u32 %v4626_v5, %v3316_v6  ;;  %v3295_v6 = vor.u32 %v4620_v52, %v3292_v53 }
  0xde   :  { %2725 = vmatpush.bf16.msra.mxu2 %v3159_v23  ;;  %v3383_v23 = vor.u32 %v4642_v8, %v3380_v10  ;;  %v3359_v10 = vor.u32 %v4636_v54, %v3356_v58  ;;  %v3580_v58 = vld [vmem:[%s7369_s1 + $0x468] sm:$0xf0] }
  0xdf   :  { %2738 = vmatpush.bf16.msra.mxu3 %v3223_v30 }
  0xe0   :  { %2700 = vmatpush.bf16.msra.mxu0 %v3023_v40  ;;  %v2494_v30 = vpop.f32.mrf.mxu0  ;;  %v4622_v40 = vld [vmem:[%s7369_s1 + $0x234] sm:$0xf] }
  0xe1   :  { %2713 = vmatpush.bf16.msra.mxu1 %v3087_v44  ;;  %v2495_v36 = vadd.f32 %v2494_v30, %v6324_v57  ;;  %v2507_v38 = vpop.f32.mrf.mxu1  ;;  %v3503_v57 = vor.u32 %v4672_v34, %v3500_v35  ;;  %v3364_v44 = vld [vmem:[%s7369_s1 + $0x2b8] sm:$0xf0]  ;;  %v4632_v34 = vld [vmem:[%s7369_s1 + $0x284] sm:$0xf]  ;;  %v3340_v35 = vld [vmem:[%s7369_s1 + $0x288] sm:$0xf0] }
  0xe2   :  { %2726 = vmatpush.bf16.msra.mxu2 %v3151_v45  ;;  %v4654_v45 = vld [vmem:[%s7369_s1 + $0x334] sm:$0xf] }
  0xe3   :  { %2739 = vmatpush.bf16.msra.mxu3 %v3215_v48  ;;  %2701 = vmatmul.bf16.vlgmr.msra.gmra.mxu0 %v5270_v21  ;;  %v4640_v21 = vld [vmem:[%s7369_s1 + $0x2c4] sm:$0xf]  ;;  %v2508_v43 = vadd.f32 %v2507_v38, %v2495_v36  ;;  %v3492_v48 = vld [vmem:[%s7369_s1 + $0x3b8] sm:$0xf0]  ;;  %v3404_v38 = vld [vmem:[%s7369_s1 + $0x308] sm:$0xf0] }
  0xe4   :  { %2745 = vmatpush.bf16.msrb.mxu0 %v3335_v49  ;;  %2714 = vmatmul.bf16.vlgmr.msra.gmra.mxu1 %v5281_v26  ;;  %v3372_v26 = vld [vmem:[%s7369_s1 + $0x2c8] sm:$0xf0]  ;;  %v3303_v49 = vor.u32 %v4622_v40, %v3300_v41  ;;  %v4648_v36 = vld [vmem:[%s7369_s1 + $0x304] sm:$0xf]  ;;  %v4694_v41 = vld [vmem:[%s7369_s1 + $0x474] sm:$0xf] }
  0xe5   :  { %2758 = vmatpush.bf16.msrb.mxu1 %v3399_v50  ;;  %2727 = vmatmul.bf16.vlgmr.msra.gmra.mxu2 %v5268_v20  ;;  %v3447_v20 = vor.u32 %v4658_v11, %v3444_v15  ;;  %v3375_v39 = vor.u32 %v4640_v21, %v3372_v26  ;;  %v3367_v50 = vor.u32 %v4638_v42, %v3364_v44  ;;  %v4618_v15 = vld [vmem:[%s7369_s1 + $0x214] sm:$0xf]  ;;  %v3476_v21 = vld [vmem:[%s7369_s1 + $0x398] sm:$0xf0]  ;;  %v4616_v26 = vld [vmem:[%s7369_s1 + $0x204] sm:$0xf] }
  0xe6   :  { %2771 = vmatpush.bf16.msrb.mxu2 %v3463_v51  ;;  %2740 = vmatmul.bf16.vlgmr.msra.gmra.mxu3 %v5272_v22  ;;  %v3511_v22 = vor.u32 %v4674_v16, %v3508_v18  ;;  %v3431_v51 = vor.u32 %v4654_v45, %v3428_v46  ;;  %v3423_v11 = vor.u32 %v4652_v59, %v3420_v60  ;;  %v3284_v16 = vld [vmem:[%s7369_s1 + $0x218] sm:$0xf0]  ;;  %v4634_v18 = vld [vmem:[%s7369_s1 + $0x294] sm:$0xf]  ;;  %v4708_v59 = vld [vmem:[%s7369_s1 + $0x4e4] sm:$0xf] }
  0xe7   :  { %2784 = vmatpush.bf16.msrb.mxu3 %v3527_v55  ;;  %v3495_v55 = vor.u32 %v4670_v47, %v3492_v48  ;;  %v3588_v42 = vld [vmem:[%s7369_s1 + $0x478] sm:$0xf0]  ;;  %v3279_v44 = vor.u32 %v4616_v26, %v3276_v27  ;;  %v4726_v46 = vld [vmem:[%s7369_s1 + $0x574] sm:$0xf]  ;;  %v3343_v48 = vor.u32 %v4632_v34, %v3340_v35  ;;  %v4704_v26 = vld [vmem:[%s7369_s1 + $0x4c4] sm:$0xf] }
  0xe8   :  { %2746 = vmatpush.bf16.msrb.mxu0 %v3327_v63  ;;  %v2520_v56 = vpop.f32.mrf.mxu2  ;;  %v2496_v5 = vpop.f32.mrf.mxu0  ;;  %v3652_v45 = vld [vmem:[%s7369_s1 + $0x4f8] sm:$0xf0]  ;;  %v3591_v53 = vor.u32 %v4694_v41, %v3588_v42  ;;  %v4736_v35 = vld [vmem:[%s7369_s1 + $0x5c4] sm:$0xf]  ;;  %v4686_v41 = vld [vmem:[%s7369_s1 + $0x434] sm:$0xf] }
  0xe9   :  { %2759 = vmatpush.bf16.msrb.mxu1 %v3391_v3  ;;  %v2521_v62 = vadd.f32 %v2520_v56, %v2508_v43  ;;  %v2533_v63 = vpop.f32.mrf.mxu3  ;;  %v4668_v3 = vld [vmem:[%s7369_s1 + $0x3a4] sm:$0xf]  ;;  %v2509_v8 = vpop.f32.mrf.mxu1  ;;  %v3716_v47 = vld [vmem:[%s7369_s1 + $0x578] sm:$0xf0]  ;;  %v3772_v5 = vld [vmem:[%s7369_s1 + $0x5e8] sm:$0xf0] }
  0xea   :  { %2772 = vmatpush.bf16.msrb.mxu2 %v3455_v4  ;;  %v3484_v4 = vld [vmem:[%s7369_s1 + $0x3a8] sm:$0xf0]  ;;  %v4692_v56 = vld [vmem:[%s7369_s1 + $0x464] sm:$0xf]  ;;  %v3556_v42 = vld [vmem:[%s7369_s1 + $0x438] sm:$0xf0] }
  0xeb   :  { %2785 = vmatpush.bf16.msrb.mxu3 %v3519_v9  ;;  %v6523_v9 = vadd.f32 %v2533_v63, %v2521_v62  ;;  %v3644_v62 = vld [vmem:[%s7369_s1 + $0x4e8] sm:$0xf0]  ;;  %v4724_v63 = vld [vmem:[%s7369_s1 + $0x564] sm:$0xf] }
  0xec   :  { %2747 = vmatpush.bf16.msrb.mxu0 %v3319_v19  ;;  %v3487_v19 = vor.u32 %v4668_v3, %v3484_v4  ;;  %v3708_v3 = vld [vmem:[%s7369_s1 + $0x568] sm:$0xf0]  ;;  %v4740_v4 = vld [vmem:[%s7369_s1 + $0x5e4] sm:$0xf]  ;;  %v3647_v8 = vor.u32 %v4708_v59, %v3644_v62 }
  0xed   :  { %2760 = vmatpush.bf16.msrb.mxu1 %v3383_v23  ;;  %v3348_v23 = vld [vmem:[%s7369_s1 + $0x298] sm:$0xf0]  ;;  %v4716_v59 = vld [vmem:[%s7369_s1 + $0x524] sm:$0xf] }
  0xee   :  { %2773 = vmatpush.bf16.msrb.mxu2 %v3447_v20  ;;  %v4650_v20 = vld [vmem:[%s7369_s1 + $0x314] sm:$0xf]  ;;  %v3351_v29 = vor.u32 %v4634_v18, %v3348_v23  ;;  %v3775_v18 = vor.u32 %v4740_v4, %v3772_v5  ;;  %v3740_v4 = vld [vmem:[%s7369_s1 + $0x5a8] sm:$0xf0] }
  0xef   :  { %2786 = vmatpush.bf16.msrb.mxu3 %v3511_v22  ;;  %v3287_v22 = vor.u32 %v4618_v15, %v3284_v16  ;;  %v3415_v30 = vor.u32 %v4650_v20, %v3412_v24  ;;  %v3572_v15 = vld [vmem:[%s7369_s1 + $0x458] sm:$0xf0]  ;;  %v4706_v16 = vld [vmem:[%s7369_s1 + $0x4d4] sm:$0xf] }
  0xf0   :  { %2748 = vmatpush.bf16.msrb.mxu0 %v3311_v37  ;;  %v3479_v37 = vor.u32 %v4666_v25, %v3476_v21  ;;  %v2522_v40 = vpop.f32.mrf.mxu2  ;;  %v4722_v23 = vld [vmem:[%s7369_s1 + $0x554] sm:$0xf]  ;;  %v3700_v20 = vld [vmem:[%s7369_s1 + $0x558] sm:$0xf0] }
  0xf1   :  { %2761 = vmatpush.bf16.msrb.mxu1 %v3375_v39  ;;  %v4664_v39 = vld [vmem:[%s7369_s1 + $0x384] sm:$0xf]  ;;  %v2535_v43 = vpop.f32.mrf.mxu3  ;;  %v3764_v24 = vld [vmem:[%s7369_s1 + $0x5d8] sm:$0xf0] }
  0xf2   :  { %2774 = vmatpush.bf16.msrb.mxu2 %v3439_v14  ;;  %v3468_v14 = vld [vmem:[%s7369_s1 + $0x388] sm:$0xf0] }
  0xf3   :  { %2787 = vmatpush.bf16.msrb.mxu3 %v3503_v57  ;;  %v4710_v57 = vld [vmem:[%s7369_s1 + $0x4f4] sm:$0xf]  ;;  %v3471_v52 = vor.u32 %v4664_v39, %v3468_v14 }
  0xf4   :  { %2749 = vmatpush.bf16.msrb.mxu0 %v3303_v49  ;;  %v3407_v49 = vor.u32 %v4648_v36, %v3404_v38  ;;  %v3655_v54 = vor.u32 %v4710_v57, %v3652_v45  ;;  %v3756_v36 = vld [vmem:[%s7369_s1 + $0x5c8] sm:$0xf0]  ;;  %v4702_v57 = vld [vmem:[%s7369_s1 + $0x4b4] sm:$0xf] }
  0xf5   :  { %2762 = vmatpush.bf16.msrb.mxu1 %v3367_v50  ;;  %v4742_v50 = vld [vmem:[%s7369_s1 + $0x5f4] sm:$0xf] }
  0xf6   :  { %2775 = vmatpush.bf16.msrb.mxu2 %v3431_v51  ;;  %v3780_v51 = vld [vmem:[%s7369_s1 + $0x5f8] sm:$0xf0]  ;;  %v4718_v45 = vld [vmem:[%s7369_s1 + $0x534] sm:$0xf] }
  0xf7   :  { %2788 = vmatpush.bf16.msrb.mxu3 %v3495_v55  ;;  %v3719_v55 = vor.u32 %v4726_v46, %v3716_v47  ;;  %v3783_v60 = vor.u32 %v4742_v50, %v3780_v51  ;;  %v3684_v46 = vld [vmem:[%s7369_s1 + $0x538] sm:$0xf0]  ;;  %v4734_v47 = vld [vmem:[%s7369_s1 + $0x5b4] sm:$0xf] }
  0xf8   :  { %2750 = vmatpush.bf16.msrb.mxu0 %v3295_v6  ;;  %v3583_v6 = vor.u32 %v4692_v56, %v3580_v58  ;;  %v3687_v51 = vor.u32 %v4718_v45, %v3684_v46  ;;  %v3612_v58 = vld [vmem:[%s7369_s1 + $0x4a8] sm:$0xf0]  ;;  %v4806_v46 = vld [vmem:[%s7369_s1 + $0x7f4] sm:$0xf] }
  0xf9   :  { %2763 = vmatpush.bf16.msrb.mxu1 %v3359_v10  ;;  %v3711_v10 = vor.u32 %v4724_v63, %v3708_v3  ;;  %v4732_v3 = vld [vmem:[%s7369_s1 + $0x5a4] sm:$0xf] }
  0xfa   :  { %2776 = vmatpush.bf16.msrb.mxu2 %v3423_v11  ;;  %v4690_v11 = vld [vmem:[%s7369_s1 + $0x454] sm:$0xf] }
  0xfb   :  { %2789 = vmatpush.bf16.msrb.mxu3 %v3487_v19  ;;  %v3636_v19 = vld [vmem:[%s7369_s1 + $0x4d8] sm:$0xf0]  ;;  %v3575_v25 = vor.u32 %v4690_v11, %v3572_v15 }
  0xfc   :  { %2751 = vmatpush.bf16.msrb.mxu0 %v3287_v22  ;;  %v3639_v21 = vor.u32 %v4706_v16, %v3636_v19  ;;  %v3703_v22 = vor.u32 %v4722_v23, %v3700_v20  ;;  %v4682_v16 = vld [vmem:[%s7369_s1 + $0x414] sm:$0xf]  ;;  %v3743_v23 = vor.u32 %v4732_v3, %v3740_v4  ;;  %v3604_v20 = vld [vmem:[%s7369_s1 + $0x498] sm:$0xf0] }
  0xfd   :  { %2764 = vmatpush.bf16.msrb.mxu1 %v3351_v29  ;;  %v4720_v29 = vld [vmem:[%s7369_s1 + $0x544] sm:$0xf]  ;;  %v4698_v19 = vld [vmem:[%s7369_s1 + $0x494] sm:$0xf] }
  0xfe   :  { %2777 = vmatpush.bf16.msrb.mxu2 %v3415_v30  ;;  %v3692_v30 = vld [vmem:[%s7369_s1 + $0x548] sm:$0xf0] }
  0xff   :  { %2790 = vmatpush.bf16.msrb.mxu3 %v3479_v37  ;;  %v3695_v40 = vor.u32 %v4720_v29, %v3692_v30  ;;  %v3596_v29 = vld [vmem:[%s7369_s1 + $0x488] sm:$0xf0]  ;;  %v4712_v30 = vld [vmem:[%s7369_s1 + $0x504] sm:$0xf] }
 0x100   :  { %2752 = vmatpush.bf16.msrb.mxu0 %v3279_v44  ;;  %v2546_v34 = vpop.f32.mrf.mxu0  ;;  %v3620_v44 = vld [vmem:[%s7369_s1 + $0x4b8] sm:$0xf0] }
 0x101   :  { %2765 = vmatpush.bf16.msrb.mxu1 %v3343_v48  ;;  %v2547_v37 = vadd.f32 %v2546_v34, %v6523_v9  ;;  %v2559_v39 = vpop.f32.mrf.mxu1  ;;  %v3759_v9 = vor.u32 %v4736_v35, %v3756_v36  ;;  %v3748_v48 = vld [vmem:[%s7369_s1 + $0x5b8] sm:$0xf0]  ;;  %v3623_v50 = vor.u32 %v4702_v57, %v3620_v44  ;;  %v3660_v35 = vld [vmem:[%s7369_s1 + $0x508] sm:$0xf0]  ;;  %v4728_v36 = vld [vmem:[%s7369_s1 + $0x584] sm:$0xf] }
 0x102   :  { %2778 = vmatpush.bf16.msrb.mxu2 %v3407_v49  ;;  %v3559_v49 = vor.u32 %v4686_v41, %v3556_v42  ;;  %v3908_v57 = vld [vmem:[%s7369_s1 + $0x6f8] sm:$0xf0]  ;;  %v3663_v45 = vor.u32 %v4712_v30, %v3660_v35  ;;  %v4750_v35 = vld [vmem:[%s7369_s1 + $0x634] sm:$0xf] }
 0x103   :  { %2791 = vmatpush.bf16.msrb.mxu3 %v3471_v52  ;;  %2753 = vmatmul.bf16.vlgmr.msrb.gmra.mxu0 %v5363_v0  ;;  %v4688_v0 = vld [vmem:[%s7369_s1 + $0x444] sm:$0xf]  ;;  %v2560_v43 = vadd.f32 %v2559_v39, %v2547_v37  ;;  %v3724_v37 = vld [vmem:[%s7369_s1 + $0x588] sm:$0xf0]  ;;  %v4758_v39 = vld [vmem:[%s7369_s1 + $0x674] sm:$0xf] }
 0x104   :  { %2797 = vmatpush.bf16.msra.mxu0 %v3591_v53  ;;  %2766 = vmatmul.bf16.vlgmr.msrb.gmra.mxu1 %v5367_v2  ;;  %v3628_v2 = vld [vmem:[%s7369_s1 + $0x4c8] sm:$0xf0]  ;;  %v4684_v52 = vld [vmem:[%s7369_s1 + $0x424] sm:$0xf] }
 0x105   :  { %2810 = vmatpush.bf16.msra.mxu1 %v3655_v54  ;;  %2779 = vmatmul.bf16.vlgmr.msrb.gmra.mxu2 %v5361_v61  ;;  %v4738_v61 = vld [vmem:[%s7369_s1 + $0x5d4] sm:$0xf]  ;;  %v3631_v14 = vor.u32 %v4704_v26, %v3628_v2  ;;  %v3548_v53 = vld [vmem:[%s7369_s1 + $0x428] sm:$0xf0]  ;;  %v4700_v54 = vld [vmem:[%s7369_s1 + $0x4a4] sm:$0xf]  ;;  %v3607_v26 = vor.u32 %v4698_v19, %v3604_v20 }
 0x106   :  { %2823 = vmatpush.bf16.msra.mxu2 %v3719_v55  ;;  %2792 = vmatmul.bf16.vlgmr.msrb.gmra.mxu3 %v5365_v1  ;;  %v3564_v1 = vld [vmem:[%s7369_s1 + $0x448] sm:$0xf0]  ;;  %v3767_v27 = vor.u32 %v4738_v61, %v3764_v24  ;;  %v3751_v55 = vor.u32 %v4734_v47, %v3748_v48  ;;  %v3615_v11 = vor.u32 %v4700_v54, %v3612_v58  ;;  %v4714_v61 = vld [vmem:[%s7369_s1 + $0x514] sm:$0xf]  ;;  %v3668_v24 = vld [vmem:[%s7369_s1 + $0x518] sm:$0xf0] }
 0x107   :  { %2836 = vmatpush.bf16.msra.mxu3 %v3783_v60  ;;  %v3567_v38 = vor.u32 %v4688_v0, %v3564_v1  ;;  %v3676_v60 = vld [vmem:[%s7369_s1 + $0x528] sm:$0xf0]  ;;  %v4680_v0 = vld [vmem:[%s7369_s1 + $0x404] sm:$0xf]  ;;  %v4036_v47 = vld [vmem:[%s7369_s1 + $0x7f8] sm:$0xf0]  ;;  %v3727_v48 = vor.u32 %v4728_v36, %v3724_v37 }
 0x108   :  { %2798 = vmatpush.bf16.msra.mxu0 %v3583_v6  ;;  %v2572_v56 = vpop.f32.mrf.mxu2  ;;  %v2548_v5 = vpop.f32.mrf.mxu0  ;;  %v3551_v6 = vor.u32 %v4684_v52, %v3548_v53  ;;  %v3679_v15 = vor.u32 %v4716_v59, %v3676_v60  ;;  %v3532_v1 = vld [vmem:[%s7369_s1 + $0x408] sm:$0xf0]  ;;  %v4696_v2 = vld [vmem:[%s7369_s1 + $0x484] sm:$0xf]  ;;  %v4020_v19 = vld [vmem:[%s7369_s1 + $0x7d8] sm:$0xf0] }
 0x109   :  { %2811 = vmatpush.bf16.msra.mxu1 %v3647_v8  ;;  %v2573_v62 = vadd.f32 %v2572_v56, %v2560_v43  ;;  %v2585_v63 = vpop.f32.mrf.mxu3  ;;  %v2561_v8 = vpop.f32.mrf.mxu1  ;;  %v3535_v42 = vor.u32 %v4680_v0, %v3532_v1  ;;  %v3972_v43 = vld [vmem:[%s7369_s1 + $0x778] sm:$0xf0]  ;;  %v3599_v44 = vor.u32 %v4696_v2, %v3596_v29  ;;  %v4756_v52 = vld [vmem:[%s7369_s1 + $0x664] sm:$0xf]  ;;  %v3836_v53 = vld [vmem:[%s7369_s1 + $0x668] sm:$0xf0] }
 0x10a   :  { %2824 = vmatpush.bf16.msra.mxu2 %v3711_v10  ;;  %v4772_v54 = vld [vmem:[%s7369_s1 + $0x6e4] sm:$0xf]  ;;  %v3900_v56 = vld [vmem:[%s7369_s1 + $0x6e8] sm:$0xf0]  ;;  %v4754_v5 = vld [vmem:[%s7369_s1 + $0x654] sm:$0xf] }
 0x10b   :  { %2837 = vmatpush.bf16.msra.mxu3 %v3775_v18  ;;  %v6722_v10 = vadd.f32 %v2585_v63, %v2573_v62  ;;  %v3540_v18 = vld [vmem:[%s7369_s1 + $0x418] sm:$0xf0]  ;;  %v4788_v58 = vld [vmem:[%s7369_s1 + $0x764] sm:$0xf]  ;;  %v3964_v59 = vld [vmem:[%s7369_s1 + $0x768] sm:$0xf0]  ;;  %v3839_v63 = vor.u32 %v4756_v52, %v3836_v53  ;;  %v3903_v3 = vor.u32 %v4772_v54, %v3900_v56 }
 0x10c   :  { %2799 = vmatpush.bf16.msra.mxu0 %v3575_v25  ;;  %v4730_v25 = vld [vmem:[%s7369_s1 + $0x594] sm:$0xf]  ;;  %v4804_v60 = vld [vmem:[%s7369_s1 + $0x7e4] sm:$0xf]  ;;  %v4028_v62 = vld [vmem:[%s7369_s1 + $0x7e8] sm:$0xf0]  ;;  %v3967_v4 = vor.u32 %v4788_v58, %v3964_v59 }
 0x10d   :  { %2812 = vmatpush.bf16.msra.mxu1 %v3639_v21  ;;  %v3732_v21 = vld [vmem:[%s7369_s1 + $0x598] sm:$0xf0]  ;;  %v4770_v8 = vld [vmem:[%s7369_s1 + $0x6d4] sm:$0xf]  ;;  %v4800_v1 = vld [vmem:[%s7369_s1 + $0x7c4] sm:$0xf] }
 0x10e   :  { %2825 = vmatpush.bf16.msra.mxu2 %v3703_v22  ;;  %v3543_v22 = vor.u32 %v4682_v16, %v3540_v18  ;;  %v3735_v34 = vor.u32 %v4730_v25, %v3732_v21  ;;  %v4786_v16 = vld [vmem:[%s7369_s1 + $0x754] sm:$0xf]  ;;  %v3956_v18 = vld [vmem:[%s7369_s1 + $0x758] sm:$0xf0]  ;;  %v3884_v25 = vld [vmem:[%s7369_s1 + $0x6c8] sm:$0xf0] }
 0x10f   :  { %2838 = vmatpush.bf16.msra.mxu3 %v3767_v27  ;;  %v3671_v27 = vor.u32 %v4714_v61, %v3668_v24  ;;  %v3959_v61 = vor.u32 %v4786_v16, %v3956_v18  ;;  %v4768_v24 = vld [vmem:[%s7369_s1 + $0x6c4] sm:$0xf]  ;;  %v3812_v36 = vld [vmem:[%s7369_s1 + $0x638] sm:$0xf0]  ;;  %v4766_v37 = vld [vmem:[%s7369_s1 + $0x6b4] sm:$0xf] }
 0x110   :  { %2800 = vmatpush.bf16.msra.mxu0 %v3567_v38  ;;  %v2574_v38 = vpop.f32.mrf.mxu2  ;;  %v4784_v21 = vld [vmem:[%s7369_s1 + $0x744] sm:$0xf]  ;;  %v3887_v30 = vor.u32 %v4768_v24, %v3884_v25  ;;  %v4794_v16 = vld [vmem:[%s7369_s1 + $0x794] sm:$0xf]  ;;  %v3988_v18 = vld [vmem:[%s7369_s1 + $0x798] sm:$0xf0] }
 0x111   :  { %2813 = vmatpush.bf16.msra.mxu1 %v3631_v14  ;;  %v3844_v14 = vld [vmem:[%s7369_s1 + $0x678] sm:$0xf0]  ;;  %v2587_v41 = vpop.f32.mrf.mxu3  ;;  %v4796_v54 = vld [vmem:[%s7369_s1 + $0x7a4] sm:$0xf]  ;;  %v3916_v25 = vld [vmem:[%s7369_s1 + $0x708] sm:$0xf0] }
 0x112   :  { %2826 = vmatpush.bf16.msra.mxu2 %v3695_v40  ;;  %v4774_v40 = vld [vmem:[%s7369_s1 + $0x6f4] sm:$0xf]  ;;  %v4776_v24 = vld [vmem:[%s7369_s1 + $0x704] sm:$0xf] }
 0x113   :  { %2839 = vmatpush.bf16.msra.mxu3 %v3759_v9  ;;  %v4790_v9 = vld [vmem:[%s7369_s1 + $0x774] sm:$0xf] }
 0x114   :  { %2801 = vmatpush.bf16.msra.mxu0 %v3559_v49  ;;  %v3847_v49 = vor.u32 %v4758_v39, %v3844_v14  ;;  %v3876_v39 = vld [vmem:[%s7369_s1 + $0x6b8] sm:$0xf0]  ;;  %v4782_v14 = vld [vmem:[%s7369_s1 + $0x734] sm:$0xf] }
 0x115   :  { %2814 = vmatpush.bf16.msra.mxu1 %v3623_v50  ;;  %v3911_v50 = vor.u32 %v4774_v40, %v3908_v57  ;;  %v3940_v40 = vld [vmem:[%s7369_s1 + $0x738] sm:$0xf0]  ;;  %v4798_v41 = vld [vmem:[%s7369_s1 + $0x7b4] sm:$0xf]  ;;  %v3815_v57 = vor.u32 %v4750_v35, %v3812_v36 }
 0x116   :  { %2827 = vmatpush.bf16.msra.mxu2 %v3687_v51  ;;  %v3975_v51 = vor.u32 %v4790_v9, %v3972_v43  ;;  %v3879_v9 = vor.u32 %v4766_v37, %v3876_v39  ;;  %v3943_v43 = vor.u32 %v4782_v14, %v3940_v40  ;;  %v4228_v35 = vld [vmem:[%s7369_s1 + $0x978] sm:$0xf0]  ;;  %v3919_v37 = vor.u32 %v4776_v24, %v3916_v25  ;;  %v4830_v24 = vld [vmem:[%s7369_s1 + $0x8b4] sm:$0xf] }
 0x117   :  { %2840 = vmatpush.bf16.msra.mxu3 %v3751_v55  ;;  %v4039_v55 = vor.u32 %v4806_v46, %v4036_v47  ;;  %v4764_v46 = vld [vmem:[%s7369_s1 + $0x6a4] sm:$0xf]  ;;  %v4132_v25 = vld [vmem:[%s7369_s1 + $0x8b8] sm:$0xf0] }
 0x118   :  { %2802 = vmatpush.bf16.msra.mxu0 %v3551_v6  ;;  %v3828_v6 = vld [vmem:[%s7369_s1 + $0x658] sm:$0xf0] }
 0x119   :  { %2815 = vmatpush.bf16.msra.mxu1 %v3615_v11  ;;  %v4031_v11 = vor.u32 %v4804_v60, %v4028_v62 }
 0x11a   :  { %2828 = vmatpush.bf16.msra.mxu2 %v3679_v15  ;;  %v3892_v15 = vld [vmem:[%s7369_s1 + $0x6d8] sm:$0xf0] }
 0x11b   :  { %2841 = vmatpush.bf16.msra.mxu3 %v3743_v23  ;;  %v3831_v23 = vor.u32 %v4754_v5, %v3828_v6  ;;  %v3895_v20 = vor.u32 %v4770_v8, %v3892_v15  ;;  %v4762_v5 = vld [vmem:[%s7369_s1 + $0x694] sm:$0xf]  ;;  %v3860_v8 = vld [vmem:[%s7369_s1 + $0x698] sm:$0xf0] }
 0x11c   :  { %2803 = vmatpush.bf16.msra.mxu0 %v3543_v22  ;;  %v3948_v22 = vld [vmem:[%s7369_s1 + $0x748] sm:$0xf0]  ;;  %v3924_v15 = vld [vmem:[%s7369_s1 + $0x718] sm:$0xf0] }
 0x11d   :  { %2816 = vmatpush.bf16.msra.mxu1 %v3607_v26  ;;  %v4012_v26 = vld [vmem:[%s7369_s1 + $0x7c8] sm:$0xf0] }
 0x11e   :  { %2829 = vmatpush.bf16.msra.mxu2 %v3671_v27 }
 0x11f   :  { %2842 = vmatpush.bf16.msra.mxu3 %v3735_v34  ;;  %v3951_v34 = vor.u32 %v4784_v21, %v3948_v22  ;;  %v4792_v21 = vld [vmem:[%s7369_s1 + $0x784] sm:$0xf]  ;;  %v3980_v22 = vld [vmem:[%s7369_s1 + $0x788] sm:$0xf0] }
 0x120   :  { %2804 = vmatpush.bf16.msra.mxu0 %v3535_v42  ;;  %v2598_v0 = vpop.f32.mrf.mxu0  ;;  %v4004_v42 = vld [vmem:[%s7369_s1 + $0x7b8] sm:$0xf0]  ;;  %v3983_v39 = vor.u32 %v4792_v21, %v3980_v22  ;;  %v4846_v21 = vld [vmem:[%s7369_s1 + $0x934] sm:$0xf] }
 0x121   :  { %2817 = vmatpush.bf16.msra.mxu1 %v3599_v44  ;;  %v2599_v27 = vadd.f32 %v2598_v0, %v6722_v10  ;;  %v2611_v29 = vpop.f32.mrf.mxu1  ;;  %v4015_v10 = vor.u32 %v4800_v1, %v4012_v26  ;;  %v4748_v44 = vld [vmem:[%s7369_s1 + $0x624] sm:$0xf]  ;;  %v4007_v47 = vor.u32 %v4798_v41, %v4004_v42  ;;  %v4822_v1 = vld [vmem:[%s7369_s1 + $0x874] sm:$0xf]  ;;  %v4100_v26 = vld [vmem:[%s7369_s1 + $0x878] sm:$0xf0] }
 0x122   :  { %2830 = vmatpush.bf16.msra.mxu2 %v3663_v45  ;;  %v3804_v45 = vld [vmem:[%s7369_s1 + $0x628] sm:$0xf0]  ;;  %v4103_v14 = vor.u32 %v4822_v1, %v4100_v26  ;;  %v4820_v42 = vld [vmem:[%s7369_s1 + $0x864] sm:$0xf]  ;;  %v4196_v22 = vld [vmem:[%s7369_s1 + $0x938] sm:$0xf0] }
 0x123   :  { %2843 = vmatpush.bf16.msra.mxu3 %v3727_v48  ;;  %2805 = vmatmul.bf16.vlgmr.msra.gmra.mxu0 %v5601_v7  ;;  %v4802_v7 = vld [vmem:[%s7369_s1 + $0x7d4] sm:$0xf]  ;;  %v2612_v38 = vadd.f32 %v2611_v29, %v2599_v27  ;;  %v3807_v58 = vor.u32 %v4748_v44, %v3804_v45  ;;  %v4156_v44 = vld [vmem:[%s7369_s1 + $0x8e8] sm:$0xf0]  ;;  %v4852_v45 = vld [vmem:[%s7369_s1 + $0x964] sm:$0xf] }
 0x124   :  { %2849 = vmatpush.bf16.msrb.mxu0 %v3847_v49  ;;  %2818 = vmatmul.bf16.vlgmr.msra.gmra.mxu1 %v5614_v13  ;;  %v3820_v13 = vld [vmem:[%s7369_s1 + $0x648] sm:$0xf0]  ;;  %v4838_v27 = vld [vmem:[%s7369_s1 + $0x8f4] sm:$0xf]  ;;  %v4260_v1 = vld [vmem:[%s7369_s1 + $0x9b8] sm:$0xf0] }
 0x125   :  { %2862 = vmatpush.bf16.msrb.mxu1 %v3911_v50  ;;  %2831 = vmatmul.bf16.vlgmr.msra.gmra.mxu2 %v5612_v12  ;;  %v4752_v12 = vld [vmem:[%s7369_s1 + $0x644] sm:$0xf]  ;;  %v3868_v49 = vld [vmem:[%s7369_s1 + $0x6a8] sm:$0xf0] }
 0x126   :  { %2875 = vmatpush.bf16.msrb.mxu2 %v3975_v51  ;;  %2844 = vmatmul.bf16.vlgmr.msra.gmra.mxu3 %v5625_v17  ;;  %v4023_v17 = vor.u32 %v4802_v7, %v4020_v19  ;;  %v3823_v2 = vor.u32 %v4752_v12, %v3820_v13  ;;  %v4780_v50 = vld [vmem:[%s7369_s1 + $0x724] sm:$0xf]  ;;  %v3932_v51 = vld [vmem:[%s7369_s1 + $0x728] sm:$0xf0]  ;;  %v3871_v62 = vor.u32 %v4764_v46, %v3868_v49 }
 0x127   :  { %2888 = vmatpush.bf16.msrb.mxu3 %v4039_v55  ;;  %v3996_v55 = vld [vmem:[%s7369_s1 + $0x7a8] sm:$0xf0]  ;;  %v4744_v19 = vld [vmem:[%s7369_s1 + $0x604] sm:$0xf] }
 0x128   :  { %2850 = vmatpush.bf16.msrb.mxu0 %v3839_v63  ;;  %v2624_v48 = vpop.f32.mrf.mxu2  ;;  %v2600_v56 = vpop.f32.mrf.mxu0  ;;  %v3935_v63 = vor.u32 %v4780_v50, %v3932_v51  ;;  %v3999_v6 = vor.u32 %v4796_v54, %v3996_v55  ;;  %v4760_v12 = vld [vmem:[%s7369_s1 + $0x684] sm:$0xf]  ;;  %v3852_v13 = vld [vmem:[%s7369_s1 + $0x688] sm:$0xf0]  ;;  %v4834_v54 = vld [vmem:[%s7369_s1 + $0x8d4] sm:$0xf] }
 0x129   :  { %2863 = vmatpush.bf16.msrb.mxu1 %v3903_v3  ;;  %v2625_v52 = vadd.f32 %v2624_v48, %v2612_v38  ;;  %v2637_v53 = vpop.f32.mrf.mxu3  ;;  %v2613_v59 = vpop.f32.mrf.mxu1  ;;  %v4746_v3 = vld [vmem:[%s7369_s1 + $0x614] sm:$0xf]  ;;  %v3855_v36 = vor.u32 %v4760_v12, %v3852_v13  ;;  %v4292_v38 = vld [vmem:[%s7369_s1 + $0x9f8] sm:$0xf0]  ;;  %v4220_v46 = vld [vmem:[%s7369_s1 + $0x968] sm:$0xf0] }
 0x12a   :  { %2876 = vmatpush.bf16.msrb.mxu2 %v3967_v4  ;;  %v3796_v4 = vld [vmem:[%s7369_s1 + $0x618] sm:$0xf0]  ;;  %v4284_v48 = vld [vmem:[%s7369_s1 + $0x9e8] sm:$0xf0]  ;;  %v4223_v51 = vor.u32 %v4852_v45, %v4220_v46  ;;  %v4814_v12 = vld [vmem:[%s7369_s1 + $0x834] sm:$0xf] }
 0x12b   :  { %2889 = vmatpush.bf16.msrb.mxu3 %v4031_v11  ;;  %v6921_v60 = vadd.f32 %v2637_v53, %v2625_v52  ;;  %v4778_v11 = vld [vmem:[%s7369_s1 + $0x714] sm:$0xf]  ;;  %v3799_v7 = vor.u32 %v4746_v3, %v3796_v4  ;;  %v4084_v53 = vld [vmem:[%s7369_s1 + $0x858] sm:$0xf0] }
 0x12c   :  { %2851 = vmatpush.bf16.msrb.mxu0 %v3831_v23  ;;  %v3788_v23 = vld [vmem:[%s7369_s1 + $0x608] sm:$0xf0]  ;;  %v4818_v52 = vld [vmem:[%s7369_s1 + $0x854] sm:$0xf]  ;;  %v4148_v56 = vld [vmem:[%s7369_s1 + $0x8d8] sm:$0xf0] }
 0x12d   :  { %2864 = vmatpush.bf16.msrb.mxu1 %v3895_v20  ;;  %v3863_v20 = vor.u32 %v4762_v5, %v3860_v8  ;;  %v3791_v29 = vor.u32 %v4744_v19, %v3788_v23  ;;  %v4212_v59 = vld [vmem:[%s7369_s1 + $0x958] sm:$0xf0]  ;;  %v4151_v3 = vor.u32 %v4834_v54, %v4148_v56  ;;  %v4832_v5 = vld [vmem:[%s7369_s1 + $0x8c4] sm:$0xf]  ;;  %v4810_v46 = vld [vmem:[%s7369_s1 + $0x814] sm:$0xf] }
 0x12e   :  { %2877 = vmatpush.bf16.msrb.mxu2 %v3959_v61  ;;  %v3927_v61 = vor.u32 %v4778_v11, %v3924_v15  ;;  %v4848_v8 = vld [vmem:[%s7369_s1 + $0x944] sm:$0xf]  ;;  %v4204_v11 = vld [vmem:[%s7369_s1 + $0x948] sm:$0xf0]  ;;  %v4068_v13 = vld [vmem:[%s7369_s1 + $0x838] sm:$0xf0] }
 0x12f   :  { %2890 = vmatpush.bf16.msrb.mxu3 %v4023_v17  ;;  %v3991_v17 = vor.u32 %v4794_v16, %v3988_v18  ;;  %v4864_v16 = vld [vmem:[%s7369_s1 + $0x9c4] sm:$0xf]  ;;  %v4268_v18 = vld [vmem:[%s7369_s1 + $0x9c8] sm:$0xf0]  ;;  %v4071_v26 = vor.u32 %v4814_v12, %v4068_v13  ;;  %v4244_v54 = vld [vmem:[%s7369_s1 + $0x998] sm:$0xf0] }
 0x130   :  { %2852 = vmatpush.bf16.msrb.mxu0 %v3823_v2  ;;  %v2626_v0 = vpop.f32.mrf.mxu2  ;;  %v4808_v56 = vld [vmem:[%s7369_s1 + $0x804] sm:$0xf]  ;;  %v4548_v12 = vld [vmem:[%s7369_s1 + $0xbf8] sm:$0xf0] }
 0x131   :  { %2865 = vmatpush.bf16.msrb.mxu1 %v3887_v30  ;;  %v2639_v2 = vpop.f32.mrf.mxu3  ;;  %v4164_v30 = vld [vmem:[%s7369_s1 + $0x8f8] sm:$0xf0]  ;;  %v4862_v0 = vld [vmem:[%s7369_s1 + $0x9b4] sm:$0xf] }
 0x132   :  { %2878 = vmatpush.bf16.msrb.mxu2 %v3951_v34  ;;  %v4854_v34 = vld [vmem:[%s7369_s1 + $0x974] sm:$0xf]  ;;  %v4167_v40 = vor.u32 %v4838_v27, %v4164_v30  ;;  %v4135_v27 = vor.u32 %v4830_v24, %v4132_v25  ;;  %v4199_v2 = vor.u32 %v4846_v21, %v4196_v22  ;;  %v4060_v30 = vld [vmem:[%s7369_s1 + $0x828] sm:$0xf0]  ;;  %v4884_v25 = vld [vmem:[%s7369_s1 + $0xa64] sm:$0xf] }
 0x133   :  { %2891 = vmatpush.bf16.msrb.mxu3 %v4015_v10  ;;  %v4870_v10 = vld [vmem:[%s7369_s1 + $0x9f4] sm:$0xf]  ;;  %v4231_v41 = vor.u32 %v4854_v34, %v4228_v35  ;;  %v4828_v34 = vld [vmem:[%s7369_s1 + $0x8a4] sm:$0xf]  ;;  %v4263_v35 = vor.u32 %v4862_v0, %v4260_v1  ;;  %v4348_v21 = vld [vmem:[%s7369_s1 + $0xa68] sm:$0xf0] }
 0x134   :  { %2853 = vmatpush.bf16.msrb.mxu0 %v3815_v57  ;;  %v4092_v57 = vld [vmem:[%s7369_s1 + $0x868] sm:$0xf0]  ;;  %v4900_v22 = vld [vmem:[%s7369_s1 + $0xae4] sm:$0xf] }
 0x135   :  { %2866 = vmatpush.bf16.msrb.mxu1 %v3879_v9  ;;  %v4836_v9 = vld [vmem:[%s7369_s1 + $0x8e4] sm:$0xf]  ;;  %v4095_v49 = vor.u32 %v4820_v42, %v4092_v57  ;;  %v4412_v1 = vld [vmem:[%s7369_s1 + $0xae8] sm:$0xf0] }
 0x136   :  { %2879 = vmatpush.bf16.msrb.mxu2 %v3943_v43  ;;  %v4295_v43 = vor.u32 %v4870_v10, %v4292_v38  ;;  %v4159_v50 = vor.u32 %v4836_v9, %v4156_v44  ;;  %v4844_v10 = vld [vmem:[%s7369_s1 + $0x924] sm:$0xf]  ;;  %v4188_v38 = vld [vmem:[%s7369_s1 + $0x928] sm:$0xf0] }
 0x137   :  { %2892 = vmatpush.bf16.msrb.mxu3 %v4007_v47  ;;  %v4868_v47 = vld [vmem:[%s7369_s1 + $0x9e4] sm:$0xf]  ;;  %v4191_v45 = vor.u32 %v4844_v10, %v4188_v38  ;;  %v4898_v10 = vld [vmem:[%s7369_s1 + $0xad4] sm:$0xf] }
 0x138   :  { %2854 = vmatpush.bf16.msrb.mxu0 %v3807_v58  ;;  %v4287_v55 = vor.u32 %v4868_v47, %v4284_v48  ;;  %v4850_v58 = vld [vmem:[%s7369_s1 + $0x954] sm:$0xf]  ;;  %v4052_v47 = vld [vmem:[%s7369_s1 + $0x818] sm:$0xf0]  ;;  %v4936_v38 = vld [vmem:[#allocation1] sm:$0xff] }
 0x139   :  { %2867 = vmatpush.bf16.msrb.mxu1 %v3871_v62  ;;  %v4276_v62 = vld [vmem:[%s7369_s1 + $0x9d8] sm:$0xf0]  ;;  %v4215_v4 = vor.u32 %v4850_v58, %v4212_v59  ;;  %v4826_v48 = vld [vmem:[%s7369_s1 + $0x894] sm:$0xf]  ;;  %v4044_v58 = vld [vmem:[%s7369_s1 + $0x808] sm:$0xf0] }
 0x13a   :  { %2880 = vmatpush.bf16.msrb.mxu2 %v3935_v63  ;;  %v4087_v63 = vor.u32 %v4818_v52, %v4084_v53  ;;  %v4180_v52 = vld [vmem:[%s7369_s1 + $0x918] sm:$0xf0]  ;;  %v4858_v53 = vld [vmem:[%s7369_s1 + $0x994] sm:$0xf] }
 0x13b   :  { %2893 = vmatpush.bf16.msrb.mxu3 %v3999_v6  ;;  %v4140_v6 = vld [vmem:[%s7369_s1 + $0x8c8] sm:$0xf0] }
 0x13c   :  { %2855 = vmatpush.bf16.msrb.mxu0 %v3799_v7 }
 0x13d   :  { %2868 = vmatpush.bf16.msrb.mxu1 %v3863_v20  ;;  %v4143_v20 = vor.u32 %v4832_v5, %v4140_v6  ;;  %v4236_v5 = vld [vmem:[%s7369_s1 + $0x988] sm:$0xf0]  ;;  %v4886_v6 = vld [vmem:[%s7369_s1 + $0xa74] sm:$0xf] }
 0x13e   :  { %2881 = vmatpush.bf16.msrb.mxu2 %v3927_v61  ;;  %v4207_v61 = vor.u32 %v4848_v8, %v4204_v11  ;;  %v4356_v8 = vld [vmem:[%s7369_s1 + $0xa78] sm:$0xf0]  ;;  %v4902_v11 = vld [vmem:[%s7369_s1 + $0xaf4] sm:$0xf] }
 0x13f   :  { %2894 = vmatpush.bf16.msrb.mxu3 %v3991_v17  ;;  %v4359_v24 = vor.u32 %v4886_v6, %v4356_v8 }
 0x140   :  { %2856 = vmatpush.bf16.msrb.mxu0 %v3791_v29  ;;  %v2650_v15 = vpop.f32.mrf.mxu0  ;;  %v4812_v29 = vld [vmem:[%s7369_s1 + $0x824] sm:$0xf] }
 0x141   :  { %2869 = vmatpush.bf16.msrb.mxu1 %v3855_v36  ;;  %v2651_v7 = vadd.f32 %v2650_v15, %v6921_v60  ;;  %v2663_v23 = vpop.f32.mrf.mxu1  ;;  %v4271_v60 = vor.u32 %v4864_v16, %v4268_v18  ;;  %v4063_v57 = vor.u32 %v4812_v29, %v4060_v30  ;;  %v4047_v16 = vor.u32 %v4808_v56, %v4044_v58  ;;  %v4420_v18 = vld [vmem:[%s7369_s1 + $0xaf8] sm:$0xf0]  ;;  %v4540_v29 = vld [vmem:[%s7369_s1 + $0xbe8] sm:$0xf0]  ;;  %v4912_v56 = vld [vmem:[%s7369_s1 + $0xb44] sm:$0xf] }
 0x142   :  { %2882 = vmatpush.bf16.msrb.mxu2 %v3919_v37  ;;  %v4124_v37 = vld [vmem:[%s7369_s1 + $0x8a8] sm:$0xf0]  ;;  %v4351_v30 = vor.u32 %v4884_v25, %v4348_v21  ;;  %v4908_v21 = vld [vmem:[%s7369_s1 + $0xb24] sm:$0xf] }
 0x143   :  { %2895 = vmatpush.bf16.msrb.mxu3 %v3983_v39  ;;  %2857 = vmatmul.bf16.vlgmr.msrb.gmra.mxu0 %v5642_v28  ;;  %v4866_v28 = vld [vmem:[%s7369_s1 + $0x9d4] sm:$0xf]  ;;  %v2664_v17 = vadd.f32 %v2663_v23, %v2651_v7  ;;  %v4127_v44 = vor.u32 %v4828_v34, %v4124_v37  ;;  %v4415_v34 = vor.u32 %v4900_v22, %v4412_v1  ;;  %v4340_v37 = vld [vmem:[%s7369_s1 + $0xa58] sm:$0xf0]  ;;  %v4460_v58 = vld [vmem:[%s7369_s1 + $0xb48] sm:$0xf0] }
 0x144   :  { %2901 = vmatpush.bf16.msra.mxu0 %v4103_v14  ;;  %2870 = vmatmul.bf16.vlgmr.msrb.gmra.mxu1 %v5646_v32  ;;  %v4076_v32 = vld [vmem:[%s7369_s1 + $0x848] sm:$0xf0]  ;;  %v4918_v7 = vld [vmem:[%s7369_s1 + $0xb74] sm:$0xf] }
 0x145   :  { %2914 = vmatpush.bf16.msra.mxu1 %v4167_v40  ;;  %2883 = vmatmul.bf16.vlgmr.msrb.gmra.mxu2 %v5644_v31  ;;  %v4816_v31 = vld [vmem:[%s7369_s1 + $0x844] sm:$0xf]  ;;  %v4380_v25 = vld [vmem:[%s7369_s1 + $0xaa8] sm:$0xf0] }
 0x146   :  { %2927 = vmatpush.bf16.msra.mxu2 %v4231_v41  ;;  %2896 = vmatmul.bf16.vlgmr.msrb.gmra.mxu3 %v5648_v33  ;;  %v4279_v33 = vor.u32 %v4866_v28, %v4276_v62  ;;  %v4079_v19 = vor.u32 %v4816_v31, %v4076_v32  ;;  %v4860_v40 = vld [vmem:[%s7369_s1 + $0x9a4] sm:$0xf]  ;;  %v4252_v41 = vld [vmem:[%s7369_s1 + $0x9a8] sm:$0xf0] }
 0x147   :  { %2940 = vmatpush.bf16.msra.mxu3 %v4295_v43  ;;  %v4824_v62 = vld [vmem:[%s7369_s1 + $0x884] sm:$0xf]  ;;  %v4172_v31 = vld [vmem:[%s7369_s1 + $0x908] sm:$0xf0] }
 0x148   :  { %2902 = vmatpush.bf16.msra.mxu0 %v4095_v49  ;;  %v2676_v36 = vpop.f32.mrf.mxu2  ;;  %v2652_v42 = vpop.f32.mrf.mxu0  ;;  %v4255_v49 = vor.u32 %v4860_v40, %v4252_v41  ;;  %v4856_v32 = vld [vmem:[%s7369_s1 + $0x984] sm:$0xf]  ;;  %v4914_v40 = vld [vmem:[%s7369_s1 + $0xb54] sm:$0xf]  ;;  %v4468_v41 = vld [vmem:[%s7369_s1 + $0xb58] sm:$0xf0] }
 0x149   :  { %2915 = vmatpush.bf16.msra.mxu1 %v4159_v50  ;;  %v2677_v39 = vadd.f32 %v2676_v36, %v2664_v17  ;;  %v2689_v14 = vpop.f32.mrf.mxu3  ;;  %v2665_v9 = vpop.f32.mrf.mxu1  ;;  %v4116_v50 = vld [vmem:[%s7369_s1 + $0x898] sm:$0xf0]  ;;  %v4239_v13 = vor.u32 %v4856_v32, %v4236_v5  ;;  %v4882_v36 = vld [vmem:[%s7369_s1 + $0xa54] sm:$0xf]  ;;  %v4444_v22 = vld [vmem:[%s7369_s1 + $0xb28] sm:$0xf0] }
 0x14a   :  { %2928 = vmatpush.bf16.msra.mxu2 %v4223_v51  ;;  %v4842_v51 = vld [vmem:[%s7369_s1 + $0x914] sm:$0xf]  ;;  %v4119_v59 = vor.u32 %v4826_v48, %v4116_v50  ;;  %v4332_v50 = vld [vmem:[%s7369_s1 + $0xa48] sm:$0xf0]  ;;  %v4324_v32 = vld [vmem:[%s7369_s1 + $0xa38] sm:$0xf0] }
 0x14b   :  { %2941 = vmatpush.bf16.msra.mxu3 %v4287_v55  ;;  %v7120_v43 = vadd.f32 %v2689_v14, %v2677_v39  ;;  %v4055_v55 = vor.u32 %v4810_v46, %v4052_v47  ;;  %v4183_v28 = vor.u32 %v4842_v51, %v4180_v52  ;;  %v4404_v14 = vld [vmem:[%s7369_s1 + $0xad8] sm:$0xf0]  ;;  %v4937_v42 = vld [vmem:[#allocation1 + $0x12] sm:$0xff]  ;;  %v4343_v46 = vor.u32 %v4882_v36, %v4340_v37  ;;  %v4880_v47 = vld [vmem:[%s7369_s1 + $0xa44] sm:$0xf] }
 0x14c   :  { %2903 = vmatpush.bf16.msra.mxu0 %v4087_v63  ;;  %v4108_v63 = vld [vmem:[%s7369_s1 + $0x888] sm:$0xf0]  ;;  %v4930_v9 = vld [vmem:[%s7369_s1 + $0xbd4] sm:$0xf]  ;;  %v4407_v48 = vor.u32 %v4898_v10, %v4404_v14  ;;  %v4896_v51 = vld [vmem:[%s7369_s1 + $0xac4] sm:$0xf] }
 0x14d   :  { %2916 = vmatpush.bf16.msra.mxu1 %v4151_v3  ;;  %v4840_v3 = vld [vmem:[%s7369_s1 + $0x904] sm:$0xf]  ;;  %v4111_v23 = vor.u32 %v4824_v62, %v4108_v63  ;;  %v4940_v52 = vld [vmem:[%s7371_s2] sm:$0x3]  ;;  %v4335_v62 = vor.u32 %v4880_v47, %v4332_v50  ;;  %v4894_v5 = vld [vmem:[%s7369_s1 + $0xab4] sm:$0xf] }
 0x14e   :  { %2929 = vmatpush.bf16.msra.mxu2 %v4215_v4  ;;  %v4247_v4 = vor.u32 %v4858_v53, %v4244_v54  ;;  %v404_v53 = vperm.slane %v4940_v52, 1  ;;  %v4874_v36 = vld [vmem:[%s7369_s1 + $0xa14] sm:$0xf]  ;;  %v4308_v37 = vld [vmem:[%s7369_s1 + $0xa18] sm:$0xf0] }
 0x14f   :  { %2942 = vmatpush.bf16.msra.mxu3 %v4279_v33  ;;  %v4890_v10 = vld [vmem:[%s7369_s1 + $0xa94] sm:$0xf]  ;;  %v4372_v14 = vld [vmem:[%s7369_s1 + $0xa98] sm:$0xf0]  ;;  %v4300_v47 = vld [vmem:[%s7369_s1 + $0xa08] sm:$0xf0] }
 0x150   :  { %2904 = vmatpush.bf16.msra.mxu0 %v4079_v19  ;;  %v2678_v33 = vpop.f32.mrf.mxu2  ;;  %v4484_v19 = vld [vmem:[%s7369_s1 + $0xb78] sm:$0xf0]  ;;  %v4904_v52 = vld [vmem:[%s7369_s1 + $0xb04] sm:$0xf] }
 0x151   :  { %2917 = vmatpush.bf16.msra.mxu1 %v4143_v20  ;;  %v2691_v15 = vpop.f32.mrf.mxu3  ;;  %v4175_v20 = vor.u32 %v4840_v3, %v4172_v31  ;;  %v4487_v17 = vor.u32 %v4918_v7, %v4484_v19  ;;  %v4878_v31 = vld [vmem:[%s7369_s1 + $0xa34] sm:$0xf]  ;;  %v4516_v7 = vld [vmem:[%s7369_s1 + $0xbb8] sm:$0xf0] }
 0x152   :  { %2930 = vmatpush.bf16.msra.mxu2 %v4207_v61  ;;  %v4934_v61 = vld [vmem:[%s7369_s1 + $0xbf4] sm:$0xf] }
 0x153   :  { %2943 = vmatpush.bf16.msra.mxu3 %v4271_v60  ;;  %v4423_v60 = vor.u32 %v4902_v11, %v4420_v18  ;;  %v4551_v0 = vor.u32 %v4934_v61, %v4548_v12  ;;  %v4388_v11 = vld [vmem:[%s7369_s1 + $0xab8] sm:$0xf0]  ;;  %v4910_v15 = vld [vmem:[%s7369_s1 + $0xb34] sm:$0xf]  ;;  %v4876_v12 = vld [vmem:[%s7369_s1 + $0xa24] sm:$0xf] }
 0x154   :  { %2905 = vmatpush.bf16.msra.mxu0 %v4071_v26  ;;  %v4916_v26 = vld [vmem:[%s7369_s1 + $0xb64] sm:$0xf]  ;;  %v4926_v18 = vld [vmem:[%s7369_s1 + $0xbb4] sm:$0xf] }
 0x155   :  { %2918 = vmatpush.bf16.msra.mxu1 %v4135_v27  ;;  %v4476_v27 = vld [vmem:[%s7369_s1 + $0xb68] sm:$0xf0] }
 0x156   :  { %2931 = vmatpush.bf16.msra.mxu2 %v4199_v2  ;;  %v4932_v2 = vld [vmem:[%s7369_s1 + $0xbe4] sm:$0xf] }
 0x157   :  { %2944 = vmatpush.bf16.msra.mxu3 %v4263_v35  ;;  %v4479_v35 = vor.u32 %v4916_v26, %v4476_v27  ;;  %v4543_v39 = vor.u32 %v4932_v2, %v4540_v29  ;;  %v4924_v26 = vld [vmem:[%s7369_s1 + $0xba4] sm:$0xf]  ;;  %v4508_v27 = vld [vmem:[%s7369_s1 + $0xba8] sm:$0xf0] }
 0x158   :  { %2906 = vmatpush.bf16.msra.mxu0 %v4063_v57  ;;  %v4938_v57 = vld [vmem:[#allocation1 + $0x9] sm:$0xff] }
 0x159   :  { %2919 = vmatpush.bf16.msra.mxu1 %v4127_v44  ;;  %v4532_v44 = vld [vmem:[%s7369_s1 + $0xbd8] sm:$0xf0] }
 0x15a   :  { %2932 = vmatpush.bf16.msra.mxu2 %v4191_v45  ;;  %v4939_v45 = vld [vmem:[#allocation1 + $0x1b] sm:$0xff]  ;;  %v4535_v54 = vor.u32 %v4930_v9, %v4532_v44  ;;  %v4311_v9 = vor.u32 %v4874_v36, %v4308_v37  ;;  %v4375_v44 = vor.u32 %v4890_v10, %v4372_v14 }
 0x15b   :  { %2945 = vmatpush.bf16.msra.mxu3 %v4255_v49  ;;  %v4471_v49 = vor.u32 %v4914_v40, %v4468_v41  ;;  %v4906_v40 = vld [vmem:[%s7369_s1 + $0xb14] sm:$0xf]  ;;  %v4436_v41 = vld [vmem:[%s7369_s1 + $0xb18] sm:$0xf0] }
 0x15c   :  { %2907 = vmatpush.bf16.msra.mxu0 %v4055_v55  ;;  %v4396_v55 = vld [vmem:[%s7369_s1 + $0xac8] sm:$0xf0] }
 0x15d   :  { %2920 = vmatpush.bf16.msra.mxu1 %v4119_v59  ;;  %v4928_v59 = vld [vmem:[%s7369_s1 + $0xbc4] sm:$0xf]  ;;  %v4399_v3 = vor.u32 %v4896_v51, %v4396_v55  ;;  %v4364_v51 = vld [vmem:[%s7369_s1 + $0xa88] sm:$0xf0] }
 0x15e   :  { %2933 = vmatpush.bf16.msra.mxu2 %v4183_v28  ;;  %v4524_v28 = vld [vmem:[%s7369_s1 + $0xbc8] sm:$0xf0]  ;;  %v4920_v55 = vld [vmem:[%s7369_s1 + $0xb84] sm:$0xf] }
 0x15f   :  { %2946 = vmatpush.bf16.msra.mxu3 %v4247_v4  ;;  %v4463_v4 = vor.u32 %v4912_v56, %v4460_v58  ;;  %v4527_v8 = vor.u32 %v4928_v59, %v4524_v28  ;;  %v4492_v56 = vld [vmem:[%s7369_s1 + $0xb88] sm:$0xf0] }
 0x160   :  { %2908 = vmatpush.bf16.msra.mxu0 %v4047_v16  ;;  %v2702_v63 = vpop.f32.mrf.mxu0  ;;  %v4452_v16 = vld [vmem:[%s7369_s1 + $0xb38] sm:$0xf0] }
 0x161   :  { %2921 = vmatpush.bf16.msra.mxu1 %v4111_v23  ;;  %v2703_v33 = vadd.f32 %v2702_v63, %v404_v53  ;;  %v2715_v6 = vpop.f32.mrf.mxu1  ;;  %v4327_v23 = vor.u32 %v4878_v31, %v4324_v32  ;;  %v4455_v61 = vor.u32 %v4910_v15, %v4452_v16  ;;  %v4428_v53 = vld [vmem:[%s7369_s1 + $0xb08] sm:$0xf0]  ;;  %v4941_v63 = vld [vmem:[#allocation1 + $0x24] sm:$0xff] }
 0x162   :  { %2934 = vmatpush.bf16.msra.mxu2 %v4175_v20  ;;  %v4391_v20 = vor.u32 %v4894_v5, %v4388_v11  ;;  %v4431_v28 = vor.u32 %v4904_v52, %v4428_v53  ;;  %v4944_v31 = vld [vmem:[#allocation1 + $0x3f] sm:$0xff] }
 0x163   :  { %2947 = vmatpush.bf16.msra.mxu3 %v4239_v13  ;;  %2909 = vmatmul.bf16.vlgmr.msra.gmra.mxu0 %v4936_v38  ;;  %v2716_v19 = vadd.f32 %v2715_v6, %v2703_v33  ;;  %v4316_v13 = vld [vmem:[%s7369_s1 + $0xa28] sm:$0xf0] }
 0x164   :  { %2953 = vmatpush.bf16.msrb.mxu0 %v4359_v24  ;;  %2922 = vmatmul.bf16.vlgmr.msra.gmra.mxu1 %v4938_v57  ;;  %v4892_v24 = vld [vmem:[%s7369_s1 + $0xaa4] sm:$0xf]  ;;  %v4319_v2 = vor.u32 %v4876_v12, %v4316_v13  ;;  %v4500_v57 = vld [vmem:[%s7369_s1 + $0xb98] sm:$0xf0] }
 0x165   :  { %2966 = vmatpush.bf16.msrb.mxu1 %v4423_v60  ;;  %2935 = vmatmul.bf16.vlgmr.msra.gmra.mxu2 %v4937_v42  ;;  %v4922_v42 = vld [vmem:[%s7369_s1 + $0xb94] sm:$0xf] }
 0x166   :  { %2979 = vmatpush.bf16.msrb.mxu2 %v4487_v17  ;;  %2948 = vmatmul.bf16.vlgmr.msra.gmra.mxu3 %v4939_v45  ;;  %v4519_v17 = vor.u32 %v4926_v18, %v4516_v7  ;;  %v4439_v45 = vor.u32 %v4906_v40, %v4436_v41  ;;  %v4503_v50 = vor.u32 %v4922_v42, %v4500_v57 }
 0x167   :  { %2992 = vmatpush.bf16.msrb.mxu3 %v4551_v0 }
 0x168   :  { %2954 = vmatpush.bf16.msrb.mxu0 %v4351_v30  ;;  %v2728_v60 = vpop.f32.mrf.mxu2  ;;  %v2704_v30 = vpop.f32.mrf.mxu0 }
 0x169   :  { %2967 = vmatpush.bf16.msrb.mxu1 %v4415_v34  ;;  %v2729_v0 = vadd.f32 %v2728_v60, %v2716_v19  ;;  %v2741_v1 = vpop.f32.mrf.mxu3  ;;  %v4383_v34 = vor.u32 %v4892_v24, %v4380_v25  ;;  %v2717_v38 = vpop.f32.mrf.mxu1 }
 0x16a   :  { %2980 = vmatpush.bf16.msrb.mxu2 %v4479_v35  ;;  %v4447_v35 = vor.u32 %v4908_v21, %v4444_v22 }
 0x16b   :  { %2993 = vmatpush.bf16.msrb.mxu3 %v4543_v39  ;;  %v2742_v29 = vadd.f32 %v2741_v1, %v2729_v0  ;;  %v4511_v39 = vor.u32 %v4924_v26, %v4508_v27 }
 0x16c   :  { %2955 = vmatpush.bf16.msrb.mxu0 %v4343_v46  ;;  %v4872_v46 = vld [vmem:[%s7369_s1 + $0xa04] sm:$0xf] }
 0x16d   :  { %2968 = vmatpush.bf16.msrb.mxu1 %v4407_v48  ;;  %v4888_v48 = vld [vmem:[%s7369_s1 + $0xa84] sm:$0xf]  ;;  %v4303_v58 = vor.u32 %v4872_v46, %v4300_v47 }
 0x16e   :  { %2981 = vmatpush.bf16.msrb.mxu2 %v4471_v49  ;;  %v4367_v59 = vor.u32 %v4888_v48, %v4364_v51 }
 0x16f   :  { %2994 = vmatpush.bf16.msrb.mxu3 %v4535_v54 }
 0x170   :  { %2956 = vmatpush.bf16.msrb.mxu0 %v4335_v62  ;;  %v2730_v49 = vpop.f32.mrf.mxu2  ;;  %v4495_v62 = vor.u32 %v4920_v55, %v4492_v56 }
 0x171   :  { %2969 = vmatpush.bf16.msrb.mxu1 %v4399_v3  ;;  %v2743_v54 = vpop.f32.mrf.mxu3  ;;  %v4942_v3 = vld [vmem:[#allocation1 + $0x2d] sm:$0xff] }
 0x172   :  { %2982 = vmatpush.bf16.msrb.mxu2 %v4463_v4  ;;  %v4943_v4 = vld [vmem:[#allocation1 + $0x36] sm:$0xff] }
 0x173   :  { %2995 = vmatpush.bf16.msrb.mxu3 %v4527_v8 }
 0x174   :  { %2957 = vmatpush.bf16.msrb.mxu0 %v4327_v23 }
 0x175   :  { %2970 = vmatpush.bf16.msrb.mxu1 %v4391_v20 }
 0x176   :  { %2983 = vmatpush.bf16.msrb.mxu2 %v4455_v61 }
 0x177   :  { %2996 = vmatpush.bf16.msrb.mxu3 %v4519_v17 }
 0x178   :  { %2958 = vmatpush.bf16.msrb.mxu0 %v4319_v2 }
 0x179   :  { %2971 = vmatpush.bf16.msrb.mxu1 %v4383_v34 }
 0x17a   :  { %2984 = vmatpush.bf16.msrb.mxu2 %v4447_v35 }
 0x17b   :  { %2997 = vmatpush.bf16.msrb.mxu3 %v4511_v39 }
 0x17c   :  { %2959 = vmatpush.bf16.msrb.mxu0 %v4311_v9 }
 0x17d   :  { %2972 = vmatpush.bf16.msrb.mxu1 %v4375_v44 }
 0x17e   :  { %2985 = vmatpush.bf16.msrb.mxu2 %v4439_v45 }
 0x17f   :  { %2998 = vmatpush.bf16.msrb.mxu3 %v4503_v50 }
 0x180   :  { %2960 = vmatpush.bf16.msrb.mxu0 %v4303_v58  ;;  %v2754_v32 = vpop.f32.mrf.mxu0 }
 0x181   :  { %2973 = vmatpush.bf16.msrb.mxu1 %v4367_v59  ;;  %v2755_v5 = vadd.f32 %v2754_v32, %v2742_v29  ;;  %v2767_v33 = vpop.f32.mrf.mxu1 }
 0x182   :  { %2986 = vmatpush.bf16.msrb.mxu2 %v4431_v28 }
 0x183   :  { %2999 = vmatpush.bf16.msrb.mxu3 %v4495_v62  ;;  %2961 = vmatmul.bf16.vlgmr.msrb.gmra.mxu0 %v4941_v63  ;;  %v2768_v6 = vadd.f32 %v2767_v33, %v2755_v5 }
 0x184   :  { %2974 = vmatmul.bf16.vlgmr.msrb.gmra.mxu1 %v4942_v3 }
 0x185   :  { %2987 = vmatmul.bf16.vlgmr.msrb.gmra.mxu2 %v4943_v4 }
 0x186   :  { %3000 = vmatmul.bf16.vlgmr.msrb.gmra.mxu3 %v4944_v31 }
 0x188   :  { %v2780_v8 = vpop.f32.mrf.mxu2  ;;  %v2756_v18 = vpop.f32.mrf.mxu0 }
 0x189   :  { %v2781_v11 = vadd.f32 %v2780_v8, %v2768_v6  ;;  %v2793_v15 = vpop.f32.mrf.mxu3  ;;  %v2769_v7 = vpop.f32.mrf.mxu1 }
 0x18b   :  { %v2794_v16 = vadd.f32 %v2793_v15, %v2781_v11 }
 0x190   :  { %v2782_v19 = vpop.f32.mrf.mxu2 }
 0x191   :  { %v2795_v23 = vpop.f32.mrf.mxu3 }
 0x1a0   :  { %v2806_v20 = vpop.f32.mrf.mxu0 }
 0x1a1   :  { %v2807_v61 = vadd.f32 %v2806_v20, %v2794_v16  ;;  %v2819_v12 = vpop.f32.mrf.mxu1 }
 0x1a3   :  { %v2820_v13 = vadd.f32 %v2819_v12, %v2807_v61 }
 0x1a8   :  { %v2832_v24 = vpop.f32.mrf.mxu2  ;;  %v2808_v25 = vpop.f32.mrf.mxu0 }
 0x1a9   :  { %v2833_v60 = vadd.f32 %v2832_v24, %v2820_v13  ;;  %v2845_v17 = vpop.f32.mrf.mxu3  ;;  %v2821_v21 = vpop.f32.mrf.mxu1 }
 0x1ab   :  { %v2846_v22 = vadd.f32 %v2845_v17, %v2833_v60 }
 0x1b0   :  { %v2834_v0 = vpop.f32.mrf.mxu2 }
 0x1b1   :  { %v2847_v1 = vpop.f32.mrf.mxu3 }
 0x1c0   :  { %v2858_v26 = vpop.f32.mrf.mxu0 }
 0x1c1   :  { %v2871_v27 = vpop.f32.mrf.mxu1  ;;  %v2859_v38 = vadd.f32 %v2858_v26, %v2846_v22 }
 0x1c3   :  { %v2872_v42 = vadd.f32 %v2871_v27, %v2859_v38 }
 0x1c8   :  { %v2884_v2 = vpop.f32.mrf.mxu2  ;;  %v2860_v30 = vpop.f32.mrf.mxu0 }
 0x1c9   :  { %v2897_v29 = vpop.f32.mrf.mxu3  ;;  %v2873_v34 = vpop.f32.mrf.mxu1  ;;  %v2885_v57 = vadd.f32 %v2884_v2, %v2872_v42 }
 0x1cb   :  { %v2898_v45 = vadd.f32 %v2897_v29, %v2885_v57 }
 0x1d0   :  { %v2886_v35 = vpop.f32.mrf.mxu2 }
 0x1d1   :  { %v2899_v36 = vpop.f32.mrf.mxu3 }
 0x1e0   :  { %v2910_v37 = vpop.f32.mrf.mxu0 }
 0x1e1   :  { %v2923_v10 = vpop.f32.mrf.mxu1  ;;  %v2911_v46 = vadd.f32 %v2910_v37, %v2898_v45 }
 0x1e3   :  { %v2924_v47 = vadd.f32 %v2923_v10, %v2911_v46 }
 0x1e8   :  { %v2936_v39 = vpop.f32.mrf.mxu2  ;;  %v2912_v40 = vpop.f32.mrf.mxu0 }
 0x1e9   :  { %v2949_v14 = vpop.f32.mrf.mxu3  ;;  %v2925_v41 = vpop.f32.mrf.mxu1  ;;  %v2937_v48 = vadd.f32 %v2936_v39, %v2924_v47 }
 0x1eb   :  { %v2950_v49 = vadd.f32 %v2949_v14, %v2937_v48 }
 0x1f0   :  { %v2938_v9 = vpop.f32.mrf.mxu2 }
 0x1f1   :  { %v2951_v44 = vpop.f32.mrf.mxu3 }
 0x200   :  { %v2962_v50 = vpop.f32.mrf.mxu0 }
 0x201   :  { %v2975_v51 = vpop.f32.mrf.mxu1  ;;  %v2963_v52 = vadd.f32 %v2962_v50, %v2950_v49 }
 0x203   :  { %v2976_v53 = vadd.f32 %v2975_v51, %v2963_v52 }
 0x208   :  { %v2988_v54 = vpop.f32.mrf.mxu2  ;;  %v2964_v58 = vpop.f32.mrf.mxu0 }
 0x209   :  { %v2989_v55 = vadd.f32 %v2988_v54, %v2976_v53  ;;  %v3001_v56 = vpop.f32.mrf.mxu3  ;;  %v2977_v59 = vpop.f32.mrf.mxu1 }
 0x20b   :  { %v3002_v28 = vadd.f32 %v3001_v56, %v2989_v55 }
 0x20d   :  { %v3007_v62 = vrot.slane %v3002_v28, 6 }
 0x20f   :  { %v3009_v63 = vsel %vm3008_vm0, %v7120_v43, %v3007_v62 }
 0x210   :  { %3011 = vst [vmem:[%s7372_s3] sm:$0xf] %v3009_v63  ;;  %v2990_v3 = vpop.f32.mrf.mxu2 }
 0x211   :  { %v3003_v4 = vpop.f32.mrf.mxu3 }

</bundles_post_ra>
